<compile_context>
chip_gen: v7x
topology: tpu7x:2x2x1
jax: 0.10.0
libtpu: 0.0.40
codegen_flags: <defaults>
</compile_context>

<pallas_src>
import functools

import numpy as np
import jax
import jax.numpy as jnp
from jax.experimental import pallas as pl
from jax.experimental.pallas import tpu as pltpu


KERNEL_STYLE = [(1, 3, 3), (1, 1, 3), (1, 3, 1), (3, 3, 1)]
SPLIT_NUM = len(KERNEL_STYLE)
_EPS = 1e-5


def _round_up(a, m):
    return -(-a // m) * m


# ---------------------------------------------------------------------------
# In-kernel helpers
# ---------------------------------------------------------------------------
def _conv_in_elu(xs, th, off, cin, cout, ks, hp, mask, inv_n):
    """'same' Conv3d + InstanceNorm3d(affine) + ELU on padded-flat tiles.

    xs:   list of `cin` (Dpad, Lpad) f32 tiles, zero outside the interior.
    th:   SMEM ref; parameters start at the STATIC python-int offset `off`,
          packed as [w (cout,cin,kd,kw,kh row-major), gamma(cout), beta(cout)].
          The conv bias is omitted: InstanceNorm's mean subtraction cancels it
          exactly (the affine beta carries the learned shift).
    ks:   TRUE kernel shape (kd, kw, kh) -- only real taps are computed.
    Returns a list of `cout` (Dpad, Lpad) f32 tiles, zero outside interior.
    """
    kd, kw, kh = ks
    ktaps = kd * kw * kh
    nw = cout * cin * ktaps
    accs = [None] * cout
    for ci in range(cin):
        for a in range(kd):
            dd = a - kd // 2
            # Depth (sublane) roll hoisted out of the (kw, kh) loops.
            xd = xs[ci]
            if dd != 0:
                xd = pltpu.roll(xd, (-dd) % xd.shape[0], axis=0)
            for b in range(kw):
                for c in range(kh):
                    dl = (b - kw // 2) * hp + (c - kh // 2)
                    xsh = xd
                    if dl != 0:
                        xsh = pltpu.roll(xd, (-dl) % xd.shape[1], axis=1)
                    tap = (a * kw + b) * kh + c
                    for co in range(cout):
                        w = th[off + (co * cin + ci) * ktaps + tap]  # static
                        term = w * xsh
                        accs[co] = term if accs[co] is None else accs[co] + term

    outs = []
    for co in range(cout):
        gamma = th[off + nw + co]
        beta = th[off + nw + cout + co]
        acc = accs[co]
        # Single-pass InstanceNorm stats over the interior only (biased var).
        # NOTE: E[x^2]-E[x]^2 in f32 loses precision when |mean| >> std; with
        # the conv bias removed the activations are near-centered, acceptable.
        am = acc * mask
        s1 = jnp.sum(am)
        s2 = jnp.sum(am * acc)                 # == sum(acc^2 * mask)
        mean = s1 * inv_n
        var = jnp.maximum(s2 * inv_n - mean * mean, 0.0)
        y = (acc - mean) * jax.lax.rsqrt(var + _EPS)
        y = gamma * y + beta
        # ELU(alpha=1); clamp so the unselected exp branch can never overflow.
        y = jnp.where(y > 0.0, y, jnp.exp(jnp.minimum(y, 0.0)) - 1.0)
        outs.append(y * mask)                  # restore zeros in the halo
    return outs


# ---------------------------------------------------------------------------
# Fused kernel: all 4 split chains + residuals + combine + scale conv +
# skip path + timestep embedding, one grid step per batch element.
# ---------------------------------------------------------------------------
def _resgnet_kernel(th_ref, emb_ref, x_ref, mask_ref, o_ref, *, ic, oc, c_in,
                    c_out, hp, inv_n, offs, has_res, has_skip):
    bidx = pl.program_id(0)
    mask = mask_ref[...]
    xin = [x_ref[0, ci] for ci in range(c_in)]

    # --- per-split chains, unrolled at trace time; xcat stays in vregs ------
    xcat = []
    for s in range(SPLIT_NUM):
        xs = xin[s * ic:(s + 1) * ic]
        ks1 = KERNEL_STYLE[s]
        ks2 = KERNEL_STYLE[SPLIT_NUM - 1 - s]
        h = _conv_in_elu(xs, th_ref, offs[f"b{s}c0"], ic, ic, ks1, hp, mask, inv_n)
        h = _conv_in_elu(h, th_ref, offs[f"b{s}c1"], ic, ic, ks2, hp, mask, inv_n)
        h = _conv_in_elu(h, th_ref, offs[f"b{s}c2"], ic, oc, (3, 3, 3), hp, mask, inv_n)
        if has_res:
            r = _conv_in_elu(xs, th_ref, offs[f"res{s}"], ic, oc, (1, 1, 1),
                             hp, mask, inv_n)
        else:
            r = xs                              # Identity residual (ic == oc)
        if s % 2 == 0:                          # even split -> add, odd -> mul
            xcat.extend(h[co] + r[co] for co in range(oc))
        else:
            xcat.extend(h[co] * r[co] for co in range(oc))

    # --- scale conv (1,3,3) + IN + ELU over the concatenated channels -------
    y = _conv_in_elu(xcat, th_ref, offs["scale"], SPLIT_NUM * oc, c_out,
                     (1, 3, 3), hp, mask, inv_n)

    # --- skip path + residual add + timestep-embedding add ------------------
    if has_skip:
        r = _conv_in_elu(xin, th_ref, offs["skip"], c_in, c_out, (1, 1, 1),
                         hp, mask, inv_n)
    else:
        r = xin                                 # res = x (c_in == c_out)

    for co in range(c_out):
        o_ref[0, co] = y[co] + r[co] + emb_ref[bidx * c_out + co]


# ---------------------------------------------------------------------------
# Parameter construction (deterministic, PyTorch-like default inits)
# ---------------------------------------------------------------------------
def _conv_block_params(key, cin, cout, ks):
    kd, kw, kh = ks
    kw_key, kb_key = jax.random.split(key)
    fan_in = cin * kd * kw * kh
    bound = 1.0 / float(np.sqrt(fan_in))
    w = jax.random.uniform(kw_key, (cout, cin, kd, kw, kh), jnp.float32,
                           -bound, bound)
    b = jax.random.uniform(kb_key, (cout,), jnp.float32, -bound, bound)
    gamma = jnp.ones((cout,), jnp.float32)     # InstanceNorm3d affine weight
    beta = jnp.zeros((cout,), jnp.float32)     # InstanceNorm3d affine bias
    return (w, b, gamma, beta)


def init_resgnet_params(key, in_channel, out_channel, num_steps):
    assert in_channel % SPLIT_NUM == 0 and out_channel % SPLIT_NUM == 0, \
        "demo implements the channel-split branch of ResGNet.forward"
    ic, oc = in_channel // SPLIT_NUM, out_channel // SPLIT_NUM

    keys = jax.random.split(key, 20)
    kit = iter(keys)

    entries = []                               # (name, conv-block params)
    for i in range(SPLIT_NUM):
        cor = SPLIT_NUM - 1 - i
        entries.append((f"b{i}c0", _conv_block_params(next(kit), ic, ic,
                                                      KERNEL_STYLE[i])))
        entries.append((f"b{i}c1", _conv_block_params(next(kit), ic, ic,
                                                      KERNEL_STYLE[cor])))
        entries.append((f"b{i}c2", _conv_block_params(next(kit), ic, oc,
                                                      (3, 3, 3))))
        if ic != oc:
            entries.append((f"res{i}", _conv_block_params(next(kit), ic, oc,
                                                          (1, 1, 1))))
        else:
            next(kit)                          # keep key stream deterministic
    entries.append(("scale", _conv_block_params(next(kit), oc * SPLIT_NUM,
                                                out_channel, (1, 3, 3))))
    if in_channel != out_channel:
        entries.append(("skip", _conv_block_params(next(kit), in_channel,
                                                   out_channel, (1, 1, 1))))
    else:
        next(kit)
    embedding = jax.random.normal(next(kit), (num_steps, out_channel),
                                  jnp.float32)

    # Pack [w, gamma, beta] per block; offsets are Python ints (static).
    # Conv biases are intentionally NOT packed: InstanceNorm absorbs them.
    parts, offs, cursor = [], {}, 0
    for name, (w, _bias, g, be) in entries:
        flat = jnp.concatenate([w.reshape(-1), g, be])
        offs[name] = cursor
        cursor += int(flat.shape[0])
        parts.append(flat)
    theta = jnp.concatenate(parts)

    return dict(in_channel=in_channel, out_channel=out_channel, ic=ic, oc=oc,
                has_res=(ic != oc), has_skip=(in_channel != out_channel),
                theta=theta, offsets=offs, embedding=embedding)


# ---------------------------------------------------------------------------
# Forward pass (channel-split branch: raw_in % 4 == raw_out % 4 == 0)
# ---------------------------------------------------------------------------
def resgnet_forward(params, x, t):
    B, c_in, D, W, H = x.shape
    assert c_in == params["in_channel"]
    c_out = params["out_channel"]
    ic, oc = params["ic"], params["oc"]

    Dp, Wp, Hp = D + 2, W + 2, H + 2           # halo of 1 covers every conv
    Dpad = _round_up(Dp, 8)
    Lpad = _round_up(Wp * Hp, 128)
    inv_n = 1.0 / float(D * W * H)

    # Pack x ONCE into the lane-dense padded layout (B, C, Dpad, Lpad):
    #   (d, w, h) -> (d + 1, (w + 1) * Hp + (h + 1)); halo/alignment slots = 0.
    xp = jnp.pad(x, ((0, 0), (0, 0), (1, Dpad - D - 1), (1, 1), (1, 1)))
    xp = xp.reshape(B, c_in, Dpad, Wp * Hp)
    if Lpad > Wp * Hp:
        xp = jnp.pad(xp, ((0, 0), (0, 0), (0, 0), (0, Lpad - Wp * Hp)))

    mask_np = np.zeros((Dpad, Lpad), np.float32)
    for w in range(W):
        mask_np[1:1 + D, (w + 1) * Hp + 1:(w + 1) * Hp + 1 + H] = 1.0
    mask = jnp.asarray(mask_np)

    emb_flat = params["embedding"][t].reshape(-1)                # (B*c_out,)

    kernel = functools.partial(
        _resgnet_kernel, ic=ic, oc=oc, c_in=c_in, c_out=c_out, hp=Hp,
        inv_n=inv_n, offs=params["offsets"], has_res=params["has_res"],
        has_skip=params["has_skip"])

    smem_spec = pl.BlockSpec(memory_space=pltpu.MemorySpace.SMEM)

    out_pad = pl.pallas_call(
        kernel,
        out_shape=jax.ShapeDtypeStruct((B, c_out, Dpad, Lpad), jnp.float32),
        grid=(B,),
        in_specs=[
            smem_spec,                                           # theta
            smem_spec,                                           # emb_flat
            pl.BlockSpec((1, c_in, Dpad, Lpad), lambda b: (b, 0, 0, 0)),
            pl.BlockSpec((Dpad, Lpad), lambda b: (0, 0)),        # mask
        ],
        out_specs=pl.BlockSpec((1, c_out, Dpad, Lpad), lambda b: (b, 0, 0, 0)),
        compiler_params=pltpu.CompilerParams(
            dimension_semantics=("parallel",)),
    )(params["theta"], emb_flat, xp, mask)

    # Unpack the interior back to (B, C, D, W, H).
    out = out_pad[:, :, 1:1 + D, :Wp * Hp].reshape(B, c_out, D, Wp, Hp)
    out = out[:, :, :, 1:1 + W, 1:1 + H]
    return out, t


# ---------------------------------------------------------------------------
if __name__ == "__main__":
    key = jax.random.PRNGKey(0)
    in_channel, out_channel, num_steps = 4, 4, 10
    B, D, W, H = 2, 4, 8, 8

    k_par, k_x, k_t = jax.random.split(key, 3)
    params = init_resgnet_params(k_par, in_channel, out_channel, num_steps)
    x = jax.random.normal(k_x, (B, in_channel, D, W, H), jnp.float32)
    t = jax.random.randint(k_t, (B,), 0, num_steps)

    out, t_out = resgnet_forward(params, x, t)
    jax.block_until_ready(out)
    assert out.shape == (B, out_channel, D, W, H), out.shape
    assert out.dtype == jnp.float32
    assert bool(jnp.all(jnp.isfinite(out)))
    print("KERNEL_OK")
</pallas_src>

<mosaic_0001>
module attributes {stable_mosaic.version = 11 : i64} {
  func.func @_resgnet_kernel(%arg0: i32, %arg1: memref<332xf32, #tpu.memory_space<smem>>, %arg2: memref<8xf32, #tpu.memory_space<smem>>, %arg3: memref<1x4x8x128xf32, #tpu.memory_space<vmem>>, %arg4: memref<8x128xf32, #tpu.memory_space<vmem>>, %arg5: memref<1x4x8x128xf32, #tpu.memory_space<vmem>>) attributes {dimension_semantics = [#tpu.dimension_semantics<parallel>], iteration_bounds = array<i64: 2>, scalar_prefetch = 0 : i64, scratch_operands = 0 : i64, tpu.core_type = #tpu.core_type<tc>, window_params = [{transform_indices = @transform_0, window_bounds = array<i64: 332>}, {transform_indices = @transform_1, window_bounds = array<i64: 8>}, {transform_indices = @transform_2, window_bounds = array<i64: 1, 4, 8, 128>}, {pipeline_mode = #tpu.pipeline_mode<synchronous>, transform_indices = @transform_3, window_bounds = array<i64: 8, 128>}, {transform_indices = @transform_4, window_bounds = array<i64: 1, 4, 8, 128>}]} {
    %c0 = arith.constant 0 : index
    %c0_0 = arith.constant 0 : index
    %0 = vector.load %arg4[%c0, %c0_0] : memref<8x128xf32, #tpu.memory_space<vmem>>, vector<8x128xf32>
    %c0_1 = arith.constant 0 : index
    %c0_2 = arith.constant 0 : index
    %c0_3 = arith.constant 0 : index
    %c0_4 = arith.constant 0 : index
    %1 = vector.load %arg3[%c0_1, %c0_2, %c0_3, %c0_4] : memref<1x4x8x128xf32, #tpu.memory_space<vmem>>, vector<1x1x8x128xf32>
    %2 = vector.shape_cast %1 : vector<1x1x8x128xf32> to vector<8x128xf32>
    %c0_5 = arith.constant 0 : index
    %c1 = arith.constant 1 : index
    %c0_6 = arith.constant 0 : index
    %c0_7 = arith.constant 0 : index
    %3 = vector.load %arg3[%c0_5, %c1, %c0_6, %c0_7] : memref<1x4x8x128xf32, #tpu.memory_space<vmem>>, vector<1x1x8x128xf32>
    %4 = vector.shape_cast %3 : vector<1x1x8x128xf32> to vector<8x128xf32>
    %c0_8 = arith.constant 0 : index
    %c2 = arith.constant 2 : index
    %c0_9 = arith.constant 0 : index
    %c0_10 = arith.constant 0 : index
    %5 = vector.load %arg3[%c0_8, %c2, %c0_9, %c0_10] : memref<1x4x8x128xf32, #tpu.memory_space<vmem>>, vector<1x1x8x128xf32>
    %6 = vector.shape_cast %5 : vector<1x1x8x128xf32> to vector<8x128xf32>
    %c0_11 = arith.constant 0 : index
    %c3 = arith.constant 3 : index
    %c0_12 = arith.constant 0 : index
    %c0_13 = arith.constant 0 : index
    %7 = vector.load %arg3[%c0_11, %c3, %c0_12, %c0_13] : memref<1x4x8x128xf32, #tpu.memory_space<vmem>>, vector<1x1x8x128xf32>
    %8 = vector.shape_cast %7 : vector<1x1x8x128xf32> to vector<8x128xf32>
    %c11_i32 = arith.constant 11 : i32
    %9 = tpu.dynamic_rotate %2 by %c11_i32 dim 1 : vector<8x128xf32>, i32 -> vector<8x128xf32>
    %c0_14 = arith.constant 0 : index
    %10 = memref.load %arg1[%c0_14] : memref<332xf32, #tpu.memory_space<smem>>
    %11 = vector.broadcast %10 : f32 to vector<8x128xf32>
    %12 = arith.mulf %11, %9 : vector<8x128xf32>
    %c10_i32 = arith.constant 10 : i32
    %13 = tpu.dynamic_rotate %2 by %c10_i32 dim 1 : vector<8x128xf32>, i32 -> vector<8x128xf32>
    %c1_15 = arith.constant 1 : index
    %14 = memref.load %arg1[%c1_15] : memref<332xf32, #tpu.memory_space<smem>>
    %15 = vector.broadcast %14 : f32 to vector<8x128xf32>
    %16 = arith.mulf %15, %13 : vector<8x128xf32>
    %17 = arith.addf %12, %16 : vector<8x128xf32>
    %c9_i32 = arith.constant 9 : i32
    %18 = tpu.dynamic_rotate %2 by %c9_i32 dim 1 : vector<8x128xf32>, i32 -> vector<8x128xf32>
    %c2_16 = arith.constant 2 : index
    %19 = memref.load %arg1[%c2_16] : memref<332xf32, #tpu.memory_space<smem>>
    %20 = vector.broadcast %19 : f32 to vector<8x128xf32>
    %21 = arith.mulf %20, %18 : vector<8x128xf32>
    %22 = arith.addf %17, %21 : vector<8x128xf32>
    %c1_i32 = arith.constant 1 : i32
    %23 = tpu.dynamic_rotate %2 by %c1_i32 dim 1 : vector<8x128xf32>, i32 -> vector<8x128xf32>
    %c3_17 = arith.constant 3 : index
    %24 = memref.load %arg1[%c3_17] : memref<332xf32, #tpu.memory_space<smem>>
    %25 = vector.broadcast %24 : f32 to vector<8x128xf32>
    %26 = arith.mulf %25, %23 : vector<8x128xf32>
    %27 = arith.addf %22, %26 : vector<8x128xf32>
    %c4 = arith.constant 4 : index
    %28 = memref.load %arg1[%c4] : memref<332xf32, #tpu.memory_space<smem>>
    %29 = vector.broadcast %28 : f32 to vector<8x128xf32>
    %30 = arith.mulf %29, %2 : vector<8x128xf32>
    %31 = arith.addf %27, %30 : vector<8x128xf32>
    %c127_i32 = arith.constant 127 : i32
    %32 = tpu.dynamic_rotate %2 by %c127_i32 dim 1 : vector<8x128xf32>, i32 -> vector<8x128xf32>
    %c5 = arith.constant 5 : index
    %33 = memref.load %arg1[%c5] : memref<332xf32, #tpu.memory_space<smem>>
    %34 = vector.broadcast %33 : f32 to vector<8x128xf32>
    %35 = arith.mulf %34, %32 : vector<8x128xf32>
    %36 = arith.addf %31, %35 : vector<8x128xf32>
    %c119_i32 = arith.constant 119 : i32
    %37 = tpu.dynamic_rotate %2 by %c119_i32 dim 1 : vector<8x128xf32>, i32 -> vector<8x128xf32>
    %c6 = arith.constant 6 : index
    %38 = memref.load %arg1[%c6] : memref<332xf32, #tpu.memory_space<smem>>
    %39 = vector.broadcast %38 : f32 to vector<8x128xf32>
    %40 = arith.mulf %39, %37 : vector<8x128xf32>
    %41 = arith.addf %36, %40 : vector<8x128xf32>
    %c118_i32 = arith.constant 118 : i32
    %42 = tpu.dynamic_rotate %2 by %c118_i32 dim 1 : vector<8x128xf32>, i32 -> vector<8x128xf32>
    %c7 = arith.constant 7 : index
    %43 = memref.load %arg1[%c7] : memref<332xf32, #tpu.memory_space<smem>>
    %44 = vector.broadcast %43 : f32 to vector<8x128xf32>
    %45 = arith.mulf %44, %42 : vector<8x128xf32>
    %46 = arith.addf %41, %45 : vector<8x128xf32>
    %c117_i32 = arith.constant 117 : i32
    %47 = tpu.dynamic_rotate %2 by %c117_i32 dim 1 : vector<8x128xf32>, i32 -> vector<8x128xf32>
    %c8 = arith.constant 8 : index
    %48 = memref.load %arg1[%c8] : memref<332xf32, #tpu.memory_space<smem>>
    %49 = vector.broadcast %48 : f32 to vector<8x128xf32>
    %50 = arith.mulf %49, %47 : vector<8x128xf32>
    %51 = arith.addf %46, %50 : vector<8x128xf32>
    %c9 = arith.constant 9 : index
    %52 = memref.load %arg1[%c9] : memref<332xf32, #tpu.memory_space<smem>>
    %c10 = arith.constant 10 : index
    %53 = memref.load %arg1[%c10] : memref<332xf32, #tpu.memory_space<smem>>
    %54 = arith.mulf %51, %0 : vector<8x128xf32>
    %55 = vector.shape_cast %54 : vector<8x128xf32> to vector<1x8x128xf32>
    %cst = arith.constant dense<0.000000e+00> : vector<1xf32>
    %56 = vector.multi_reduction <add>, %55, %cst [1, 2] : vector<1x8x128xf32> to vector<1xf32>
    %57 = vector.shape_cast %56 : vector<1xf32> to vector<1x1x1xf32>
    %58 = vector.extract %57[0, 0, 0] : f32 from vector<1x1x1xf32>
    %59 = arith.mulf %54, %51 : vector<8x128xf32>
    %60 = vector.shape_cast %59 : vector<8x128xf32> to vector<1x8x128xf32>
    %cst_18 = arith.constant dense<0.000000e+00> : vector<1xf32>
    %61 = vector.multi_reduction <add>, %60, %cst_18 [1, 2] : vector<1x8x128xf32> to vector<1xf32>
    %62 = vector.shape_cast %61 : vector<1xf32> to vector<1x1x1xf32>
    %63 = vector.extract %62[0, 0, 0] : f32 from vector<1x1x1xf32>
    %cst_19 = arith.constant 3.906250e-03 : f32
    %64 = arith.mulf %58, %cst_19 : f32
    %cst_20 = arith.constant 3.906250e-03 : f32
    %65 = arith.mulf %63, %cst_20 : f32
    %66 = arith.mulf %64, %64 : f32
    %67 = arith.subf %65, %66 : f32
    %cst_21 = arith.constant 0.000000e+00 : f32
    %68 = arith.maximumf %67, %cst_21 : f32
    %69 = vector.broadcast %64 : f32 to vector<8x128xf32>
    %70 = arith.subf %51, %69 : vector<8x128xf32>
    %cst_22 = arith.constant 9.99999974E-6 : f32
    %71 = arith.addf %68, %cst_22 : f32
    %72 = math.rsqrt %71 : f32
    %73 = vector.broadcast %72 : f32 to vector<8x128xf32>
    %74 = arith.mulf %70, %73 : vector<8x128xf32>
    %75 = vector.broadcast %52 : f32 to vector<8x128xf32>
    %76 = arith.mulf %75, %74 : vector<8x128xf32>
    %77 = vector.broadcast %53 : f32 to vector<8x128xf32>
    %78 = arith.addf %76, %77 : vector<8x128xf32>
    %cst_23 = arith.constant 0.000000e+00 : f32
    %79 = vector.broadcast %cst_23 : f32 to vector<8x128xf32>
    %80 = arith.cmpf ogt, %78, %79 : vector<8x128xf32>
    %cst_24 = arith.constant 0.000000e+00 : f32
    %81 = vector.broadcast %cst_24 : f32 to vector<8x128xf32>
    %82 = arith.minimumf %78, %81 : vector<8x128xf32>
    %83 = math.exp %82 : vector<8x128xf32>
    %cst_25 = arith.constant 1.000000e+00 : f32
    %84 = vector.broadcast %cst_25 : f32 to vector<8x128xf32>
    %85 = arith.subf %83, %84 : vector<8x128xf32>
    %86 = arith.select %80, %78, %85 : vector<8x128xi1>, vector<8x128xf32>
    %87 = arith.mulf %86, %0 : vector<8x128xf32>
    %c1_i32_26 = arith.constant 1 : i32
    %88 = tpu.dynamic_rotate %87 by %c1_i32_26 dim 0 : vector<8x128xf32>, i32 -> vector<8x128xf32>
    %c10_i32_27 = arith.constant 10 : i32
    %89 = tpu.dynamic_rotate %88 by %c10_i32_27 dim 1 : vector<8x128xf32>, i32 -> vector<8x128xf32>
    %c11 = arith.constant 11 : index
    %90 = memref.load %arg1[%c11] : memref<332xf32, #tpu.memory_space<smem>>
    %91 = vector.broadcast %90 : f32 to vector<8x128xf32>
    %92 = arith.mulf %91, %89 : vector<8x128xf32>
    %c12 = arith.constant 12 : index
    %93 = memref.load %arg1[%c12] : memref<332xf32, #tpu.memory_space<smem>>
    %94 = vector.broadcast %93 : f32 to vector<8x128xf32>
    %95 = arith.mulf %94, %88 : vector<8x128xf32>
    %96 = arith.addf %92, %95 : vector<8x128xf32>
    %c118_i32_28 = arith.constant 118 : i32
    %97 = tpu.dynamic_rotate %88 by %c118_i32_28 dim 1 : vector<8x128xf32>, i32 -> vector<8x128xf32>
    %c13 = arith.constant 13 : index
    %98 = memref.load %arg1[%c13] : memref<332xf32, #tpu.memory_space<smem>>
    %99 = vector.broadcast %98 : f32 to vector<8x128xf32>
    %100 = arith.mulf %99, %97 : vector<8x128xf32>
    %101 = arith.addf %96, %100 : vector<8x128xf32>
    %c10_i32_29 = arith.constant 10 : i32
    %102 = tpu.dynamic_rotate %87 by %c10_i32_29 dim 1 : vector<8x128xf32>, i32 -> vector<8x128xf32>
    %c14 = arith.constant 14 : index
    %103 = memref.load %arg1[%c14] : memref<332xf32, #tpu.memory_space<smem>>
    %104 = vector.broadcast %103 : f32 to vector<8x128xf32>
    %105 = arith.mulf %104, %102 : vector<8x128xf32>
    %106 = arith.addf %101, %105 : vector<8x128xf32>
    %c15 = arith.constant 15 : index
    %107 = memref.load %arg1[%c15] : memref<332xf32, #tpu.memory_space<smem>>
    %108 = vector.broadcast %107 : f32 to vector<8x128xf32>
    %109 = arith.mulf %108, %87 : vector<8x128xf32>
    %110 = arith.addf %106, %109 : vector<8x128xf32>
    %c118_i32_30 = arith.constant 118 : i32
    %111 = tpu.dynamic_rotate %87 by %c118_i32_30 dim 1 : vector<8x128xf32>, i32 -> vector<8x128xf32>
    %c16 = arith.constant 16 : index
    %112 = memref.load %arg1[%c16] : memref<332xf32, #tpu.memory_space<smem>>
    %113 = vector.broadcast %112 : f32 to vector<8x128xf32>
    %114 = arith.mulf %113, %111 : vector<8x128xf32>
    %115 = arith.addf %110, %114 : vector<8x128xf32>
    %c7_i32 = arith.constant 7 : i32
    %116 = tpu.dynamic_rotate %87 by %c7_i32 dim 0 : vector<8x128xf32>, i32 -> vector<8x128xf32>
    %c10_i32_31 = arith.constant 10 : i32
    %117 = tpu.dynamic_rotate %116 by %c10_i32_31 dim 1 : vector<8x128xf32>, i32 -> vector<8x128xf32>
    %c17 = arith.constant 17 : index
    %118 = memref.load %arg1[%c17] : memref<332xf32, #tpu.memory_space<smem>>
    %119 = vector.broadcast %118 : f32 to vector<8x128xf32>
    %120 = arith.mulf %119, %117 : vector<8x128xf32>
    %121 = arith.addf %115, %120 : vector<8x128xf32>
    %c18 = arith.constant 18 : index
    %122 = memref.load %arg1[%c18] : memref<332xf32, #tpu.memory_space<smem>>
    %123 = vector.broadcast %122 : f32 to vector<8x128xf32>
    %124 = arith.mulf %123, %116 : vector<8x128xf32>
    %125 = arith.addf %121, %124 : vector<8x128xf32>
    %c118_i32_32 = arith.constant 118 : i32
    %126 = tpu.dynamic_rotate %116 by %c118_i32_32 dim 1 : vector<8x128xf32>, i32 -> vector<8x128xf32>
    %c19 = arith.constant 19 : index
    %127 = memref.load %arg1[%c19] : memref<332xf32, #tpu.memory_space<smem>>
    %128 = vector.broadcast %127 : f32 to vector<8x128xf32>
    %129 = arith.mulf %128, %126 : vector<8x128xf32>
    %130 = arith.addf %125, %129 : vector<8x128xf32>
    %c20 = arith.constant 20 : index
    %131 = memref.load %arg1[%c20] : memref<332xf32, #tpu.memory_space<smem>>
    %c21 = arith.constant 21 : index
    %132 = memref.load %arg1[%c21] : memref<332xf32, #tpu.memory_space<smem>>
    %133 = arith.mulf %130, %0 : vector<8x128xf32>
    %134 = vector.shape_cast %133 : vector<8x128xf32> to vector<1x8x128xf32>
    %cst_33 = arith.constant dense<0.000000e+00> : vector<1xf32>
    %135 = vector.multi_reduction <add>, %134, %cst_33 [1, 2] : vector<1x8x128xf32> to vector<1xf32>
    %136 = vector.shape_cast %135 : vector<1xf32> to vector<1x1x1xf32>
    %137 = vector.extract %136[0, 0, 0] : f32 from vector<1x1x1xf32>
    %138 = arith.mulf %133, %130 : vector<8x128xf32>
    %139 = vector.shape_cast %138 : vector<8x128xf32> to vector<1x8x128xf32>
    %cst_34 = arith.constant dense<0.000000e+00> : vector<1xf32>
    %140 = vector.multi_reduction <add>, %139, %cst_34 [1, 2] : vector<1x8x128xf32> to vector<1xf32>
    %141 = vector.shape_cast %140 : vector<1xf32> to vector<1x1x1xf32>
    %142 = vector.extract %141[0, 0, 0] : f32 from vector<1x1x1xf32>
    %cst_35 = arith.constant 3.906250e-03 : f32
    %143 = arith.mulf %137, %cst_35 : f32
    %cst_36 = arith.constant 3.906250e-03 : f32
    %144 = arith.mulf %142, %cst_36 : f32
    %145 = arith.mulf %143, %143 : f32
    %146 = arith.subf %144, %145 : f32
    %cst_37 = arith.constant 0.000000e+00 : f32
    %147 = arith.maximumf %146, %cst_37 : f32
    %148 = vector.broadcast %143 : f32 to vector<8x128xf32>
    %149 = arith.subf %130, %148 : vector<8x128xf32>
    %cst_38 = arith.constant 9.99999974E-6 : f32
    %150 = arith.addf %147, %cst_38 : f32
    %151 = math.rsqrt %150 : f32
    %152 = vector.broadcast %151 : f32 to vector<8x128xf32>
    %153 = arith.mulf %149, %152 : vector<8x128xf32>
    %154 = vector.broadcast %131 : f32 to vector<8x128xf32>
    %155 = arith.mulf %154, %153 : vector<8x128xf32>
    %156 = vector.broadcast %132 : f32 to vector<8x128xf32>
    %157 = arith.addf %155, %156 : vector<8x128xf32>
    %cst_39 = arith.constant 0.000000e+00 : f32
    %158 = vector.broadcast %cst_39 : f32 to vector<8x128xf32>
    %159 = arith.cmpf ogt, %157, %158 : vector<8x128xf32>
    %cst_40 = arith.constant 0.000000e+00 : f32
    %160 = vector.broadcast %cst_40 : f32 to vector<8x128xf32>
    %161 = arith.minimumf %157, %160 : vector<8x128xf32>
    %162 = math.exp %161 : vector<8x128xf32>
    %cst_41 = arith.constant 1.000000e+00 : f32
    %163 = vector.broadcast %cst_41 : f32 to vector<8x128xf32>
    %164 = arith.subf %162, %163 : vector<8x128xf32>
    %165 = arith.select %159, %157, %164 : vector<8x128xi1>, vector<8x128xf32>
    %166 = arith.mulf %165, %0 : vector<8x128xf32>
    %c1_i32_42 = arith.constant 1 : i32
    %167 = tpu.dynamic_rotate %166 by %c1_i32_42 dim 0 : vector<8x128xf32>, i32 -> vector<8x128xf32>
    %c11_i32_43 = arith.constant 11 : i32
    %168 = tpu.dynamic_rotate %167 by %c11_i32_43 dim 1 : vector<8x128xf32>, i32 -> vector<8x128xf32>
    %c22 = arith.constant 22 : index
    %169 = memref.load %arg1[%c22] : memref<332xf32, #tpu.memory_space<smem>>
    %170 = vector.broadcast %169 : f32 to vector<8x128xf32>
    %171 = arith.mulf %170, %168 : vector<8x128xf32>
    %c10_i32_44 = arith.constant 10 : i32
    %172 = tpu.dynamic_rotate %167 by %c10_i32_44 dim 1 : vector<8x128xf32>, i32 -> vector<8x128xf32>
    %c23 = arith.constant 23 : index
    %173 = memref.load %arg1[%c23] : memref<332xf32, #tpu.memory_space<smem>>
    %174 = vector.broadcast %173 : f32 to vector<8x128xf32>
    %175 = arith.mulf %174, %172 : vector<8x128xf32>
    %176 = arith.addf %171, %175 : vector<8x128xf32>
    %c9_i32_45 = arith.constant 9 : i32
    %177 = tpu.dynamic_rotate %167 by %c9_i32_45 dim 1 : vector<8x128xf32>, i32 -> vector<8x128xf32>
    %c24 = arith.constant 24 : index
    %178 = memref.load %arg1[%c24] : memref<332xf32, #tpu.memory_space<smem>>
    %179 = vector.broadcast %178 : f32 to vector<8x128xf32>
    %180 = arith.mulf %179, %177 : vector<8x128xf32>
    %181 = arith.addf %176, %180 : vector<8x128xf32>
    %c1_i32_46 = arith.constant 1 : i32
    %182 = tpu.dynamic_rotate %167 by %c1_i32_46 dim 1 : vector<8x128xf32>, i32 -> vector<8x128xf32>
    %c25 = arith.constant 25 : index
    %183 = memref.load %arg1[%c25] : memref<332xf32, #tpu.memory_space<smem>>
    %184 = vector.broadcast %183 : f32 to vector<8x128xf32>
    %185 = arith.mulf %184, %182 : vector<8x128xf32>
    %186 = arith.addf %181, %185 : vector<8x128xf32>
    %c26 = arith.constant 26 : index
    %187 = memref.load %arg1[%c26] : memref<332xf32, #tpu.memory_space<smem>>
    %188 = vector.broadcast %187 : f32 to vector<8x128xf32>
    %189 = arith.mulf %188, %167 : vector<8x128xf32>
    %190 = arith.addf %186, %189 : vector<8x128xf32>
    %c127_i32_47 = arith.constant 127 : i32
    %191 = tpu.dynamic_rotate %167 by %c127_i32_47 dim 1 : vector<8x128xf32>, i32 -> vector<8x128xf32>
    %c27 = arith.constant 27 : index
    %192 = memref.load %arg1[%c27] : memref<332xf32, #tpu.memory_space<smem>>
    %193 = vector.broadcast %192 : f32 to vector<8x128xf32>
    %194 = arith.mulf %193, %191 : vector<8x128xf32>
    %195 = arith.addf %190, %194 : vector<8x128xf32>
    %c119_i32_48 = arith.constant 119 : i32
    %196 = tpu.dynamic_rotate %167 by %c119_i32_48 dim 1 : vector<8x128xf32>, i32 -> vector<8x128xf32>
    %c28 = arith.constant 28 : index
    %197 = memref.load %arg1[%c28] : memref<332xf32, #tpu.memory_space<smem>>
    %198 = vector.broadcast %197 : f32 to vector<8x128xf32>
    %199 = arith.mulf %198, %196 : vector<8x128xf32>
    %200 = arith.addf %195, %199 : vector<8x128xf32>
    %c118_i32_49 = arith.constant 118 : i32
    %201 = tpu.dynamic_rotate %167 by %c118_i32_49 dim 1 : vector<8x128xf32>, i32 -> vector<8x128xf32>
    %c29 = arith.constant 29 : index
    %202 = memref.load %arg1[%c29] : memref<332xf32, #tpu.memory_space<smem>>
    %203 = vector.broadcast %202 : f32 to vector<8x128xf32>
    %204 = arith.mulf %203, %201 : vector<8x128xf32>
    %205 = arith.addf %200, %204 : vector<8x128xf32>
    %c117_i32_50 = arith.constant 117 : i32
    %206 = tpu.dynamic_rotate %167 by %c117_i32_50 dim 1 : vector<8x128xf32>, i32 -> vector<8x128xf32>
    %c30 = arith.constant 30 : index
    %207 = memref.load %arg1[%c30] : memref<332xf32, #tpu.memory_space<smem>>
    %208 = vector.broadcast %207 : f32 to vector<8x128xf32>
    %209 = arith.mulf %208, %206 : vector<8x128xf32>
    %210 = arith.addf %205, %209 : vector<8x128xf32>
    %c11_i32_51 = arith.constant 11 : i32
    %211 = tpu.dynamic_rotate %166 by %c11_i32_51 dim 1 : vector<8x128xf32>, i32 -> vector<8x128xf32>
    %c31 = arith.constant 31 : index
    %212 = memref.load %arg1[%c31] : memref<332xf32, #tpu.memory_space<smem>>
    %213 = vector.broadcast %212 : f32 to vector<8x128xf32>
    %214 = arith.mulf %213, %211 : vector<8x128xf32>
    %215 = arith.addf %210, %214 : vector<8x128xf32>
    %c10_i32_52 = arith.constant 10 : i32
    %216 = tpu.dynamic_rotate %166 by %c10_i32_52 dim 1 : vector<8x128xf32>, i32 -> vector<8x128xf32>
    %c32 = arith.constant 32 : index
    %217 = memref.load %arg1[%c32] : memref<332xf32, #tpu.memory_space<smem>>
    %218 = vector.broadcast %217 : f32 to vector<8x128xf32>
    %219 = arith.mulf %218, %216 : vector<8x128xf32>
    %220 = arith.addf %215, %219 : vector<8x128xf32>
    %c9_i32_53 = arith.constant 9 : i32
    %221 = tpu.dynamic_rotate %166 by %c9_i32_53 dim 1 : vector<8x128xf32>, i32 -> vector<8x128xf32>
    %c33 = arith.constant 33 : index
    %222 = memref.load %arg1[%c33] : memref<332xf32, #tpu.memory_space<smem>>
    %223 = vector.broadcast %222 : f32 to vector<8x128xf32>
    %224 = arith.mulf %223, %221 : vector<8x128xf32>
    %225 = arith.addf %220, %224 : vector<8x128xf32>
    %c1_i32_54 = arith.constant 1 : i32
    %226 = tpu.dynamic_rotate %166 by %c1_i32_54 dim 1 : vector<8x128xf32>, i32 -> vector<8x128xf32>
    %c34 = arith.constant 34 : index
    %227 = memref.load %arg1[%c34] : memref<332xf32, #tpu.memory_space<smem>>
    %228 = vector.broadcast %227 : f32 to vector<8x128xf32>
    %229 = arith.mulf %228, %226 : vector<8x128xf32>
    %230 = arith.addf %225, %229 : vector<8x128xf32>
    %c35 = arith.constant 35 : index
    %231 = memref.load %arg1[%c35] : memref<332xf32, #tpu.memory_space<smem>>
    %232 = vector.broadcast %231 : f32 to vector<8x128xf32>
    %233 = arith.mulf %232, %166 : vector<8x128xf32>
    %234 = arith.addf %230, %233 : vector<8x128xf32>
    %c127_i32_55 = arith.constant 127 : i32
    %235 = tpu.dynamic_rotate %166 by %c127_i32_55 dim 1 : vector<8x128xf32>, i32 -> vector<8x128xf32>
    %c36 = arith.constant 36 : index
    %236 = memref.load %arg1[%c36] : memref<332xf32, #tpu.memory_space<smem>>
    %237 = vector.broadcast %236 : f32 to vector<8x128xf32>
    %238 = arith.mulf %237, %235 : vector<8x128xf32>
    %239 = arith.addf %234, %238 : vector<8x128xf32>
    %c119_i32_56 = arith.constant 119 : i32
    %240 = tpu.dynamic_rotate %166 by %c119_i32_56 dim 1 : vector<8x128xf32>, i32 -> vector<8x128xf32>
    %c37 = arith.constant 37 : index
    %241 = memref.load %arg1[%c37] : memref<332xf32, #tpu.memory_space<smem>>
    %242 = vector.broadcast %241 : f32 to vector<8x128xf32>
    %243 = arith.mulf %242, %240 : vector<8x128xf32>
    %244 = arith.addf %239, %243 : vector<8x128xf32>
    %c118_i32_57 = arith.constant 118 : i32
    %245 = tpu.dynamic_rotate %166 by %c118_i32_57 dim 1 : vector<8x128xf32>, i32 -> vector<8x128xf32>
    %c38 = arith.constant 38 : index
    %246 = memref.load %arg1[%c38] : memref<332xf32, #tpu.memory_space<smem>>
    %247 = vector.broadcast %246 : f32 to vector<8x128xf32>
    %248 = arith.mulf %247, %245 : vector<8x128xf32>
    %249 = arith.addf %244, %248 : vector<8x128xf32>
    %c117_i32_58 = arith.constant 117 : i32
    %250 = tpu.dynamic_rotate %166 by %c117_i32_58 dim 1 : vector<8x128xf32>, i32 -> vector<8x128xf32>
    %c39 = arith.constant 39 : index
    %251 = memref.load %arg1[%c39] : memref<332xf32, #tpu.memory_space<smem>>
    %252 = vector.broadcast %251 : f32 to vector<8x128xf32>
    %253 = arith.mulf %252, %250 : vector<8x128xf32>
    %254 = arith.addf %249, %253 : vector<8x128xf32>
    %c7_i32_59 = arith.constant 7 : i32
    %255 = tpu.dynamic_rotate %166 by %c7_i32_59 dim 0 : vector<8x128xf32>, i32 -> vector<8x128xf32>
    %c11_i32_60 = arith.constant 11 : i32
    %256 = tpu.dynamic_rotate %255 by %c11_i32_60 dim 1 : vector<8x128xf32>, i32 -> vector<8x128xf32>
    %c40 = arith.constant 40 : index
    %257 = memref.load %arg1[%c40] : memref<332xf32, #tpu.memory_space<smem>>
    %258 = vector.broadcast %257 : f32 to vector<8x128xf32>
    %259 = arith.mulf %258, %256 : vector<8x128xf32>
    %260 = arith.addf %254, %259 : vector<8x128xf32>
    %c10_i32_61 = arith.constant 10 : i32
    %261 = tpu.dynamic_rotate %255 by %c10_i32_61 dim 1 : vector<8x128xf32>, i32 -> vector<8x128xf32>
    %c41 = arith.constant 41 : index
    %262 = memref.load %arg1[%c41] : memref<332xf32, #tpu.memory_space<smem>>
    %263 = vector.broadcast %262 : f32 to vector<8x128xf32>
    %264 = arith.mulf %263, %261 : vector<8x128xf32>
    %265 = arith.addf %260, %264 : vector<8x128xf32>
    %c9_i32_62 = arith.constant 9 : i32
    %266 = tpu.dynamic_rotate %255 by %c9_i32_62 dim 1 : vector<8x128xf32>, i32 -> vector<8x128xf32>
    %c42 = arith.constant 42 : index
    %267 = memref.load %arg1[%c42] : memref<332xf32, #tpu.memory_space<smem>>
    %268 = vector.broadcast %267 : f32 to vector<8x128xf32>
    %269 = arith.mulf %268, %266 : vector<8x128xf32>
    %270 = arith.addf %265, %269 : vector<8x128xf32>
    %c1_i32_63 = arith.constant 1 : i32
    %271 = tpu.dynamic_rotate %255 by %c1_i32_63 dim 1 : vector<8x128xf32>, i32 -> vector<8x128xf32>
    %c43 = arith.constant 43 : index
    %272 = memref.load %arg1[%c43] : memref<332xf32, #tpu.memory_space<smem>>
    %273 = vector.broadcast %272 : f32 to vector<8x128xf32>
    %274 = arith.mulf %273, %271 : vector<8x128xf32>
    %275 = arith.addf %270, %274 : vector<8x128xf32>
    %c44 = arith.constant 44 : index
    %276 = memref.load %arg1[%c44] : memref<332xf32, #tpu.memory_space<smem>>
    %277 = vector.broadcast %276 : f32 to vector<8x128xf32>
    %278 = arith.mulf %277, %255 : vector<8x128xf32>
    %279 = arith.addf %275, %278 : vector<8x128xf32>
    %c127_i32_64 = arith.constant 127 : i32
    %280 = tpu.dynamic_rotate %255 by %c127_i32_64 dim 1 : vector<8x128xf32>, i32 -> vector<8x128xf32>
    %c45 = arith.constant 45 : index
    %281 = memref.load %arg1[%c45] : memref<332xf32, #tpu.memory_space<smem>>
    %282 = vector.broadcast %281 : f32 to vector<8x128xf32>
    %283 = arith.mulf %282, %280 : vector<8x128xf32>
    %284 = arith.addf %279, %283 : vector<8x128xf32>
    %c119_i32_65 = arith.constant 119 : i32
    %285 = tpu.dynamic_rotate %255 by %c119_i32_65 dim 1 : vector<8x128xf32>, i32 -> vector<8x128xf32>
    %c46 = arith.constant 46 : index
    %286 = memref.load %arg1[%c46] : memref<332xf32, #tpu.memory_space<smem>>
    %287 = vector.broadcast %286 : f32 to vector<8x128xf32>
    %288 = arith.mulf %287, %285 : vector<8x128xf32>
    %289 = arith.addf %284, %288 : vector<8x128xf32>
    %c118_i32_66 = arith.constant 118 : i32
    %290 = tpu.dynamic_rotate %255 by %c118_i32_66 dim 1 : vector<8x128xf32>, i32 -> vector<8x128xf32>
    %c47 = arith.constant 47 : index
    %291 = memref.load %arg1[%c47] : memref<332xf32, #tpu.memory_space<smem>>
    %292 = vector.broadcast %291 : f32 to vector<8x128xf32>
    %293 = arith.mulf %292, %290 : vector<8x128xf32>
    %294 = arith.addf %289, %293 : vector<8x128xf32>
    %c117_i32_67 = arith.constant 117 : i32
    %295 = tpu.dynamic_rotate %255 by %c117_i32_67 dim 1 : vector<8x128xf32>, i32 -> vector<8x128xf32>
    %c48 = arith.constant 48 : index
    %296 = memref.load %arg1[%c48] : memref<332xf32, #tpu.memory_space<smem>>
    %297 = vector.broadcast %296 : f32 to vector<8x128xf32>
    %298 = arith.mulf %297, %295 : vector<8x128xf32>
    %299 = arith.addf %294, %298 : vector<8x128xf32>
    %c49 = arith.constant 49 : index
    %300 = memref.load %arg1[%c49] : memref<332xf32, #tpu.memory_space<smem>>
    %c50 = arith.constant 50 : index
    %301 = memref.load %arg1[%c50] : memref<332xf32, #tpu.memory_space<smem>>
    %302 = arith.mulf %299, %0 : vector<8x128xf32>
    %303 = vector.shape_cast %302 : vector<8x128xf32> to vector<1x8x128xf32>
    %cst_68 = arith.constant dense<0.000000e+00> : vector<1xf32>
    %304 = vector.multi_reduction <add>, %303, %cst_68 [1, 2] : vector<1x8x128xf32> to vector<1xf32>
    %305 = vector.shape_cast %304 : vector<1xf32> to vector<1x1x1xf32>
    %306 = vector.extract %305[0, 0, 0] : f32 from vector<1x1x1xf32>
    %307 = arith.mulf %302, %299 : vector<8x128xf32>
    %308 = vector.shape_cast %307 : vector<8x128xf32> to vector<1x8x128xf32>
    %cst_69 = arith.constant dense<0.000000e+00> : vector<1xf32>
    %309 = vector.multi_reduction <add>, %308, %cst_69 [1, 2] : vector<1x8x128xf32> to vector<1xf32>
    %310 = vector.shape_cast %309 : vector<1xf32> to vector<1x1x1xf32>
    %311 = vector.extract %310[0, 0, 0] : f32 from vector<1x1x1xf32>
    %cst_70 = arith.constant 3.906250e-03 : f32
    %312 = arith.mulf %306, %cst_70 : f32
    %cst_71 = arith.constant 3.906250e-03 : f32
    %313 = arith.mulf %311, %cst_71 : f32
    %314 = arith.mulf %312, %312 : f32
    %315 = arith.subf %313, %314 : f32
    %cst_72 = arith.constant 0.000000e+00 : f32
    %316 = arith.maximumf %315, %cst_72 : f32
    %317 = vector.broadcast %312 : f32 to vector<8x128xf32>
    %318 = arith.subf %299, %317 : vector<8x128xf32>
    %cst_73 = arith.constant 9.99999974E-6 : f32
    %319 = arith.addf %316, %cst_73 : f32
    %320 = math.rsqrt %319 : f32
    %321 = vector.broadcast %320 : f32 to vector<8x128xf32>
    %322 = arith.mulf %318, %321 : vector<8x128xf32>
    %323 = vector.broadcast %300 : f32 to vector<8x128xf32>
    %324 = arith.mulf %323, %322 : vector<8x128xf32>
    %325 = vector.broadcast %301 : f32 to vector<8x128xf32>
    %326 = arith.addf %324, %325 : vector<8x128xf32>
    %cst_74 = arith.constant 0.000000e+00 : f32
    %327 = vector.broadcast %cst_74 : f32 to vector<8x128xf32>
    %328 = arith.cmpf ogt, %326, %327 : vector<8x128xf32>
    %cst_75 = arith.constant 0.000000e+00 : f32
    %329 = vector.broadcast %cst_75 : f32 to vector<8x128xf32>
    %330 = arith.minimumf %326, %329 : vector<8x128xf32>
    %331 = math.exp %330 : vector<8x128xf32>
    %cst_76 = arith.constant 1.000000e+00 : f32
    %332 = vector.broadcast %cst_76 : f32 to vector<8x128xf32>
    %333 = arith.subf %331, %332 : vector<8x128xf32>
    %334 = arith.select %328, %326, %333 : vector<8x128xi1>, vector<8x128xf32>
    %335 = arith.mulf %334, %0 : vector<8x128xf32>
    %336 = arith.addf %335, %2 : vector<8x128xf32>
    %c1_i32_77 = arith.constant 1 : i32
    %337 = tpu.dynamic_rotate %4 by %c1_i32_77 dim 1 : vector<8x128xf32>, i32 -> vector<8x128xf32>
    %c51 = arith.constant 51 : index
    %338 = memref.load %arg1[%c51] : memref<332xf32, #tpu.memory_space<smem>>
    %339 = vector.broadcast %338 : f32 to vector<8x128xf32>
    %340 = arith.mulf %339, %337 : vector<8x128xf32>
    %c52 = arith.constant 52 : index
    %341 = memref.load %arg1[%c52] : memref<332xf32, #tpu.memory_space<smem>>
    %342 = vector.broadcast %341 : f32 to vector<8x128xf32>
    %343 = arith.mulf %342, %4 : vector<8x128xf32>
    %344 = arith.addf %340, %343 : vector<8x128xf32>
    %c127_i32_78 = arith.constant 127 : i32
    %345 = tpu.dynamic_rotate %4 by %c127_i32_78 dim 1 : vector<8x128xf32>, i32 -> vector<8x128xf32>
    %c53 = arith.constant 53 : index
    %346 = memref.load %arg1[%c53] : memref<332xf32, #tpu.memory_space<smem>>
    %347 = vector.broadcast %346 : f32 to vector<8x128xf32>
    %348 = arith.mulf %347, %345 : vector<8x128xf32>
    %349 = arith.addf %344, %348 : vector<8x128xf32>
    %c54 = arith.constant 54 : index
    %350 = memref.load %arg1[%c54] : memref<332xf32, #tpu.memory_space<smem>>
    %c55 = arith.constant 55 : index
    %351 = memref.load %arg1[%c55] : memref<332xf32, #tpu.memory_space<smem>>
    %352 = arith.mulf %349, %0 : vector<8x128xf32>
    %353 = vector.shape_cast %352 : vector<8x128xf32> to vector<1x8x128xf32>
    %cst_79 = arith.constant dense<0.000000e+00> : vector<1xf32>
    %354 = vector.multi_reduction <add>, %353, %cst_79 [1, 2] : vector<1x8x128xf32> to vector<1xf32>
    %355 = vector.shape_cast %354 : vector<1xf32> to vector<1x1x1xf32>
    %356 = vector.extract %355[0, 0, 0] : f32 from vector<1x1x1xf32>
    %357 = arith.mulf %352, %349 : vector<8x128xf32>
    %358 = vector.shape_cast %357 : vector<8x128xf32> to vector<1x8x128xf32>
    %cst_80 = arith.constant dense<0.000000e+00> : vector<1xf32>
    %359 = vector.multi_reduction <add>, %358, %cst_80 [1, 2] : vector<1x8x128xf32> to vector<1xf32>
    %360 = vector.shape_cast %359 : vector<1xf32> to vector<1x1x1xf32>
    %361 = vector.extract %360[0, 0, 0] : f32 from vector<1x1x1xf32>
    %cst_81 = arith.constant 3.906250e-03 : f32
    %362 = arith.mulf %356, %cst_81 : f32
    %cst_82 = arith.constant 3.906250e-03 : f32
    %363 = arith.mulf %361, %cst_82 : f32
    %364 = arith.mulf %362, %362 : f32
    %365 = arith.subf %363, %364 : f32
    %cst_83 = arith.constant 0.000000e+00 : f32
    %366 = arith.maximumf %365, %cst_83 : f32
    %367 = vector.broadcast %362 : f32 to vector<8x128xf32>
    %368 = arith.subf %349, %367 : vector<8x128xf32>
    %cst_84 = arith.constant 9.99999974E-6 : f32
    %369 = arith.addf %366, %cst_84 : f32
    %370 = math.rsqrt %369 : f32
    %371 = vector.broadcast %370 : f32 to vector<8x128xf32>
    %372 = arith.mulf %368, %371 : vector<8x128xf32>
    %373 = vector.broadcast %350 : f32 to vector<8x128xf32>
    %374 = arith.mulf %373, %372 : vector<8x128xf32>
    %375 = vector.broadcast %351 : f32 to vector<8x128xf32>
    %376 = arith.addf %374, %375 : vector<8x128xf32>
    %cst_85 = arith.constant 0.000000e+00 : f32
    %377 = vector.broadcast %cst_85 : f32 to vector<8x128xf32>
    %378 = arith.cmpf ogt, %376, %377 : vector<8x128xf32>
    %cst_86 = arith.constant 0.000000e+00 : f32
    %379 = vector.broadcast %cst_86 : f32 to vector<8x128xf32>
    %380 = arith.minimumf %376, %379 : vector<8x128xf32>
    %381 = math.exp %380 : vector<8x128xf32>
    %cst_87 = arith.constant 1.000000e+00 : f32
    %382 = vector.broadcast %cst_87 : f32 to vector<8x128xf32>
    %383 = arith.subf %381, %382 : vector<8x128xf32>
    %384 = arith.select %378, %376, %383 : vector<8x128xi1>, vector<8x128xf32>
    %385 = arith.mulf %384, %0 : vector<8x128xf32>
    %c10_i32_88 = arith.constant 10 : i32
    %386 = tpu.dynamic_rotate %385 by %c10_i32_88 dim 1 : vector<8x128xf32>, i32 -> vector<8x128xf32>
    %c56 = arith.constant 56 : index
    %387 = memref.load %arg1[%c56] : memref<332xf32, #tpu.memory_space<smem>>
    %388 = vector.broadcast %387 : f32 to vector<8x128xf32>
    %389 = arith.mulf %388, %386 : vector<8x128xf32>
    %c57 = arith.constant 57 : index
    %390 = memref.load %arg1[%c57] : memref<332xf32, #tpu.memory_space<smem>>
    %391 = vector.broadcast %390 : f32 to vector<8x128xf32>
    %392 = arith.mulf %391, %385 : vector<8x128xf32>
    %393 = arith.addf %389, %392 : vector<8x128xf32>
    %c118_i32_89 = arith.constant 118 : i32
    %394 = tpu.dynamic_rotate %385 by %c118_i32_89 dim 1 : vector<8x128xf32>, i32 -> vector<8x128xf32>
    %c58 = arith.constant 58 : index
    %395 = memref.load %arg1[%c58] : memref<332xf32, #tpu.memory_space<smem>>
    %396 = vector.broadcast %395 : f32 to vector<8x128xf32>
    %397 = arith.mulf %396, %394 : vector<8x128xf32>
    %398 = arith.addf %393, %397 : vector<8x128xf32>
    %c59 = arith.constant 59 : index
    %399 = memref.load %arg1[%c59] : memref<332xf32, #tpu.memory_space<smem>>
    %c60 = arith.constant 60 : index
    %400 = memref.load %arg1[%c60] : memref<332xf32, #tpu.memory_space<smem>>
    %401 = arith.mulf %398, %0 : vector<8x128xf32>
    %402 = vector.shape_cast %401 : vector<8x128xf32> to vector<1x8x128xf32>
    %cst_90 = arith.constant dense<0.000000e+00> : vector<1xf32>
    %403 = vector.multi_reduction <add>, %402, %cst_90 [1, 2] : vector<1x8x128xf32> to vector<1xf32>
    %404 = vector.shape_cast %403 : vector<1xf32> to vector<1x1x1xf32>
    %405 = vector.extract %404[0, 0, 0] : f32 from vector<1x1x1xf32>
    %406 = arith.mulf %401, %398 : vector<8x128xf32>
    %407 = vector.shape_cast %406 : vector<8x128xf32> to vector<1x8x128xf32>
    %cst_91 = arith.constant dense<0.000000e+00> : vector<1xf32>
    %408 = vector.multi_reduction <add>, %407, %cst_91 [1, 2] : vector<1x8x128xf32> to vector<1xf32>
    %409 = vector.shape_cast %408 : vector<1xf32> to vector<1x1x1xf32>
    %410 = vector.extract %409[0, 0, 0] : f32 from vector<1x1x1xf32>
    %cst_92 = arith.constant 3.906250e-03 : f32
    %411 = arith.mulf %405, %cst_92 : f32
    %cst_93 = arith.constant 3.906250e-03 : f32
    %412 = arith.mulf %410, %cst_93 : f32
    %413 = arith.mulf %411, %411 : f32
    %414 = arith.subf %412, %413 : f32
    %cst_94 = arith.constant 0.000000e+00 : f32
    %415 = arith.maximumf %414, %cst_94 : f32
    %416 = vector.broadcast %411 : f32 to vector<8x128xf32>
    %417 = arith.subf %398, %416 : vector<8x128xf32>
    %cst_95 = arith.constant 9.99999974E-6 : f32
    %418 = arith.addf %415, %cst_95 : f32
    %419 = math.rsqrt %418 : f32
    %420 = vector.broadcast %419 : f32 to vector<8x128xf32>
    %421 = arith.mulf %417, %420 : vector<8x128xf32>
    %422 = vector.broadcast %399 : f32 to vector<8x128xf32>
    %423 = arith.mulf %422, %421 : vector<8x128xf32>
    %424 = vector.broadcast %400 : f32 to vector<8x128xf32>
    %425 = arith.addf %423, %424 : vector<8x128xf32>
    %cst_96 = arith.constant 0.000000e+00 : f32
    %426 = vector.broadcast %cst_96 : f32 to vector<8x128xf32>
    %427 = arith.cmpf ogt, %425, %426 : vector<8x128xf32>
    %cst_97 = arith.constant 0.000000e+00 : f32
    %428 = vector.broadcast %cst_97 : f32 to vector<8x128xf32>
    %429 = arith.minimumf %425, %428 : vector<8x128xf32>
    %430 = math.exp %429 : vector<8x128xf32>
    %cst_98 = arith.constant 1.000000e+00 : f32
    %431 = vector.broadcast %cst_98 : f32 to vector<8x128xf32>
    %432 = arith.subf %430, %431 : vector<8x128xf32>
    %433 = arith.select %427, %425, %432 : vector<8x128xi1>, vector<8x128xf32>
    %434 = arith.mulf %433, %0 : vector<8x128xf32>
    %c1_i32_99 = arith.constant 1 : i32
    %435 = tpu.dynamic_rotate %434 by %c1_i32_99 dim 0 : vector<8x128xf32>, i32 -> vector<8x128xf32>
    %c11_i32_100 = arith.constant 11 : i32
    %436 = tpu.dynamic_rotate %435 by %c11_i32_100 dim 1 : vector<8x128xf32>, i32 -> vector<8x128xf32>
    %c61 = arith.constant 61 : index
    %437 = memref.load %arg1[%c61] : memref<332xf32, #tpu.memory_space<smem>>
    %438 = vector.broadcast %437 : f32 to vector<8x128xf32>
    %439 = arith.mulf %438, %436 : vector<8x128xf32>
    %c10_i32_101 = arith.constant 10 : i32
    %440 = tpu.dynamic_rotate %435 by %c10_i32_101 dim 1 : vector<8x128xf32>, i32 -> vector<8x128xf32>
    %c62 = arith.constant 62 : index
    %441 = memref.load %arg1[%c62] : memref<332xf32, #tpu.memory_space<smem>>
    %442 = vector.broadcast %441 : f32 to vector<8x128xf32>
    %443 = arith.mulf %442, %440 : vector<8x128xf32>
    %444 = arith.addf %439, %443 : vector<8x128xf32>
    %c9_i32_102 = arith.constant 9 : i32
    %445 = tpu.dynamic_rotate %435 by %c9_i32_102 dim 1 : vector<8x128xf32>, i32 -> vector<8x128xf32>
    %c63 = arith.constant 63 : index
    %446 = memref.load %arg1[%c63] : memref<332xf32, #tpu.memory_space<smem>>
    %447 = vector.broadcast %446 : f32 to vector<8x128xf32>
    %448 = arith.mulf %447, %445 : vector<8x128xf32>
    %449 = arith.addf %444, %448 : vector<8x128xf32>
    %c1_i32_103 = arith.constant 1 : i32
    %450 = tpu.dynamic_rotate %435 by %c1_i32_103 dim 1 : vector<8x128xf32>, i32 -> vector<8x128xf32>
    %c64 = arith.constant 64 : index
    %451 = memref.load %arg1[%c64] : memref<332xf32, #tpu.memory_space<smem>>
    %452 = vector.broadcast %451 : f32 to vector<8x128xf32>
    %453 = arith.mulf %452, %450 : vector<8x128xf32>
    %454 = arith.addf %449, %453 : vector<8x128xf32>
    %c65 = arith.constant 65 : index
    %455 = memref.load %arg1[%c65] : memref<332xf32, #tpu.memory_space<smem>>
    %456 = vector.broadcast %455 : f32 to vector<8x128xf32>
    %457 = arith.mulf %456, %435 : vector<8x128xf32>
    %458 = arith.addf %454, %457 : vector<8x128xf32>
    %c127_i32_104 = arith.constant 127 : i32
    %459 = tpu.dynamic_rotate %435 by %c127_i32_104 dim 1 : vector<8x128xf32>, i32 -> vector<8x128xf32>
    %c66 = arith.constant 66 : index
    %460 = memref.load %arg1[%c66] : memref<332xf32, #tpu.memory_space<smem>>
    %461 = vector.broadcast %460 : f32 to vector<8x128xf32>
    %462 = arith.mulf %461, %459 : vector<8x128xf32>
    %463 = arith.addf %458, %462 : vector<8x128xf32>
    %c119_i32_105 = arith.constant 119 : i32
    %464 = tpu.dynamic_rotate %435 by %c119_i32_105 dim 1 : vector<8x128xf32>, i32 -> vector<8x128xf32>
    %c67 = arith.constant 67 : index
    %465 = memref.load %arg1[%c67] : memref<332xf32, #tpu.memory_space<smem>>
    %466 = vector.broadcast %465 : f32 to vector<8x128xf32>
    %467 = arith.mulf %466, %464 : vector<8x128xf32>
    %468 = arith.addf %463, %467 : vector<8x128xf32>
    %c118_i32_106 = arith.constant 118 : i32
    %469 = tpu.dynamic_rotate %435 by %c118_i32_106 dim 1 : vector<8x128xf32>, i32 -> vector<8x128xf32>
    %c68 = arith.constant 68 : index
    %470 = memref.load %arg1[%c68] : memref<332xf32, #tpu.memory_space<smem>>
    %471 = vector.broadcast %470 : f32 to vector<8x128xf32>
    %472 = arith.mulf %471, %469 : vector<8x128xf32>
    %473 = arith.addf %468, %472 : vector<8x128xf32>
    %c117_i32_107 = arith.constant 117 : i32
    %474 = tpu.dynamic_rotate %435 by %c117_i32_107 dim 1 : vector<8x128xf32>, i32 -> vector<8x128xf32>
    %c69 = arith.constant 69 : index
    %475 = memref.load %arg1[%c69] : memref<332xf32, #tpu.memory_space<smem>>
    %476 = vector.broadcast %475 : f32 to vector<8x128xf32>
    %477 = arith.mulf %476, %474 : vector<8x128xf32>
    %478 = arith.addf %473, %477 : vector<8x128xf32>
    %c11_i32_108 = arith.constant 11 : i32
    %479 = tpu.dynamic_rotate %434 by %c11_i32_108 dim 1 : vector<8x128xf32>, i32 -> vector<8x128xf32>
    %c70 = arith.constant 70 : index
    %480 = memref.load %arg1[%c70] : memref<332xf32, #tpu.memory_space<smem>>
    %481 = vector.broadcast %480 : f32 to vector<8x128xf32>
    %482 = arith.mulf %481, %479 : vector<8x128xf32>
    %483 = arith.addf %478, %482 : vector<8x128xf32>
    %c10_i32_109 = arith.constant 10 : i32
    %484 = tpu.dynamic_rotate %434 by %c10_i32_109 dim 1 : vector<8x128xf32>, i32 -> vector<8x128xf32>
    %c71 = arith.constant 71 : index
    %485 = memref.load %arg1[%c71] : memref<332xf32, #tpu.memory_space<smem>>
    %486 = vector.broadcast %485 : f32 to vector<8x128xf32>
    %487 = arith.mulf %486, %484 : vector<8x128xf32>
    %488 = arith.addf %483, %487 : vector<8x128xf32>
    %c9_i32_110 = arith.constant 9 : i32
    %489 = tpu.dynamic_rotate %434 by %c9_i32_110 dim 1 : vector<8x128xf32>, i32 -> vector<8x128xf32>
    %c72 = arith.constant 72 : index
    %490 = memref.load %arg1[%c72] : memref<332xf32, #tpu.memory_space<smem>>
    %491 = vector.broadcast %490 : f32 to vector<8x128xf32>
    %492 = arith.mulf %491, %489 : vector<8x128xf32>
    %493 = arith.addf %488, %492 : vector<8x128xf32>
    %c1_i32_111 = arith.constant 1 : i32
    %494 = tpu.dynamic_rotate %434 by %c1_i32_111 dim 1 : vector<8x128xf32>, i32 -> vector<8x128xf32>
    %c73 = arith.constant 73 : index
    %495 = memref.load %arg1[%c73] : memref<332xf32, #tpu.memory_space<smem>>
    %496 = vector.broadcast %495 : f32 to vector<8x128xf32>
    %497 = arith.mulf %496, %494 : vector<8x128xf32>
    %498 = arith.addf %493, %497 : vector<8x128xf32>
    %c74 = arith.constant 74 : index
    %499 = memref.load %arg1[%c74] : memref<332xf32, #tpu.memory_space<smem>>
    %500 = vector.broadcast %499 : f32 to vector<8x128xf32>
    %501 = arith.mulf %500, %434 : vector<8x128xf32>
    %502 = arith.addf %498, %501 : vector<8x128xf32>
    %c127_i32_112 = arith.constant 127 : i32
    %503 = tpu.dynamic_rotate %434 by %c127_i32_112 dim 1 : vector<8x128xf32>, i32 -> vector<8x128xf32>
    %c75 = arith.constant 75 : index
    %504 = memref.load %arg1[%c75] : memref<332xf32, #tpu.memory_space<smem>>
    %505 = vector.broadcast %504 : f32 to vector<8x128xf32>
    %506 = arith.mulf %505, %503 : vector<8x128xf32>
    %507 = arith.addf %502, %506 : vector<8x128xf32>
    %c119_i32_113 = arith.constant 119 : i32
    %508 = tpu.dynamic_rotate %434 by %c119_i32_113 dim 1 : vector<8x128xf32>, i32 -> vector<8x128xf32>
    %c76 = arith.constant 76 : index
    %509 = memref.load %arg1[%c76] : memref<332xf32, #tpu.memory_space<smem>>
    %510 = vector.broadcast %509 : f32 to vector<8x128xf32>
    %511 = arith.mulf %510, %508 : vector<8x128xf32>
    %512 = arith.addf %507, %511 : vector<8x128xf32>
    %c118_i32_114 = arith.constant 118 : i32
    %513 = tpu.dynamic_rotate %434 by %c118_i32_114 dim 1 : vector<8x128xf32>, i32 -> vector<8x128xf32>
    %c77 = arith.constant 77 : index
    %514 = memref.load %arg1[%c77] : memref<332xf32, #tpu.memory_space<smem>>
    %515 = vector.broadcast %514 : f32 to vector<8x128xf32>
    %516 = arith.mulf %515, %513 : vector<8x128xf32>
    %517 = arith.addf %512, %516 : vector<8x128xf32>
    %c117_i32_115 = arith.constant 117 : i32
    %518 = tpu.dynamic_rotate %434 by %c117_i32_115 dim 1 : vector<8x128xf32>, i32 -> vector<8x128xf32>
    %c78 = arith.constant 78 : index
    %519 = memref.load %arg1[%c78] : memref<332xf32, #tpu.memory_space<smem>>
    %520 = vector.broadcast %519 : f32 to vector<8x128xf32>
    %521 = arith.mulf %520, %518 : vector<8x128xf32>
    %522 = arith.addf %517, %521 : vector<8x128xf32>
    %c7_i32_116 = arith.constant 7 : i32
    %523 = tpu.dynamic_rotate %434 by %c7_i32_116 dim 0 : vector<8x128xf32>, i32 -> vector<8x128xf32>
    %c11_i32_117 = arith.constant 11 : i32
    %524 = tpu.dynamic_rotate %523 by %c11_i32_117 dim 1 : vector<8x128xf32>, i32 -> vector<8x128xf32>
    %c79 = arith.constant 79 : index
    %525 = memref.load %arg1[%c79] : memref<332xf32, #tpu.memory_space<smem>>
    %526 = vector.broadcast %525 : f32 to vector<8x128xf32>
    %527 = arith.mulf %526, %524 : vector<8x128xf32>
    %528 = arith.addf %522, %527 : vector<8x128xf32>
    %c10_i32_118 = arith.constant 10 : i32
    %529 = tpu.dynamic_rotate %523 by %c10_i32_118 dim 1 : vector<8x128xf32>, i32 -> vector<8x128xf32>
    %c80 = arith.constant 80 : index
    %530 = memref.load %arg1[%c80] : memref<332xf32, #tpu.memory_space<smem>>
    %531 = vector.broadcast %530 : f32 to vector<8x128xf32>
    %532 = arith.mulf %531, %529 : vector<8x128xf32>
    %533 = arith.addf %528, %532 : vector<8x128xf32>
    %c9_i32_119 = arith.constant 9 : i32
    %534 = tpu.dynamic_rotate %523 by %c9_i32_119 dim 1 : vector<8x128xf32>, i32 -> vector<8x128xf32>
    %c81 = arith.constant 81 : index
    %535 = memref.load %arg1[%c81] : memref<332xf32, #tpu.memory_space<smem>>
    %536 = vector.broadcast %535 : f32 to vector<8x128xf32>
    %537 = arith.mulf %536, %534 : vector<8x128xf32>
    %538 = arith.addf %533, %537 : vector<8x128xf32>
    %c1_i32_120 = arith.constant 1 : i32
    %539 = tpu.dynamic_rotate %523 by %c1_i32_120 dim 1 : vector<8x128xf32>, i32 -> vector<8x128xf32>
    %c82 = arith.constant 82 : index
    %540 = memref.load %arg1[%c82] : memref<332xf32, #tpu.memory_space<smem>>
    %541 = vector.broadcast %540 : f32 to vector<8x128xf32>
    %542 = arith.mulf %541, %539 : vector<8x128xf32>
    %543 = arith.addf %538, %542 : vector<8x128xf32>
    %c83 = arith.constant 83 : index
    %544 = memref.load %arg1[%c83] : memref<332xf32, #tpu.memory_space<smem>>
    %545 = vector.broadcast %544 : f32 to vector<8x128xf32>
    %546 = arith.mulf %545, %523 : vector<8x128xf32>
    %547 = arith.addf %543, %546 : vector<8x128xf32>
    %c127_i32_121 = arith.constant 127 : i32
    %548 = tpu.dynamic_rotate %523 by %c127_i32_121 dim 1 : vector<8x128xf32>, i32 -> vector<8x128xf32>
    %c84 = arith.constant 84 : index
    %549 = memref.load %arg1[%c84] : memref<332xf32, #tpu.memory_space<smem>>
    %550 = vector.broadcast %549 : f32 to vector<8x128xf32>
    %551 = arith.mulf %550, %548 : vector<8x128xf32>
    %552 = arith.addf %547, %551 : vector<8x128xf32>
    %c119_i32_122 = arith.constant 119 : i32
    %553 = tpu.dynamic_rotate %523 by %c119_i32_122 dim 1 : vector<8x128xf32>, i32 -> vector<8x128xf32>
    %c85 = arith.constant 85 : index
    %554 = memref.load %arg1[%c85] : memref<332xf32, #tpu.memory_space<smem>>
    %555 = vector.broadcast %554 : f32 to vector<8x128xf32>
    %556 = arith.mulf %555, %553 : vector<8x128xf32>
    %557 = arith.addf %552, %556 : vector<8x128xf32>
    %c118_i32_123 = arith.constant 118 : i32
    %558 = tpu.dynamic_rotate %523 by %c118_i32_123 dim 1 : vector<8x128xf32>, i32 -> vector<8x128xf32>
    %c86 = arith.constant 86 : index
    %559 = memref.load %arg1[%c86] : memref<332xf32, #tpu.memory_space<smem>>
    %560 = vector.broadcast %559 : f32 to vector<8x128xf32>
    %561 = arith.mulf %560, %558 : vector<8x128xf32>
    %562 = arith.addf %557, %561 : vector<8x128xf32>
    %c117_i32_124 = arith.constant 117 : i32
    %563 = tpu.dynamic_rotate %523 by %c117_i32_124 dim 1 : vector<8x128xf32>, i32 -> vector<8x128xf32>
    %c87 = arith.constant 87 : index
    %564 = memref.load %arg1[%c87] : memref<332xf32, #tpu.memory_space<smem>>
    %565 = vector.broadcast %564 : f32 to vector<8x128xf32>
    %566 = arith.mulf %565, %563 : vector<8x128xf32>
    %567 = arith.addf %562, %566 : vector<8x128xf32>
    %c88 = arith.constant 88 : index
    %568 = memref.load %arg1[%c88] : memref<332xf32, #tpu.memory_space<smem>>
    %c89 = arith.constant 89 : index
    %569 = memref.load %arg1[%c89] : memref<332xf32, #tpu.memory_space<smem>>
    %570 = arith.mulf %567, %0 : vector<8x128xf32>
    %571 = vector.shape_cast %570 : vector<8x128xf32> to vector<1x8x128xf32>
    %cst_125 = arith.constant dense<0.000000e+00> : vector<1xf32>
    %572 = vector.multi_reduction <add>, %571, %cst_125 [1, 2] : vector<1x8x128xf32> to vector<1xf32>
    %573 = vector.shape_cast %572 : vector<1xf32> to vector<1x1x1xf32>
    %574 = vector.extract %573[0, 0, 0] : f32 from vector<1x1x1xf32>
    %575 = arith.mulf %570, %567 : vector<8x128xf32>
    %576 = vector.shape_cast %575 : vector<8x128xf32> to vector<1x8x128xf32>
    %cst_126 = arith.constant dense<0.000000e+00> : vector<1xf32>
    %577 = vector.multi_reduction <add>, %576, %cst_126 [1, 2] : vector<1x8x128xf32> to vector<1xf32>
    %578 = vector.shape_cast %577 : vector<1xf32> to vector<1x1x1xf32>
    %579 = vector.extract %578[0, 0, 0] : f32 from vector<1x1x1xf32>
    %cst_127 = arith.constant 3.906250e-03 : f32
    %580 = arith.mulf %574, %cst_127 : f32
    %cst_128 = arith.constant 3.906250e-03 : f32
    %581 = arith.mulf %579, %cst_128 : f32
    %582 = arith.mulf %580, %580 : f32
    %583 = arith.subf %581, %582 : f32
    %cst_129 = arith.constant 0.000000e+00 : f32
    %584 = arith.maximumf %583, %cst_129 : f32
    %585 = vector.broadcast %580 : f32 to vector<8x128xf32>
    %586 = arith.subf %567, %585 : vector<8x128xf32>
    %cst_130 = arith.constant 9.99999974E-6 : f32
    %587 = arith.addf %584, %cst_130 : f32
    %588 = math.rsqrt %587 : f32
    %589 = vector.broadcast %588 : f32 to vector<8x128xf32>
    %590 = arith.mulf %586, %589 : vector<8x128xf32>
    %591 = vector.broadcast %568 : f32 to vector<8x128xf32>
    %592 = arith.mulf %591, %590 : vector<8x128xf32>
    %593 = vector.broadcast %569 : f32 to vector<8x128xf32>
    %594 = arith.addf %592, %593 : vector<8x128xf32>
    %cst_131 = arith.constant 0.000000e+00 : f32
    %595 = vector.broadcast %cst_131 : f32 to vector<8x128xf32>
    %596 = arith.cmpf ogt, %594, %595 : vector<8x128xf32>
    %cst_132 = arith.constant 0.000000e+00 : f32
    %597 = vector.broadcast %cst_132 : f32 to vector<8x128xf32>
    %598 = arith.minimumf %594, %597 : vector<8x128xf32>
    %599 = math.exp %598 : vector<8x128xf32>
    %cst_133 = arith.constant 1.000000e+00 : f32
    %600 = vector.broadcast %cst_133 : f32 to vector<8x128xf32>
    %601 = arith.subf %599, %600 : vector<8x128xf32>
    %602 = arith.select %596, %594, %601 : vector<8x128xi1>, vector<8x128xf32>
    %603 = arith.mulf %602, %0 : vector<8x128xf32>
    %604 = arith.mulf %603, %4 : vector<8x128xf32>
    %c10_i32_134 = arith.constant 10 : i32
    %605 = tpu.dynamic_rotate %6 by %c10_i32_134 dim 1 : vector<8x128xf32>, i32 -> vector<8x128xf32>
    %c90 = arith.constant 90 : index
    %606 = memref.load %arg1[%c90] : memref<332xf32, #tpu.memory_space<smem>>
    %607 = vector.broadcast %606 : f32 to vector<8x128xf32>
    %608 = arith.mulf %607, %605 : vector<8x128xf32>
    %c91 = arith.constant 91 : index
    %609 = memref.load %arg1[%c91] : memref<332xf32, #tpu.memory_space<smem>>
    %610 = vector.broadcast %609 : f32 to vector<8x128xf32>
    %611 = arith.mulf %610, %6 : vector<8x128xf32>
    %612 = arith.addf %608, %611 : vector<8x128xf32>
    %c118_i32_135 = arith.constant 118 : i32
    %613 = tpu.dynamic_rotate %6 by %c118_i32_135 dim 1 : vector<8x128xf32>, i32 -> vector<8x128xf32>
    %c92 = arith.constant 92 : index
    %614 = memref.load %arg1[%c92] : memref<332xf32, #tpu.memory_space<smem>>
    %615 = vector.broadcast %614 : f32 to vector<8x128xf32>
    %616 = arith.mulf %615, %613 : vector<8x128xf32>
    %617 = arith.addf %612, %616 : vector<8x128xf32>
    %c93 = arith.constant 93 : index
    %618 = memref.load %arg1[%c93] : memref<332xf32, #tpu.memory_space<smem>>
    %c94 = arith.constant 94 : index
    %619 = memref.load %arg1[%c94] : memref<332xf32, #tpu.memory_space<smem>>
    %620 = arith.mulf %617, %0 : vector<8x128xf32>
    %621 = vector.shape_cast %620 : vector<8x128xf32> to vector<1x8x128xf32>
    %cst_136 = arith.constant dense<0.000000e+00> : vector<1xf32>
    %622 = vector.multi_reduction <add>, %621, %cst_136 [1, 2] : vector<1x8x128xf32> to vector<1xf32>
    %623 = vector.shape_cast %622 : vector<1xf32> to vector<1x1x1xf32>
    %624 = vector.extract %623[0, 0, 0] : f32 from vector<1x1x1xf32>
    %625 = arith.mulf %620, %617 : vector<8x128xf32>
    %626 = vector.shape_cast %625 : vector<8x128xf32> to vector<1x8x128xf32>
    %cst_137 = arith.constant dense<0.000000e+00> : vector<1xf32>
    %627 = vector.multi_reduction <add>, %626, %cst_137 [1, 2] : vector<1x8x128xf32> to vector<1xf32>
    %628 = vector.shape_cast %627 : vector<1xf32> to vector<1x1x1xf32>
    %629 = vector.extract %628[0, 0, 0] : f32 from vector<1x1x1xf32>
    %cst_138 = arith.constant 3.906250e-03 : f32
    %630 = arith.mulf %624, %cst_138 : f32
    %cst_139 = arith.constant 3.906250e-03 : f32
    %631 = arith.mulf %629, %cst_139 : f32
    %632 = arith.mulf %630, %630 : f32
    %633 = arith.subf %631, %632 : f32
    %cst_140 = arith.constant 0.000000e+00 : f32
    %634 = arith.maximumf %633, %cst_140 : f32
    %635 = vector.broadcast %630 : f32 to vector<8x128xf32>
    %636 = arith.subf %617, %635 : vector<8x128xf32>
    %cst_141 = arith.constant 9.99999974E-6 : f32
    %637 = arith.addf %634, %cst_141 : f32
    %638 = math.rsqrt %637 : f32
    %639 = vector.broadcast %638 : f32 to vector<8x128xf32>
    %640 = arith.mulf %636, %639 : vector<8x128xf32>
    %641 = vector.broadcast %618 : f32 to vector<8x128xf32>
    %642 = arith.mulf %641, %640 : vector<8x128xf32>
    %643 = vector.broadcast %619 : f32 to vector<8x128xf32>
    %644 = arith.addf %642, %643 : vector<8x128xf32>
    %cst_142 = arith.constant 0.000000e+00 : f32
    %645 = vector.broadcast %cst_142 : f32 to vector<8x128xf32>
    %646 = arith.cmpf ogt, %644, %645 : vector<8x128xf32>
    %cst_143 = arith.constant 0.000000e+00 : f32
    %647 = vector.broadcast %cst_143 : f32 to vector<8x128xf32>
    %648 = arith.minimumf %644, %647 : vector<8x128xf32>
    %649 = math.exp %648 : vector<8x128xf32>
    %cst_144 = arith.constant 1.000000e+00 : f32
    %650 = vector.broadcast %cst_144 : f32 to vector<8x128xf32>
    %651 = arith.subf %649, %650 : vector<8x128xf32>
    %652 = arith.select %646, %644, %651 : vector<8x128xi1>, vector<8x128xf32>
    %653 = arith.mulf %652, %0 : vector<8x128xf32>
    %c1_i32_145 = arith.constant 1 : i32
    %654 = tpu.dynamic_rotate %653 by %c1_i32_145 dim 1 : vector<8x128xf32>, i32 -> vector<8x128xf32>
    %c95 = arith.constant 95 : index
    %655 = memref.load %arg1[%c95] : memref<332xf32, #tpu.memory_space<smem>>
    %656 = vector.broadcast %655 : f32 to vector<8x128xf32>
    %657 = arith.mulf %656, %654 : vector<8x128xf32>
    %c96 = arith.constant 96 : index
    %658 = memref.load %arg1[%c96] : memref<332xf32, #tpu.memory_space<smem>>
    %659 = vector.broadcast %658 : f32 to vector<8x128xf32>
    %660 = arith.mulf %659, %653 : vector<8x128xf32>
    %661 = arith.addf %657, %660 : vector<8x128xf32>
    %c127_i32_146 = arith.constant 127 : i32
    %662 = tpu.dynamic_rotate %653 by %c127_i32_146 dim 1 : vector<8x128xf32>, i32 -> vector<8x128xf32>
    %c97 = arith.constant 97 : index
    %663 = memref.load %arg1[%c97] : memref<332xf32, #tpu.memory_space<smem>>
    %664 = vector.broadcast %663 : f32 to vector<8x128xf32>
    %665 = arith.mulf %664, %662 : vector<8x128xf32>
    %666 = arith.addf %661, %665 : vector<8x128xf32>
    %c98 = arith.constant 98 : index
    %667 = memref.load %arg1[%c98] : memref<332xf32, #tpu.memory_space<smem>>
    %c99 = arith.constant 99 : index
    %668 = memref.load %arg1[%c99] : memref<332xf32, #tpu.memory_space<smem>>
    %669 = arith.mulf %666, %0 : vector<8x128xf32>
    %670 = vector.shape_cast %669 : vector<8x128xf32> to vector<1x8x128xf32>
    %cst_147 = arith.constant dense<0.000000e+00> : vector<1xf32>
    %671 = vector.multi_reduction <add>, %670, %cst_147 [1, 2] : vector<1x8x128xf32> to vector<1xf32>
    %672 = vector.shape_cast %671 : vector<1xf32> to vector<1x1x1xf32>
    %673 = vector.extract %672[0, 0, 0] : f32 from vector<1x1x1xf32>
    %674 = arith.mulf %669, %666 : vector<8x128xf32>
    %675 = vector.shape_cast %674 : vector<8x128xf32> to vector<1x8x128xf32>
    %cst_148 = arith.constant dense<0.000000e+00> : vector<1xf32>
    %676 = vector.multi_reduction <add>, %675, %cst_148 [1, 2] : vector<1x8x128xf32> to vector<1xf32>
    %677 = vector.shape_cast %676 : vector<1xf32> to vector<1x1x1xf32>
    %678 = vector.extract %677[0, 0, 0] : f32 from vector<1x1x1xf32>
    %cst_149 = arith.constant 3.906250e-03 : f32
    %679 = arith.mulf %673, %cst_149 : f32
    %cst_150 = arith.constant 3.906250e-03 : f32
    %680 = arith.mulf %678, %cst_150 : f32
    %681 = arith.mulf %679, %679 : f32
    %682 = arith.subf %680, %681 : f32
    %cst_151 = arith.constant 0.000000e+00 : f32
    %683 = arith.maximumf %682, %cst_151 : f32
    %684 = vector.broadcast %679 : f32 to vector<8x128xf32>
    %685 = arith.subf %666, %684 : vector<8x128xf32>
    %cst_152 = arith.constant 9.99999974E-6 : f32
    %686 = arith.addf %683, %cst_152 : f32
    %687 = math.rsqrt %686 : f32
    %688 = vector.broadcast %687 : f32 to vector<8x128xf32>
    %689 = arith.mulf %685, %688 : vector<8x128xf32>
    %690 = vector.broadcast %667 : f32 to vector<8x128xf32>
    %691 = arith.mulf %690, %689 : vector<8x128xf32>
    %692 = vector.broadcast %668 : f32 to vector<8x128xf32>
    %693 = arith.addf %691, %692 : vector<8x128xf32>
    %cst_153 = arith.constant 0.000000e+00 : f32
    %694 = vector.broadcast %cst_153 : f32 to vector<8x128xf32>
    %695 = arith.cmpf ogt, %693, %694 : vector<8x128xf32>
    %cst_154 = arith.constant 0.000000e+00 : f32
    %696 = vector.broadcast %cst_154 : f32 to vector<8x128xf32>
    %697 = arith.minimumf %693, %696 : vector<8x128xf32>
    %698 = math.exp %697 : vector<8x128xf32>
    %cst_155 = arith.constant 1.000000e+00 : f32
    %699 = vector.broadcast %cst_155 : f32 to vector<8x128xf32>
    %700 = arith.subf %698, %699 : vector<8x128xf32>
    %701 = arith.select %695, %693, %700 : vector<8x128xi1>, vector<8x128xf32>
    %702 = arith.mulf %701, %0 : vector<8x128xf32>
    %c1_i32_156 = arith.constant 1 : i32
    %703 = tpu.dynamic_rotate %702 by %c1_i32_156 dim 0 : vector<8x128xf32>, i32 -> vector<8x128xf32>
    %c11_i32_157 = arith.constant 11 : i32
    %704 = tpu.dynamic_rotate %703 by %c11_i32_157 dim 1 : vector<8x128xf32>, i32 -> vector<8x128xf32>
    %c100 = arith.constant 100 : index
    %705 = memref.load %arg1[%c100] : memref<332xf32, #tpu.memory_space<smem>>
    %706 = vector.broadcast %705 : f32 to vector<8x128xf32>
    %707 = arith.mulf %706, %704 : vector<8x128xf32>
    %c10_i32_158 = arith.constant 10 : i32
    %708 = tpu.dynamic_rotate %703 by %c10_i32_158 dim 1 : vector<8x128xf32>, i32 -> vector<8x128xf32>
    %c101 = arith.constant 101 : index
    %709 = memref.load %arg1[%c101] : memref<332xf32, #tpu.memory_space<smem>>
    %710 = vector.broadcast %709 : f32 to vector<8x128xf32>
    %711 = arith.mulf %710, %708 : vector<8x128xf32>
    %712 = arith.addf %707, %711 : vector<8x128xf32>
    %c9_i32_159 = arith.constant 9 : i32
    %713 = tpu.dynamic_rotate %703 by %c9_i32_159 dim 1 : vector<8x128xf32>, i32 -> vector<8x128xf32>
    %c102 = arith.constant 102 : index
    %714 = memref.load %arg1[%c102] : memref<332xf32, #tpu.memory_space<smem>>
    %715 = vector.broadcast %714 : f32 to vector<8x128xf32>
    %716 = arith.mulf %715, %713 : vector<8x128xf32>
    %717 = arith.addf %712, %716 : vector<8x128xf32>
    %c1_i32_160 = arith.constant 1 : i32
    %718 = tpu.dynamic_rotate %703 by %c1_i32_160 dim 1 : vector<8x128xf32>, i32 -> vector<8x128xf32>
    %c103 = arith.constant 103 : index
    %719 = memref.load %arg1[%c103] : memref<332xf32, #tpu.memory_space<smem>>
    %720 = vector.broadcast %719 : f32 to vector<8x128xf32>
    %721 = arith.mulf %720, %718 : vector<8x128xf32>
    %722 = arith.addf %717, %721 : vector<8x128xf32>
    %c104 = arith.constant 104 : index
    %723 = memref.load %arg1[%c104] : memref<332xf32, #tpu.memory_space<smem>>
    %724 = vector.broadcast %723 : f32 to vector<8x128xf32>
    %725 = arith.mulf %724, %703 : vector<8x128xf32>
    %726 = arith.addf %722, %725 : vector<8x128xf32>
    %c127_i32_161 = arith.constant 127 : i32
    %727 = tpu.dynamic_rotate %703 by %c127_i32_161 dim 1 : vector<8x128xf32>, i32 -> vector<8x128xf32>
    %c105 = arith.constant 105 : index
    %728 = memref.load %arg1[%c105] : memref<332xf32, #tpu.memory_space<smem>>
    %729 = vector.broadcast %728 : f32 to vector<8x128xf32>
    %730 = arith.mulf %729, %727 : vector<8x128xf32>
    %731 = arith.addf %726, %730 : vector<8x128xf32>
    %c119_i32_162 = arith.constant 119 : i32
    %732 = tpu.dynamic_rotate %703 by %c119_i32_162 dim 1 : vector<8x128xf32>, i32 -> vector<8x128xf32>
    %c106 = arith.constant 106 : index
    %733 = memref.load %arg1[%c106] : memref<332xf32, #tpu.memory_space<smem>>
    %734 = vector.broadcast %733 : f32 to vector<8x128xf32>
    %735 = arith.mulf %734, %732 : vector<8x128xf32>
    %736 = arith.addf %731, %735 : vector<8x128xf32>
    %c118_i32_163 = arith.constant 118 : i32
    %737 = tpu.dynamic_rotate %703 by %c118_i32_163 dim 1 : vector<8x128xf32>, i32 -> vector<8x128xf32>
    %c107 = arith.constant 107 : index
    %738 = memref.load %arg1[%c107] : memref<332xf32, #tpu.memory_space<smem>>
    %739 = vector.broadcast %738 : f32 to vector<8x128xf32>
    %740 = arith.mulf %739, %737 : vector<8x128xf32>
    %741 = arith.addf %736, %740 : vector<8x128xf32>
    %c117_i32_164 = arith.constant 117 : i32
    %742 = tpu.dynamic_rotate %703 by %c117_i32_164 dim 1 : vector<8x128xf32>, i32 -> vector<8x128xf32>
    %c108 = arith.constant 108 : index
    %743 = memref.load %arg1[%c108] : memref<332xf32, #tpu.memory_space<smem>>
    %744 = vector.broadcast %743 : f32 to vector<8x128xf32>
    %745 = arith.mulf %744, %742 : vector<8x128xf32>
    %746 = arith.addf %741, %745 : vector<8x128xf32>
    %c11_i32_165 = arith.constant 11 : i32
    %747 = tpu.dynamic_rotate %702 by %c11_i32_165 dim 1 : vector<8x128xf32>, i32 -> vector<8x128xf32>
    %c109 = arith.constant 109 : index
    %748 = memref.load %arg1[%c109] : memref<332xf32, #tpu.memory_space<smem>>
    %749 = vector.broadcast %748 : f32 to vector<8x128xf32>
    %750 = arith.mulf %749, %747 : vector<8x128xf32>
    %751 = arith.addf %746, %750 : vector<8x128xf32>
    %c10_i32_166 = arith.constant 10 : i32
    %752 = tpu.dynamic_rotate %702 by %c10_i32_166 dim 1 : vector<8x128xf32>, i32 -> vector<8x128xf32>
    %c110 = arith.constant 110 : index
    %753 = memref.load %arg1[%c110] : memref<332xf32, #tpu.memory_space<smem>>
    %754 = vector.broadcast %753 : f32 to vector<8x128xf32>
    %755 = arith.mulf %754, %752 : vector<8x128xf32>
    %756 = arith.addf %751, %755 : vector<8x128xf32>
    %c9_i32_167 = arith.constant 9 : i32
    %757 = tpu.dynamic_rotate %702 by %c9_i32_167 dim 1 : vector<8x128xf32>, i32 -> vector<8x128xf32>
    %c111 = arith.constant 111 : index
    %758 = memref.load %arg1[%c111] : memref<332xf32, #tpu.memory_space<smem>>
    %759 = vector.broadcast %758 : f32 to vector<8x128xf32>
    %760 = arith.mulf %759, %757 : vector<8x128xf32>
    %761 = arith.addf %756, %760 : vector<8x128xf32>
    %c1_i32_168 = arith.constant 1 : i32
    %762 = tpu.dynamic_rotate %702 by %c1_i32_168 dim 1 : vector<8x128xf32>, i32 -> vector<8x128xf32>
    %c112 = arith.constant 112 : index
    %763 = memref.load %arg1[%c112] : memref<332xf32, #tpu.memory_space<smem>>
    %764 = vector.broadcast %763 : f32 to vector<8x128xf32>
    %765 = arith.mulf %764, %762 : vector<8x128xf32>
    %766 = arith.addf %761, %765 : vector<8x128xf32>
    %c113 = arith.constant 113 : index
    %767 = memref.load %arg1[%c113] : memref<332xf32, #tpu.memory_space<smem>>
    %768 = vector.broadcast %767 : f32 to vector<8x128xf32>
    %769 = arith.mulf %768, %702 : vector<8x128xf32>
    %770 = arith.addf %766, %769 : vector<8x128xf32>
    %c127_i32_169 = arith.constant 127 : i32
    %771 = tpu.dynamic_rotate %702 by %c127_i32_169 dim 1 : vector<8x128xf32>, i32 -> vector<8x128xf32>
    %c114 = arith.constant 114 : index
    %772 = memref.load %arg1[%c114] : memref<332xf32, #tpu.memory_space<smem>>
    %773 = vector.broadcast %772 : f32 to vector<8x128xf32>
    %774 = arith.mulf %773, %771 : vector<8x128xf32>
    %775 = arith.addf %770, %774 : vector<8x128xf32>
    %c119_i32_170 = arith.constant 119 : i32
    %776 = tpu.dynamic_rotate %702 by %c119_i32_170 dim 1 : vector<8x128xf32>, i32 -> vector<8x128xf32>
    %c115 = arith.constant 115 : index
    %777 = memref.load %arg1[%c115] : memref<332xf32, #tpu.memory_space<smem>>
    %778 = vector.broadcast %777 : f32 to vector<8x128xf32>
    %779 = arith.mulf %778, %776 : vector<8x128xf32>
    %780 = arith.addf %775, %779 : vector<8x128xf32>
    %c118_i32_171 = arith.constant 118 : i32
    %781 = tpu.dynamic_rotate %702 by %c118_i32_171 dim 1 : vector<8x128xf32>, i32 -> vector<8x128xf32>
    %c116 = arith.constant 116 : index
    %782 = memref.load %arg1[%c116] : memref<332xf32, #tpu.memory_space<smem>>
    %783 = vector.broadcast %782 : f32 to vector<8x128xf32>
    %784 = arith.mulf %783, %781 : vector<8x128xf32>
    %785 = arith.addf %780, %784 : vector<8x128xf32>
    %c117_i32_172 = arith.constant 117 : i32
    %786 = tpu.dynamic_rotate %702 by %c117_i32_172 dim 1 : vector<8x128xf32>, i32 -> vector<8x128xf32>
    %c117 = arith.constant 117 : index
    %787 = memref.load %arg1[%c117] : memref<332xf32, #tpu.memory_space<smem>>
    %788 = vector.broadcast %787 : f32 to vector<8x128xf32>
    %789 = arith.mulf %788, %786 : vector<8x128xf32>
    %790 = arith.addf %785, %789 : vector<8x128xf32>
    %c7_i32_173 = arith.constant 7 : i32
    %791 = tpu.dynamic_rotate %702 by %c7_i32_173 dim 0 : vector<8x128xf32>, i32 -> vector<8x128xf32>
    %c11_i32_174 = arith.constant 11 : i32
    %792 = tpu.dynamic_rotate %791 by %c11_i32_174 dim 1 : vector<8x128xf32>, i32 -> vector<8x128xf32>
    %c118 = arith.constant 118 : index
    %793 = memref.load %arg1[%c118] : memref<332xf32, #tpu.memory_space<smem>>
    %794 = vector.broadcast %793 : f32 to vector<8x128xf32>
    %795 = arith.mulf %794, %792 : vector<8x128xf32>
    %796 = arith.addf %790, %795 : vector<8x128xf32>
    %c10_i32_175 = arith.constant 10 : i32
    %797 = tpu.dynamic_rotate %791 by %c10_i32_175 dim 1 : vector<8x128xf32>, i32 -> vector<8x128xf32>
    %c119 = arith.constant 119 : index
    %798 = memref.load %arg1[%c119] : memref<332xf32, #tpu.memory_space<smem>>
    %799 = vector.broadcast %798 : f32 to vector<8x128xf32>
    %800 = arith.mulf %799, %797 : vector<8x128xf32>
    %801 = arith.addf %796, %800 : vector<8x128xf32>
    %c9_i32_176 = arith.constant 9 : i32
    %802 = tpu.dynamic_rotate %791 by %c9_i32_176 dim 1 : vector<8x128xf32>, i32 -> vector<8x128xf32>
    %c120 = arith.constant 120 : index
    %803 = memref.load %arg1[%c120] : memref<332xf32, #tpu.memory_space<smem>>
    %804 = vector.broadcast %803 : f32 to vector<8x128xf32>
    %805 = arith.mulf %804, %802 : vector<8x128xf32>
    %806 = arith.addf %801, %805 : vector<8x128xf32>
    %c1_i32_177 = arith.constant 1 : i32
    %807 = tpu.dynamic_rotate %791 by %c1_i32_177 dim 1 : vector<8x128xf32>, i32 -> vector<8x128xf32>
    %c121 = arith.constant 121 : index
    %808 = memref.load %arg1[%c121] : memref<332xf32, #tpu.memory_space<smem>>
    %809 = vector.broadcast %808 : f32 to vector<8x128xf32>
    %810 = arith.mulf %809, %807 : vector<8x128xf32>
    %811 = arith.addf %806, %810 : vector<8x128xf32>
    %c122 = arith.constant 122 : index
    %812 = memref.load %arg1[%c122] : memref<332xf32, #tpu.memory_space<smem>>
    %813 = vector.broadcast %812 : f32 to vector<8x128xf32>
    %814 = arith.mulf %813, %791 : vector<8x128xf32>
    %815 = arith.addf %811, %814 : vector<8x128xf32>
    %c127_i32_178 = arith.constant 127 : i32
    %816 = tpu.dynamic_rotate %791 by %c127_i32_178 dim 1 : vector<8x128xf32>, i32 -> vector<8x128xf32>
    %c123 = arith.constant 123 : index
    %817 = memref.load %arg1[%c123] : memref<332xf32, #tpu.memory_space<smem>>
    %818 = vector.broadcast %817 : f32 to vector<8x128xf32>
    %819 = arith.mulf %818, %816 : vector<8x128xf32>
    %820 = arith.addf %815, %819 : vector<8x128xf32>
    %c119_i32_179 = arith.constant 119 : i32
    %821 = tpu.dynamic_rotate %791 by %c119_i32_179 dim 1 : vector<8x128xf32>, i32 -> vector<8x128xf32>
    %c124 = arith.constant 124 : index
    %822 = memref.load %arg1[%c124] : memref<332xf32, #tpu.memory_space<smem>>
    %823 = vector.broadcast %822 : f32 to vector<8x128xf32>
    %824 = arith.mulf %823, %821 : vector<8x128xf32>
    %825 = arith.addf %820, %824 : vector<8x128xf32>
    %c118_i32_180 = arith.constant 118 : i32
    %826 = tpu.dynamic_rotate %791 by %c118_i32_180 dim 1 : vector<8x128xf32>, i32 -> vector<8x128xf32>
    %c125 = arith.constant 125 : index
    %827 = memref.load %arg1[%c125] : memref<332xf32, #tpu.memory_space<smem>>
    %828 = vector.broadcast %827 : f32 to vector<8x128xf32>
    %829 = arith.mulf %828, %826 : vector<8x128xf32>
    %830 = arith.addf %825, %829 : vector<8x128xf32>
    %c117_i32_181 = arith.constant 117 : i32
    %831 = tpu.dynamic_rotate %791 by %c117_i32_181 dim 1 : vector<8x128xf32>, i32 -> vector<8x128xf32>
    %c126 = arith.constant 126 : index
    %832 = memref.load %arg1[%c126] : memref<332xf32, #tpu.memory_space<smem>>
    %833 = vector.broadcast %832 : f32 to vector<8x128xf32>
    %834 = arith.mulf %833, %831 : vector<8x128xf32>
    %835 = arith.addf %830, %834 : vector<8x128xf32>
    %c127 = arith.constant 127 : index
    %836 = memref.load %arg1[%c127] : memref<332xf32, #tpu.memory_space<smem>>
    %c128 = arith.constant 128 : index
    %837 = memref.load %arg1[%c128] : memref<332xf32, #tpu.memory_space<smem>>
    %838 = arith.mulf %835, %0 : vector<8x128xf32>
    %839 = vector.shape_cast %838 : vector<8x128xf32> to vector<1x8x128xf32>
    %cst_182 = arith.constant dense<0.000000e+00> : vector<1xf32>
    %840 = vector.multi_reduction <add>, %839, %cst_182 [1, 2] : vector<1x8x128xf32> to vector<1xf32>
    %841 = vector.shape_cast %840 : vector<1xf32> to vector<1x1x1xf32>
    %842 = vector.extract %841[0, 0, 0] : f32 from vector<1x1x1xf32>
    %843 = arith.mulf %838, %835 : vector<8x128xf32>
    %844 = vector.shape_cast %843 : vector<8x128xf32> to vector<1x8x128xf32>
    %cst_183 = arith.constant dense<0.000000e+00> : vector<1xf32>
    %845 = vector.multi_reduction <add>, %844, %cst_183 [1, 2] : vector<1x8x128xf32> to vector<1xf32>
    %846 = vector.shape_cast %845 : vector<1xf32> to vector<1x1x1xf32>
    %847 = vector.extract %846[0, 0, 0] : f32 from vector<1x1x1xf32>
    %cst_184 = arith.constant 3.906250e-03 : f32
    %848 = arith.mulf %842, %cst_184 : f32
    %cst_185 = arith.constant 3.906250e-03 : f32
    %849 = arith.mulf %847, %cst_185 : f32
    %850 = arith.mulf %848, %848 : f32
    %851 = arith.subf %849, %850 : f32
    %cst_186 = arith.constant 0.000000e+00 : f32
    %852 = arith.maximumf %851, %cst_186 : f32
    %853 = vector.broadcast %848 : f32 to vector<8x128xf32>
    %854 = arith.subf %835, %853 : vector<8x128xf32>
    %cst_187 = arith.constant 9.99999974E-6 : f32
    %855 = arith.addf %852, %cst_187 : f32
    %856 = math.rsqrt %855 : f32
    %857 = vector.broadcast %856 : f32 to vector<8x128xf32>
    %858 = arith.mulf %854, %857 : vector<8x128xf32>
    %859 = vector.broadcast %836 : f32 to vector<8x128xf32>
    %860 = arith.mulf %859, %858 : vector<8x128xf32>
    %861 = vector.broadcast %837 : f32 to vector<8x128xf32>
    %862 = arith.addf %860, %861 : vector<8x128xf32>
    %cst_188 = arith.constant 0.000000e+00 : f32
    %863 = vector.broadcast %cst_188 : f32 to vector<8x128xf32>
    %864 = arith.cmpf ogt, %862, %863 : vector<8x128xf32>
    %cst_189 = arith.constant 0.000000e+00 : f32
    %865 = vector.broadcast %cst_189 : f32 to vector<8x128xf32>
    %866 = arith.minimumf %862, %865 : vector<8x128xf32>
    %867 = math.exp %866 : vector<8x128xf32>
    %cst_190 = arith.constant 1.000000e+00 : f32
    %868 = vector.broadcast %cst_190 : f32 to vector<8x128xf32>
    %869 = arith.subf %867, %868 : vector<8x128xf32>
    %870 = arith.select %864, %862, %869 : vector<8x128xi1>, vector<8x128xf32>
    %871 = arith.mulf %870, %0 : vector<8x128xf32>
    %872 = arith.addf %871, %6 : vector<8x128xf32>
    %c1_i32_191 = arith.constant 1 : i32
    %873 = tpu.dynamic_rotate %8 by %c1_i32_191 dim 0 : vector<8x128xf32>, i32 -> vector<8x128xf32>
    %c10_i32_192 = arith.constant 10 : i32
    %874 = tpu.dynamic_rotate %873 by %c10_i32_192 dim 1 : vector<8x128xf32>, i32 -> vector<8x128xf32>
    %c129 = arith.constant 129 : index
    %875 = memref.load %arg1[%c129] : memref<332xf32, #tpu.memory_space<smem>>
    %876 = vector.broadcast %875 : f32 to vector<8x128xf32>
    %877 = arith.mulf %876, %874 : vector<8x128xf32>
    %c130 = arith.constant 130 : index
    %878 = memref.load %arg1[%c130] : memref<332xf32, #tpu.memory_space<smem>>
    %879 = vector.broadcast %878 : f32 to vector<8x128xf32>
    %880 = arith.mulf %879, %873 : vector<8x128xf32>
    %881 = arith.addf %877, %880 : vector<8x128xf32>
    %c118_i32_193 = arith.constant 118 : i32
    %882 = tpu.dynamic_rotate %873 by %c118_i32_193 dim 1 : vector<8x128xf32>, i32 -> vector<8x128xf32>
    %c131 = arith.constant 131 : index
    %883 = memref.load %arg1[%c131] : memref<332xf32, #tpu.memory_space<smem>>
    %884 = vector.broadcast %883 : f32 to vector<8x128xf32>
    %885 = arith.mulf %884, %882 : vector<8x128xf32>
    %886 = arith.addf %881, %885 : vector<8x128xf32>
    %c10_i32_194 = arith.constant 10 : i32
    %887 = tpu.dynamic_rotate %8 by %c10_i32_194 dim 1 : vector<8x128xf32>, i32 -> vector<8x128xf32>
    %c132 = arith.constant 132 : index
    %888 = memref.load %arg1[%c132] : memref<332xf32, #tpu.memory_space<smem>>
    %889 = vector.broadcast %888 : f32 to vector<8x128xf32>
    %890 = arith.mulf %889, %887 : vector<8x128xf32>
    %891 = arith.addf %886, %890 : vector<8x128xf32>
    %c133 = arith.constant 133 : index
    %892 = memref.load %arg1[%c133] : memref<332xf32, #tpu.memory_space<smem>>
    %893 = vector.broadcast %892 : f32 to vector<8x128xf32>
    %894 = arith.mulf %893, %8 : vector<8x128xf32>
    %895 = arith.addf %891, %894 : vector<8x128xf32>
    %c118_i32_195 = arith.constant 118 : i32
    %896 = tpu.dynamic_rotate %8 by %c118_i32_195 dim 1 : vector<8x128xf32>, i32 -> vector<8x128xf32>
    %c134 = arith.constant 134 : index
    %897 = memref.load %arg1[%c134] : memref<332xf32, #tpu.memory_space<smem>>
    %898 = vector.broadcast %897 : f32 to vector<8x128xf32>
    %899 = arith.mulf %898, %896 : vector<8x128xf32>
    %900 = arith.addf %895, %899 : vector<8x128xf32>
    %c7_i32_196 = arith.constant 7 : i32
    %901 = tpu.dynamic_rotate %8 by %c7_i32_196 dim 0 : vector<8x128xf32>, i32 -> vector<8x128xf32>
    %c10_i32_197 = arith.constant 10 : i32
    %902 = tpu.dynamic_rotate %901 by %c10_i32_197 dim 1 : vector<8x128xf32>, i32 -> vector<8x128xf32>
    %c135 = arith.constant 135 : index
    %903 = memref.load %arg1[%c135] : memref<332xf32, #tpu.memory_space<smem>>
    %904 = vector.broadcast %903 : f32 to vector<8x128xf32>
    %905 = arith.mulf %904, %902 : vector<8x128xf32>
    %906 = arith.addf %900, %905 : vector<8x128xf32>
    %c136 = arith.constant 136 : index
    %907 = memref.load %arg1[%c136] : memref<332xf32, #tpu.memory_space<smem>>
    %908 = vector.broadcast %907 : f32 to vector<8x128xf32>
    %909 = arith.mulf %908, %901 : vector<8x128xf32>
    %910 = arith.addf %906, %909 : vector<8x128xf32>
    %c118_i32_198 = arith.constant 118 : i32
    %911 = tpu.dynamic_rotate %901 by %c118_i32_198 dim 1 : vector<8x128xf32>, i32 -> vector<8x128xf32>
    %c137 = arith.constant 137 : index
    %912 = memref.load %arg1[%c137] : memref<332xf32, #tpu.memory_space<smem>>
    %913 = vector.broadcast %912 : f32 to vector<8x128xf32>
    %914 = arith.mulf %913, %911 : vector<8x128xf32>
    %915 = arith.addf %910, %914 : vector<8x128xf32>
    %c138 = arith.constant 138 : index
    %916 = memref.load %arg1[%c138] : memref<332xf32, #tpu.memory_space<smem>>
    %c139 = arith.constant 139 : index
    %917 = memref.load %arg1[%c139] : memref<332xf32, #tpu.memory_space<smem>>
    %918 = arith.mulf %915, %0 : vector<8x128xf32>
    %919 = vector.shape_cast %918 : vector<8x128xf32> to vector<1x8x128xf32>
    %cst_199 = arith.constant dense<0.000000e+00> : vector<1xf32>
    %920 = vector.multi_reduction <add>, %919, %cst_199 [1, 2] : vector<1x8x128xf32> to vector<1xf32>
    %921 = vector.shape_cast %920 : vector<1xf32> to vector<1x1x1xf32>
    %922 = vector.extract %921[0, 0, 0] : f32 from vector<1x1x1xf32>
    %923 = arith.mulf %918, %915 : vector<8x128xf32>
    %924 = vector.shape_cast %923 : vector<8x128xf32> to vector<1x8x128xf32>
    %cst_200 = arith.constant dense<0.000000e+00> : vector<1xf32>
    %925 = vector.multi_reduction <add>, %924, %cst_200 [1, 2] : vector<1x8x128xf32> to vector<1xf32>
    %926 = vector.shape_cast %925 : vector<1xf32> to vector<1x1x1xf32>
    %927 = vector.extract %926[0, 0, 0] : f32 from vector<1x1x1xf32>
    %cst_201 = arith.constant 3.906250e-03 : f32
    %928 = arith.mulf %922, %cst_201 : f32
    %cst_202 = arith.constant 3.906250e-03 : f32
    %929 = arith.mulf %927, %cst_202 : f32
    %930 = arith.mulf %928, %928 : f32
    %931 = arith.subf %929, %930 : f32
    %cst_203 = arith.constant 0.000000e+00 : f32
    %932 = arith.maximumf %931, %cst_203 : f32
    %933 = vector.broadcast %928 : f32 to vector<8x128xf32>
    %934 = arith.subf %915, %933 : vector<8x128xf32>
    %cst_204 = arith.constant 9.99999974E-6 : f32
    %935 = arith.addf %932, %cst_204 : f32
    %936 = math.rsqrt %935 : f32
    %937 = vector.broadcast %936 : f32 to vector<8x128xf32>
    %938 = arith.mulf %934, %937 : vector<8x128xf32>
    %939 = vector.broadcast %916 : f32 to vector<8x128xf32>
    %940 = arith.mulf %939, %938 : vector<8x128xf32>
    %941 = vector.broadcast %917 : f32 to vector<8x128xf32>
    %942 = arith.addf %940, %941 : vector<8x128xf32>
    %cst_205 = arith.constant 0.000000e+00 : f32
    %943 = vector.broadcast %cst_205 : f32 to vector<8x128xf32>
    %944 = arith.cmpf ogt, %942, %943 : vector<8x128xf32>
    %cst_206 = arith.constant 0.000000e+00 : f32
    %945 = vector.broadcast %cst_206 : f32 to vector<8x128xf32>
    %946 = arith.minimumf %942, %945 : vector<8x128xf32>
    %947 = math.exp %946 : vector<8x128xf32>
    %cst_207 = arith.constant 1.000000e+00 : f32
    %948 = vector.broadcast %cst_207 : f32 to vector<8x128xf32>
    %949 = arith.subf %947, %948 : vector<8x128xf32>
    %950 = arith.select %944, %942, %949 : vector<8x128xi1>, vector<8x128xf32>
    %951 = arith.mulf %950, %0 : vector<8x128xf32>
    %c11_i32_208 = arith.constant 11 : i32
    %952 = tpu.dynamic_rotate %951 by %c11_i32_208 dim 1 : vector<8x128xf32>, i32 -> vector<8x128xf32>
    %c140 = arith.constant 140 : index
    %953 = memref.load %arg1[%c140] : memref<332xf32, #tpu.memory_space<smem>>
    %954 = vector.broadcast %953 : f32 to vector<8x128xf32>
    %955 = arith.mulf %954, %952 : vector<8x128xf32>
    %c10_i32_209 = arith.constant 10 : i32
    %956 = tpu.dynamic_rotate %951 by %c10_i32_209 dim 1 : vector<8x128xf32>, i32 -> vector<8x128xf32>
    %c141 = arith.constant 141 : index
    %957 = memref.load %arg1[%c141] : memref<332xf32, #tpu.memory_space<smem>>
    %958 = vector.broadcast %957 : f32 to vector<8x128xf32>
    %959 = arith.mulf %958, %956 : vector<8x128xf32>
    %960 = arith.addf %955, %959 : vector<8x128xf32>
    %c9_i32_210 = arith.constant 9 : i32
    %961 = tpu.dynamic_rotate %951 by %c9_i32_210 dim 1 : vector<8x128xf32>, i32 -> vector<8x128xf32>
    %c142 = arith.constant 142 : index
    %962 = memref.load %arg1[%c142] : memref<332xf32, #tpu.memory_space<smem>>
    %963 = vector.broadcast %962 : f32 to vector<8x128xf32>
    %964 = arith.mulf %963, %961 : vector<8x128xf32>
    %965 = arith.addf %960, %964 : vector<8x128xf32>
    %c1_i32_211 = arith.constant 1 : i32
    %966 = tpu.dynamic_rotate %951 by %c1_i32_211 dim 1 : vector<8x128xf32>, i32 -> vector<8x128xf32>
    %c143 = arith.constant 143 : index
    %967 = memref.load %arg1[%c143] : memref<332xf32, #tpu.memory_space<smem>>
    %968 = vector.broadcast %967 : f32 to vector<8x128xf32>
    %969 = arith.mulf %968, %966 : vector<8x128xf32>
    %970 = arith.addf %965, %969 : vector<8x128xf32>
    %c144 = arith.constant 144 : index
    %971 = memref.load %arg1[%c144] : memref<332xf32, #tpu.memory_space<smem>>
    %972 = vector.broadcast %971 : f32 to vector<8x128xf32>
    %973 = arith.mulf %972, %951 : vector<8x128xf32>
    %974 = arith.addf %970, %973 : vector<8x128xf32>
    %c127_i32_212 = arith.constant 127 : i32
    %975 = tpu.dynamic_rotate %951 by %c127_i32_212 dim 1 : vector<8x128xf32>, i32 -> vector<8x128xf32>
    %c145 = arith.constant 145 : index
    %976 = memref.load %arg1[%c145] : memref<332xf32, #tpu.memory_space<smem>>
    %977 = vector.broadcast %976 : f32 to vector<8x128xf32>
    %978 = arith.mulf %977, %975 : vector<8x128xf32>
    %979 = arith.addf %974, %978 : vector<8x128xf32>
    %c119_i32_213 = arith.constant 119 : i32
    %980 = tpu.dynamic_rotate %951 by %c119_i32_213 dim 1 : vector<8x128xf32>, i32 -> vector<8x128xf32>
    %c146 = arith.constant 146 : index
    %981 = memref.load %arg1[%c146] : memref<332xf32, #tpu.memory_space<smem>>
    %982 = vector.broadcast %981 : f32 to vector<8x128xf32>
    %983 = arith.mulf %982, %980 : vector<8x128xf32>
    %984 = arith.addf %979, %983 : vector<8x128xf32>
    %c118_i32_214 = arith.constant 118 : i32
    %985 = tpu.dynamic_rotate %951 by %c118_i32_214 dim 1 : vector<8x128xf32>, i32 -> vector<8x128xf32>
    %c147 = arith.constant 147 : index
    %986 = memref.load %arg1[%c147] : memref<332xf32, #tpu.memory_space<smem>>
    %987 = vector.broadcast %986 : f32 to vector<8x128xf32>
    %988 = arith.mulf %987, %985 : vector<8x128xf32>
    %989 = arith.addf %984, %988 : vector<8x128xf32>
    %c117_i32_215 = arith.constant 117 : i32
    %990 = tpu.dynamic_rotate %951 by %c117_i32_215 dim 1 : vector<8x128xf32>, i32 -> vector<8x128xf32>
    %c148 = arith.constant 148 : index
    %991 = memref.load %arg1[%c148] : memref<332xf32, #tpu.memory_space<smem>>
    %992 = vector.broadcast %991 : f32 to vector<8x128xf32>
    %993 = arith.mulf %992, %990 : vector<8x128xf32>
    %994 = arith.addf %989, %993 : vector<8x128xf32>
    %c149 = arith.constant 149 : index
    %995 = memref.load %arg1[%c149] : memref<332xf32, #tpu.memory_space<smem>>
    %c150 = arith.constant 150 : index
    %996 = memref.load %arg1[%c150] : memref<332xf32, #tpu.memory_space<smem>>
    %997 = arith.mulf %994, %0 : vector<8x128xf32>
    %998 = vector.shape_cast %997 : vector<8x128xf32> to vector<1x8x128xf32>
    %cst_216 = arith.constant dense<0.000000e+00> : vector<1xf32>
    %999 = vector.multi_reduction <add>, %998, %cst_216 [1, 2] : vector<1x8x128xf32> to vector<1xf32>
    %1000 = vector.shape_cast %999 : vector<1xf32> to vector<1x1x1xf32>
    %1001 = vector.extract %1000[0, 0, 0] : f32 from vector<1x1x1xf32>
    %1002 = arith.mulf %997, %994 : vector<8x128xf32>
    %1003 = vector.shape_cast %1002 : vector<8x128xf32> to vector<1x8x128xf32>
    %cst_217 = arith.constant dense<0.000000e+00> : vector<1xf32>
    %1004 = vector.multi_reduction <add>, %1003, %cst_217 [1, 2] : vector<1x8x128xf32> to vector<1xf32>
    %1005 = vector.shape_cast %1004 : vector<1xf32> to vector<1x1x1xf32>
    %1006 = vector.extract %1005[0, 0, 0] : f32 from vector<1x1x1xf32>
    %cst_218 = arith.constant 3.906250e-03 : f32
    %1007 = arith.mulf %1001, %cst_218 : f32
    %cst_219 = arith.constant 3.906250e-03 : f32
    %1008 = arith.mulf %1006, %cst_219 : f32
    %1009 = arith.mulf %1007, %1007 : f32
    %1010 = arith.subf %1008, %1009 : f32
    %cst_220 = arith.constant 0.000000e+00 : f32
    %1011 = arith.maximumf %1010, %cst_220 : f32
    %1012 = vector.broadcast %1007 : f32 to vector<8x128xf32>
    %1013 = arith.subf %994, %1012 : vector<8x128xf32>
    %cst_221 = arith.constant 9.99999974E-6 : f32
    %1014 = arith.addf %1011, %cst_221 : f32
    %1015 = math.rsqrt %1014 : f32
    %1016 = vector.broadcast %1015 : f32 to vector<8x128xf32>
    %1017 = arith.mulf %1013, %1016 : vector<8x128xf32>
    %1018 = vector.broadcast %995 : f32 to vector<8x128xf32>
    %1019 = arith.mulf %1018, %1017 : vector<8x128xf32>
    %1020 = vector.broadcast %996 : f32 to vector<8x128xf32>
    %1021 = arith.addf %1019, %1020 : vector<8x128xf32>
    %cst_222 = arith.constant 0.000000e+00 : f32
    %1022 = vector.broadcast %cst_222 : f32 to vector<8x128xf32>
    %1023 = arith.cmpf ogt, %1021, %1022 : vector<8x128xf32>
    %cst_223 = arith.constant 0.000000e+00 : f32
    %1024 = vector.broadcast %cst_223 : f32 to vector<8x128xf32>
    %1025 = arith.minimumf %1021, %1024 : vector<8x128xf32>
    %1026 = math.exp %1025 : vector<8x128xf32>
    %cst_224 = arith.constant 1.000000e+00 : f32
    %1027 = vector.broadcast %cst_224 : f32 to vector<8x128xf32>
    %1028 = arith.subf %1026, %1027 : vector<8x128xf32>
    %1029 = arith.select %1023, %1021, %1028 : vector<8x128xi1>, vector<8x128xf32>
    %1030 = arith.mulf %1029, %0 : vector<8x128xf32>
    %c1_i32_225 = arith.constant 1 : i32
    %1031 = tpu.dynamic_rotate %1030 by %c1_i32_225 dim 0 : vector<8x128xf32>, i32 -> vector<8x128xf32>
    %c11_i32_226 = arith.constant 11 : i32
    %1032 = tpu.dynamic_rotate %1031 by %c11_i32_226 dim 1 : vector<8x128xf32>, i32 -> vector<8x128xf32>
    %c151 = arith.constant 151 : index
    %1033 = memref.load %arg1[%c151] : memref<332xf32, #tpu.memory_space<smem>>
    %1034 = vector.broadcast %1033 : f32 to vector<8x128xf32>
    %1035 = arith.mulf %1034, %1032 : vector<8x128xf32>
    %c10_i32_227 = arith.constant 10 : i32
    %1036 = tpu.dynamic_rotate %1031 by %c10_i32_227 dim 1 : vector<8x128xf32>, i32 -> vector<8x128xf32>
    %c152 = arith.constant 152 : index
    %1037 = memref.load %arg1[%c152] : memref<332xf32, #tpu.memory_space<smem>>
    %1038 = vector.broadcast %1037 : f32 to vector<8x128xf32>
    %1039 = arith.mulf %1038, %1036 : vector<8x128xf32>
    %1040 = arith.addf %1035, %1039 : vector<8x128xf32>
    %c9_i32_228 = arith.constant 9 : i32
    %1041 = tpu.dynamic_rotate %1031 by %c9_i32_228 dim 1 : vector<8x128xf32>, i32 -> vector<8x128xf32>
    %c153 = arith.constant 153 : index
    %1042 = memref.load %arg1[%c153] : memref<332xf32, #tpu.memory_space<smem>>
    %1043 = vector.broadcast %1042 : f32 to vector<8x128xf32>
    %1044 = arith.mulf %1043, %1041 : vector<8x128xf32>
    %1045 = arith.addf %1040, %1044 : vector<8x128xf32>
    %c1_i32_229 = arith.constant 1 : i32
    %1046 = tpu.dynamic_rotate %1031 by %c1_i32_229 dim 1 : vector<8x128xf32>, i32 -> vector<8x128xf32>
    %c154 = arith.constant 154 : index
    %1047 = memref.load %arg1[%c154] : memref<332xf32, #tpu.memory_space<smem>>
    %1048 = vector.broadcast %1047 : f32 to vector<8x128xf32>
    %1049 = arith.mulf %1048, %1046 : vector<8x128xf32>
    %1050 = arith.addf %1045, %1049 : vector<8x128xf32>
    %c155 = arith.constant 155 : index
    %1051 = memref.load %arg1[%c155] : memref<332xf32, #tpu.memory_space<smem>>
    %1052 = vector.broadcast %1051 : f32 to vector<8x128xf32>
    %1053 = arith.mulf %1052, %1031 : vector<8x128xf32>
    %1054 = arith.addf %1050, %1053 : vector<8x128xf32>
    %c127_i32_230 = arith.constant 127 : i32
    %1055 = tpu.dynamic_rotate %1031 by %c127_i32_230 dim 1 : vector<8x128xf32>, i32 -> vector<8x128xf32>
    %c156 = arith.constant 156 : index
    %1056 = memref.load %arg1[%c156] : memref<332xf32, #tpu.memory_space<smem>>
    %1057 = vector.broadcast %1056 : f32 to vector<8x128xf32>
    %1058 = arith.mulf %1057, %1055 : vector<8x128xf32>
    %1059 = arith.addf %1054, %1058 : vector<8x128xf32>
    %c119_i32_231 = arith.constant 119 : i32
    %1060 = tpu.dynamic_rotate %1031 by %c119_i32_231 dim 1 : vector<8x128xf32>, i32 -> vector<8x128xf32>
    %c157 = arith.constant 157 : index
    %1061 = memref.load %arg1[%c157] : memref<332xf32, #tpu.memory_space<smem>>
    %1062 = vector.broadcast %1061 : f32 to vector<8x128xf32>
    %1063 = arith.mulf %1062, %1060 : vector<8x128xf32>
    %1064 = arith.addf %1059, %1063 : vector<8x128xf32>
    %c118_i32_232 = arith.constant 118 : i32
    %1065 = tpu.dynamic_rotate %1031 by %c118_i32_232 dim 1 : vector<8x128xf32>, i32 -> vector<8x128xf32>
    %c158 = arith.constant 158 : index
    %1066 = memref.load %arg1[%c158] : memref<332xf32, #tpu.memory_space<smem>>
    %1067 = vector.broadcast %1066 : f32 to vector<8x128xf32>
    %1068 = arith.mulf %1067, %1065 : vector<8x128xf32>
    %1069 = arith.addf %1064, %1068 : vector<8x128xf32>
    %c117_i32_233 = arith.constant 117 : i32
    %1070 = tpu.dynamic_rotate %1031 by %c117_i32_233 dim 1 : vector<8x128xf32>, i32 -> vector<8x128xf32>
    %c159 = arith.constant 159 : index
    %1071 = memref.load %arg1[%c159] : memref<332xf32, #tpu.memory_space<smem>>
    %1072 = vector.broadcast %1071 : f32 to vector<8x128xf32>
    %1073 = arith.mulf %1072, %1070 : vector<8x128xf32>
    %1074 = arith.addf %1069, %1073 : vector<8x128xf32>
    %c11_i32_234 = arith.constant 11 : i32
    %1075 = tpu.dynamic_rotate %1030 by %c11_i32_234 dim 1 : vector<8x128xf32>, i32 -> vector<8x128xf32>
    %c160 = arith.constant 160 : index
    %1076 = memref.load %arg1[%c160] : memref<332xf32, #tpu.memory_space<smem>>
    %1077 = vector.broadcast %1076 : f32 to vector<8x128xf32>
    %1078 = arith.mulf %1077, %1075 : vector<8x128xf32>
    %1079 = arith.addf %1074, %1078 : vector<8x128xf32>
    %c10_i32_235 = arith.constant 10 : i32
    %1080 = tpu.dynamic_rotate %1030 by %c10_i32_235 dim 1 : vector<8x128xf32>, i32 -> vector<8x128xf32>
    %c161 = arith.constant 161 : index
    %1081 = memref.load %arg1[%c161] : memref<332xf32, #tpu.memory_space<smem>>
    %1082 = vector.broadcast %1081 : f32 to vector<8x128xf32>
    %1083 = arith.mulf %1082, %1080 : vector<8x128xf32>
    %1084 = arith.addf %1079, %1083 : vector<8x128xf32>
    %c9_i32_236 = arith.constant 9 : i32
    %1085 = tpu.dynamic_rotate %1030 by %c9_i32_236 dim 1 : vector<8x128xf32>, i32 -> vector<8x128xf32>
    %c162 = arith.constant 162 : index
    %1086 = memref.load %arg1[%c162] : memref<332xf32, #tpu.memory_space<smem>>
    %1087 = vector.broadcast %1086 : f32 to vector<8x128xf32>
    %1088 = arith.mulf %1087, %1085 : vector<8x128xf32>
    %1089 = arith.addf %1084, %1088 : vector<8x128xf32>
    %c1_i32_237 = arith.constant 1 : i32
    %1090 = tpu.dynamic_rotate %1030 by %c1_i32_237 dim 1 : vector<8x128xf32>, i32 -> vector<8x128xf32>
    %c163 = arith.constant 163 : index
    %1091 = memref.load %arg1[%c163] : memref<332xf32, #tpu.memory_space<smem>>
    %1092 = vector.broadcast %1091 : f32 to vector<8x128xf32>
    %1093 = arith.mulf %1092, %1090 : vector<8x128xf32>
    %1094 = arith.addf %1089, %1093 : vector<8x128xf32>
    %c164 = arith.constant 164 : index
    %1095 = memref.load %arg1[%c164] : memref<332xf32, #tpu.memory_space<smem>>
    %1096 = vector.broadcast %1095 : f32 to vector<8x128xf32>
    %1097 = arith.mulf %1096, %1030 : vector<8x128xf32>
    %1098 = arith.addf %1094, %1097 : vector<8x128xf32>
    %c127_i32_238 = arith.constant 127 : i32
    %1099 = tpu.dynamic_rotate %1030 by %c127_i32_238 dim 1 : vector<8x128xf32>, i32 -> vector<8x128xf32>
    %c165 = arith.constant 165 : index
    %1100 = memref.load %arg1[%c165] : memref<332xf32, #tpu.memory_space<smem>>
    %1101 = vector.broadcast %1100 : f32 to vector<8x128xf32>
    %1102 = arith.mulf %1101, %1099 : vector<8x128xf32>
    %1103 = arith.addf %1098, %1102 : vector<8x128xf32>
    %c119_i32_239 = arith.constant 119 : i32
    %1104 = tpu.dynamic_rotate %1030 by %c119_i32_239 dim 1 : vector<8x128xf32>, i32 -> vector<8x128xf32>
    %c166 = arith.constant 166 : index
    %1105 = memref.load %arg1[%c166] : memref<332xf32, #tpu.memory_space<smem>>
    %1106 = vector.broadcast %1105 : f32 to vector<8x128xf32>
    %1107 = arith.mulf %1106, %1104 : vector<8x128xf32>
    %1108 = arith.addf %1103, %1107 : vector<8x128xf32>
    %c118_i32_240 = arith.constant 118 : i32
    %1109 = tpu.dynamic_rotate %1030 by %c118_i32_240 dim 1 : vector<8x128xf32>, i32 -> vector<8x128xf32>
    %c167 = arith.constant 167 : index
    %1110 = memref.load %arg1[%c167] : memref<332xf32, #tpu.memory_space<smem>>
    %1111 = vector.broadcast %1110 : f32 to vector<8x128xf32>
    %1112 = arith.mulf %1111, %1109 : vector<8x128xf32>
    %1113 = arith.addf %1108, %1112 : vector<8x128xf32>
    %c117_i32_241 = arith.constant 117 : i32
    %1114 = tpu.dynamic_rotate %1030 by %c117_i32_241 dim 1 : vector<8x128xf32>, i32 -> vector<8x128xf32>
    %c168 = arith.constant 168 : index
    %1115 = memref.load %arg1[%c168] : memref<332xf32, #tpu.memory_space<smem>>
    %1116 = vector.broadcast %1115 : f32 to vector<8x128xf32>
    %1117 = arith.mulf %1116, %1114 : vector<8x128xf32>
    %1118 = arith.addf %1113, %1117 : vector<8x128xf32>
    %c7_i32_242 = arith.constant 7 : i32
    %1119 = tpu.dynamic_rotate %1030 by %c7_i32_242 dim 0 : vector<8x128xf32>, i32 -> vector<8x128xf32>
    %c11_i32_243 = arith.constant 11 : i32
    %1120 = tpu.dynamic_rotate %1119 by %c11_i32_243 dim 1 : vector<8x128xf32>, i32 -> vector<8x128xf32>
    %c169 = arith.constant 169 : index
    %1121 = memref.load %arg1[%c169] : memref<332xf32, #tpu.memory_space<smem>>
    %1122 = vector.broadcast %1121 : f32 to vector<8x128xf32>
    %1123 = arith.mulf %1122, %1120 : vector<8x128xf32>
    %1124 = arith.addf %1118, %1123 : vector<8x128xf32>
    %c10_i32_244 = arith.constant 10 : i32
    %1125 = tpu.dynamic_rotate %1119 by %c10_i32_244 dim 1 : vector<8x128xf32>, i32 -> vector<8x128xf32>
    %c170 = arith.constant 170 : index
    %1126 = memref.load %arg1[%c170] : memref<332xf32, #tpu.memory_space<smem>>
    %1127 = vector.broadcast %1126 : f32 to vector<8x128xf32>
    %1128 = arith.mulf %1127, %1125 : vector<8x128xf32>
    %1129 = arith.addf %1124, %1128 : vector<8x128xf32>
    %c9_i32_245 = arith.constant 9 : i32
    %1130 = tpu.dynamic_rotate %1119 by %c9_i32_245 dim 1 : vector<8x128xf32>, i32 -> vector<8x128xf32>
    %c171 = arith.constant 171 : index
    %1131 = memref.load %arg1[%c171] : memref<332xf32, #tpu.memory_space<smem>>
    %1132 = vector.broadcast %1131 : f32 to vector<8x128xf32>
    %1133 = arith.mulf %1132, %1130 : vector<8x128xf32>
    %1134 = arith.addf %1129, %1133 : vector<8x128xf32>
    %c1_i32_246 = arith.constant 1 : i32
    %1135 = tpu.dynamic_rotate %1119 by %c1_i32_246 dim 1 : vector<8x128xf32>, i32 -> vector<8x128xf32>
    %c172 = arith.constant 172 : index
    %1136 = memref.load %arg1[%c172] : memref<332xf32, #tpu.memory_space<smem>>
    %1137 = vector.broadcast %1136 : f32 to vector<8x128xf32>
    %1138 = arith.mulf %1137, %1135 : vector<8x128xf32>
    %1139 = arith.addf %1134, %1138 : vector<8x128xf32>
    %c173 = arith.constant 173 : index
    %1140 = memref.load %arg1[%c173] : memref<332xf32, #tpu.memory_space<smem>>
    %1141 = vector.broadcast %1140 : f32 to vector<8x128xf32>
    %1142 = arith.mulf %1141, %1119 : vector<8x128xf32>
    %1143 = arith.addf %1139, %1142 : vector<8x128xf32>
    %c127_i32_247 = arith.constant 127 : i32
    %1144 = tpu.dynamic_rotate %1119 by %c127_i32_247 dim 1 : vector<8x128xf32>, i32 -> vector<8x128xf32>
    %c174 = arith.constant 174 : index
    %1145 = memref.load %arg1[%c174] : memref<332xf32, #tpu.memory_space<smem>>
    %1146 = vector.broadcast %1145 : f32 to vector<8x128xf32>
    %1147 = arith.mulf %1146, %1144 : vector<8x128xf32>
    %1148 = arith.addf %1143, %1147 : vector<8x128xf32>
    %c119_i32_248 = arith.constant 119 : i32
    %1149 = tpu.dynamic_rotate %1119 by %c119_i32_248 dim 1 : vector<8x128xf32>, i32 -> vector<8x128xf32>
    %c175 = arith.constant 175 : index
    %1150 = memref.load %arg1[%c175] : memref<332xf32, #tpu.memory_space<smem>>
    %1151 = vector.broadcast %1150 : f32 to vector<8x128xf32>
    %1152 = arith.mulf %1151, %1149 : vector<8x128xf32>
    %1153 = arith.addf %1148, %1152 : vector<8x128xf32>
    %c118_i32_249 = arith.constant 118 : i32
    %1154 = tpu.dynamic_rotate %1119 by %c118_i32_249 dim 1 : vector<8x128xf32>, i32 -> vector<8x128xf32>
    %c176 = arith.constant 176 : index
    %1155 = memref.load %arg1[%c176] : memref<332xf32, #tpu.memory_space<smem>>
    %1156 = vector.broadcast %1155 : f32 to vector<8x128xf32>
    %1157 = arith.mulf %1156, %1154 : vector<8x128xf32>
    %1158 = arith.addf %1153, %1157 : vector<8x128xf32>
    %c117_i32_250 = arith.constant 117 : i32
    %1159 = tpu.dynamic_rotate %1119 by %c117_i32_250 dim 1 : vector<8x128xf32>, i32 -> vector<8x128xf32>
    %c177 = arith.constant 177 : index
    %1160 = memref.load %arg1[%c177] : memref<332xf32, #tpu.memory_space<smem>>
    %1161 = vector.broadcast %1160 : f32 to vector<8x128xf32>
    %1162 = arith.mulf %1161, %1159 : vector<8x128xf32>
    %1163 = arith.addf %1158, %1162 : vector<8x128xf32>
    %c178 = arith.constant 178 : index
    %1164 = memref.load %arg1[%c178] : memref<332xf32, #tpu.memory_space<smem>>
    %c179 = arith.constant 179 : index
    %1165 = memref.load %arg1[%c179] : memref<332xf32, #tpu.memory_space<smem>>
    %1166 = arith.mulf %1163, %0 : vector<8x128xf32>
    %1167 = vector.shape_cast %1166 : vector<8x128xf32> to vector<1x8x128xf32>
    %cst_251 = arith.constant dense<0.000000e+00> : vector<1xf32>
    %1168 = vector.multi_reduction <add>, %1167, %cst_251 [1, 2] : vector<1x8x128xf32> to vector<1xf32>
    %1169 = vector.shape_cast %1168 : vector<1xf32> to vector<1x1x1xf32>
    %1170 = vector.extract %1169[0, 0, 0] : f32 from vector<1x1x1xf32>
    %1171 = arith.mulf %1166, %1163 : vector<8x128xf32>
    %1172 = vector.shape_cast %1171 : vector<8x128xf32> to vector<1x8x128xf32>
    %cst_252 = arith.constant dense<0.000000e+00> : vector<1xf32>
    %1173 = vector.multi_reduction <add>, %1172, %cst_252 [1, 2] : vector<1x8x128xf32> to vector<1xf32>
    %1174 = vector.shape_cast %1173 : vector<1xf32> to vector<1x1x1xf32>
    %1175 = vector.extract %1174[0, 0, 0] : f32 from vector<1x1x1xf32>
    %cst_253 = arith.constant 3.906250e-03 : f32
    %1176 = arith.mulf %1170, %cst_253 : f32
    %cst_254 = arith.constant 3.906250e-03 : f32
    %1177 = arith.mulf %1175, %cst_254 : f32
    %1178 = arith.mulf %1176, %1176 : f32
    %1179 = arith.subf %1177, %1178 : f32
    %cst_255 = arith.constant 0.000000e+00 : f32
    %1180 = arith.maximumf %1179, %cst_255 : f32
    %1181 = vector.broadcast %1176 : f32 to vector<8x128xf32>
    %1182 = arith.subf %1163, %1181 : vector<8x128xf32>
    %cst_256 = arith.constant 9.99999974E-6 : f32
    %1183 = arith.addf %1180, %cst_256 : f32
    %1184 = math.rsqrt %1183 : f32
    %1185 = vector.broadcast %1184 : f32 to vector<8x128xf32>
    %1186 = arith.mulf %1182, %1185 : vector<8x128xf32>
    %1187 = vector.broadcast %1164 : f32 to vector<8x128xf32>
    %1188 = arith.mulf %1187, %1186 : vector<8x128xf32>
    %1189 = vector.broadcast %1165 : f32 to vector<8x128xf32>
    %1190 = arith.addf %1188, %1189 : vector<8x128xf32>
    %cst_257 = arith.constant 0.000000e+00 : f32
    %1191 = vector.broadcast %cst_257 : f32 to vector<8x128xf32>
    %1192 = arith.cmpf ogt, %1190, %1191 : vector<8x128xf32>
    %cst_258 = arith.constant 0.000000e+00 : f32
    %1193 = vector.broadcast %cst_258 : f32 to vector<8x128xf32>
    %1194 = arith.minimumf %1190, %1193 : vector<8x128xf32>
    %1195 = math.exp %1194 : vector<8x128xf32>
    %cst_259 = arith.constant 1.000000e+00 : f32
    %1196 = vector.broadcast %cst_259 : f32 to vector<8x128xf32>
    %1197 = arith.subf %1195, %1196 : vector<8x128xf32>
    %1198 = arith.select %1192, %1190, %1197 : vector<8x128xi1>, vector<8x128xf32>
    %1199 = arith.mulf %1198, %0 : vector<8x128xf32>
    %1200 = arith.mulf %1199, %8 : vector<8x128xf32>
    %c11_i32_260 = arith.constant 11 : i32
    %1201 = tpu.dynamic_rotate %336 by %c11_i32_260 dim 1 : vector<8x128xf32>, i32 -> vector<8x128xf32>
    %c180 = arith.constant 180 : index
    %1202 = memref.load %arg1[%c180] : memref<332xf32, #tpu.memory_space<smem>>
    %1203 = vector.broadcast %1202 : f32 to vector<8x128xf32>
    %1204 = arith.mulf %1203, %1201 : vector<8x128xf32>
    %c216 = arith.constant 216 : index
    %1205 = memref.load %arg1[%c216] : memref<332xf32, #tpu.memory_space<smem>>
    %1206 = vector.broadcast %1205 : f32 to vector<8x128xf32>
    %1207 = arith.mulf %1206, %1201 : vector<8x128xf32>
    %c252 = arith.constant 252 : index
    %1208 = memref.load %arg1[%c252] : memref<332xf32, #tpu.memory_space<smem>>
    %1209 = vector.broadcast %1208 : f32 to vector<8x128xf32>
    %1210 = arith.mulf %1209, %1201 : vector<8x128xf32>
    %c288 = arith.constant 288 : index
    %1211 = memref.load %arg1[%c288] : memref<332xf32, #tpu.memory_space<smem>>
    %1212 = vector.broadcast %1211 : f32 to vector<8x128xf32>
    %1213 = arith.mulf %1212, %1201 : vector<8x128xf32>
    %c10_i32_261 = arith.constant 10 : i32
    %1214 = tpu.dynamic_rotate %336 by %c10_i32_261 dim 1 : vector<8x128xf32>, i32 -> vector<8x128xf32>
    %c181 = arith.constant 181 : index
    %1215 = memref.load %arg1[%c181] : memref<332xf32, #tpu.memory_space<smem>>
    %1216 = vector.broadcast %1215 : f32 to vector<8x128xf32>
    %1217 = arith.mulf %1216, %1214 : vector<8x128xf32>
    %1218 = arith.addf %1204, %1217 : vector<8x128xf32>
    %c217 = arith.constant 217 : index
    %1219 = memref.load %arg1[%c217] : memref<332xf32, #tpu.memory_space<smem>>
    %1220 = vector.broadcast %1219 : f32 to vector<8x128xf32>
    %1221 = arith.mulf %1220, %1214 : vector<8x128xf32>
    %1222 = arith.addf %1207, %1221 : vector<8x128xf32>
    %c253 = arith.constant 253 : index
    %1223 = memref.load %arg1[%c253] : memref<332xf32, #tpu.memory_space<smem>>
    %1224 = vector.broadcast %1223 : f32 to vector<8x128xf32>
    %1225 = arith.mulf %1224, %1214 : vector<8x128xf32>
    %1226 = arith.addf %1210, %1225 : vector<8x128xf32>
    %c289 = arith.constant 289 : index
    %1227 = memref.load %arg1[%c289] : memref<332xf32, #tpu.memory_space<smem>>
    %1228 = vector.broadcast %1227 : f32 to vector<8x128xf32>
    %1229 = arith.mulf %1228, %1214 : vector<8x128xf32>
    %1230 = arith.addf %1213, %1229 : vector<8x128xf32>
    %c9_i32_262 = arith.constant 9 : i32
    %1231 = tpu.dynamic_rotate %336 by %c9_i32_262 dim 1 : vector<8x128xf32>, i32 -> vector<8x128xf32>
    %c182 = arith.constant 182 : index
    %1232 = memref.load %arg1[%c182] : memref<332xf32, #tpu.memory_space<smem>>
    %1233 = vector.broadcast %1232 : f32 to vector<8x128xf32>
    %1234 = arith.mulf %1233, %1231 : vector<8x128xf32>
    %1235 = arith.addf %1218, %1234 : vector<8x128xf32>
    %c218 = arith.constant 218 : index
    %1236 = memref.load %arg1[%c218] : memref<332xf32, #tpu.memory_space<smem>>
    %1237 = vector.broadcast %1236 : f32 to vector<8x128xf32>
    %1238 = arith.mulf %1237, %1231 : vector<8x128xf32>
    %1239 = arith.addf %1222, %1238 : vector<8x128xf32>
    %c254 = arith.constant 254 : index
    %1240 = memref.load %arg1[%c254] : memref<332xf32, #tpu.memory_space<smem>>
    %1241 = vector.broadcast %1240 : f32 to vector<8x128xf32>
    %1242 = arith.mulf %1241, %1231 : vector<8x128xf32>
    %1243 = arith.addf %1226, %1242 : vector<8x128xf32>
    %c290 = arith.constant 290 : index
    %1244 = memref.load %arg1[%c290] : memref<332xf32, #tpu.memory_space<smem>>
    %1245 = vector.broadcast %1244 : f32 to vector<8x128xf32>
    %1246 = arith.mulf %1245, %1231 : vector<8x128xf32>
    %1247 = arith.addf %1230, %1246 : vector<8x128xf32>
    %c1_i32_263 = arith.constant 1 : i32
    %1248 = tpu.dynamic_rotate %336 by %c1_i32_263 dim 1 : vector<8x128xf32>, i32 -> vector<8x128xf32>
    %c183 = arith.constant 183 : index
    %1249 = memref.load %arg1[%c183] : memref<332xf32, #tpu.memory_space<smem>>
    %1250 = vector.broadcast %1249 : f32 to vector<8x128xf32>
    %1251 = arith.mulf %1250, %1248 : vector<8x128xf32>
    %1252 = arith.addf %1235, %1251 : vector<8x128xf32>
    %c219 = arith.constant 219 : index
    %1253 = memref.load %arg1[%c219] : memref<332xf32, #tpu.memory_space<smem>>
    %1254 = vector.broadcast %1253 : f32 to vector<8x128xf32>
    %1255 = arith.mulf %1254, %1248 : vector<8x128xf32>
    %1256 = arith.addf %1239, %1255 : vector<8x128xf32>
    %c255 = arith.constant 255 : index
    %1257 = memref.load %arg1[%c255] : memref<332xf32, #tpu.memory_space<smem>>
    %1258 = vector.broadcast %1257 : f32 to vector<8x128xf32>
    %1259 = arith.mulf %1258, %1248 : vector<8x128xf32>
    %1260 = arith.addf %1243, %1259 : vector<8x128xf32>
    %c291 = arith.constant 291 : index
    %1261 = memref.load %arg1[%c291] : memref<332xf32, #tpu.memory_space<smem>>
    %1262 = vector.broadcast %1261 : f32 to vector<8x128xf32>
    %1263 = arith.mulf %1262, %1248 : vector<8x128xf32>
    %1264 = arith.addf %1247, %1263 : vector<8x128xf32>
    %c184 = arith.constant 184 : index
    %1265 = memref.load %arg1[%c184] : memref<332xf32, #tpu.memory_space<smem>>
    %1266 = vector.broadcast %1265 : f32 to vector<8x128xf32>
    %1267 = arith.mulf %1266, %336 : vector<8x128xf32>
    %1268 = arith.addf %1252, %1267 : vector<8x128xf32>
    %c220 = arith.constant 220 : index
    %1269 = memref.load %arg1[%c220] : memref<332xf32, #tpu.memory_space<smem>>
    %1270 = vector.broadcast %1269 : f32 to vector<8x128xf32>
    %1271 = arith.mulf %1270, %336 : vector<8x128xf32>
    %1272 = arith.addf %1256, %1271 : vector<8x128xf32>
    %c256 = arith.constant 256 : index
    %1273 = memref.load %arg1[%c256] : memref<332xf32, #tpu.memory_space<smem>>
    %1274 = vector.broadcast %1273 : f32 to vector<8x128xf32>
    %1275 = arith.mulf %1274, %336 : vector<8x128xf32>
    %1276 = arith.addf %1260, %1275 : vector<8x128xf32>
    %c292 = arith.constant 292 : index
    %1277 = memref.load %arg1[%c292] : memref<332xf32, #tpu.memory_space<smem>>
    %1278 = vector.broadcast %1277 : f32 to vector<8x128xf32>
    %1279 = arith.mulf %1278, %336 : vector<8x128xf32>
    %1280 = arith.addf %1264, %1279 : vector<8x128xf32>
    %c127_i32_264 = arith.constant 127 : i32
    %1281 = tpu.dynamic_rotate %336 by %c127_i32_264 dim 1 : vector<8x128xf32>, i32 -> vector<8x128xf32>
    %c185 = arith.constant 185 : index
    %1282 = memref.load %arg1[%c185] : memref<332xf32, #tpu.memory_space<smem>>
    %1283 = vector.broadcast %1282 : f32 to vector<8x128xf32>
    %1284 = arith.mulf %1283, %1281 : vector<8x128xf32>
    %1285 = arith.addf %1268, %1284 : vector<8x128xf32>
    %c221 = arith.constant 221 : index
    %1286 = memref.load %arg1[%c221] : memref<332xf32, #tpu.memory_space<smem>>
    %1287 = vector.broadcast %1286 : f32 to vector<8x128xf32>
    %1288 = arith.mulf %1287, %1281 : vector<8x128xf32>
    %1289 = arith.addf %1272, %1288 : vector<8x128xf32>
    %c257 = arith.constant 257 : index
    %1290 = memref.load %arg1[%c257] : memref<332xf32, #tpu.memory_space<smem>>
    %1291 = vector.broadcast %1290 : f32 to vector<8x128xf32>
    %1292 = arith.mulf %1291, %1281 : vector<8x128xf32>
    %1293 = arith.addf %1276, %1292 : vector<8x128xf32>
    %c293 = arith.constant 293 : index
    %1294 = memref.load %arg1[%c293] : memref<332xf32, #tpu.memory_space<smem>>
    %1295 = vector.broadcast %1294 : f32 to vector<8x128xf32>
    %1296 = arith.mulf %1295, %1281 : vector<8x128xf32>
    %1297 = arith.addf %1280, %1296 : vector<8x128xf32>
    %c119_i32_265 = arith.constant 119 : i32
    %1298 = tpu.dynamic_rotate %336 by %c119_i32_265 dim 1 : vector<8x128xf32>, i32 -> vector<8x128xf32>
    %c186 = arith.constant 186 : index
    %1299 = memref.load %arg1[%c186] : memref<332xf32, #tpu.memory_space<smem>>
    %1300 = vector.broadcast %1299 : f32 to vector<8x128xf32>
    %1301 = arith.mulf %1300, %1298 : vector<8x128xf32>
    %1302 = arith.addf %1285, %1301 : vector<8x128xf32>
    %c222 = arith.constant 222 : index
    %1303 = memref.load %arg1[%c222] : memref<332xf32, #tpu.memory_space<smem>>
    %1304 = vector.broadcast %1303 : f32 to vector<8x128xf32>
    %1305 = arith.mulf %1304, %1298 : vector<8x128xf32>
    %1306 = arith.addf %1289, %1305 : vector<8x128xf32>
    %c258 = arith.constant 258 : index
    %1307 = memref.load %arg1[%c258] : memref<332xf32, #tpu.memory_space<smem>>
    %1308 = vector.broadcast %1307 : f32 to vector<8x128xf32>
    %1309 = arith.mulf %1308, %1298 : vector<8x128xf32>
    %1310 = arith.addf %1293, %1309 : vector<8x128xf32>
    %c294 = arith.constant 294 : index
    %1311 = memref.load %arg1[%c294] : memref<332xf32, #tpu.memory_space<smem>>
    %1312 = vector.broadcast %1311 : f32 to vector<8x128xf32>
    %1313 = arith.mulf %1312, %1298 : vector<8x128xf32>
    %1314 = arith.addf %1297, %1313 : vector<8x128xf32>
    %c118_i32_266 = arith.constant 118 : i32
    %1315 = tpu.dynamic_rotate %336 by %c118_i32_266 dim 1 : vector<8x128xf32>, i32 -> vector<8x128xf32>
    %c187 = arith.constant 187 : index
    %1316 = memref.load %arg1[%c187] : memref<332xf32, #tpu.memory_space<smem>>
    %1317 = vector.broadcast %1316 : f32 to vector<8x128xf32>
    %1318 = arith.mulf %1317, %1315 : vector<8x128xf32>
    %1319 = arith.addf %1302, %1318 : vector<8x128xf32>
    %c223 = arith.constant 223 : index
    %1320 = memref.load %arg1[%c223] : memref<332xf32, #tpu.memory_space<smem>>
    %1321 = vector.broadcast %1320 : f32 to vector<8x128xf32>
    %1322 = arith.mulf %1321, %1315 : vector<8x128xf32>
    %1323 = arith.addf %1306, %1322 : vector<8x128xf32>
    %c259 = arith.constant 259 : index
    %1324 = memref.load %arg1[%c259] : memref<332xf32, #tpu.memory_space<smem>>
    %1325 = vector.broadcast %1324 : f32 to vector<8x128xf32>
    %1326 = arith.mulf %1325, %1315 : vector<8x128xf32>
    %1327 = arith.addf %1310, %1326 : vector<8x128xf32>
    %c295 = arith.constant 295 : index
    %1328 = memref.load %arg1[%c295] : memref<332xf32, #tpu.memory_space<smem>>
    %1329 = vector.broadcast %1328 : f32 to vector<8x128xf32>
    %1330 = arith.mulf %1329, %1315 : vector<8x128xf32>
    %1331 = arith.addf %1314, %1330 : vector<8x128xf32>
    %c117_i32_267 = arith.constant 117 : i32
    %1332 = tpu.dynamic_rotate %336 by %c117_i32_267 dim 1 : vector<8x128xf32>, i32 -> vector<8x128xf32>
    %c188 = arith.constant 188 : index
    %1333 = memref.load %arg1[%c188] : memref<332xf32, #tpu.memory_space<smem>>
    %1334 = vector.broadcast %1333 : f32 to vector<8x128xf32>
    %1335 = arith.mulf %1334, %1332 : vector<8x128xf32>
    %1336 = arith.addf %1319, %1335 : vector<8x128xf32>
    %c224 = arith.constant 224 : index
    %1337 = memref.load %arg1[%c224] : memref<332xf32, #tpu.memory_space<smem>>
    %1338 = vector.broadcast %1337 : f32 to vector<8x128xf32>
    %1339 = arith.mulf %1338, %1332 : vector<8x128xf32>
    %1340 = arith.addf %1323, %1339 : vector<8x128xf32>
    %c260 = arith.constant 260 : index
    %1341 = memref.load %arg1[%c260] : memref<332xf32, #tpu.memory_space<smem>>
    %1342 = vector.broadcast %1341 : f32 to vector<8x128xf32>
    %1343 = arith.mulf %1342, %1332 : vector<8x128xf32>
    %1344 = arith.addf %1327, %1343 : vector<8x128xf32>
    %c296 = arith.constant 296 : index
    %1345 = memref.load %arg1[%c296] : memref<332xf32, #tpu.memory_space<smem>>
    %1346 = vector.broadcast %1345 : f32 to vector<8x128xf32>
    %1347 = arith.mulf %1346, %1332 : vector<8x128xf32>
    %1348 = arith.addf %1331, %1347 : vector<8x128xf32>
    %c11_i32_268 = arith.constant 11 : i32
    %1349 = tpu.dynamic_rotate %604 by %c11_i32_268 dim 1 : vector<8x128xf32>, i32 -> vector<8x128xf32>
    %c189 = arith.constant 189 : index
    %1350 = memref.load %arg1[%c189] : memref<332xf32, #tpu.memory_space<smem>>
    %1351 = vector.broadcast %1350 : f32 to vector<8x128xf32>
    %1352 = arith.mulf %1351, %1349 : vector<8x128xf32>
    %1353 = arith.addf %1336, %1352 : vector<8x128xf32>
    %c225 = arith.constant 225 : index
    %1354 = memref.load %arg1[%c225] : memref<332xf32, #tpu.memory_space<smem>>
    %1355 = vector.broadcast %1354 : f32 to vector<8x128xf32>
    %1356 = arith.mulf %1355, %1349 : vector<8x128xf32>
    %1357 = arith.addf %1340, %1356 : vector<8x128xf32>
    %c261 = arith.constant 261 : index
    %1358 = memref.load %arg1[%c261] : memref<332xf32, #tpu.memory_space<smem>>
    %1359 = vector.broadcast %1358 : f32 to vector<8x128xf32>
    %1360 = arith.mulf %1359, %1349 : vector<8x128xf32>
    %1361 = arith.addf %1344, %1360 : vector<8x128xf32>
    %c297 = arith.constant 297 : index
    %1362 = memref.load %arg1[%c297] : memref<332xf32, #tpu.memory_space<smem>>
    %1363 = vector.broadcast %1362 : f32 to vector<8x128xf32>
    %1364 = arith.mulf %1363, %1349 : vector<8x128xf32>
    %1365 = arith.addf %1348, %1364 : vector<8x128xf32>
    %c10_i32_269 = arith.constant 10 : i32
    %1366 = tpu.dynamic_rotate %604 by %c10_i32_269 dim 1 : vector<8x128xf32>, i32 -> vector<8x128xf32>
    %c190 = arith.constant 190 : index
    %1367 = memref.load %arg1[%c190] : memref<332xf32, #tpu.memory_space<smem>>
    %1368 = vector.broadcast %1367 : f32 to vector<8x128xf32>
    %1369 = arith.mulf %1368, %1366 : vector<8x128xf32>
    %1370 = arith.addf %1353, %1369 : vector<8x128xf32>
    %c226 = arith.constant 226 : index
    %1371 = memref.load %arg1[%c226] : memref<332xf32, #tpu.memory_space<smem>>
    %1372 = vector.broadcast %1371 : f32 to vector<8x128xf32>
    %1373 = arith.mulf %1372, %1366 : vector<8x128xf32>
    %1374 = arith.addf %1357, %1373 : vector<8x128xf32>
    %c262 = arith.constant 262 : index
    %1375 = memref.load %arg1[%c262] : memref<332xf32, #tpu.memory_space<smem>>
    %1376 = vector.broadcast %1375 : f32 to vector<8x128xf32>
    %1377 = arith.mulf %1376, %1366 : vector<8x128xf32>
    %1378 = arith.addf %1361, %1377 : vector<8x128xf32>
    %c298 = arith.constant 298 : index
    %1379 = memref.load %arg1[%c298] : memref<332xf32, #tpu.memory_space<smem>>
    %1380 = vector.broadcast %1379 : f32 to vector<8x128xf32>
    %1381 = arith.mulf %1380, %1366 : vector<8x128xf32>
    %1382 = arith.addf %1365, %1381 : vector<8x128xf32>
    %c9_i32_270 = arith.constant 9 : i32
    %1383 = tpu.dynamic_rotate %604 by %c9_i32_270 dim 1 : vector<8x128xf32>, i32 -> vector<8x128xf32>
    %c191 = arith.constant 191 : index
    %1384 = memref.load %arg1[%c191] : memref<332xf32, #tpu.memory_space<smem>>
    %1385 = vector.broadcast %1384 : f32 to vector<8x128xf32>
    %1386 = arith.mulf %1385, %1383 : vector<8x128xf32>
    %1387 = arith.addf %1370, %1386 : vector<8x128xf32>
    %c227 = arith.constant 227 : index
    %1388 = memref.load %arg1[%c227] : memref<332xf32, #tpu.memory_space<smem>>
    %1389 = vector.broadcast %1388 : f32 to vector<8x128xf32>
    %1390 = arith.mulf %1389, %1383 : vector<8x128xf32>
    %1391 = arith.addf %1374, %1390 : vector<8x128xf32>
    %c263 = arith.constant 263 : index
    %1392 = memref.load %arg1[%c263] : memref<332xf32, #tpu.memory_space<smem>>
    %1393 = vector.broadcast %1392 : f32 to vector<8x128xf32>
    %1394 = arith.mulf %1393, %1383 : vector<8x128xf32>
    %1395 = arith.addf %1378, %1394 : vector<8x128xf32>
    %c299 = arith.constant 299 : index
    %1396 = memref.load %arg1[%c299] : memref<332xf32, #tpu.memory_space<smem>>
    %1397 = vector.broadcast %1396 : f32 to vector<8x128xf32>
    %1398 = arith.mulf %1397, %1383 : vector<8x128xf32>
    %1399 = arith.addf %1382, %1398 : vector<8x128xf32>
    %c1_i32_271 = arith.constant 1 : i32
    %1400 = tpu.dynamic_rotate %604 by %c1_i32_271 dim 1 : vector<8x128xf32>, i32 -> vector<8x128xf32>
    %c192 = arith.constant 192 : index
    %1401 = memref.load %arg1[%c192] : memref<332xf32, #tpu.memory_space<smem>>
    %1402 = vector.broadcast %1401 : f32 to vector<8x128xf32>
    %1403 = arith.mulf %1402, %1400 : vector<8x128xf32>
    %1404 = arith.addf %1387, %1403 : vector<8x128xf32>
    %c228 = arith.constant 228 : index
    %1405 = memref.load %arg1[%c228] : memref<332xf32, #tpu.memory_space<smem>>
    %1406 = vector.broadcast %1405 : f32 to vector<8x128xf32>
    %1407 = arith.mulf %1406, %1400 : vector<8x128xf32>
    %1408 = arith.addf %1391, %1407 : vector<8x128xf32>
    %c264 = arith.constant 264 : index
    %1409 = memref.load %arg1[%c264] : memref<332xf32, #tpu.memory_space<smem>>
    %1410 = vector.broadcast %1409 : f32 to vector<8x128xf32>
    %1411 = arith.mulf %1410, %1400 : vector<8x128xf32>
    %1412 = arith.addf %1395, %1411 : vector<8x128xf32>
    %c300 = arith.constant 300 : index
    %1413 = memref.load %arg1[%c300] : memref<332xf32, #tpu.memory_space<smem>>
    %1414 = vector.broadcast %1413 : f32 to vector<8x128xf32>
    %1415 = arith.mulf %1414, %1400 : vector<8x128xf32>
    %1416 = arith.addf %1399, %1415 : vector<8x128xf32>
    %c193 = arith.constant 193 : index
    %1417 = memref.load %arg1[%c193] : memref<332xf32, #tpu.memory_space<smem>>
    %1418 = vector.broadcast %1417 : f32 to vector<8x128xf32>
    %1419 = arith.mulf %1418, %604 : vector<8x128xf32>
    %1420 = arith.addf %1404, %1419 : vector<8x128xf32>
    %c229 = arith.constant 229 : index
    %1421 = memref.load %arg1[%c229] : memref<332xf32, #tpu.memory_space<smem>>
    %1422 = vector.broadcast %1421 : f32 to vector<8x128xf32>
    %1423 = arith.mulf %1422, %604 : vector<8x128xf32>
    %1424 = arith.addf %1408, %1423 : vector<8x128xf32>
    %c265 = arith.constant 265 : index
    %1425 = memref.load %arg1[%c265] : memref<332xf32, #tpu.memory_space<smem>>
    %1426 = vector.broadcast %1425 : f32 to vector<8x128xf32>
    %1427 = arith.mulf %1426, %604 : vector<8x128xf32>
    %1428 = arith.addf %1412, %1427 : vector<8x128xf32>
    %c301 = arith.constant 301 : index
    %1429 = memref.load %arg1[%c301] : memref<332xf32, #tpu.memory_space<smem>>
    %1430 = vector.broadcast %1429 : f32 to vector<8x128xf32>
    %1431 = arith.mulf %1430, %604 : vector<8x128xf32>
    %1432 = arith.addf %1416, %1431 : vector<8x128xf32>
    %c127_i32_272 = arith.constant 127 : i32
    %1433 = tpu.dynamic_rotate %604 by %c127_i32_272 dim 1 : vector<8x128xf32>, i32 -> vector<8x128xf32>
    %c194 = arith.constant 194 : index
    %1434 = memref.load %arg1[%c194] : memref<332xf32, #tpu.memory_space<smem>>
    %1435 = vector.broadcast %1434 : f32 to vector<8x128xf32>
    %1436 = arith.mulf %1435, %1433 : vector<8x128xf32>
    %1437 = arith.addf %1420, %1436 : vector<8x128xf32>
    %c230 = arith.constant 230 : index
    %1438 = memref.load %arg1[%c230] : memref<332xf32, #tpu.memory_space<smem>>
    %1439 = vector.broadcast %1438 : f32 to vector<8x128xf32>
    %1440 = arith.mulf %1439, %1433 : vector<8x128xf32>
    %1441 = arith.addf %1424, %1440 : vector<8x128xf32>
    %c266 = arith.constant 266 : index
    %1442 = memref.load %arg1[%c266] : memref<332xf32, #tpu.memory_space<smem>>
    %1443 = vector.broadcast %1442 : f32 to vector<8x128xf32>
    %1444 = arith.mulf %1443, %1433 : vector<8x128xf32>
    %1445 = arith.addf %1428, %1444 : vector<8x128xf32>
    %c302 = arith.constant 302 : index
    %1446 = memref.load %arg1[%c302] : memref<332xf32, #tpu.memory_space<smem>>
    %1447 = vector.broadcast %1446 : f32 to vector<8x128xf32>
    %1448 = arith.mulf %1447, %1433 : vector<8x128xf32>
    %1449 = arith.addf %1432, %1448 : vector<8x128xf32>
    %c119_i32_273 = arith.constant 119 : i32
    %1450 = tpu.dynamic_rotate %604 by %c119_i32_273 dim 1 : vector<8x128xf32>, i32 -> vector<8x128xf32>
    %c195 = arith.constant 195 : index
    %1451 = memref.load %arg1[%c195] : memref<332xf32, #tpu.memory_space<smem>>
    %1452 = vector.broadcast %1451 : f32 to vector<8x128xf32>
    %1453 = arith.mulf %1452, %1450 : vector<8x128xf32>
    %1454 = arith.addf %1437, %1453 : vector<8x128xf32>
    %c231 = arith.constant 231 : index
    %1455 = memref.load %arg1[%c231] : memref<332xf32, #tpu.memory_space<smem>>
    %1456 = vector.broadcast %1455 : f32 to vector<8x128xf32>
    %1457 = arith.mulf %1456, %1450 : vector<8x128xf32>
    %1458 = arith.addf %1441, %1457 : vector<8x128xf32>
    %c267 = arith.constant 267 : index
    %1459 = memref.load %arg1[%c267] : memref<332xf32, #tpu.memory_space<smem>>
    %1460 = vector.broadcast %1459 : f32 to vector<8x128xf32>
    %1461 = arith.mulf %1460, %1450 : vector<8x128xf32>
    %1462 = arith.addf %1445, %1461 : vector<8x128xf32>
    %c303 = arith.constant 303 : index
    %1463 = memref.load %arg1[%c303] : memref<332xf32, #tpu.memory_space<smem>>
    %1464 = vector.broadcast %1463 : f32 to vector<8x128xf32>
    %1465 = arith.mulf %1464, %1450 : vector<8x128xf32>
    %1466 = arith.addf %1449, %1465 : vector<8x128xf32>
    %c118_i32_274 = arith.constant 118 : i32
    %1467 = tpu.dynamic_rotate %604 by %c118_i32_274 dim 1 : vector<8x128xf32>, i32 -> vector<8x128xf32>
    %c196 = arith.constant 196 : index
    %1468 = memref.load %arg1[%c196] : memref<332xf32, #tpu.memory_space<smem>>
    %1469 = vector.broadcast %1468 : f32 to vector<8x128xf32>
    %1470 = arith.mulf %1469, %1467 : vector<8x128xf32>
    %1471 = arith.addf %1454, %1470 : vector<8x128xf32>
    %c232 = arith.constant 232 : index
    %1472 = memref.load %arg1[%c232] : memref<332xf32, #tpu.memory_space<smem>>
    %1473 = vector.broadcast %1472 : f32 to vector<8x128xf32>
    %1474 = arith.mulf %1473, %1467 : vector<8x128xf32>
    %1475 = arith.addf %1458, %1474 : vector<8x128xf32>
    %c268 = arith.constant 268 : index
    %1476 = memref.load %arg1[%c268] : memref<332xf32, #tpu.memory_space<smem>>
    %1477 = vector.broadcast %1476 : f32 to vector<8x128xf32>
    %1478 = arith.mulf %1477, %1467 : vector<8x128xf32>
    %1479 = arith.addf %1462, %1478 : vector<8x128xf32>
    %c304 = arith.constant 304 : index
    %1480 = memref.load %arg1[%c304] : memref<332xf32, #tpu.memory_space<smem>>
    %1481 = vector.broadcast %1480 : f32 to vector<8x128xf32>
    %1482 = arith.mulf %1481, %1467 : vector<8x128xf32>
    %1483 = arith.addf %1466, %1482 : vector<8x128xf32>
    %c117_i32_275 = arith.constant 117 : i32
    %1484 = tpu.dynamic_rotate %604 by %c117_i32_275 dim 1 : vector<8x128xf32>, i32 -> vector<8x128xf32>
    %c197 = arith.constant 197 : index
    %1485 = memref.load %arg1[%c197] : memref<332xf32, #tpu.memory_space<smem>>
    %1486 = vector.broadcast %1485 : f32 to vector<8x128xf32>
    %1487 = arith.mulf %1486, %1484 : vector<8x128xf32>
    %1488 = arith.addf %1471, %1487 : vector<8x128xf32>
    %c233 = arith.constant 233 : index
    %1489 = memref.load %arg1[%c233] : memref<332xf32, #tpu.memory_space<smem>>
    %1490 = vector.broadcast %1489 : f32 to vector<8x128xf32>
    %1491 = arith.mulf %1490, %1484 : vector<8x128xf32>
    %1492 = arith.addf %1475, %1491 : vector<8x128xf32>
    %c269 = arith.constant 269 : index
    %1493 = memref.load %arg1[%c269] : memref<332xf32, #tpu.memory_space<smem>>
    %1494 = vector.broadcast %1493 : f32 to vector<8x128xf32>
    %1495 = arith.mulf %1494, %1484 : vector<8x128xf32>
    %1496 = arith.addf %1479, %1495 : vector<8x128xf32>
    %c305 = arith.constant 305 : index
    %1497 = memref.load %arg1[%c305] : memref<332xf32, #tpu.memory_space<smem>>
    %1498 = vector.broadcast %1497 : f32 to vector<8x128xf32>
    %1499 = arith.mulf %1498, %1484 : vector<8x128xf32>
    %1500 = arith.addf %1483, %1499 : vector<8x128xf32>
    %c11_i32_276 = arith.constant 11 : i32
    %1501 = tpu.dynamic_rotate %872 by %c11_i32_276 dim 1 : vector<8x128xf32>, i32 -> vector<8x128xf32>
    %c198 = arith.constant 198 : index
    %1502 = memref.load %arg1[%c198] : memref<332xf32, #tpu.memory_space<smem>>
    %1503 = vector.broadcast %1502 : f32 to vector<8x128xf32>
    %1504 = arith.mulf %1503, %1501 : vector<8x128xf32>
    %1505 = arith.addf %1488, %1504 : vector<8x128xf32>
    %c234 = arith.constant 234 : index
    %1506 = memref.load %arg1[%c234] : memref<332xf32, #tpu.memory_space<smem>>
    %1507 = vector.broadcast %1506 : f32 to vector<8x128xf32>
    %1508 = arith.mulf %1507, %1501 : vector<8x128xf32>
    %1509 = arith.addf %1492, %1508 : vector<8x128xf32>
    %c270 = arith.constant 270 : index
    %1510 = memref.load %arg1[%c270] : memref<332xf32, #tpu.memory_space<smem>>
    %1511 = vector.broadcast %1510 : f32 to vector<8x128xf32>
    %1512 = arith.mulf %1511, %1501 : vector<8x128xf32>
    %1513 = arith.addf %1496, %1512 : vector<8x128xf32>
    %c306 = arith.constant 306 : index
    %1514 = memref.load %arg1[%c306] : memref<332xf32, #tpu.memory_space<smem>>
    %1515 = vector.broadcast %1514 : f32 to vector<8x128xf32>
    %1516 = arith.mulf %1515, %1501 : vector<8x128xf32>
    %1517 = arith.addf %1500, %1516 : vector<8x128xf32>
    %c10_i32_277 = arith.constant 10 : i32
    %1518 = tpu.dynamic_rotate %872 by %c10_i32_277 dim 1 : vector<8x128xf32>, i32 -> vector<8x128xf32>
    %c199 = arith.constant 199 : index
    %1519 = memref.load %arg1[%c199] : memref<332xf32, #tpu.memory_space<smem>>
    %1520 = vector.broadcast %1519 : f32 to vector<8x128xf32>
    %1521 = arith.mulf %1520, %1518 : vector<8x128xf32>
    %1522 = arith.addf %1505, %1521 : vector<8x128xf32>
    %c235 = arith.constant 235 : index
    %1523 = memref.load %arg1[%c235] : memref<332xf32, #tpu.memory_space<smem>>
    %1524 = vector.broadcast %1523 : f32 to vector<8x128xf32>
    %1525 = arith.mulf %1524, %1518 : vector<8x128xf32>
    %1526 = arith.addf %1509, %1525 : vector<8x128xf32>
    %c271 = arith.constant 271 : index
    %1527 = memref.load %arg1[%c271] : memref<332xf32, #tpu.memory_space<smem>>
    %1528 = vector.broadcast %1527 : f32 to vector<8x128xf32>
    %1529 = arith.mulf %1528, %1518 : vector<8x128xf32>
    %1530 = arith.addf %1513, %1529 : vector<8x128xf32>
    %c307 = arith.constant 307 : index
    %1531 = memref.load %arg1[%c307] : memref<332xf32, #tpu.memory_space<smem>>
    %1532 = vector.broadcast %1531 : f32 to vector<8x128xf32>
    %1533 = arith.mulf %1532, %1518 : vector<8x128xf32>
    %1534 = arith.addf %1517, %1533 : vector<8x128xf32>
    %c9_i32_278 = arith.constant 9 : i32
    %1535 = tpu.dynamic_rotate %872 by %c9_i32_278 dim 1 : vector<8x128xf32>, i32 -> vector<8x128xf32>
    %c200 = arith.constant 200 : index
    %1536 = memref.load %arg1[%c200] : memref<332xf32, #tpu.memory_space<smem>>
    %1537 = vector.broadcast %1536 : f32 to vector<8x128xf32>
    %1538 = arith.mulf %1537, %1535 : vector<8x128xf32>
    %1539 = arith.addf %1522, %1538 : vector<8x128xf32>
    %c236 = arith.constant 236 : index
    %1540 = memref.load %arg1[%c236] : memref<332xf32, #tpu.memory_space<smem>>
    %1541 = vector.broadcast %1540 : f32 to vector<8x128xf32>
    %1542 = arith.mulf %1541, %1535 : vector<8x128xf32>
    %1543 = arith.addf %1526, %1542 : vector<8x128xf32>
    %c272 = arith.constant 272 : index
    %1544 = memref.load %arg1[%c272] : memref<332xf32, #tpu.memory_space<smem>>
    %1545 = vector.broadcast %1544 : f32 to vector<8x128xf32>
    %1546 = arith.mulf %1545, %1535 : vector<8x128xf32>
    %1547 = arith.addf %1530, %1546 : vector<8x128xf32>
    %c308 = arith.constant 308 : index
    %1548 = memref.load %arg1[%c308] : memref<332xf32, #tpu.memory_space<smem>>
    %1549 = vector.broadcast %1548 : f32 to vector<8x128xf32>
    %1550 = arith.mulf %1549, %1535 : vector<8x128xf32>
    %1551 = arith.addf %1534, %1550 : vector<8x128xf32>
    %c1_i32_279 = arith.constant 1 : i32
    %1552 = tpu.dynamic_rotate %872 by %c1_i32_279 dim 1 : vector<8x128xf32>, i32 -> vector<8x128xf32>
    %c201 = arith.constant 201 : index
    %1553 = memref.load %arg1[%c201] : memref<332xf32, #tpu.memory_space<smem>>
    %1554 = vector.broadcast %1553 : f32 to vector<8x128xf32>
    %1555 = arith.mulf %1554, %1552 : vector<8x128xf32>
    %1556 = arith.addf %1539, %1555 : vector<8x128xf32>
    %c237 = arith.constant 237 : index
    %1557 = memref.load %arg1[%c237] : memref<332xf32, #tpu.memory_space<smem>>
    %1558 = vector.broadcast %1557 : f32 to vector<8x128xf32>
    %1559 = arith.mulf %1558, %1552 : vector<8x128xf32>
    %1560 = arith.addf %1543, %1559 : vector<8x128xf32>
    %c273 = arith.constant 273 : index
    %1561 = memref.load %arg1[%c273] : memref<332xf32, #tpu.memory_space<smem>>
    %1562 = vector.broadcast %1561 : f32 to vector<8x128xf32>
    %1563 = arith.mulf %1562, %1552 : vector<8x128xf32>
    %1564 = arith.addf %1547, %1563 : vector<8x128xf32>
    %c309 = arith.constant 309 : index
    %1565 = memref.load %arg1[%c309] : memref<332xf32, #tpu.memory_space<smem>>
    %1566 = vector.broadcast %1565 : f32 to vector<8x128xf32>
    %1567 = arith.mulf %1566, %1552 : vector<8x128xf32>
    %1568 = arith.addf %1551, %1567 : vector<8x128xf32>
    %c202 = arith.constant 202 : index
    %1569 = memref.load %arg1[%c202] : memref<332xf32, #tpu.memory_space<smem>>
    %1570 = vector.broadcast %1569 : f32 to vector<8x128xf32>
    %1571 = arith.mulf %1570, %872 : vector<8x128xf32>
    %1572 = arith.addf %1556, %1571 : vector<8x128xf32>
    %c238 = arith.constant 238 : index
    %1573 = memref.load %arg1[%c238] : memref<332xf32, #tpu.memory_space<smem>>
    %1574 = vector.broadcast %1573 : f32 to vector<8x128xf32>
    %1575 = arith.mulf %1574, %872 : vector<8x128xf32>
    %1576 = arith.addf %1560, %1575 : vector<8x128xf32>
    %c274 = arith.constant 274 : index
    %1577 = memref.load %arg1[%c274] : memref<332xf32, #tpu.memory_space<smem>>
    %1578 = vector.broadcast %1577 : f32 to vector<8x128xf32>
    %1579 = arith.mulf %1578, %872 : vector<8x128xf32>
    %1580 = arith.addf %1564, %1579 : vector<8x128xf32>
    %c310 = arith.constant 310 : index
    %1581 = memref.load %arg1[%c310] : memref<332xf32, #tpu.memory_space<smem>>
    %1582 = vector.broadcast %1581 : f32 to vector<8x128xf32>
    %1583 = arith.mulf %1582, %872 : vector<8x128xf32>
    %1584 = arith.addf %1568, %1583 : vector<8x128xf32>
    %c127_i32_280 = arith.constant 127 : i32
    %1585 = tpu.dynamic_rotate %872 by %c127_i32_280 dim 1 : vector<8x128xf32>, i32 -> vector<8x128xf32>
    %c203 = arith.constant 203 : index
    %1586 = memref.load %arg1[%c203] : memref<332xf32, #tpu.memory_space<smem>>
    %1587 = vector.broadcast %1586 : f32 to vector<8x128xf32>
    %1588 = arith.mulf %1587, %1585 : vector<8x128xf32>
    %1589 = arith.addf %1572, %1588 : vector<8x128xf32>
    %c239 = arith.constant 239 : index
    %1590 = memref.load %arg1[%c239] : memref<332xf32, #tpu.memory_space<smem>>
    %1591 = vector.broadcast %1590 : f32 to vector<8x128xf32>
    %1592 = arith.mulf %1591, %1585 : vector<8x128xf32>
    %1593 = arith.addf %1576, %1592 : vector<8x128xf32>
    %c275 = arith.constant 275 : index
    %1594 = memref.load %arg1[%c275] : memref<332xf32, #tpu.memory_space<smem>>
    %1595 = vector.broadcast %1594 : f32 to vector<8x128xf32>
    %1596 = arith.mulf %1595, %1585 : vector<8x128xf32>
    %1597 = arith.addf %1580, %1596 : vector<8x128xf32>
    %c311 = arith.constant 311 : index
    %1598 = memref.load %arg1[%c311] : memref<332xf32, #tpu.memory_space<smem>>
    %1599 = vector.broadcast %1598 : f32 to vector<8x128xf32>
    %1600 = arith.mulf %1599, %1585 : vector<8x128xf32>
    %1601 = arith.addf %1584, %1600 : vector<8x128xf32>
    %c119_i32_281 = arith.constant 119 : i32
    %1602 = tpu.dynamic_rotate %872 by %c119_i32_281 dim 1 : vector<8x128xf32>, i32 -> vector<8x128xf32>
    %c204 = arith.constant 204 : index
    %1603 = memref.load %arg1[%c204] : memref<332xf32, #tpu.memory_space<smem>>
    %1604 = vector.broadcast %1603 : f32 to vector<8x128xf32>
    %1605 = arith.mulf %1604, %1602 : vector<8x128xf32>
    %1606 = arith.addf %1589, %1605 : vector<8x128xf32>
    %c240 = arith.constant 240 : index
    %1607 = memref.load %arg1[%c240] : memref<332xf32, #tpu.memory_space<smem>>
    %1608 = vector.broadcast %1607 : f32 to vector<8x128xf32>
    %1609 = arith.mulf %1608, %1602 : vector<8x128xf32>
    %1610 = arith.addf %1593, %1609 : vector<8x128xf32>
    %c276 = arith.constant 276 : index
    %1611 = memref.load %arg1[%c276] : memref<332xf32, #tpu.memory_space<smem>>
    %1612 = vector.broadcast %1611 : f32 to vector<8x128xf32>
    %1613 = arith.mulf %1612, %1602 : vector<8x128xf32>
    %1614 = arith.addf %1597, %1613 : vector<8x128xf32>
    %c312 = arith.constant 312 : index
    %1615 = memref.load %arg1[%c312] : memref<332xf32, #tpu.memory_space<smem>>
    %1616 = vector.broadcast %1615 : f32 to vector<8x128xf32>
    %1617 = arith.mulf %1616, %1602 : vector<8x128xf32>
    %1618 = arith.addf %1601, %1617 : vector<8x128xf32>
    %c118_i32_282 = arith.constant 118 : i32
    %1619 = tpu.dynamic_rotate %872 by %c118_i32_282 dim 1 : vector<8x128xf32>, i32 -> vector<8x128xf32>
    %c205 = arith.constant 205 : index
    %1620 = memref.load %arg1[%c205] : memref<332xf32, #tpu.memory_space<smem>>
    %1621 = vector.broadcast %1620 : f32 to vector<8x128xf32>
    %1622 = arith.mulf %1621, %1619 : vector<8x128xf32>
    %1623 = arith.addf %1606, %1622 : vector<8x128xf32>
    %c241 = arith.constant 241 : index
    %1624 = memref.load %arg1[%c241] : memref<332xf32, #tpu.memory_space<smem>>
    %1625 = vector.broadcast %1624 : f32 to vector<8x128xf32>
    %1626 = arith.mulf %1625, %1619 : vector<8x128xf32>
    %1627 = arith.addf %1610, %1626 : vector<8x128xf32>
    %c277 = arith.constant 277 : index
    %1628 = memref.load %arg1[%c277] : memref<332xf32, #tpu.memory_space<smem>>
    %1629 = vector.broadcast %1628 : f32 to vector<8x128xf32>
    %1630 = arith.mulf %1629, %1619 : vector<8x128xf32>
    %1631 = arith.addf %1614, %1630 : vector<8x128xf32>
    %c313 = arith.constant 313 : index
    %1632 = memref.load %arg1[%c313] : memref<332xf32, #tpu.memory_space<smem>>
    %1633 = vector.broadcast %1632 : f32 to vector<8x128xf32>
    %1634 = arith.mulf %1633, %1619 : vector<8x128xf32>
    %1635 = arith.addf %1618, %1634 : vector<8x128xf32>
    %c117_i32_283 = arith.constant 117 : i32
    %1636 = tpu.dynamic_rotate %872 by %c117_i32_283 dim 1 : vector<8x128xf32>, i32 -> vector<8x128xf32>
    %c206 = arith.constant 206 : index
    %1637 = memref.load %arg1[%c206] : memref<332xf32, #tpu.memory_space<smem>>
    %1638 = vector.broadcast %1637 : f32 to vector<8x128xf32>
    %1639 = arith.mulf %1638, %1636 : vector<8x128xf32>
    %1640 = arith.addf %1623, %1639 : vector<8x128xf32>
    %c242 = arith.constant 242 : index
    %1641 = memref.load %arg1[%c242] : memref<332xf32, #tpu.memory_space<smem>>
    %1642 = vector.broadcast %1641 : f32 to vector<8x128xf32>
    %1643 = arith.mulf %1642, %1636 : vector<8x128xf32>
    %1644 = arith.addf %1627, %1643 : vector<8x128xf32>
    %c278 = arith.constant 278 : index
    %1645 = memref.load %arg1[%c278] : memref<332xf32, #tpu.memory_space<smem>>
    %1646 = vector.broadcast %1645 : f32 to vector<8x128xf32>
    %1647 = arith.mulf %1646, %1636 : vector<8x128xf32>
    %1648 = arith.addf %1631, %1647 : vector<8x128xf32>
    %c314 = arith.constant 314 : index
    %1649 = memref.load %arg1[%c314] : memref<332xf32, #tpu.memory_space<smem>>
    %1650 = vector.broadcast %1649 : f32 to vector<8x128xf32>
    %1651 = arith.mulf %1650, %1636 : vector<8x128xf32>
    %1652 = arith.addf %1635, %1651 : vector<8x128xf32>
    %c11_i32_284 = arith.constant 11 : i32
    %1653 = tpu.dynamic_rotate %1200 by %c11_i32_284 dim 1 : vector<8x128xf32>, i32 -> vector<8x128xf32>
    %c207 = arith.constant 207 : index
    %1654 = memref.load %arg1[%c207] : memref<332xf32, #tpu.memory_space<smem>>
    %1655 = vector.broadcast %1654 : f32 to vector<8x128xf32>
    %1656 = arith.mulf %1655, %1653 : vector<8x128xf32>
    %1657 = arith.addf %1640, %1656 : vector<8x128xf32>
    %c243 = arith.constant 243 : index
    %1658 = memref.load %arg1[%c243] : memref<332xf32, #tpu.memory_space<smem>>
    %1659 = vector.broadcast %1658 : f32 to vector<8x128xf32>
    %1660 = arith.mulf %1659, %1653 : vector<8x128xf32>
    %1661 = arith.addf %1644, %1660 : vector<8x128xf32>
    %c279 = arith.constant 279 : index
    %1662 = memref.load %arg1[%c279] : memref<332xf32, #tpu.memory_space<smem>>
    %1663 = vector.broadcast %1662 : f32 to vector<8x128xf32>
    %1664 = arith.mulf %1663, %1653 : vector<8x128xf32>
    %1665 = arith.addf %1648, %1664 : vector<8x128xf32>
    %c315 = arith.constant 315 : index
    %1666 = memref.load %arg1[%c315] : memref<332xf32, #tpu.memory_space<smem>>
    %1667 = vector.broadcast %1666 : f32 to vector<8x128xf32>
    %1668 = arith.mulf %1667, %1653 : vector<8x128xf32>
    %1669 = arith.addf %1652, %1668 : vector<8x128xf32>
    %c10_i32_285 = arith.constant 10 : i32
    %1670 = tpu.dynamic_rotate %1200 by %c10_i32_285 dim 1 : vector<8x128xf32>, i32 -> vector<8x128xf32>
    %c208 = arith.constant 208 : index
    %1671 = memref.load %arg1[%c208] : memref<332xf32, #tpu.memory_space<smem>>
    %1672 = vector.broadcast %1671 : f32 to vector<8x128xf32>
    %1673 = arith.mulf %1672, %1670 : vector<8x128xf32>
    %1674 = arith.addf %1657, %1673 : vector<8x128xf32>
    %c244 = arith.constant 244 : index
    %1675 = memref.load %arg1[%c244] : memref<332xf32, #tpu.memory_space<smem>>
    %1676 = vector.broadcast %1675 : f32 to vector<8x128xf32>
    %1677 = arith.mulf %1676, %1670 : vector<8x128xf32>
    %1678 = arith.addf %1661, %1677 : vector<8x128xf32>
    %c280 = arith.constant 280 : index
    %1679 = memref.load %arg1[%c280] : memref<332xf32, #tpu.memory_space<smem>>
    %1680 = vector.broadcast %1679 : f32 to vector<8x128xf32>
    %1681 = arith.mulf %1680, %1670 : vector<8x128xf32>
    %1682 = arith.addf %1665, %1681 : vector<8x128xf32>
    %c316 = arith.constant 316 : index
    %1683 = memref.load %arg1[%c316] : memref<332xf32, #tpu.memory_space<smem>>
    %1684 = vector.broadcast %1683 : f32 to vector<8x128xf32>
    %1685 = arith.mulf %1684, %1670 : vector<8x128xf32>
    %1686 = arith.addf %1669, %1685 : vector<8x128xf32>
    %c9_i32_286 = arith.constant 9 : i32
    %1687 = tpu.dynamic_rotate %1200 by %c9_i32_286 dim 1 : vector<8x128xf32>, i32 -> vector<8x128xf32>
    %c209 = arith.constant 209 : index
    %1688 = memref.load %arg1[%c209] : memref<332xf32, #tpu.memory_space<smem>>
    %1689 = vector.broadcast %1688 : f32 to vector<8x128xf32>
    %1690 = arith.mulf %1689, %1687 : vector<8x128xf32>
    %1691 = arith.addf %1674, %1690 : vector<8x128xf32>
    %c245 = arith.constant 245 : index
    %1692 = memref.load %arg1[%c245] : memref<332xf32, #tpu.memory_space<smem>>
    %1693 = vector.broadcast %1692 : f32 to vector<8x128xf32>
    %1694 = arith.mulf %1693, %1687 : vector<8x128xf32>
    %1695 = arith.addf %1678, %1694 : vector<8x128xf32>
    %c281 = arith.constant 281 : index
    %1696 = memref.load %arg1[%c281] : memref<332xf32, #tpu.memory_space<smem>>
    %1697 = vector.broadcast %1696 : f32 to vector<8x128xf32>
    %1698 = arith.mulf %1697, %1687 : vector<8x128xf32>
    %1699 = arith.addf %1682, %1698 : vector<8x128xf32>
    %c317 = arith.constant 317 : index
    %1700 = memref.load %arg1[%c317] : memref<332xf32, #tpu.memory_space<smem>>
    %1701 = vector.broadcast %1700 : f32 to vector<8x128xf32>
    %1702 = arith.mulf %1701, %1687 : vector<8x128xf32>
    %1703 = arith.addf %1686, %1702 : vector<8x128xf32>
    %c1_i32_287 = arith.constant 1 : i32
    %1704 = tpu.dynamic_rotate %1200 by %c1_i32_287 dim 1 : vector<8x128xf32>, i32 -> vector<8x128xf32>
    %c210 = arith.constant 210 : index
    %1705 = memref.load %arg1[%c210] : memref<332xf32, #tpu.memory_space<smem>>
    %1706 = vector.broadcast %1705 : f32 to vector<8x128xf32>
    %1707 = arith.mulf %1706, %1704 : vector<8x128xf32>
    %1708 = arith.addf %1691, %1707 : vector<8x128xf32>
    %c246 = arith.constant 246 : index
    %1709 = memref.load %arg1[%c246] : memref<332xf32, #tpu.memory_space<smem>>
    %1710 = vector.broadcast %1709 : f32 to vector<8x128xf32>
    %1711 = arith.mulf %1710, %1704 : vector<8x128xf32>
    %1712 = arith.addf %1695, %1711 : vector<8x128xf32>
    %c282 = arith.constant 282 : index
    %1713 = memref.load %arg1[%c282] : memref<332xf32, #tpu.memory_space<smem>>
    %1714 = vector.broadcast %1713 : f32 to vector<8x128xf32>
    %1715 = arith.mulf %1714, %1704 : vector<8x128xf32>
    %1716 = arith.addf %1699, %1715 : vector<8x128xf32>
    %c318 = arith.constant 318 : index
    %1717 = memref.load %arg1[%c318] : memref<332xf32, #tpu.memory_space<smem>>
    %1718 = vector.broadcast %1717 : f32 to vector<8x128xf32>
    %1719 = arith.mulf %1718, %1704 : vector<8x128xf32>
    %1720 = arith.addf %1703, %1719 : vector<8x128xf32>
    %c211 = arith.constant 211 : index
    %1721 = memref.load %arg1[%c211] : memref<332xf32, #tpu.memory_space<smem>>
    %1722 = vector.broadcast %1721 : f32 to vector<8x128xf32>
    %1723 = arith.mulf %1722, %1200 : vector<8x128xf32>
    %1724 = arith.addf %1708, %1723 : vector<8x128xf32>
    %c247 = arith.constant 247 : index
    %1725 = memref.load %arg1[%c247] : memref<332xf32, #tpu.memory_space<smem>>
    %1726 = vector.broadcast %1725 : f32 to vector<8x128xf32>
    %1727 = arith.mulf %1726, %1200 : vector<8x128xf32>
    %1728 = arith.addf %1712, %1727 : vector<8x128xf32>
    %c283 = arith.constant 283 : index
    %1729 = memref.load %arg1[%c283] : memref<332xf32, #tpu.memory_space<smem>>
    %1730 = vector.broadcast %1729 : f32 to vector<8x128xf32>
    %1731 = arith.mulf %1730, %1200 : vector<8x128xf32>
    %1732 = arith.addf %1716, %1731 : vector<8x128xf32>
    %c319 = arith.constant 319 : index
    %1733 = memref.load %arg1[%c319] : memref<332xf32, #tpu.memory_space<smem>>
    %1734 = vector.broadcast %1733 : f32 to vector<8x128xf32>
    %1735 = arith.mulf %1734, %1200 : vector<8x128xf32>
    %1736 = arith.addf %1720, %1735 : vector<8x128xf32>
    %c127_i32_288 = arith.constant 127 : i32
    %1737 = tpu.dynamic_rotate %1200 by %c127_i32_288 dim 1 : vector<8x128xf32>, i32 -> vector<8x128xf32>
    %c212 = arith.constant 212 : index
    %1738 = memref.load %arg1[%c212] : memref<332xf32, #tpu.memory_space<smem>>
    %1739 = vector.broadcast %1738 : f32 to vector<8x128xf32>
    %1740 = arith.mulf %1739, %1737 : vector<8x128xf32>
    %1741 = arith.addf %1724, %1740 : vector<8x128xf32>
    %c248 = arith.constant 248 : index
    %1742 = memref.load %arg1[%c248] : memref<332xf32, #tpu.memory_space<smem>>
    %1743 = vector.broadcast %1742 : f32 to vector<8x128xf32>
    %1744 = arith.mulf %1743, %1737 : vector<8x128xf32>
    %1745 = arith.addf %1728, %1744 : vector<8x128xf32>
    %c284 = arith.constant 284 : index
    %1746 = memref.load %arg1[%c284] : memref<332xf32, #tpu.memory_space<smem>>
    %1747 = vector.broadcast %1746 : f32 to vector<8x128xf32>
    %1748 = arith.mulf %1747, %1737 : vector<8x128xf32>
    %1749 = arith.addf %1732, %1748 : vector<8x128xf32>
    %c320 = arith.constant 320 : index
    %1750 = memref.load %arg1[%c320] : memref<332xf32, #tpu.memory_space<smem>>
    %1751 = vector.broadcast %1750 : f32 to vector<8x128xf32>
    %1752 = arith.mulf %1751, %1737 : vector<8x128xf32>
    %1753 = arith.addf %1736, %1752 : vector<8x128xf32>
    %c119_i32_289 = arith.constant 119 : i32
    %1754 = tpu.dynamic_rotate %1200 by %c119_i32_289 dim 1 : vector<8x128xf32>, i32 -> vector<8x128xf32>
    %c213 = arith.constant 213 : index
    %1755 = memref.load %arg1[%c213] : memref<332xf32, #tpu.memory_space<smem>>
    %1756 = vector.broadcast %1755 : f32 to vector<8x128xf32>
    %1757 = arith.mulf %1756, %1754 : vector<8x128xf32>
    %1758 = arith.addf %1741, %1757 : vector<8x128xf32>
    %c249 = arith.constant 249 : index
    %1759 = memref.load %arg1[%c249] : memref<332xf32, #tpu.memory_space<smem>>
    %1760 = vector.broadcast %1759 : f32 to vector<8x128xf32>
    %1761 = arith.mulf %1760, %1754 : vector<8x128xf32>
    %1762 = arith.addf %1745, %1761 : vector<8x128xf32>
    %c285 = arith.constant 285 : index
    %1763 = memref.load %arg1[%c285] : memref<332xf32, #tpu.memory_space<smem>>
    %1764 = vector.broadcast %1763 : f32 to vector<8x128xf32>
    %1765 = arith.mulf %1764, %1754 : vector<8x128xf32>
    %1766 = arith.addf %1749, %1765 : vector<8x128xf32>
    %c321 = arith.constant 321 : index
    %1767 = memref.load %arg1[%c321] : memref<332xf32, #tpu.memory_space<smem>>
    %1768 = vector.broadcast %1767 : f32 to vector<8x128xf32>
    %1769 = arith.mulf %1768, %1754 : vector<8x128xf32>
    %1770 = arith.addf %1753, %1769 : vector<8x128xf32>
    %c118_i32_290 = arith.constant 118 : i32
    %1771 = tpu.dynamic_rotate %1200 by %c118_i32_290 dim 1 : vector<8x128xf32>, i32 -> vector<8x128xf32>
    %c214 = arith.constant 214 : index
    %1772 = memref.load %arg1[%c214] : memref<332xf32, #tpu.memory_space<smem>>
    %1773 = vector.broadcast %1772 : f32 to vector<8x128xf32>
    %1774 = arith.mulf %1773, %1771 : vector<8x128xf32>
    %1775 = arith.addf %1758, %1774 : vector<8x128xf32>
    %c250 = arith.constant 250 : index
    %1776 = memref.load %arg1[%c250] : memref<332xf32, #tpu.memory_space<smem>>
    %1777 = vector.broadcast %1776 : f32 to vector<8x128xf32>
    %1778 = arith.mulf %1777, %1771 : vector<8x128xf32>
    %1779 = arith.addf %1762, %1778 : vector<8x128xf32>
    %c286 = arith.constant 286 : index
    %1780 = memref.load %arg1[%c286] : memref<332xf32, #tpu.memory_space<smem>>
    %1781 = vector.broadcast %1780 : f32 to vector<8x128xf32>
    %1782 = arith.mulf %1781, %1771 : vector<8x128xf32>
    %1783 = arith.addf %1766, %1782 : vector<8x128xf32>
    %c322 = arith.constant 322 : index
    %1784 = memref.load %arg1[%c322] : memref<332xf32, #tpu.memory_space<smem>>
    %1785 = vector.broadcast %1784 : f32 to vector<8x128xf32>
    %1786 = arith.mulf %1785, %1771 : vector<8x128xf32>
    %1787 = arith.addf %1770, %1786 : vector<8x128xf32>
    %c117_i32_291 = arith.constant 117 : i32
    %1788 = tpu.dynamic_rotate %1200 by %c117_i32_291 dim 1 : vector<8x128xf32>, i32 -> vector<8x128xf32>
    %c215 = arith.constant 215 : index
    %1789 = memref.load %arg1[%c215] : memref<332xf32, #tpu.memory_space<smem>>
    %1790 = vector.broadcast %1789 : f32 to vector<8x128xf32>
    %1791 = arith.mulf %1790, %1788 : vector<8x128xf32>
    %1792 = arith.addf %1775, %1791 : vector<8x128xf32>
    %c251 = arith.constant 251 : index
    %1793 = memref.load %arg1[%c251] : memref<332xf32, #tpu.memory_space<smem>>
    %1794 = vector.broadcast %1793 : f32 to vector<8x128xf32>
    %1795 = arith.mulf %1794, %1788 : vector<8x128xf32>
    %1796 = arith.addf %1779, %1795 : vector<8x128xf32>
    %c287 = arith.constant 287 : index
    %1797 = memref.load %arg1[%c287] : memref<332xf32, #tpu.memory_space<smem>>
    %1798 = vector.broadcast %1797 : f32 to vector<8x128xf32>
    %1799 = arith.mulf %1798, %1788 : vector<8x128xf32>
    %1800 = arith.addf %1783, %1799 : vector<8x128xf32>
    %c323 = arith.constant 323 : index
    %1801 = memref.load %arg1[%c323] : memref<332xf32, #tpu.memory_space<smem>>
    %1802 = vector.broadcast %1801 : f32 to vector<8x128xf32>
    %1803 = arith.mulf %1802, %1788 : vector<8x128xf32>
    %1804 = arith.addf %1787, %1803 : vector<8x128xf32>
    %c324 = arith.constant 324 : index
    %1805 = memref.load %arg1[%c324] : memref<332xf32, #tpu.memory_space<smem>>
    %c328 = arith.constant 328 : index
    %1806 = memref.load %arg1[%c328] : memref<332xf32, #tpu.memory_space<smem>>
    %1807 = arith.mulf %1792, %0 : vector<8x128xf32>
    %1808 = vector.shape_cast %1807 : vector<8x128xf32> to vector<1x8x128xf32>
    %cst_292 = arith.constant dense<0.000000e+00> : vector<1xf32>
    %1809 = vector.multi_reduction <add>, %1808, %cst_292 [1, 2] : vector<1x8x128xf32> to vector<1xf32>
    %1810 = vector.shape_cast %1809 : vector<1xf32> to vector<1x1x1xf32>
    %1811 = vector.extract %1810[0, 0, 0] : f32 from vector<1x1x1xf32>
    %1812 = arith.mulf %1807, %1792 : vector<8x128xf32>
    %1813 = vector.shape_cast %1812 : vector<8x128xf32> to vector<1x8x128xf32>
    %cst_293 = arith.constant dense<0.000000e+00> : vector<1xf32>
    %1814 = vector.multi_reduction <add>, %1813, %cst_293 [1, 2] : vector<1x8x128xf32> to vector<1xf32>
    %1815 = vector.shape_cast %1814 : vector<1xf32> to vector<1x1x1xf32>
    %1816 = vector.extract %1815[0, 0, 0] : f32 from vector<1x1x1xf32>
    %cst_294 = arith.constant 3.906250e-03 : f32
    %1817 = arith.mulf %1811, %cst_294 : f32
    %cst_295 = arith.constant 3.906250e-03 : f32
    %1818 = arith.mulf %1816, %cst_295 : f32
    %1819 = arith.mulf %1817, %1817 : f32
    %1820 = arith.subf %1818, %1819 : f32
    %cst_296 = arith.constant 0.000000e+00 : f32
    %1821 = arith.maximumf %1820, %cst_296 : f32
    %1822 = vector.broadcast %1817 : f32 to vector<8x128xf32>
    %1823 = arith.subf %1792, %1822 : vector<8x128xf32>
    %cst_297 = arith.constant 9.99999974E-6 : f32
    %1824 = arith.addf %1821, %cst_297 : f32
    %1825 = math.rsqrt %1824 : f32
    %1826 = vector.broadcast %1825 : f32 to vector<8x128xf32>
    %1827 = arith.mulf %1823, %1826 : vector<8x128xf32>
    %1828 = vector.broadcast %1805 : f32 to vector<8x128xf32>
    %1829 = arith.mulf %1828, %1827 : vector<8x128xf32>
    %1830 = vector.broadcast %1806 : f32 to vector<8x128xf32>
    %1831 = arith.addf %1829, %1830 : vector<8x128xf32>
    %cst_298 = arith.constant 0.000000e+00 : f32
    %1832 = vector.broadcast %cst_298 : f32 to vector<8x128xf32>
    %1833 = arith.cmpf ogt, %1831, %1832 : vector<8x128xf32>
    %cst_299 = arith.constant 0.000000e+00 : f32
    %1834 = vector.broadcast %cst_299 : f32 to vector<8x128xf32>
    %1835 = arith.minimumf %1831, %1834 : vector<8x128xf32>
    %1836 = math.exp %1835 : vector<8x128xf32>
    %cst_300 = arith.constant 1.000000e+00 : f32
    %1837 = vector.broadcast %cst_300 : f32 to vector<8x128xf32>
    %1838 = arith.subf %1836, %1837 : vector<8x128xf32>
    %1839 = arith.select %1833, %1831, %1838 : vector<8x128xi1>, vector<8x128xf32>
    %1840 = arith.mulf %1839, %0 : vector<8x128xf32>
    %c325 = arith.constant 325 : index
    %1841 = memref.load %arg1[%c325] : memref<332xf32, #tpu.memory_space<smem>>
    %c329 = arith.constant 329 : index
    %1842 = memref.load %arg1[%c329] : memref<332xf32, #tpu.memory_space<smem>>
    %1843 = arith.mulf %1796, %0 : vector<8x128xf32>
    %1844 = vector.shape_cast %1843 : vector<8x128xf32> to vector<1x8x128xf32>
    %cst_301 = arith.constant dense<0.000000e+00> : vector<1xf32>
    %1845 = vector.multi_reduction <add>, %1844, %cst_301 [1, 2] : vector<1x8x128xf32> to vector<1xf32>
    %1846 = vector.shape_cast %1845 : vector<1xf32> to vector<1x1x1xf32>
    %1847 = vector.extract %1846[0, 0, 0] : f32 from vector<1x1x1xf32>
    %1848 = arith.mulf %1843, %1796 : vector<8x128xf32>
    %1849 = vector.shape_cast %1848 : vector<8x128xf32> to vector<1x8x128xf32>
    %cst_302 = arith.constant dense<0.000000e+00> : vector<1xf32>
    %1850 = vector.multi_reduction <add>, %1849, %cst_302 [1, 2] : vector<1x8x128xf32> to vector<1xf32>
    %1851 = vector.shape_cast %1850 : vector<1xf32> to vector<1x1x1xf32>
    %1852 = vector.extract %1851[0, 0, 0] : f32 from vector<1x1x1xf32>
    %cst_303 = arith.constant 3.906250e-03 : f32
    %1853 = arith.mulf %1847, %cst_303 : f32
    %cst_304 = arith.constant 3.906250e-03 : f32
    %1854 = arith.mulf %1852, %cst_304 : f32
    %1855 = arith.mulf %1853, %1853 : f32
    %1856 = arith.subf %1854, %1855 : f32
    %cst_305 = arith.constant 0.000000e+00 : f32
    %1857 = arith.maximumf %1856, %cst_305 : f32
    %1858 = vector.broadcast %1853 : f32 to vector<8x128xf32>
    %1859 = arith.subf %1796, %1858 : vector<8x128xf32>
    %cst_306 = arith.constant 9.99999974E-6 : f32
    %1860 = arith.addf %1857, %cst_306 : f32
    %1861 = math.rsqrt %1860 : f32
    %1862 = vector.broadcast %1861 : f32 to vector<8x128xf32>
    %1863 = arith.mulf %1859, %1862 : vector<8x128xf32>
    %1864 = vector.broadcast %1841 : f32 to vector<8x128xf32>
    %1865 = arith.mulf %1864, %1863 : vector<8x128xf32>
    %1866 = vector.broadcast %1842 : f32 to vector<8x128xf32>
    %1867 = arith.addf %1865, %1866 : vector<8x128xf32>
    %cst_307 = arith.constant 0.000000e+00 : f32
    %1868 = vector.broadcast %cst_307 : f32 to vector<8x128xf32>
    %1869 = arith.cmpf ogt, %1867, %1868 : vector<8x128xf32>
    %cst_308 = arith.constant 0.000000e+00 : f32
    %1870 = vector.broadcast %cst_308 : f32 to vector<8x128xf32>
    %1871 = arith.minimumf %1867, %1870 : vector<8x128xf32>
    %1872 = math.exp %1871 : vector<8x128xf32>
    %cst_309 = arith.constant 1.000000e+00 : f32
    %1873 = vector.broadcast %cst_309 : f32 to vector<8x128xf32>
    %1874 = arith.subf %1872, %1873 : vector<8x128xf32>
    %1875 = arith.select %1869, %1867, %1874 : vector<8x128xi1>, vector<8x128xf32>
    %1876 = arith.mulf %1875, %0 : vector<8x128xf32>
    %c326 = arith.constant 326 : index
    %1877 = memref.load %arg1[%c326] : memref<332xf32, #tpu.memory_space<smem>>
    %c330 = arith.constant 330 : index
    %1878 = memref.load %arg1[%c330] : memref<332xf32, #tpu.memory_space<smem>>
    %1879 = arith.mulf %1800, %0 : vector<8x128xf32>
    %1880 = vector.shape_cast %1879 : vector<8x128xf32> to vector<1x8x128xf32>
    %cst_310 = arith.constant dense<0.000000e+00> : vector<1xf32>
    %1881 = vector.multi_reduction <add>, %1880, %cst_310 [1, 2] : vector<1x8x128xf32> to vector<1xf32>
    %1882 = vector.shape_cast %1881 : vector<1xf32> to vector<1x1x1xf32>
    %1883 = vector.extract %1882[0, 0, 0] : f32 from vector<1x1x1xf32>
    %1884 = arith.mulf %1879, %1800 : vector<8x128xf32>
    %1885 = vector.shape_cast %1884 : vector<8x128xf32> to vector<1x8x128xf32>
    %cst_311 = arith.constant dense<0.000000e+00> : vector<1xf32>
    %1886 = vector.multi_reduction <add>, %1885, %cst_311 [1, 2] : vector<1x8x128xf32> to vector<1xf32>
    %1887 = vector.shape_cast %1886 : vector<1xf32> to vector<1x1x1xf32>
    %1888 = vector.extract %1887[0, 0, 0] : f32 from vector<1x1x1xf32>
    %cst_312 = arith.constant 3.906250e-03 : f32
    %1889 = arith.mulf %1883, %cst_312 : f32
    %cst_313 = arith.constant 3.906250e-03 : f32
    %1890 = arith.mulf %1888, %cst_313 : f32
    %1891 = arith.mulf %1889, %1889 : f32
    %1892 = arith.subf %1890, %1891 : f32
    %cst_314 = arith.constant 0.000000e+00 : f32
    %1893 = arith.maximumf %1892, %cst_314 : f32
    %1894 = vector.broadcast %1889 : f32 to vector<8x128xf32>
    %1895 = arith.subf %1800, %1894 : vector<8x128xf32>
    %cst_315 = arith.constant 9.99999974E-6 : f32
    %1896 = arith.addf %1893, %cst_315 : f32
    %1897 = math.rsqrt %1896 : f32
    %1898 = vector.broadcast %1897 : f32 to vector<8x128xf32>
    %1899 = arith.mulf %1895, %1898 : vector<8x128xf32>
    %1900 = vector.broadcast %1877 : f32 to vector<8x128xf32>
    %1901 = arith.mulf %1900, %1899 : vector<8x128xf32>
    %1902 = vector.broadcast %1878 : f32 to vector<8x128xf32>
    %1903 = arith.addf %1901, %1902 : vector<8x128xf32>
    %cst_316 = arith.constant 0.000000e+00 : f32
    %1904 = vector.broadcast %cst_316 : f32 to vector<8x128xf32>
    %1905 = arith.cmpf ogt, %1903, %1904 : vector<8x128xf32>
    %cst_317 = arith.constant 0.000000e+00 : f32
    %1906 = vector.broadcast %cst_317 : f32 to vector<8x128xf32>
    %1907 = arith.minimumf %1903, %1906 : vector<8x128xf32>
    %1908 = math.exp %1907 : vector<8x128xf32>
    %cst_318 = arith.constant 1.000000e+00 : f32
    %1909 = vector.broadcast %cst_318 : f32 to vector<8x128xf32>
    %1910 = arith.subf %1908, %1909 : vector<8x128xf32>
    %1911 = arith.select %1905, %1903, %1910 : vector<8x128xi1>, vector<8x128xf32>
    %1912 = arith.mulf %1911, %0 : vector<8x128xf32>
    %c327 = arith.constant 327 : index
    %1913 = memref.load %arg1[%c327] : memref<332xf32, #tpu.memory_space<smem>>
    %c331 = arith.constant 331 : index
    %1914 = memref.load %arg1[%c331] : memref<332xf32, #tpu.memory_space<smem>>
    %1915 = arith.mulf %1804, %0 : vector<8x128xf32>
    %1916 = vector.shape_cast %1915 : vector<8x128xf32> to vector<1x8x128xf32>
    %cst_319 = arith.constant dense<0.000000e+00> : vector<1xf32>
    %1917 = vector.multi_reduction <add>, %1916, %cst_319 [1, 2] : vector<1x8x128xf32> to vector<1xf32>
    %1918 = vector.shape_cast %1917 : vector<1xf32> to vector<1x1x1xf32>
    %1919 = vector.extract %1918[0, 0, 0] : f32 from vector<1x1x1xf32>
    %1920 = arith.mulf %1915, %1804 : vector<8x128xf32>
    %1921 = vector.shape_cast %1920 : vector<8x128xf32> to vector<1x8x128xf32>
    %cst_320 = arith.constant dense<0.000000e+00> : vector<1xf32>
    %1922 = vector.multi_reduction <add>, %1921, %cst_320 [1, 2] : vector<1x8x128xf32> to vector<1xf32>
    %1923 = vector.shape_cast %1922 : vector<1xf32> to vector<1x1x1xf32>
    %1924 = vector.extract %1923[0, 0, 0] : f32 from vector<1x1x1xf32>
    %cst_321 = arith.constant 3.906250e-03 : f32
    %1925 = arith.mulf %1919, %cst_321 : f32
    %cst_322 = arith.constant 3.906250e-03 : f32
    %1926 = arith.mulf %1924, %cst_322 : f32
    %1927 = arith.mulf %1925, %1925 : f32
    %1928 = arith.subf %1926, %1927 : f32
    %cst_323 = arith.constant 0.000000e+00 : f32
    %1929 = arith.maximumf %1928, %cst_323 : f32
    %1930 = vector.broadcast %1925 : f32 to vector<8x128xf32>
    %1931 = arith.subf %1804, %1930 : vector<8x128xf32>
    %cst_324 = arith.constant 9.99999974E-6 : f32
    %1932 = arith.addf %1929, %cst_324 : f32
    %1933 = math.rsqrt %1932 : f32
    %1934 = vector.broadcast %1933 : f32 to vector<8x128xf32>
    %1935 = arith.mulf %1931, %1934 : vector<8x128xf32>
    %1936 = vector.broadcast %1913 : f32 to vector<8x128xf32>
    %1937 = arith.mulf %1936, %1935 : vector<8x128xf32>
    %1938 = vector.broadcast %1914 : f32 to vector<8x128xf32>
    %1939 = arith.addf %1937, %1938 : vector<8x128xf32>
    %cst_325 = arith.constant 0.000000e+00 : f32
    %1940 = vector.broadcast %cst_325 : f32 to vector<8x128xf32>
    %1941 = arith.cmpf ogt, %1939, %1940 : vector<8x128xf32>
    %cst_326 = arith.constant 0.000000e+00 : f32
    %1942 = vector.broadcast %cst_326 : f32 to vector<8x128xf32>
    %1943 = arith.minimumf %1939, %1942 : vector<8x128xf32>
    %1944 = math.exp %1943 : vector<8x128xf32>
    %cst_327 = arith.constant 1.000000e+00 : f32
    %1945 = vector.broadcast %cst_327 : f32 to vector<8x128xf32>
    %1946 = arith.subf %1944, %1945 : vector<8x128xf32>
    %1947 = arith.select %1941, %1939, %1946 : vector<8x128xi1>, vector<8x128xf32>
    %1948 = arith.mulf %1947, %0 : vector<8x128xf32>
    %1949 = arith.addf %1840, %2 : vector<8x128xf32>
    %c4_i32 = arith.constant 4 : i32
    %1950 = arith.muli %arg0, %c4_i32 : i32
    %c0_i32 = arith.constant 0 : i32
    %1951 = arith.addi %1950, %c0_i32 : i32
    %1952 = arith.index_cast %1951 : i32 to index
    %1953 = memref.load %arg2[%1952] : memref<8xf32, #tpu.memory_space<smem>>
    %1954 = vector.broadcast %1953 : f32 to vector<8x128xf32>
    %1955 = arith.addf %1949, %1954 : vector<8x128xf32>
    %c0_328 = arith.constant 0 : index
    %c0_329 = arith.constant 0 : index
    %c0_330 = arith.constant 0 : index
    %c0_331 = arith.constant 0 : index
    %1956 = vector.load %arg5[%c0_328, %c0_329, %c0_330, %c0_331] : memref<1x4x8x128xf32, #tpu.memory_space<vmem>>, vector<1x1x8x128xf32>
    %1957 = vector.shape_cast %1956 : vector<1x1x8x128xf32> to vector<8x128xf32>
    %1958 = vector.shape_cast %1955 : vector<8x128xf32> to vector<1x1x8x128xf32>
    tpu.vector_store %arg5[%c0_328, %c0_329, %c0_330, %c0_331], %1958 {strides = array<i32>} : memref<1x4x8x128xf32, #tpu.memory_space<vmem>>, vector<1x1x8x128xf32>,
    %1959 = arith.addf %1876, %4 : vector<8x128xf32>
    %c4_i32_332 = arith.constant 4 : i32
    %1960 = arith.muli %arg0, %c4_i32_332 : i32
    %c1_i32_333 = arith.constant 1 : i32
    %1961 = arith.addi %1960, %c1_i32_333 : i32
    %1962 = arith.index_cast %1961 : i32 to index
    %1963 = memref.load %arg2[%1962] : memref<8xf32, #tpu.memory_space<smem>>
    %1964 = vector.broadcast %1963 : f32 to vector<8x128xf32>
    %1965 = arith.addf %1959, %1964 : vector<8x128xf32>
    %c0_334 = arith.constant 0 : index
    %c1_335 = arith.constant 1 : index
    %c0_336 = arith.constant 0 : index
    %c0_337 = arith.constant 0 : index
    %1966 = vector.load %arg5[%c0_334, %c1_335, %c0_336, %c0_337] : memref<1x4x8x128xf32, #tpu.memory_space<vmem>>, vector<1x1x8x128xf32>
    %1967 = vector.shape_cast %1966 : vector<1x1x8x128xf32> to vector<8x128xf32>
    %1968 = vector.shape_cast %1965 : vector<8x128xf32> to vector<1x1x8x128xf32>
    tpu.vector_store %arg5[%c0_334, %c1_335, %c0_336, %c0_337], %1968 {strides = array<i32>} : memref<1x4x8x128xf32, #tpu.memory_space<vmem>>, vector<1x1x8x128xf32>,
    %1969 = arith.addf %1912, %6 : vector<8x128xf32>
    %c4_i32_338 = arith.constant 4 : i32
    %1970 = arith.muli %arg0, %c4_i32_338 : i32
    %c2_i32 = arith.constant 2 : i32
    %1971 = arith.addi %1970, %c2_i32 : i32
    %1972 = arith.index_cast %1971 : i32 to index
    %1973 = memref.load %arg2[%1972] : memref<8xf32, #tpu.memory_space<smem>>
    %1974 = vector.broadcast %1973 : f32 to vector<8x128xf32>
    %1975 = arith.addf %1969, %1974 : vector<8x128xf32>
    %c0_339 = arith.constant 0 : index
    %c2_340 = arith.constant 2 : index
    %c0_341 = arith.constant 0 : index
    %c0_342 = arith.constant 0 : index
    %1976 = vector.load %arg5[%c0_339, %c2_340, %c0_341, %c0_342] : memref<1x4x8x128xf32, #tpu.memory_space<vmem>>, vector<1x1x8x128xf32>
    %1977 = vector.shape_cast %1976 : vector<1x1x8x128xf32> to vector<8x128xf32>
    %1978 = vector.shape_cast %1975 : vector<8x128xf32> to vector<1x1x8x128xf32>
    tpu.vector_store %arg5[%c0_339, %c2_340, %c0_341, %c0_342], %1978 {strides = array<i32>} : memref<1x4x8x128xf32, #tpu.memory_space<vmem>>, vector<1x1x8x128xf32>,
    %1979 = arith.addf %1948, %8 : vector<8x128xf32>
    %c4_i32_343 = arith.constant 4 : i32
    %1980 = arith.muli %arg0, %c4_i32_343 : i32
    %c3_i32 = arith.constant 3 : i32
    %1981 = arith.addi %1980, %c3_i32 : i32
    %1982 = arith.index_cast %1981 : i32 to index
    %1983 = memref.load %arg2[%1982] : memref<8xf32, #tpu.memory_space<smem>>
    %1984 = vector.broadcast %1983 : f32 to vector<8x128xf32>
    %1985 = arith.addf %1979, %1984 : vector<8x128xf32>
    %c0_344 = arith.constant 0 : index
    %c3_345 = arith.constant 3 : index
    %c0_346 = arith.constant 0 : index
    %c0_347 = arith.constant 0 : index
    %1986 = vector.load %arg5[%c0_344, %c3_345, %c0_346, %c0_347] : memref<1x4x8x128xf32, #tpu.memory_space<vmem>>, vector<1x1x8x128xf32>
    %1987 = vector.shape_cast %1986 : vector<1x1x8x128xf32> to vector<8x128xf32>
    %1988 = vector.shape_cast %1985 : vector<8x128xf32> to vector<1x1x8x128xf32>
    tpu.vector_store %arg5[%c0_344, %c3_345, %c0_346, %c0_347], %1988 {strides = array<i32>} : memref<1x4x8x128xf32, #tpu.memory_space<vmem>>, vector<1x1x8x128xf32>,
    return
  }
  func.func @transform_0(%arg0: i32) -> i32 {
    %c0_i32 = arith.constant 0 : i32
    %c0_i32_0 = arith.constant 0 : i32
    return %c0_i32 : i32
  }
  func.func @transform_1(%arg0: i32) -> i32 {
    %c0_i32 = arith.constant 0 : i32
    %c0_i32_0 = arith.constant 0 : i32
    return %c0_i32 : i32
  }
  func.func @transform_2(%arg0: i32) -> (i32, i32, i32, i32) {
    %c0_i32 = arith.constant 0 : i32
    %c0_i32_0 = arith.constant 0 : i32
    %c0_i32_1 = arith.constant 0 : i32
    %c0_i32_2 = arith.constant 0 : i32
    return %arg0, %c0_i32, %c0_i32_0, %c0_i32_1 : i32, i32, i32, i32
  }
  func.func @transform_3(%arg0: i32) -> (i32, i32) {
    %c0_i32 = arith.constant 0 : i32
    %c0_i32_0 = arith.constant 0 : i32
    %c0_i32_1 = arith.constant 0 : i32
    return %c0_i32, %c0_i32_0 : i32, i32
  }
  func.func @transform_4(%arg0: i32) -> (i32, i32, i32, i32) {
    %c0_i32 = arith.constant 0 : i32
    %c0_i32_0 = arith.constant 0 : i32
    %c0_i32_1 = arith.constant 0 : i32
    %c0_i32_2 = arith.constant 0 : i32
    return %arg0, %c0_i32, %c0_i32_0, %c0_i32_1 : i32, i32, i32, i32
  }
}

</mosaic_0001>

<bundles_post_ra>
// kernel: tpu_custom_call.1
= control target key start
LH: loop header
LB: loop body
LE: loop exit
PB: predicated region body
PF: predicated region fallthrough
CT: control target
= control target key end

     0   :  { %s4656_s0 = inlined_call_operand.hbm [shape: f32[332], index: 0, kind: input, shape index: {}]   ;;  %s4657_s1 = inlined_call_operand.vmem [shape: f32[8], index: 1, kind: input, shape index: {}]   ;;  %s4658_s2 = inlined_call_operand.hbm [shape: f32[2,4,8,128], index: 2, kind: input, shape index: {}]   ;;  %s4659_s3 = inlined_call_operand.vmem [shape: f32[8,128], index: 3, kind: input, shape index: {}]   ;;  %s4660_s4 = inlined_call_operand.hbm [shape: f32[2,4,8,128], index: 4, kind: output, shape index: {}]  }
   0x1   :  { %4692 = sst [smem:[#allocation21_spill]] %s4656_s0 }
   0x2   :  { %4693 = sst [smem:[#allocation22_spill]] %s4657_s1 }
   0x3   :  { %4694 = sst [smem:[#allocation23_spill]] %s4658_s2 }
   0x4   :  { %4695 = sst [smem:[#allocation24_spill]] %s4660_s4 }
   0x5   :  { %9 = vsyncpa [#allocation5], 0 }
   0x6   :  { %10 = vsyncpa [#allocation6], 0 }
   0x7   :  { %11 = vsyncpa [#allocation3], 0 }
   0x8   :  { %13 = vsyncpa [#allocation3 + $0x1], 0 }
   0x9   :  { %14 = vsyncpa [#allocation4], 0 }
   0xa   :  { %16 = vsyncpa [#allocation4 + $0x1], 0  ;;  %s3452_s15 = smov 0   ;;  %s3454_s16 = smov 0  }
   0xb   :  { %s3456_s17 = smov 0   ;;  %s3458_s18 = smov 0  }
   0xc LB: > { %4696 = sst [smem:[#allocation14_spill]] %s3396_s15  ;;  %s3473_s19 = sadd.s32 4294967295, %s3408_s18   ;;  %s3408_s18 = sphi %s3458_s18, %s4737_s18   ;;  %s3404_s17 = sphi %s3456_s17, %s4740_s17   ;;  %s3400_s16 = sphi %s3454_s16, %s4739_s16   ;;  %s3396_s15 = sphi %s3452_s15, %s4738_s15  }
   0xd   : > { %4697 = sst [smem:[#allocation15_spill]] %s3400_s16  ;;  %s2651_s20 = sadd.s32 4294967294, %s3408_s18  }
   0xe   : > { %4698 = sst [smem:[#allocation16_spill]] %s3404_s17  ;;  %s3477_s21 = sadd.s32 1, %s3408_s18  }
   0xf   : > { %4699 = sst [smem:[#allocation17_spill]] %s3408_s18  ;;  %s71_s22 = sadd.s32 1, %s3404_s17 }
  0x10   : > { %4700 = sst [smem:[#allocation18_spill]] %s3477_s21  ;;  %s68_s23 = ssub.s32 %s3408_s18, %s3477_s21 }
  0x11   : > { %p78_p0 = scmp.ne.s32.totalorder %s3404_s17, %s3400_s16  ;;  %p69_p1 = scmp.eq.s32.totalorder %s68_s23, 0 }
  0x12   : > { %p79_p2 = scmp.eq.s32.totalorder %s3408_s18, 0  ;;  %p84_p3 = scmp.ne.s32.totalorder %s3400_s16, %s3396_s15 }
  0x13   : > { %p4661_p4 = scmp.eq.s32.totalorder %s3473_s19, 0  ;;  %p129_p7 = scmp.eq.s32.totalorder %s3473_s19, 1 }
  0x14   : > { %s3489_s24 = scalar_select %p69_p1, %s3404_s17, %s71_s22  }
  0x15   : > { %p3491_p5 = por %p79_p2, %p78_p0  ;;  %p3497_p6 = por %p4661_p4, %p84_p3 }
  0x16   : > { %4701 = sst [smem:[#allocation19_spill]] %s3489_s24  ;;  %p135_p8 = scmp.eq.s32.totalorder %s2651_s20, 1 }
  0x17   : > { %s4703_s26 = scalar_select %p3497_p6, 1, 0 }
  0x18   : > { %p2652_p9 = scmp.ge.s32.totalorder %s3408_s18, 1  ;;  %p142_p10 = scmp.lt.s32.totalorder %s3408_s18, 3 }
  0x19   : > { %p3504_p11 = por %p129_p7, %p78_p0  ;;  %p3508_p12 = por %p135_p8, %p84_p3 }
  0x1a   : > { %p3512_p13 = pnand %p2652_p9, %p142_p10  ;;  %p3150_p4 = scmp.lt.s32.totalorder %s3408_s18, 2 }
  0x1b   : > { %s4704_s27 = scalar_select %p3504_p11, 1, 0 }
  0x1c   : > { %s4705_s28 = scalar_select %p3508_p12, 1, 0 }
  0x1d   : > { %s4707_s29 = scalar_select %p3512_p13, 1, 0 }
  0x1e   : > { %4706 = sst [smem:[#allocation20_spill]] %s4705_s28  ;;  %p3133_p2 = pneg %p3512_p13 }
  0x1f   : > { %s4708_s1 = sld [smem:[#allocation22_spill]]  ;;  %p4709_p0 = scmp.eq.s32.totalorder %s3473_s19, 0 }
  0x20   : > { %p3531_p3 = pnand %p3150_p4, %p3491_p5  ;;  %s178_s9 = sand.u32 1, %s3404_s17  }
  0x21   : > { %p3525_p7 = pnand %p3133_p2, %p4709_p0  ;;  %s4712_s0 = sld [smem:[#allocation21_spill]] }
  0x23   : > { %p3278_p9 = pneg %p3525_p7 }
  0x25   : > { %s164_s6 = sshll.u32 %s4708_s1, 4  ;;  %s165_s6 = int_to_ptr.vmem [resolvable:$true] %s164_s6 }
  0x27   : > { %s3276_s12 = scalar_lea.hbm %s4712_s0, 48  ;;  %s3281_s23 = scalar_lea.hbm %s4712_s0, 64 }
  0x28   : > { %p3277_p8 = scmp.ne.s32.totalorder %s4712_s0, %s3276_s12  ;;  %p3282_p4 = scmp.lt.u32.totalorder %s3281_s23, %s3276_s12 }
  0x29   : > { %p3283_p5 = scmp.lt.u32.totalorder %s3276_s12, %s4712_s0 }
  0x2a   : > { %p3279_p10 = pnand %p3278_p9, %p3277_p8 }
  0x2b   : > { %p3284_p0 = por %p3283_p5, %p3282_p4 }
  0x2c   : > { %p3280_p2 = pneg %p3279_p10 }
  0x2e   : > { %p3285_p1 = pnand %p3284_p0, %p3280_p2 }
  0x30   : > { %3288 = shalt.err (!%p3285_p1)
}
  0x31   : > { %s3410_s5 = smov [#allocation2]   ;;  %s3289_s13 = scalar_lea.vmem %s165_s6, 16 }
  0x32   : > { %3136 = dma.hbm_to_smem (!%p3525_p7), %s4712_s0, 48, %s3410_s5, [#allocation5]  }
  0x33   : > { %p3290_p8 = scmp.ne.s32.totalorder %s165_s6, %s3289_s13  ;;  %p3297_p11 = scmp.lt.s32.totalorder %s165_s6, %s165_s6 }
  0x34   : > { %p3298_p6 = scmp.lt.s32.totalorder %s3289_s13, %s3289_s13 }
  0x35   : > { %p3292_p10 = pnand %p3290_p8, %p3278_p9 }
  0x36   : > { %p3299_p13 = por %p3298_p6, %p3297_p11 }
  0x37   : > { %p3293_p12 = pneg %p3292_p10 }
  0x39   : > { %p3300_p4 = pnand %p3299_p13, %p3293_p12 }
  0x3b   : > { %3303 = shalt.err (!%p3300_p4)
}
  0x3c   : > { %s3411_s12 = smov [#allocation7]   ;;  %s2656_s14 = sshll.u32 %s178_s9, 5 }
  0x3d   : > { %3139 = dma.vmem_to_smem (!%p3525_p7), %s165_s6, 16, %s3411_s12, [#allocation6]  }
  0x3e   : > { %s3023_s20 = sshll.u32 %s3408_s18, 9  ;;  %s4713_s2 = sld [smem:[#allocation23_spill]] }
  0x3f   : > { %s182_s30 = scalar_lea.vmem [#allocation8], %s2656_s14  ;;  %s3575_s5 = scalar_lea.sflag [#allocation3], %s178_s9 }
  0x40   : > { %s189_s7 = sshll.u32 %s182_s30, 4  ;;  %p3306_p11 = pneg %p3531_p3  ;;  %s3571_s7 = int_to_ptr.vmem [resolvable:$true] %s189_s7 }
  0x44   : > { %s3569_s25 = scalar_lea.hbm %s4713_s2, %s3023_s20  ;;  %s3309_s13 = scalar_lea.hbm %s4713_s2, 1024 }
  0x45   : > { %s3304_s6 = scalar_lea.hbm %s3569_s25, 512  ;;  %p3310_p1 = scmp.lt.u32.totalorder %s3569_s25, %s4713_s2 }
  0x46   : > { %p3305_p6 = scmp.ne.s32.totalorder %s3569_s25, %s3304_s6  ;;  %p3311_p7 = scmp.lt.u32.totalorder %s3309_s13, %s3304_s6 }
  0x47   : > { %p3313_p2 = scmp.lt.u32.totalorder %s3304_s6, %s3569_s25 }
  0x48   : > { %p3307_p12 = pnand %p3306_p11, %p3305_p6  ;;  %p3312_p9 = por %p3311_p7, %p3310_p1 }
  0x4a   : > { %p3308_p13 = pneg %p3307_p12  ;;  %p3314_p5 = por %p3313_p2, %p3312_p9 }
  0x4c   : > { %p3315_p0 = pnand %p3314_p5, %p3308_p13 }
  0x4e   : > { %3318 = shalt.err (!%p3315_p0)
}
  0x4f   : > { %s3319_s9 = scalar_lea.vmem %s3571_s7, 512  ;;  %s3412_s20 = smov [#allocation8]  }
  0x50   : > { %p3320_p8 = scmp.ne.s32.totalorder %s3571_s7, %s3319_s9  ;;  %s3324_s22 = sshll.u32 %s3412_s20, 4  ;;  %s3325_s22 = int_to_ptr.vmem [resolvable:$false] %s3324_s22 }
  0x51   : > { %s3326_s23 = scalar_lea.vmem %s3325_s22, 1024  ;;  %p3327_p6 = scmp.lt.s32.totalorder %s3571_s7, %s3325_s22 }
  0x52   : > { %p3322_p10 = pnand %p3320_p8, %p3306_p11  ;;  %p3328_p12 = scmp.lt.s32.totalorder %s3326_s23, %s3319_s9 }
  0x54   : > { %p3323_p4 = pneg %p3322_p10  ;;  %p3329_p1 = por %p3328_p12, %p3327_p6 }
  0x56   : > { %p3330_p7 = pnand %p3329_p1, %p3323_p4 }
  0x58   : > { %3333 = shalt.err (!%p3330_p7)
}
  0x59   : > { %s3413_s30 = smov 128   ;;  %s3414_s6 = smov 8  }
  0x5a   : > { %3143 = dma.hbm_to_vmem [thread:$0]  (!%p3531_p3), %s3569_s25, 512, %s3571_s7, %s3575_s5, %s3413_s30, %s3413_s30, %s3414_s6  }
  0x5b   : > { %p4714_p11 = scmp.ne.s32.totalorder %s4707_s29, 0 }
  0x5c   : > { %p4715_p13 = scmp.eq.s32.totalorder (!%p4714_p11), %s3473_s19, 0 }
  0x5d   : > { %201 = sbr.rel (%p4714_p11) target bundleno = 5345 (0x14e1), region = 36 }
  0x64   : > { %3379 = dma.done.wait (%p4715_p13), [#allocation5], 48   ;;  %p4716_p9 = pmov %p4715_p13 }
  0x66   : > { %3381 = vsyncadd (%p4716_p9), [#allocation5], 4294967248  ;;  %p4717_p2 = pmov %p4716_p9 }
  0x68   : > { %3383 = dma.done.wait (%p4717_p2), [#allocation6], 16   ;;  %p4718_p5 = pmov %p4717_p2 }
  0x69   : > { %s3614_s10 = sand.u32 1, %s3400_s16   ;;  %p4719_p3 = scmp.ne.s32.totalorder %s4703_s26, 0 }
  0x6a   : > { %3385 = vsyncadd (%p4718_p5), [#allocation6], 4294967280  ;;  %s4665_s29 = sshll.u32 %s3614_s10, 5  ;;  %s212_s8 = scalar_lea.sflag [#allocation3], %s3614_s10 }
  0x6b   : > { %s3620_s25 = scalar_lea.vmem [#allocation8], %s4665_s29 }
  0x6c   : > { %3387 = dma.done.wait (%p4719_p3), %s212_s8, 512  }
  0x6d   : > { %3389 = vsyncadd (%p4719_p3), %s212_s8, 4294966784 }
  0x6e   : > { %220 = sfence }
  0x6f   : > { %v242_v0 = vld [vmem:[%s3620_s25] sm:$0xff]  ;;  %s4676_s7 = smov 11   ;;  %s4672_s5 = smov 9   ;;  %v3638_v34 = vld [vmem:[%s4659_s3] sm:$0xff] }
  0x70   : > { %249 = vrot.lane.b32.xlu0 %v242_v0, %s4676_s7  ;;  %260 = vrot.lane.b32.xlu1 %v242_v0, %s4672_s5  ;;  %s4678_s11 = smov 10   ;;  %s4674_s13 = smov 1  }
  0x71   : > { %s4666_s12 = smov 127   ;;  %s4670_s26 = smov 119  }
  0x72   : > { %s4680_s14 = smov 118   ;;  %s4668_s9 = smov 117  }
  0x73   : > { %s251_s20 = sld [smem:[#allocation2]]  ;;  %s2667_s22 = sld [smem:[#allocation2 + $0x1]] }
  0x74   : > { %254 = vrot.lane.b32.xlu0 %v242_v0, %s4678_s11  ;;  %266 = vrot.lane.b32.xlu1 %v242_v0, %s4674_s13  ;;  %s2668_s23 = sld [smem:[#allocation2 + $0x2]]  ;;  %s2669_s30 = sld [smem:[#allocation2 + $0x3]] }
  0x75   : > { %s2670_s6 = sld [smem:[#allocation2 + $0x4]]  ;;  %s2671_s8 = sld [smem:[#allocation2 + $0x5]] }
  0x76   : > { %s2672_s29 = sld [smem:[#allocation2 + $0x6]]  ;;  %s2676_s5 = sld [smem:[#allocation2 + $0xa]] }
  0x77   : > { %s2723_s1 = sld [smem:[#allocation2 + $0x36]]  ;;  %s2724_s2 = sld [smem:[#allocation2 + $0x37]] }
  0x78   : > { %276 = vrot.lane.b32.xlu0 %v242_v0, %s4666_s12  ;;  %282 = vrot.lane.b32.xlu1 %v242_v0, %s4670_s26  ;;  %s2673_s12 = sld [smem:[#allocation2 + $0x7]]  ;;  %s2675_s26 = sld [smem:[#allocation2 + $0x9]] }
  0x79   : > { %v252_v3 = vstv %s251_s20  ;;  %v257_v4 = vstv %s2667_s22  ;;  %s2730_s17 = sld [smem:[#allocation2 + $0x3c]]  ;;  %s2765_s21 = sld [smem:[#allocation2 + $0x5d]] }
  0x7a   : > { %v263_v5 = vstv %s2668_s23  ;;  %v269_v7 = vstv %s2669_s30  ;;  %s2766_s18 = sld [smem:[#allocation2 + $0x5e]]  ;;  %s2814_s15 = sld [smem:[#allocation2 + $0x8b]] }
  0x7b   : > { %v273_v11 = vstv %s2670_s6  ;;  %v279_v15 = vstv %s2671_s8  ;;  %s4690_s8 = smov 0.0   ;;  %p4731_p8 = scmp.ne.s32.totalorder %s4704_s27, 0 }
  0x7c   : > { %288 = vrot.lane.b32.xlu0 %v242_v0, %s4680_s14  ;;  %294 = vrot.lane.b32.xlu1 %v242_v0, %s4668_s9  ;;  %s2674_s9 = sld [smem:[#allocation2 + $0x8]]  ;;  %v274_v19 = vmul.f32 %v273_v11, %v242_v0  ;;  %v285_v20 = vstv %s2672_s29  ;;  %v337_v59 = vstv %s2676_s5  ;;  %s2678_s5 = sld [smem:[#allocation2 + $0xb]] }
  0x7e   : > { %v291_v23 = vstv %s2673_s12  ;;  %v335_v57 = vstv %s2675_s26  ;;  %s2680_s26 = sld [smem:[#allocation2 + $0xd]] }
  0x82   : > { %v297_v27 = vstv %s2674_s9 }
  0xe2   : > { %v250_v1 = vpop.permute.xlu0 %249  ;;  %v261_v2 = vpop.permute.xlu1 %260 }
  0xe3   : > { %v253_v9 = vmul.f32 %v252_v3, %v250_v1  ;;  %v264_v12 = vmul.f32 %v263_v5, %v261_v2 }
  0xe6   : > { %v255_v6 = vpop.permute.xlu0 %254  ;;  %v267_v8 = vpop.permute.xlu1 %266 }
  0xe7   : > { %v258_v10 = vmul.f32 %v257_v4, %v255_v6  ;;  %v270_v14 = vmul.f32 %v269_v7, %v267_v8  ;;  %v350_v6 = vstv %s2678_s5  ;;  %v359_v8 = vstv %s2680_s26 }
  0xe9   : > { %v259_v13 = vadd.f32 %v258_v10, %v253_v9 }
  0xea   : > { %v277_v16 = vpop.permute.xlu0 %276  ;;  %v283_v17 = vpop.permute.xlu1 %282 }
  0xeb   : > { %v265_v18 = vadd.f32 %v264_v12, %v259_v13  ;;  %v280_v22 = vmul.f32 %v279_v15, %v277_v16  ;;  %v286_v26 = vmul.f32 %v285_v20, %v283_v17 }
  0xed   : > { %v271_v21 = vadd.f32 %v270_v14, %v265_v18 }
  0xee   : > { %v289_v24 = vpop.permute.xlu0 %288  ;;  %v295_v28 = vpop.permute.xlu1 %294 }
  0xef   : > { %v275_v25 = vadd.f32 %v274_v19, %v271_v21  ;;  %v292_v30 = vmul.f32 %v291_v23, %v289_v24  ;;  %v298_v32 = vmul.f32 %v297_v27, %v295_v28 }
  0xf1   : > { %v281_v29 = vadd.f32 %v280_v22, %v275_v25 }
  0xf3   : > { %v287_v31 = vadd.f32 %v286_v26, %v281_v29 }
  0xf5   : > { %v293_v33 = vadd.f32 %v292_v30, %v287_v31 }
  0xf7   : > { %v299_v35 = vadd.f32 %v298_v32, %v293_v33 }
  0xf9   : > { %v302_v36 = vmul.f32 %v299_v35, %v3638_v34 }
  0xfb   : > { %303 = vadd.xlane.f32.xlu0 %v302_v36  ;;  %v312_v37 = vmul.f32 %v302_v36, %v299_v35 }
  0xfd   : > { %313 = vadd.xlane.f32.xlu1 %v312_v37 }
 0x188   : > { %v304_v38 = vpop.xlane.xlu0 %303 }
 0x189   : > { %v305_v39 = vrot.slane %v304_v38, 4 }
 0x18a   : > { %v314_v40 = vpop.xlane.xlu1 %313 }
 0x18b   : > { %v306_v41 = vadd.f32 %v305_v39, %v304_v38  ;;  %v315_v42 = vrot.slane %v314_v40, 4 }
 0x18d   : > { %v316_v43 = vadd.f32 %v315_v42, %v314_v40  ;;  %v307_v44 = vrot.slane %v306_v41, 2 }
 0x18f   : > { %v308_v45 = vadd.f32 %v307_v44, %v306_v41  ;;  %v317_v46 = vrot.slane %v316_v43, 2 }
 0x191   : > { %v309_v47 = vrot.slane %v308_v45, 1  ;;  %v318_v48 = vadd.f32 %v317_v46, %v316_v43 }
 0x193   : > { %v310_v49 = vadd.f32 %v309_v47, %v308_v45  ;;  %v319_v50 = vrot.slane %v318_v48, 1 }
 0x195   : > { %3025 = vpush %v310_v49  ;;  %v320_v51 = vadd.f32 %v319_v50, %v318_v48 }
 0x197   : > { %3027 = vpush %v320_v51 }
 0x1c6   : > { %s3026_s29 = spop %3025 }
 0x1c7   : > { %s322_s12 = smul.f32 0.00390625, %s3026_s29  ;;  %s2681_s29 = sld [smem:[#allocation2 + $0xe]] }
 0x1c8   : > { %s3028_s9 = spop %3027 }
 0x1c9   : > { %s324_s23 = smul.f32 %s322_s12, %s322_s12  ;;  %v327_v54 = vstv %s322_s12  ;;  %s2682_s12 = sld [smem:[#allocation2 + $0xf]] }
 0x1ca   : > { %s323_s30 = smul.f32 0.00390625, %s3028_s9  ;;  %v328_v55 = vsub.f32 %v299_v35, %v327_v54  ;;  %s2683_s9 = sld [smem:[#allocation2 + $0x10]] }
 0x1cc   : > { %s325_s6 = ssub.f32 %s323_s30, %s324_s23  ;;  %s2684_s23 = sld [smem:[#allocation2 + $0x11]] }
 0x1cd   : > { %v365_v13 = vstv %s2681_s29  ;;  %s2685_s30 = sld [smem:[#allocation2 + $0x12]] }
 0x1ce   : > { %s326_s20 = smax.f32 %s4690_s8, %s325_s6  ;;  %s2686_s6 = sld [smem:[#allocation2 + $0x13]] }
 0x1cf   : > { %s329_s22 = sadd.f32 1e-05, %s326_s20  ;;  %v369_v16 = vstv %s2682_s12 }
 0x1d0   : > { %v375_v20 = vstv %s2683_s9 }
 0x1d1   : > { %v330_v52 = vstv %s329_s22 }
 0x1d2   : > { %3201 = vrsqrt.f32 %v330_v52  ;;  %v382_v24 = vstv %s2684_s23  ;;  %s2687_s23 = sld [smem:[#allocation2 + $0x14]] }
 0x1d3   : > { %v386_v28 = vstv %s2685_s30  ;;  %s2688_s30 = sld [smem:[#allocation2 + $0x15]] }
 0x1d4   : > { %v392_v31 = vstv %s2686_s6 }
 0x1dc   : > { %v3202_v53 = vpop.eup %3201 }
 0x1dd   : > { %3029 = vpush %v3202_v53 }
 0x20e   : > { %s3030_s13 = spop %3029 }
 0x20f   : > { %v333_v56 = vstv %s3030_s13  ;;  %s2679_s13 = sld [smem:[#allocation2 + $0xc]] }
 0x210   : > { %v334_v58 = vmul.f32 %v333_v56, %v328_v55 }
 0x212   : > { %v336_v60 = vmul.f32 %v335_v57, %v334_v58 }
 0x214   : > { %v338_v61 = vadd.f32 %v337_v59, %v336_v60  ;;  %v430_v60 = vstv %s2687_s23  ;;  %s2693_s23 = sld [smem:[#allocation2 + $0x19]] }
 0x215   : > { %v353_v7 = vstv %s2679_s13 }
 0x216   : > { %v340_v62 = vmin.f32 %v338_v61, 0.0  ;;  %vm339_vm0 = vcmp.gt.f32.partialorder %v338_v61, 0.0 }
 0x218   : > { %v341_v63 = vmul.f32 1.442695, %v340_v62  ;;  %v432_v62 = vstv %s2688_s30  ;;  %s2694_s30 = sld [smem:[#allocation2 + $0x1a]] }
 0x21a   : > { %3203 = vpow2.f32 %v341_v63 }
 0x224   : > { %v3204_v0 = vpop.eup %3203 }
 0x225   : > { %v2677_v1 = vadd.f32 -1.0, %v3204_v0 }
 0x227   : > { %v344_v2 = vsel %vm339_vm0, %v338_v61, %v2677_v1 }
 0x228   : > { %v345_v3 = vmul.f32 %v344_v2, %v3638_v34 }
 0x22a   : > { %v346_v4 = vrot.slane %v345_v3, 7  ;;  %v378_v5 = vrot.slane %v345_v3, 1  ;;  %v370_v22 = vmul.f32 %v369_v16, %v345_v3  ;;  %v462_v16 = vstv %s2693_s23  ;;  %s2702_s23 = sld [smem:[#allocation2 + $0x22]] }
 0x22c   : > { %356 = vrot.lane.b32.xlu1 %v346_v4, %s4680_s14  ;;  %347 = vrot.lane.b32.xlu0 %v346_v4, %s4678_s11  ;;  %v354_v12 = vmul.f32 %v353_v7, %v346_v4  ;;  %v387_v33 = vmul.f32 %v386_v28, %v378_v5 }
 0x230   : > { %372 = vrot.lane.b32.xlu1 %v345_v3, %s4680_s14  ;;  %362 = vrot.lane.b32.xlu0 %v345_v3, %s4678_s11 }
 0x234   : > { %389 = vrot.lane.b32.xlu1 %v378_v5, %s4680_s14  ;;  %379 = vrot.lane.b32.xlu0 %v378_v5, %s4678_s11 }
 0x29e   : > { %v357_v9 = vpop.permute.xlu1 %356  ;;  %v348_v10 = vpop.permute.xlu0 %347 }
 0x29f   : > { %v351_v11 = vmul.f32 %v350_v6, %v348_v10  ;;  %v360_v14 = vmul.f32 %v359_v8, %v357_v9 }
 0x2a1   : > { %v355_v15 = vadd.f32 %v354_v12, %v351_v11 }
 0x2a2   : > { %v363_v17 = vpop.permute.xlu0 %362  ;;  %v373_v21 = vpop.permute.xlu1 %372 }
 0x2a3   : > { %v361_v18 = vadd.f32 %v360_v14, %v355_v15  ;;  %v366_v19 = vmul.f32 %v365_v13, %v363_v17  ;;  %v376_v26 = vmul.f32 %v375_v20, %v373_v21  ;;  %v466_v21 = vstv %s2694_s30  ;;  %s2703_s30 = sld [smem:[#allocation2 + $0x23]] }
 0x2a5   : > { %v367_v23 = vadd.f32 %v366_v19, %v361_v18 }
 0x2a6   : > { %v380_v25 = vpop.permute.xlu0 %379  ;;  %v390_v32 = vpop.permute.xlu1 %389 }
 0x2a7   : > { %v371_v27 = vadd.f32 %v370_v22, %v367_v23  ;;  %v383_v30 = vmul.f32 %v382_v24, %v380_v25  ;;  %v393_v36 = vmul.f32 %v392_v31, %v390_v32 }
 0x2a9   : > { %v377_v29 = vadd.f32 %v376_v26, %v371_v27 }
 0x2ab   : > { %v384_v35 = vadd.f32 %v383_v30, %v377_v29 }
 0x2ad   : > { %v388_v37 = vadd.f32 %v387_v33, %v384_v35 }
 0x2af   : > { %v394_v38 = vadd.f32 %v393_v36, %v388_v37 }
 0x2b1   : > { %v397_v39 = vmul.f32 %v394_v38, %v3638_v34 }
 0x2b3   : > { %398 = vadd.xlane.f32.xlu0 %v397_v39  ;;  %v407_v40 = vmul.f32 %v397_v39, %v394_v38 }
 0x2b5   : > { %408 = vadd.xlane.f32.xlu1 %v407_v40 }
 0x340   : > { %v399_v41 = vpop.xlane.xlu0 %398 }
 0x341   : > { %v400_v42 = vrot.slane %v399_v41, 4 }
 0x342   : > { %v409_v43 = vpop.xlane.xlu1 %408 }
 0x343   : > { %v401_v44 = vadd.f32 %v400_v42, %v399_v41  ;;  %v410_v45 = vrot.slane %v409_v43, 4 }
 0x345   : > { %v411_v46 = vadd.f32 %v410_v45, %v409_v43  ;;  %v402_v47 = vrot.slane %v401_v44, 2 }
 0x347   : > { %v403_v48 = vadd.f32 %v402_v47, %v401_v44  ;;  %v412_v49 = vrot.slane %v411_v46, 2 }
 0x349   : > { %v404_v50 = vrot.slane %v403_v48, 1  ;;  %v413_v51 = vadd.f32 %v412_v49, %v411_v46 }
 0x34b   : > { %v405_v52 = vadd.f32 %v404_v50, %v403_v48  ;;  %v414_v53 = vrot.slane %v413_v51, 1 }
 0x34d   : > { %3031 = vpush %v405_v52  ;;  %v415_v54 = vadd.f32 %v414_v53, %v413_v51 }
 0x34f   : > { %3033 = vpush %v415_v54  ;;  %v514_v54 = vstv %s2702_s23  ;;  %s2711_s23 = sld [smem:[#allocation2 + $0x2b]] }
 0x37e   : > { %s3032_s20 = spop %3031 }
 0x37f   : > { %s417_s22 = smul.f32 0.00390625, %s3032_s20  ;;  %s4720_s20 = smov 1  }
 0x380   : > { %s3034_s5 = spop %3033 }
 0x381   : > { %s419_s13 = smul.f32 %s417_s22, %s417_s22  ;;  %v422_v57 = vstv %s417_s22  ;;  %s4721_s22 = smov 9  }
 0x382   : > { %s418_s26 = smul.f32 0.00390625, %s3034_s5  ;;  %v423_v58 = vsub.f32 %v394_v38, %v422_v57  ;;  %s4722_s5 = smov 119  }
 0x384   : > { %s420_s29 = ssub.f32 %s418_s26, %s419_s13  ;;  %s4723_s13 = smov 127  }
 0x385   : > { %s4724_s26 = smov 117  }
 0x386   : > { %s421_s12 = smax.f32 %s4690_s8, %s420_s29  ;;  %s2691_s29 = sld [smem:[#allocation2 + $0x17]] }
 0x387   : > { %s424_s9 = sadd.f32 1e-05, %s421_s12  ;;  %s2690_s12 = sld [smem:[#allocation2 + $0x16]] }
 0x389   : > { %v425_v55 = vstv %s424_s9  ;;  %s2692_s9 = sld [smem:[#allocation2 + $0x18]] }
 0x38a   : > { %3205 = vrsqrt.f32 %v425_v55 }
 0x38c   : > { %v450_v9 = vstv %s2691_s29  ;;  %s2699_s29 = sld [smem:[#allocation2 + $0x1f]] }
 0x38d   : > { %v445_v10 = vstv %s2690_s12  ;;  %s2700_s12 = sld [smem:[#allocation2 + $0x20]] }
 0x38f   : > { %v456_v15 = vstv %s2692_s9  ;;  %s2701_s9 = sld [smem:[#allocation2 + $0x21]] }
 0x392   : > { %v496_v42 = vstv %s2699_s29  ;;  %s2708_s29 = sld [smem:[#allocation2 + $0x28]] }
 0x393   : > { %v502_v46 = vstv %s2700_s12  ;;  %s2709_s12 = sld [smem:[#allocation2 + $0x29]] }
 0x394   : > { %v3206_v56 = vpop.eup %3205 }
 0x395   : > { %3035 = vpush %v3206_v56  ;;  %v508_v50 = vstv %s2701_s9  ;;  %s2710_s9 = sld [smem:[#allocation2 + $0x2a]] }
 0x3c6   : > { %s3036_s6 = spop %3035 }
 0x3c7   : > { %v428_v59 = vstv %s3036_s6  ;;  %s2695_s6 = sld [smem:[#allocation2 + $0x1b]] }
 0x3c8   : > { %v429_v61 = vmul.f32 %v428_v59, %v423_v58  ;;  %v518_v58 = vstv %s2703_s30  ;;  %s2712_s30 = sld [smem:[#allocation2 + $0x2c]] }
 0x3ca   : > { %v431_v63 = vmul.f32 %v430_v60, %v429_v61 }
 0x3cc   : > { %v433_v0 = vadd.f32 %v432_v62, %v431_v63 }
 0x3cd   : > { %v472_v25 = vstv %s2695_s6  ;;  %s2707_s6 = sld [smem:[#allocation2 + $0x27]] }
 0x3ce   : > { %v435_v1 = vmin.f32 %v433_v0, 0.0  ;;  %vm434_vm1 = vcmp.gt.f32.partialorder %v433_v0, 0.0 }
 0x3d0   : > { %v436_v2 = vmul.f32 1.442695, %v435_v1 }
 0x3d2   : > { %3207 = vpow2.f32 %v436_v2 }
 0x3dc   : > { %v3208_v3 = vpop.eup %3207 }
 0x3dd   : > { %v2689_v4 = vadd.f32 -1.0, %v3208_v3 }
 0x3df   : > { %v439_v5 = vsel %vm434_vm1, %v433_v0, %v2689_v4 }
 0x3e0   : > { %v3652_v6 = vmul.f32 %v439_v5, %v3638_v34 }
 0x3e2   : > { %v441_v7 = vrot.slane %v3652_v6, 7  ;;  %v3680_v8 = vrot.slane %v3652_v6, 1  ;;  %v519_v0 = vmul.f32 %v518_v58, %v3652_v6 }
 0x3e4   : > { %447 = vrot.lane.b32.xlu1 %v441_v7, %s4678_s11  ;;  %442 = vrot.lane.b32.xlu0 %v441_v7, %s4676_s7  ;;  %v467_v28 = vmul.f32 %v466_v21, %v441_v7 }
 0x3e8   : > { %459 = vrot.lane.b32.xlu1 %v441_v7, %s4720_s20  ;;  %453 = vrot.lane.b32.xlu0 %v441_v7, %s4721_s22 }
 0x3ec   : > { %475 = vrot.lane.b32.xlu1 %v441_v7, %s4722_s5  ;;  %469 = vrot.lane.b32.xlu0 %v441_v7, %s4723_s13 }
 0x3f0   : > { %487 = vrot.lane.b32.xlu1 %v441_v7, %s4724_s26  ;;  %481 = vrot.lane.b32.xlu0 %v441_v7, %s4680_s14 }
 0x3f4   : > { %499 = vrot.lane.b32.xlu1 %v3652_v6, %s4678_s11  ;;  %493 = vrot.lane.b32.xlu0 %v3652_v6, %s4676_s7 }
 0x3f8   : > { %511 = vrot.lane.b32.xlu1 %v3652_v6, %s4720_s20  ;;  %505 = vrot.lane.b32.xlu0 %v3652_v6, %s4721_s22 }
 0x3fc   : > { %527 = vrot.lane.b32.xlu1 %v3652_v6, %s4722_s5  ;;  %521 = vrot.lane.b32.xlu0 %v3652_v6, %s4723_s13 }
 0x400   : > { %539 = vrot.lane.b32.xlu1 %v3652_v6, %s4724_s26  ;;  %533 = vrot.lane.b32.xlu0 %v3652_v6, %s4680_s14 }
 0x404   : > { %552 = vrot.lane.b32.xlu1 %v3680_v8, %s4678_s11  ;;  %546 = vrot.lane.b32.xlu0 %v3680_v8, %s4676_s7  ;;  %s2696_s7 = sld [smem:[#allocation2 + $0x1c]]  ;;  %s2697_s11 = sld [smem:[#allocation2 + $0x1d]] }
 0x408   : > { %564 = vrot.lane.b32.xlu1 %v3680_v8, %s4720_s20  ;;  %558 = vrot.lane.b32.xlu0 %v3680_v8, %s4721_s22 }
 0x40a   : > { %v478_v29 = vstv %s2696_s7  ;;  %v484_v33 = vstv %s2697_s11  ;;  %s2704_s7 = sld [smem:[#allocation2 + $0x24]]  ;;  %s2705_s11 = sld [smem:[#allocation2 + $0x25]] }
 0x40c   : > { %580 = vrot.lane.b32.xlu1 %v3680_v8, %s4722_s5  ;;  %574 = vrot.lane.b32.xlu0 %v3680_v8, %s4723_s13 }
 0x410   : > { %592 = vrot.lane.b32.xlu1 %v3680_v8, %s4724_s26  ;;  %586 = vrot.lane.b32.xlu0 %v3680_v8, %s4680_s14  ;;  %s2698_s14 = sld [smem:[#allocation2 + $0x1e]]  ;;  %v524_v62 = vstv %s2704_s7  ;;  %v530_v1 = vstv %s2705_s11  ;;  %s2713_s7 = sld [smem:[#allocation2 + $0x2d]] }
 0x411   : > { %s2714_s11 = sld [smem:[#allocation2 + $0x2e]] }
 0x416   : > { %v490_v38 = vstv %s2698_s14  ;;  %s2706_s14 = sld [smem:[#allocation2 + $0x26]] }
 0x41c   : > { %v536_v7 = vstv %s2706_s14  ;;  %s2715_s14 = sld [smem:[#allocation2 + $0x2f]] }
 0x456   : > { %v448_v11 = vpop.permute.xlu1 %447  ;;  %v443_v12 = vpop.permute.xlu0 %442 }
 0x457   : > { %v451_v13 = vmul.f32 %v450_v9, %v448_v11  ;;  %v446_v14 = vmul.f32 %v445_v10, %v443_v12  ;;  %v542_v11 = vstv %s2707_s6  ;;  %s2716_s6 = sld [smem:[#allocation2 + $0x30]] }
 0x459   : > { %v452_v19 = vadd.f32 %v451_v13, %v446_v14 }
 0x45a   : > { %v460_v17 = vpop.permute.xlu1 %459  ;;  %v454_v18 = vpop.permute.xlu0 %453 }
 0x45b   : > { %v457_v20 = vmul.f32 %v456_v15, %v454_v18  ;;  %v463_v22 = vmul.f32 %v462_v16, %v460_v17  ;;  %v549_v16 = vstv %s2708_s29  ;;  %v555_v18 = vstv %s2709_s12  ;;  %s2721_s29 = sld [smem:[#allocation2 + $0x34]]  ;;  %s2720_s12 = sld [smem:[#allocation2 + $0x33]] }
 0x45d   : > { %v458_v23 = vadd.f32 %v457_v20, %v452_v19 }
 0x45e   : > { %v476_v24 = vpop.permute.xlu1 %475  ;;  %v470_v26 = vpop.permute.xlu0 %469 }
 0x45f   : > { %v464_v27 = vadd.f32 %v463_v22, %v458_v23  ;;  %v473_v31 = vmul.f32 %v472_v25, %v470_v26  ;;  %v479_v36 = vmul.f32 %v478_v29, %v476_v24  ;;  %v561_v23 = vstv %s2710_s9  ;;  %s2722_s9 = sld [smem:[#allocation2 + $0x35]] }
 0x460   : > { %v567_v26 = vstv %s2711_s23  ;;  %v571_v29 = vstv %s2712_s30 }
 0x461   : > { %v468_v30 = vadd.f32 %v467_v28, %v464_v27  ;;  %v648_v58 = vstv %s2720_s12 }
 0x462   : > { %v488_v32 = vpop.permute.xlu1 %487  ;;  %v482_v35 = vpop.permute.xlu0 %481 }
 0x463   : > { %v474_v37 = vadd.f32 %v473_v31, %v468_v30  ;;  %v485_v40 = vmul.f32 %v484_v33, %v482_v35  ;;  %v491_v44 = vmul.f32 %v490_v38, %v488_v32  ;;  %v577_v35 = vstv %s2713_s7 }
 0x464   : > { %v583_v38 = vstv %s2714_s11 }
 0x465   : > { %v480_v39 = vadd.f32 %v479_v36, %v474_v37  ;;  %v572_v37 = vmul.f32 %v571_v29, %v3680_v8 }
 0x466   : > { %v500_v41 = vpop.permute.xlu1 %499  ;;  %v494_v43 = vpop.permute.xlu0 %493 }
 0x467   : > { %v486_v45 = vadd.f32 %v485_v40, %v480_v39  ;;  %v497_v48 = vmul.f32 %v496_v42, %v494_v43  ;;  %v503_v52 = vmul.f32 %v502_v46, %v500_v41  ;;  %v589_v41 = vstv %s2715_s14 }
 0x469   : > { %v492_v47 = vadd.f32 %v491_v44, %v486_v45  ;;  %v595_v45 = vstv %s2716_s6 }
 0x46a   : > { %v512_v49 = vpop.permute.xlu1 %511  ;;  %v506_v51 = vpop.permute.xlu0 %505 }
 0x46b   : > { %v498_v53 = vadd.f32 %v497_v48, %v492_v47  ;;  %v509_v56 = vmul.f32 %v508_v50, %v506_v51  ;;  %v515_v60 = vmul.f32 %v514_v54, %v512_v49 }
 0x46d   : > { %v504_v55 = vadd.f32 %v503_v52, %v498_v53  ;;  %v2664_v53 = vld [vmem:[%s3620_s25 + $0x8] sm:$0xff] }
 0x46e   : > { %v528_v57 = vpop.permute.xlu1 %527  ;;  %v522_v59 = vpop.permute.xlu0 %521 }
 0x46f   : > { %v510_v61 = vadd.f32 %v509_v56, %v504_v55  ;;  %v525_v5 = vmul.f32 %v524_v62, %v522_v59  ;;  %v531_v9 = vmul.f32 %v530_v1, %v528_v57  ;;  %v651_v55 = vstv %s2721_s29 }
 0x471   : > { %v516_v63 = vadd.f32 %v515_v60, %v510_v61  ;;  %v652_v61 = vmul.f32 %v2664_v53, %v651_v55 }
 0x472   : > { %v540_v2 = vpop.permute.xlu1 %539  ;;  %v534_v3 = vpop.permute.xlu0 %533 }
 0x473   : > { %v520_v4 = vadd.f32 %v519_v0, %v516_v63  ;;  %v537_v15 = vmul.f32 %v536_v7, %v534_v3  ;;  %v543_v17 = vmul.f32 %v542_v11, %v540_v2  ;;  %v657_v63 = vstv %s2722_s9 }
 0x475   : > { %v526_v10 = vadd.f32 %v525_v5, %v520_v4 }
 0x476   : > { %v553_v12 = vpop.permute.xlu1 %552  ;;  %v547_v13 = vpop.permute.xlu0 %546 }
 0x477   : > { %v532_v14 = vadd.f32 %v531_v9, %v526_v10  ;;  %v550_v21 = vmul.f32 %v549_v16, %v547_v13  ;;  %v556_v24 = vmul.f32 %v555_v18, %v553_v12 }
 0x479   : > { %v538_v6 = vadd.f32 %v537_v15, %v532_v14 }
 0x47a   : > { %v559_v19 = vpop.permute.xlu0 %558  ;;  %v565_v22 = vpop.permute.xlu1 %564 }
 0x47b   : > { %v544_v20 = vadd.f32 %v543_v17, %v538_v6  ;;  %v562_v28 = vmul.f32 %v561_v23, %v559_v19  ;;  %v568_v31 = vmul.f32 %v567_v26, %v565_v22 }
 0x47d   : > { %v551_v25 = vadd.f32 %v550_v21, %v544_v20 }
 0x47e   : > { %v575_v30 = vpop.permute.xlu0 %574  ;;  %v581_v33 = vpop.permute.xlu1 %580 }
 0x47f   : > { %v557_v27 = vadd.f32 %v556_v24, %v551_v25  ;;  %v578_v40 = vmul.f32 %v577_v35, %v575_v30  ;;  %v584_v43 = vmul.f32 %v583_v38, %v581_v33 }
 0x481   : > { %v563_v32 = vadd.f32 %v562_v28, %v557_v27 }
 0x482   : > { %v587_v42 = vpop.permute.xlu0 %586  ;;  %v593_v46 = vpop.permute.xlu1 %592 }
 0x483   : > { %v569_v36 = vadd.f32 %v568_v31, %v563_v32  ;;  %v590_v48 = vmul.f32 %v589_v41, %v587_v42  ;;  %v596_v49 = vmul.f32 %v595_v45, %v593_v46  ;;  %v697_v41 = vstv %s2724_s2 }
 0x485   : > { %v573_v39 = vadd.f32 %v572_v37, %v569_v36 }
 0x487   : > { %v579_v44 = vadd.f32 %v578_v40, %v573_v39  ;;  %v695_v39 = vstv %s2723_s1  ;;  %s2728_s1 = sld [smem:[#allocation2 + $0x3a]] }
 0x489   : > { %v585_v47 = vadd.f32 %v584_v43, %v579_v44 }
 0x48b   : > { %v591_v50 = vadd.f32 %v590_v48, %v585_v47 }
 0x48d   : > { %v3700_v51 = vadd.f32 %v596_v49, %v591_v50 }
 0x48f   : > { %v600_v52 = vmul.f32 %v3700_v51, %v3638_v34 }
 0x491   : > { %601 = vadd.xlane.f32.xlu0 %v600_v52  ;;  %v610_v8 = vmul.f32 %v600_v52, %v3700_v51 }
 0x493   : > { %611 = vadd.xlane.f32.xlu1 %v610_v8  ;;  %v718_v8 = vstv %s2728_s1  ;;  %s2729_s1 = sld [smem:[#allocation2 + $0x3b]] }
 0x4a4   : > { %654 = vrot.lane.b32.xlu1 %v2664_v53, %s4723_s13 }
 0x4a7   : > { %645 = vrot.lane.b32.xlu0 %v2664_v53, %s4720_s20 }
 0x51e   : > { %v602_v54 = vpop.xlane.xlu0 %601 }
 0x51f   : > { %v603_v56 = vrot.slane %v602_v54, 4 }
 0x520   : > { %v612_v57 = vpop.xlane.xlu1 %611 }
 0x521   : > { %v604_v59 = vadd.f32 %v603_v56, %v602_v54  ;;  %v613_v60 = vrot.slane %v612_v57, 4 }
 0x522   : > { %v646_v62 = vpop.permute.xlu0 %645 }
 0x523   : > { %v614_v0 = vadd.f32 %v613_v60, %v612_v57  ;;  %v649_v1 = vmul.f32 %v648_v58, %v646_v62  ;;  %v605_v2 = vrot.slane %v604_v59, 2 }
 0x524   : > { %v655_v3 = vpop.permute.xlu1 %654 }
 0x525   : > { %v653_v4 = vadd.f32 %v652_v61, %v649_v1  ;;  %v658_v5 = vmul.f32 %v657_v63, %v655_v3  ;;  %v606_v7 = vadd.f32 %v605_v2, %v604_v59  ;;  %v615_v9 = vrot.slane %v614_v0, 2 }
 0x527   : > { %v659_v10 = vadd.f32 %v658_v5, %v653_v4  ;;  %v607_v11 = vrot.slane %v606_v7, 1  ;;  %v616_v12 = vadd.f32 %v615_v9, %v614_v0 }
 0x529   : > { %v608_v13 = vadd.f32 %v607_v11, %v606_v7  ;;  %v662_v14 = vmul.f32 %v659_v10, %v3638_v34  ;;  %v617_v15 = vrot.slane %v616_v12, 1 }
 0x52b   : > { %3037 = vpush %v608_v13  ;;  %663 = vadd.xlane.f32.xlu0 %v662_v14  ;;  %v618_v16 = vadd.f32 %v617_v15, %v616_v12  ;;  %v672_v17 = vmul.f32 %v662_v14, %v659_v10 }
 0x52d   : > { %3039 = vpush %v618_v16  ;;  %673 = vadd.xlane.f32.xlu1 %v672_v17 }
 0x55c   : > { %s3038_s23 = spop %3037 }
 0x55d   : > { %s3709_s30 = smul.f32 0.00390625, %s3038_s23 }
 0x55e   : > { %s3040_s7 = spop %3039 }
 0x55f   : > { %s622_s11 = smul.f32 %s3709_s30, %s3709_s30 }
 0x560   : > { %s621_s14 = smul.f32 0.00390625, %s3040_s7 }
 0x562   : > { %s623_s6 = ssub.f32 %s621_s14, %s622_s11 }
 0x564   : > { %s624_s29 = smax.f32 %s4690_s8, %s623_s6 }
 0x565   : > { %s627_s12 = sadd.f32 1e-05, %s624_s29 }
 0x567   : > { %v628_v6 = vstv %s627_s12 }
 0x568   : > { %3209 = vrsqrt.f32 %v628_v6 }
 0x572   : > { %v3210_v18 = vpop.eup %3209 }
 0x573   : > { %3041 = vpush %v3210_v18  ;;  %v756_v18 = vstv %s2729_s1  ;;  %s2741_s1 = sld [smem:[#allocation2 + $0x46]] }
 0x5a4   : > { %s3714_s9 = spop %3041 }
 0x5b8   : > { %v664_v19 = vpop.xlane.xlu0 %663 }
 0x5b9   : > { %v665_v20 = vrot.slane %v664_v19, 4 }
 0x5ba   : > { %v674_v21 = vpop.xlane.xlu1 %673 }
 0x5bb   : > { %v666_v22 = vadd.f32 %v665_v20, %v664_v19  ;;  %v675_v23 = vrot.slane %v674_v21, 4  ;;  %v758_v20 = vstv %s2730_s17  ;;  %s2733_s17 = sld [smem:[#allocation2 + $0x3e]] }
 0x5bd   : > { %v676_v24 = vadd.f32 %v675_v23, %v674_v21  ;;  %v667_v25 = vrot.slane %v666_v22, 2 }
 0x5bf   : > { %v668_v26 = vadd.f32 %v667_v25, %v666_v22  ;;  %v677_v27 = vrot.slane %v676_v24, 2 }
 0x5c1   : > { %v669_v28 = vrot.slane %v668_v26, 1  ;;  %v678_v29 = vadd.f32 %v677_v27, %v676_v24 }
 0x5c3   : > { %v670_v30 = vadd.f32 %v669_v28, %v668_v26  ;;  %v679_v31 = vrot.slane %v678_v29, 1 }
 0x5c5   : > { %3043 = vpush %v670_v30  ;;  %v680_v32 = vadd.f32 %v679_v31, %v678_v29  ;;  %v776_v30 = vstv %s2733_s17  ;;  %s2742_s17 = sld [smem:[#allocation2 + $0x47]] }
 0x5c7   : > { %3045 = vpush %v680_v32 }
 0x5f6   : > { %s3044_s23 = spop %3043 }
 0x5f7   : > { %s682_s7 = smul.f32 0.00390625, %s3044_s23  ;;  %s4726_s23 = smov 10  }
 0x5f8   : > { %s3046_s11 = spop %3045 }
 0x5f9   : > { %s684_s14 = smul.f32 %s682_s7, %s682_s7  ;;  %v687_v36 = vstv %s682_s7  ;;  %s2726_s7 = sld [smem:[#allocation2 + $0x38]] }
 0x5fa   : > { %s683_s6 = smul.f32 0.00390625, %s3046_s11  ;;  %v688_v37 = vsub.f32 %v659_v10, %v687_v36 }
 0x5fc   : > { %s685_s29 = ssub.f32 %s683_s6, %s684_s14 }
 0x5fe   : > { %s686_s12 = smax.f32 %s4690_s8, %s685_s29 }
 0x5ff   : > { %s689_s0 = sadd.f32 1e-05, %s686_s12  ;;  %v709_v50 = vstv %s2726_s7 }
 0x601   : > { %v690_v33 = vstv %s689_s0  ;;  %s4725_s0 = smov 118  }
 0x602   : > { %3211 = vrsqrt.f32 %v690_v33 }
 0x60c   : > { %v3212_v35 = vpop.eup %3211 }
 0x60d   : > { %3047 = vpush %v3212_v35 }
 0x63e   : > { %s3048_s24 = spop %3047 }
 0x63f   : > { %v693_v38 = vstv %s3048_s24  ;;  %s2727_s24 = sld [smem:[#allocation2 + $0x39]] }
 0x640   : > { %v694_v40 = vmul.f32 %v693_v38, %v688_v37 }
 0x642   : > { %v696_v42 = vmul.f32 %v695_v39, %v694_v40 }
 0x644   : > { %v698_v43 = vadd.f32 %v697_v41, %v696_v42 }
 0x645   : > { %v712_v52 = vstv %s2727_s24 }
 0x646   : > { %v700_v44 = vmin.f32 %v698_v43, 0.0  ;;  %vm699_vm2 = vcmp.gt.f32.partialorder %v698_v43, 0.0 }
 0x648   : > { %v701_v45 = vmul.f32 1.442695, %v700_v44 }
 0x64a   : > { %3213 = vpow2.f32 %v701_v45 }
 0x654   : > { %v3214_v46 = vpop.eup %3213 }
 0x655   : > { %v2725_v47 = vadd.f32 -1.0, %v3214_v46 }
 0x657   : > { %v704_v48 = vsel %vm699_vm2, %v698_v43, %v2725_v47 }
 0x658   : > { %v705_v49 = vmul.f32 %v704_v48, %v3638_v34 }
 0x65a   : > { %715 = vrot.lane.b32.xlu1 %v705_v49, %s4725_s0  ;;  %706 = vrot.lane.b32.xlu0 %v705_v49, %s4726_s23  ;;  %v713_v56 = vmul.f32 %v712_v52, %v705_v49 }
 0x6cc   : > { %v716_v53 = vpop.permute.xlu1 %715  ;;  %v707_v54 = vpop.permute.xlu0 %706 }
 0x6cd   : > { %v710_v55 = vmul.f32 %v709_v50, %v707_v54  ;;  %v719_v57 = vmul.f32 %v718_v8, %v716_v53 }
 0x6cf   : > { %v714_v58 = vadd.f32 %v713_v56, %v710_v55 }
 0x6d1   : > { %v720_v59 = vadd.f32 %v719_v57, %v714_v58 }
 0x6d3   : > { %v723_v60 = vmul.f32 %v720_v59, %v3638_v34 }
 0x6d5   : > { %724 = vadd.xlane.f32.xlu0 %v723_v60  ;;  %v733_v61 = vmul.f32 %v723_v60, %v720_v59 }
 0x6d7   : > { %734 = vadd.xlane.f32.xlu1 %v733_v61 }
 0x762   : > { %v725_v62 = vpop.xlane.xlu0 %724 }
 0x763   : > { %v726_v63 = vrot.slane %v725_v62, 4 }
 0x764   : > { %v735_v0 = vpop.xlane.xlu1 %734 }
 0x765   : > { %v727_v1 = vadd.f32 %v726_v63, %v725_v62  ;;  %v736_v2 = vrot.slane %v735_v0, 4  ;;  %v822_v63 = vstv %s2741_s1  ;;  %s2751_s1 = sld [smem:[#allocation2 + $0x50]] }
 0x767   : > { %v737_v3 = vadd.f32 %v736_v2, %v735_v0  ;;  %v728_v4 = vrot.slane %v727_v1, 2 }
 0x769   : > { %v729_v5 = vadd.f32 %v728_v4, %v727_v1  ;;  %v738_v7 = vrot.slane %v737_v3, 2 }
 0x76b   : > { %v730_v9 = vrot.slane %v729_v5, 1  ;;  %v739_v10 = vadd.f32 %v738_v7, %v737_v3  ;;  %v828_v3 = vstv %s2742_s17  ;;  %s2752_s17 = sld [smem:[#allocation2 + $0x51]] }
 0x76d   : > { %v731_v11 = vadd.f32 %v730_v9, %v729_v5  ;;  %v740_v12 = vrot.slane %v739_v10, 1 }
 0x76f   : > { %3049 = vpush %v731_v11  ;;  %v741_v13 = vadd.f32 %v740_v12, %v739_v10 }
 0x771   : > { %3051 = vpush %v741_v13 }
 0x7a0   : > { %s3050_s2 = spop %3049 }
 0x7a1   : > { %s743_s11 = smul.f32 0.00390625, %s3050_s2  ;;  %s2732_s2 = sld [smem:[#allocation2 + $0x3d]] }
 0x7a2   : > { %s3052_s14 = spop %3051 }
 0x7a3   : > { %s745_s6 = smul.f32 %s743_s11, %s743_s11  ;;  %v748_v16 = vstv %s743_s11  ;;  %s2734_s11 = sld [smem:[#allocation2 + $0x3f]] }
 0x7a4   : > { %s744_s29 = smul.f32 0.00390625, %s3052_s14  ;;  %v749_v17 = vsub.f32 %v720_v59, %v748_v16  ;;  %s2735_s14 = sld [smem:[#allocation2 + $0x40]] }
 0x7a6   : > { %s746_s12 = ssub.f32 %s744_s29, %s745_s6  ;;  %s2736_s6 = sld [smem:[#allocation2 + $0x41]] }
 0x7a7   : > { %v771_v31 = vstv %s2732_s2  ;;  %s2737_s29 = sld [smem:[#allocation2 + $0x42]]  ;;  %s2743_s2 = sld [smem:[#allocation2 + $0x48]] }
 0x7a8   : > { %s747_s7 = smax.f32 %s4690_s8, %s746_s12  ;;  %s2738_s12 = sld [smem:[#allocation2 + $0x43]] }
 0x7a9   : > { %s750_s24 = sadd.f32 1e-05, %s747_s7  ;;  %v782_v37 = vstv %s2734_s11  ;;  %s2739_s7 = sld [smem:[#allocation2 + $0x44]] }
 0x7aa   : > { %v788_v38 = vstv %s2735_s14  ;;  %s2744_s11 = sld [smem:[#allocation2 + $0x49]]  ;;  %s2745_s14 = sld [smem:[#allocation2 + $0x4a]] }
 0x7ab   : > { %v751_v14 = vstv %s750_s24  ;;  %s2740_s24 = sld [smem:[#allocation2 + $0x45]] }
 0x7ac   : > { %3215 = vrsqrt.f32 %v751_v14  ;;  %v792_v43 = vstv %s2736_s6  ;;  %s2746_s6 = sld [smem:[#allocation2 + $0x4b]] }
 0x7ad   : > { %v798_v47 = vstv %s2737_s29  ;;  %v834_v9 = vstv %s2743_s2  ;;  %s2747_s29 = sld [smem:[#allocation2 + $0x4c]]  ;;  %s2753_s2 = sld [smem:[#allocation2 + $0x52]] }
 0x7ae   : > { %v804_v52 = vstv %s2738_s12  ;;  %s2748_s12 = sld [smem:[#allocation2 + $0x4d]] }
 0x7af   : > { %v810_v55 = vstv %s2739_s7  ;;  %s2749_s7 = sld [smem:[#allocation2 + $0x4e]] }
 0x7b0   : > { %v840_v13 = vstv %s2744_s11  ;;  %s2754_s11 = sld [smem:[#allocation2 + $0x53]] }
 0x7b1   : > { %v816_v59 = vstv %s2740_s24  ;;  %s2750_s24 = sld [smem:[#allocation2 + $0x4f]] }
 0x7b6   : > { %v3216_v15 = vpop.eup %3215 }
 0x7b7   : > { %3053 = vpush %v3216_v15 }
 0x7e8   : > { %s3054_s16 = spop %3053 }
 0x7e9   : > { %v754_v6 = vstv %s3054_s16  ;;  %s4727_s16 = smov 11  }
 0x7ea   : > { %v755_v19 = vmul.f32 %v754_v6, %v749_v17  ;;  %v844_v17 = vstv %s2745_s14  ;;  %s2755_s14 = sld [smem:[#allocation2 + $0x54]] }
 0x7ec   : > { %v757_v21 = vmul.f32 %v756_v18, %v755_v19 }
 0x7ee   : > { %v759_v22 = vadd.f32 %v758_v20, %v757_v21  ;;  %v850_v20 = vstv %s2746_s6  ;;  %s2756_s6 = sld [smem:[#allocation2 + $0x55]] }
 0x7f0   : > { %v761_v23 = vmin.f32 %v759_v22, 0.0  ;;  %vm760_vm3 = vcmp.gt.f32.partialorder %v759_v22, 0.0 }
 0x7f2   : > { %v762_v24 = vmul.f32 1.442695, %v761_v23  ;;  %v856_v23 = vstv %s2747_s29  ;;  %s2757_s29 = sld [smem:[#allocation2 + $0x56]] }
 0x7f4   : > { %3217 = vpow2.f32 %v762_v24 }
 0x7fe   : > { %v3218_v25 = vpop.eup %3217 }
 0x7ff   : > { %v2731_v26 = vadd.f32 -1.0, %v3218_v25 }
 0x801   : > { %v765_v27 = vsel %vm760_vm3, %v759_v22, %v2731_v26 }
 0x802   : > { %v3723_v28 = vmul.f32 %v765_v27, %v3638_v34 }
 0x804   : > { %v767_v29 = vrot.slane %v3723_v28, 7  ;;  %v3751_v34 = vrot.slane %v3723_v28, 1  ;;  %v845_v22 = vmul.f32 %v844_v17, %v3723_v28 }
 0x806   : > { %773 = vrot.lane.b32.xlu1 %v767_v29, %s4726_s23  ;;  %768 = vrot.lane.b32.xlu0 %v767_v29, %s4727_s16  ;;  %v793_v50 = vmul.f32 %v792_v43, %v767_v29 }
 0x80a   : > { %785 = vrot.lane.b32.xlu1 %v767_v29, %s4720_s20  ;;  %779 = vrot.lane.b32.xlu0 %v767_v29, %s4721_s22 }
 0x80e   : > { %801 = vrot.lane.b32.xlu1 %v767_v29, %s4722_s5  ;;  %795 = vrot.lane.b32.xlu0 %v767_v29, %s4723_s13 }
 0x812   : > { %813 = vrot.lane.b32.xlu1 %v767_v29, %s4724_s26  ;;  %807 = vrot.lane.b32.xlu0 %v767_v29, %s4725_s0  ;;  %v862_v29 = vstv %s2748_s12  ;;  %s2758_s12 = sld [smem:[#allocation2 + $0x57]] }
 0x816   : > { %825 = vrot.lane.b32.xlu1 %v3723_v28, %s4726_s23  ;;  %819 = vrot.lane.b32.xlu0 %v3723_v28, %s4727_s16 }
 0x81a   : > { %837 = vrot.lane.b32.xlu1 %v3723_v28, %s4720_s20  ;;  %831 = vrot.lane.b32.xlu0 %v3723_v28, %s4721_s22 }
 0x81e   : > { %853 = vrot.lane.b32.xlu1 %v3723_v28, %s4722_s5  ;;  %847 = vrot.lane.b32.xlu0 %v3723_v28, %s4723_s13 }
 0x822   : > { %865 = vrot.lane.b32.xlu1 %v3723_v28, %s4724_s26  ;;  %859 = vrot.lane.b32.xlu0 %v3723_v28, %s4725_s0 }
 0x826   : > { %878 = vrot.lane.b32.xlu1 %v3751_v34, %s4726_s23  ;;  %872 = vrot.lane.b32.xlu0 %v3751_v34, %s4727_s16 }
 0x82a   : > { %890 = vrot.lane.b32.xlu1 %v3751_v34, %s4720_s20  ;;  %884 = vrot.lane.b32.xlu0 %v3751_v34, %s4721_s22 }
 0x82e   : > { %906 = vrot.lane.b32.xlu1 %v3751_v34, %s4722_s5  ;;  %900 = vrot.lane.b32.xlu0 %v3751_v34, %s4723_s13 }
 0x832   : > { %918 = vrot.lane.b32.xlu1 %v3751_v34, %s4724_s26  ;;  %912 = vrot.lane.b32.xlu0 %v3751_v34, %s4725_s0 }
 0x878   : > { %v774_v32 = vpop.permute.xlu1 %773  ;;  %v769_v33 = vpop.permute.xlu0 %768 }
 0x879   : > { %v777_v35 = vmul.f32 %v776_v30, %v774_v32  ;;  %v772_v36 = vmul.f32 %v771_v31, %v769_v33  ;;  %v868_v32 = vstv %s2749_s7 }
 0x87b   : > { %v778_v41 = vadd.f32 %v777_v35, %v772_v36 }
 0x87c   : > { %v786_v39 = vpop.permute.xlu1 %785  ;;  %v780_v40 = vpop.permute.xlu0 %779 }
 0x87d   : > { %v783_v42 = vmul.f32 %v782_v37, %v780_v40  ;;  %v789_v44 = vmul.f32 %v788_v38, %v786_v39  ;;  %v875_v38 = vstv %s2750_s24  ;;  %v881_v40 = vstv %s2751_s1  ;;  %s2763_s1 = sld [smem:[#allocation2 + $0x5b]] }
 0x87f   : > { %v784_v45 = vadd.f32 %v783_v42, %v778_v41 }
 0x880   : > { %v802_v46 = vpop.permute.xlu1 %801  ;;  %v796_v48 = vpop.permute.xlu0 %795 }
 0x881   : > { %v790_v49 = vadd.f32 %v789_v44, %v784_v45  ;;  %v799_v53 = vmul.f32 %v798_v47, %v796_v48  ;;  %v805_v57 = vmul.f32 %v804_v52, %v802_v46  ;;  %v887_v45 = vstv %s2752_s17  ;;  %s2762_s17 = sld [smem:[#allocation2 + $0x5a]] }
 0x882   : > { %v893_v48 = vstv %s2753_s2  ;;  %v897_v52 = vstv %s2754_s11  ;;  %s2764_s2 = sld [smem:[#allocation2 + $0x5c]] }
 0x883   : > { %v794_v8 = vadd.f32 %v793_v50, %v790_v49 }
 0x884   : > { %v814_v54 = vpop.permute.xlu1 %813  ;;  %v808_v56 = vpop.permute.xlu0 %807 }
 0x885   : > { %v800_v58 = vadd.f32 %v799_v53, %v794_v8  ;;  %v811_v61 = vmul.f32 %v810_v55, %v808_v56  ;;  %v817_v1 = vmul.f32 %v816_v59, %v814_v54  ;;  %v903_v56 = vstv %s2755_s14 }
 0x886   : > { %v909_v59 = vstv %s2756_s6 }
 0x887   : > { %v806_v60 = vadd.f32 %v805_v57, %v800_v58  ;;  %v898_v58 = vmul.f32 %v897_v52, %v3751_v34  ;;  %v3776_v34 = vld [vmem:[%s4659_s3] sm:$0xff] }
 0x888   : > { %v826_v62 = vpop.permute.xlu1 %825  ;;  %v820_v0 = vpop.permute.xlu0 %819 }
 0x889   : > { %v812_v2 = vadd.f32 %v811_v61, %v806_v60  ;;  %v823_v5 = vmul.f32 %v822_v63, %v820_v0  ;;  %v829_v11 = vmul.f32 %v828_v3, %v826_v62  ;;  %v915_v62 = vstv %s2757_s29 }
 0x88b   : > { %v818_v4 = vadd.f32 %v817_v1, %v812_v2  ;;  %v921_v2 = vstv %s2758_s12 }
 0x88c   : > { %v838_v7 = vpop.permute.xlu1 %837  ;;  %v832_v10 = vpop.permute.xlu0 %831 }
 0x88d   : > { %v824_v12 = vadd.f32 %v823_v5, %v818_v4  ;;  %v835_v15 = vmul.f32 %v834_v9, %v832_v10  ;;  %v841_v18 = vmul.f32 %v840_v13, %v838_v7  ;;  %v2665_v13 = vld [vmem:[%s3620_s25 + $0x10] sm:$0xff] }
 0x88f   : > { %v830_v14 = vadd.f32 %v829_v11, %v824_v12 }
 0x890   : > { %v854_v16 = vpop.permute.xlu1 %853  ;;  %v848_v6 = vpop.permute.xlu0 %847 }
 0x891   : > { %v836_v19 = vadd.f32 %v835_v15, %v830_v14  ;;  %v851_v27 = vmul.f32 %v850_v20, %v848_v6  ;;  %v857_v30 = vmul.f32 %v856_v23, %v854_v16  ;;  %v977_v15 = vstv %s2763_s1 }
 0x892   : > { %v974_v6 = vstv %s2762_s17  ;;  %v978_v20 = vmul.f32 %v2665_v13, %v977_v15 }
 0x893   : > { %v842_v21 = vadd.f32 %v841_v18, %v836_v19 }
 0x894   : > { %v866_v24 = vpop.permute.xlu1 %865  ;;  %v860_v25 = vpop.permute.xlu0 %859 }
 0x895   : > { %v846_v26 = vadd.f32 %v845_v22, %v842_v21  ;;  %v863_v37 = vmul.f32 %v862_v29, %v860_v25  ;;  %v869_v39 = vmul.f32 %v868_v32, %v866_v24  ;;  %v983_v22 = vstv %s2764_s2 }
 0x897   : > { %v852_v31 = vadd.f32 %v851_v27, %v846_v26 }
 0x898   : > { %v879_v33 = vpop.permute.xlu1 %878  ;;  %v873_v35 = vpop.permute.xlu0 %872 }
 0x899   : > { %v858_v36 = vadd.f32 %v857_v30, %v852_v31  ;;  %v876_v43 = vmul.f32 %v875_v38, %v873_v35  ;;  %v882_v46 = vmul.f32 %v881_v40, %v879_v33 }
 0x89b   : > { %v864_v28 = vadd.f32 %v863_v37, %v858_v36 }
 0x89c   : > { %v885_v41 = vpop.permute.xlu0 %884  ;;  %v891_v44 = vpop.permute.xlu1 %890 }
 0x89d   : > { %v870_v42 = vadd.f32 %v869_v39, %v864_v28  ;;  %v888_v50 = vmul.f32 %v887_v45, %v885_v41  ;;  %v894_v53 = vmul.f32 %v893_v48, %v891_v44 }
 0x89f   : > { %v877_v47 = vadd.f32 %v876_v43, %v870_v42 }
 0x8a0   : > { %v901_v8 = vpop.permute.xlu0 %900  ;;  %v907_v55 = vpop.permute.xlu1 %906 }
 0x8a1   : > { %v883_v49 = vadd.f32 %v882_v46, %v877_v47  ;;  %v904_v61 = vmul.f32 %v903_v56, %v901_v8  ;;  %v910_v0 = vmul.f32 %v909_v59, %v907_v55 }
 0x8a3   : > { %v889_v54 = vadd.f32 %v888_v50, %v883_v49 }
 0x8a4   : > { %v913_v63 = vpop.permute.xlu0 %912  ;;  %v919_v3 = vpop.permute.xlu1 %918 }
 0x8a5   : > { %v895_v57 = vadd.f32 %v894_v53, %v889_v54  ;;  %v916_v5 = vmul.f32 %v915_v62, %v913_v63  ;;  %v922_v7 = vmul.f32 %v921_v2, %v919_v3  ;;  %v1023_v63 = vstv %s2766_s18 }
 0x8a7   : > { %v899_v60 = vadd.f32 %v898_v58, %v895_v57 }
 0x8a9   : > { %v905_v1 = vadd.f32 %v904_v61, %v899_v60  ;;  %v1021_v61 = vstv %s2765_s21  ;;  %s2770_s21 = sld [smem:[#allocation2 + $0x61]] }
 0x8ab   : > { %v911_v4 = vadd.f32 %v910_v0, %v905_v1 }
 0x8ad   : > { %v917_v9 = vadd.f32 %v916_v5, %v911_v4 }
 0x8af   : > { %v3771_v10 = vadd.f32 %v922_v7, %v917_v9 }
 0x8b1   : > { %v926_v11 = vmul.f32 %v3776_v34, %v3771_v10 }
 0x8b3   : > { %927 = vadd.xlane.f32.xlu0 %v926_v11  ;;  %v936_v12 = vmul.f32 %v926_v11, %v3771_v10 }
 0x8b5   : > { %937 = vadd.xlane.f32.xlu1 %v936_v12 }
 0x8c6   : > { %980 = vrot.lane.b32.xlu1 %v2665_v13, %s4725_s0 }
 0x8c9   : > { %971 = vrot.lane.b32.xlu0 %v2665_v13, %s4726_s23  ;;  %v1044_v13 = vstv %s2770_s21 }
 0x940   : > { %v928_v14 = vpop.xlane.xlu0 %927 }
 0x941   : > { %v929_v16 = vrot.slane %v928_v14, 4 }
 0x942   : > { %v938_v17 = vpop.xlane.xlu1 %937 }
 0x943   : > { %v930_v18 = vadd.f32 %v929_v16, %v928_v14  ;;  %v939_v19 = vrot.slane %v938_v17, 4 }
 0x944   : > { %v972_v21 = vpop.permute.xlu0 %971 }
 0x945   : > { %v940_v23 = vadd.f32 %v939_v19, %v938_v17  ;;  %v975_v24 = vmul.f32 %v974_v6, %v972_v21  ;;  %v931_v25 = vrot.slane %v930_v18, 2 }
 0x946   : > { %v981_v26 = vpop.permute.xlu1 %980 }
 0x947   : > { %v979_v27 = vadd.f32 %v978_v20, %v975_v24  ;;  %v984_v29 = vmul.f32 %v983_v22, %v981_v26  ;;  %v932_v30 = vadd.f32 %v931_v25, %v930_v18  ;;  %v941_v31 = vrot.slane %v940_v23, 2 }
 0x949   : > { %v985_v32 = vadd.f32 %v984_v29, %v979_v27  ;;  %v933_v33 = vrot.slane %v932_v30, 1  ;;  %v942_v35 = vadd.f32 %v941_v31, %v940_v23 }
 0x94b   : > { %v934_v36 = vadd.f32 %v933_v33, %v932_v30  ;;  %v988_v37 = vmul.f32 %v3776_v34, %v985_v32  ;;  %v943_v38 = vrot.slane %v942_v35, 1 }
 0x94d   : > { %3055 = vpush %v934_v36  ;;  %989 = vadd.xlane.f32.xlu0 %v988_v37  ;;  %v944_v39 = vadd.f32 %v943_v38, %v942_v35  ;;  %v998_v28 = vmul.f32 %v988_v37, %v985_v32 }
 0x94f   : > { %3057 = vpush %v944_v39  ;;  %999 = vadd.xlane.f32.xlu1 %v998_v28 }
 0x97e   : > { %s3056_s11 = spop %3055 }
 0x97f   : > { %s3785_s14 = smul.f32 0.00390625, %s3056_s11 }
 0x980   : > { %s3058_s6 = spop %3057 }
 0x981   : > { %s948_s29 = smul.f32 %s3785_s14, %s3785_s14 }
 0x982   : > { %s947_s12 = smul.f32 0.00390625, %s3058_s6 }
 0x984   : > { %s949_s7 = ssub.f32 %s947_s12, %s948_s29 }
 0x986   : > { %s950_s24 = smax.f32 %s4690_s8, %s949_s7 }
 0x987   : > { %s953_s1 = sadd.f32 1e-05, %s950_s24 }
 0x989   : > { %v954_v40 = vstv %s953_s1 }
 0x98a   : > { %3219 = vrsqrt.f32 %v954_v40 }
 0x994   : > { %v3220_v41 = vpop.eup %3219 }
 0x995   : > { %3059 = vpush %v3220_v41 }
 0x9c6   : > { %s3790_s17 = spop %3059 }
 0x9da   : > { %v990_v42 = vpop.xlane.xlu0 %989 }
 0x9db   : > { %v991_v43 = vrot.slane %v990_v42, 4 }
 0x9dc   : > { %v1000_v44 = vpop.xlane.xlu1 %999 }
 0x9dd   : > { %v992_v45 = vadd.f32 %v991_v43, %v990_v42  ;;  %v1001_v46 = vrot.slane %v1000_v44, 4 }
 0x9df   : > { %v1002_v47 = vadd.f32 %v1001_v46, %v1000_v44  ;;  %v993_v48 = vrot.slane %v992_v45, 2 }
 0x9e1   : > { %v994_v49 = vadd.f32 %v993_v48, %v992_v45  ;;  %v1003_v50 = vrot.slane %v1002_v47, 2 }
 0x9e3   : > { %v995_v52 = vrot.slane %v994_v49, 1  ;;  %v1004_v8 = vadd.f32 %v1003_v50, %v1002_v47 }
 0x9e5   : > { %v996_v53 = vadd.f32 %v995_v52, %v994_v49  ;;  %v1005_v54 = vrot.slane %v1004_v8, 1 }
 0x9e7   : > { %3061 = vpush %v996_v53  ;;  %v1006_v55 = vadd.f32 %v1005_v54, %v1004_v8 }
 0x9e9   : > { %3063 = vpush %v1006_v55  ;;  %v3842_v55 = vld [vmem:[%s3620_s25 + $0x18] sm:$0xff] }
 0xa18   : > { %s3062_s2 = spop %3061 }
 0xa19   : > { %s1008_s11 = smul.f32 0.00390625, %s3062_s2  ;;  %s2768_s2 = sld [smem:[#allocation2 + $0x5f]] }
 0xa1a   : > { %s3064_s6 = spop %3063 }
 0xa1b   : > { %s1010_s29 = smul.f32 %s1008_s11, %s1008_s11  ;;  %v1013_v58 = vstv %s1008_s11 }
 0xa1c   : > { %s1009_s12 = smul.f32 0.00390625, %s3064_s6  ;;  %v1014_v59 = vsub.f32 %v985_v32, %v1013_v58 }
 0xa1e   : > { %s1011_s7 = ssub.f32 %s1009_s12, %s1010_s29 }
 0xa1f   : > { %v1035_v11 = vstv %s2768_s2  ;;  %s2771_s2 = sld [smem:[#allocation2 + $0x62]] }
 0xa20   : > { %s1012_s24 = smax.f32 %s4690_s8, %s1011_s7 }
 0xa21   : > { %s1015_s1 = sadd.f32 1e-05, %s1012_s24 }
 0xa23   : > { %v1016_v56 = vstv %s1015_s1 }
 0xa24   : > { %3221 = vrsqrt.f32 %v1016_v56  ;;  %v3849_v56 = vrot.slane %v3842_v55, 7 }
 0xa25   : > { %v1082_v42 = vstv %s2771_s2  ;;  %s2782_s2 = sld [smem:[#allocation2 + $0x6c]] }
 0xa2e   : > { %v3222_v57 = vpop.eup %3221 }
 0xa2f   : > { %3065 = vpush %v3222_v57 }
 0xa60   : > { %s3066_s28 = spop %3065 }
 0xa61   : > { %v1019_v60 = vstv %s3066_s28  ;;  %s2769_s28 = sld [smem:[#allocation2 + $0x60]] }
 0xa62   : > { %v1020_v62 = vmul.f32 %v1019_v60, %v1014_v59 }
 0xa64   : > { %v1022_v0 = vmul.f32 %v1021_v61, %v1020_v62 }
 0xa66   : > { %v1024_v1 = vadd.f32 %v1023_v63, %v1022_v0 }
 0xa67   : > { %v1038_v12 = vstv %s2769_s28  ;;  %s2772_s28 = sld [smem:[#allocation2 + $0x63]] }
 0xa68   : > { %v1026_v2 = vmin.f32 %v1024_v1, 0.0  ;;  %vm1025_vm4 = vcmp.gt.f32.partialorder %v1024_v1, 0.0 }
 0xa6a   : > { %v1027_v3 = vmul.f32 1.442695, %v1026_v2 }
 0xa6c   : > { %3223 = vpow2.f32 %v1027_v3 }
 0xa6d   : > { %v1084_v44 = vstv %s2772_s28  ;;  %s2783_s28 = sld [smem:[#allocation2 + $0x6d]] }
 0xa76   : > { %v3224_v4 = vpop.eup %3223 }
 0xa77   : > { %v2767_v5 = vadd.f32 -1.0, %v3224_v4 }
 0xa79   : > { %v1030_v7 = vsel %vm1025_vm4, %v1024_v1, %v2767_v5 }
 0xa7a   : > { %v1031_v9 = vmul.f32 %v3776_v34, %v1030_v7 }
 0xa7c   : > { %1041 = vrot.lane.b32.xlu1 %v1031_v9, %s4723_s13  ;;  %1032 = vrot.lane.b32.xlu0 %v1031_v9, %s4720_s20  ;;  %v1039_v17 = vmul.f32 %v1038_v12, %v1031_v9 }
 0xaee   : > { %v1042_v14 = vpop.permute.xlu1 %1041  ;;  %v1033_v15 = vpop.permute.xlu0 %1032 }
 0xaef   : > { %v1036_v16 = vmul.f32 %v1035_v11, %v1033_v15  ;;  %v1045_v6 = vmul.f32 %v1044_v13, %v1042_v14 }
 0xaf1   : > { %v1040_v18 = vadd.f32 %v1039_v17, %v1036_v16 }
 0xaf3   : > { %v1046_v19 = vadd.f32 %v1045_v6, %v1040_v18 }
 0xaf5   : > { %v1049_v20 = vmul.f32 %v3776_v34, %v1046_v19 }
 0xaf7   : > { %1050 = vadd.xlane.f32.xlu0 %v1049_v20  ;;  %v1059_v21 = vmul.f32 %v1049_v20, %v1046_v19 }
 0xaf9   : > { %1060 = vadd.xlane.f32.xlu1 %v1059_v21 }
 0xb84   : > { %v1051_v22 = vpop.xlane.xlu0 %1050 }
 0xb85   : > { %v1052_v23 = vrot.slane %v1051_v22, 4 }
 0xb86   : > { %v1061_v24 = vpop.xlane.xlu1 %1060 }
 0xb87   : > { %v1053_v25 = vadd.f32 %v1052_v23, %v1051_v22  ;;  %v1062_v26 = vrot.slane %v1061_v24, 4  ;;  %v1142_v23 = vstv %s2782_s2  ;;  %s2793_s2 = sld [smem:[#allocation2 + $0x77]] }
 0xb89   : > { %v1063_v27 = vadd.f32 %v1062_v26, %v1061_v24  ;;  %v1054_v29 = vrot.slane %v1053_v25, 2 }
 0xb8b   : > { %v1055_v30 = vadd.f32 %v1054_v29, %v1053_v25  ;;  %v1064_v31 = vrot.slane %v1063_v27, 2 }
 0xb8d   : > { %v1056_v32 = vrot.slane %v1055_v30, 1  ;;  %v1065_v33 = vadd.f32 %v1064_v31, %v1063_v27  ;;  %v1148_v27 = vstv %s2783_s28  ;;  %s2794_s28 = sld [smem:[#allocation2 + $0x78]] }
 0xb8f   : > { %v1057_v35 = vadd.f32 %v1056_v32, %v1055_v30  ;;  %v1066_v36 = vrot.slane %v1065_v33, 1 }
 0xb91   : > { %3067 = vpush %v1057_v35  ;;  %v1067_v37 = vadd.f32 %v1066_v36, %v1065_v33 }
 0xb93   : > { %3069 = vpush %v1067_v37 }
 0xbc2   : > { %s3068_s18 = spop %3067 }
 0xbc3   : > { %s1069_s11 = smul.f32 0.00390625, %s3068_s18  ;;  %s2775_s18 = sld [smem:[#allocation2 + $0x65]] }
 0xbc4   : > { %s3070_s6 = spop %3069 }
 0xbc5   : > { %s1071_s29 = smul.f32 %s1069_s11, %s1069_s11  ;;  %v1074_v28 = vstv %s1069_s11  ;;  %s2774_s11 = sld [smem:[#allocation2 + $0x64]] }
 0xbc6   : > { %s1070_s12 = smul.f32 0.00390625, %s3070_s6  ;;  %v1075_v40 = vsub.f32 %v1046_v19, %v1074_v28  ;;  %s2776_s6 = sld [smem:[#allocation2 + $0x66]] }
 0xbc8   : > { %s1072_s7 = ssub.f32 %s1070_s12, %s1071_s29  ;;  %s2777_s29 = sld [smem:[#allocation2 + $0x67]] }
 0xbc9   : > { %v1102_v57 = vstv %s2775_s18  ;;  %s2778_s12 = sld [smem:[#allocation2 + $0x68]]  ;;  %s2785_s18 = sld [smem:[#allocation2 + $0x6f]] }
 0xbca   : > { %s1073_s24 = smax.f32 %s4690_s8, %s1072_s7  ;;  %s2779_s7 = sld [smem:[#allocation2 + $0x69]] }
 0xbcb   : > { %s1076_s1 = sadd.f32 1e-05, %s1073_s24  ;;  %v1097_v58 = vstv %s2774_s11  ;;  %s2780_s24 = sld [smem:[#allocation2 + $0x6a]] }
 0xbcc   : > { %v1108_v63 = vstv %s2776_s6  ;;  %s2786_s11 = sld [smem:[#allocation2 + $0x70]]  ;;  %s2787_s6 = sld [smem:[#allocation2 + $0x71]] }
 0xbcd   : > { %v1077_v38 = vstv %s1076_s1  ;;  %s2781_s1 = sld [smem:[#allocation2 + $0x6b]] }
 0xbce   : > { %3225 = vrsqrt.f32 %v1077_v38  ;;  %v1114_v0 = vstv %s2777_s29  ;;  %s2788_s29 = sld [smem:[#allocation2 + $0x72]] }
 0xbcf   : > { %v1118_v5 = vstv %s2778_s12  ;;  %v1160_v37 = vstv %s2785_s18  ;;  %s2789_s12 = sld [smem:[#allocation2 + $0x73]]  ;;  %s2796_s18 = sld [smem:[#allocation2 + $0x7a]] }
 0xbd0   : > { %v1124_v12 = vstv %s2779_s7  ;;  %s2790_s7 = sld [smem:[#allocation2 + $0x74]] }
 0xbd1   : > { %v1130_v16 = vstv %s2780_s24  ;;  %s2791_s24 = sld [smem:[#allocation2 + $0x75]] }
 0xbd3   : > { %v1136_v19 = vstv %s2781_s1  ;;  %s2792_s1 = sld [smem:[#allocation2 + $0x76]] }
 0xbd8   : > { %v3226_v39 = vpop.eup %3225 }
 0xbd9   : > { %3071 = vpush %v3226_v39 }
 0xc0a   : > { %s3072_s21 = spop %3071 }
 0xc0b   : > { %v1080_v41 = vstv %s3072_s21  ;;  %s2784_s21 = sld [smem:[#allocation2 + $0x6e]] }
 0xc0c   : > { %v1081_v43 = vmul.f32 %v1080_v41, %v1075_v40  ;;  %v1166_v40 = vstv %s2786_s11  ;;  %s2797_s11 = sld [smem:[#allocation2 + $0x7b]] }
 0xc0e   : > { %v1083_v45 = vmul.f32 %v1082_v42, %v1081_v43 }
 0xc10   : > { %v1085_v46 = vadd.f32 %v1084_v44, %v1083_v45  ;;  %v1170_v44 = vstv %s2787_s6  ;;  %s2798_s6 = sld [smem:[#allocation2 + $0x7c]] }
 0xc11   : > { %v1154_v32 = vstv %s2784_s21  ;;  %s2795_s21 = sld [smem:[#allocation2 + $0x79]] }
 0xc12   : > { %v1087_v47 = vmin.f32 %v1085_v46, 0.0  ;;  %vm1086_vm5 = vcmp.gt.f32.partialorder %v1085_v46, 0.0 }
 0xc14   : > { %v1088_v48 = vmul.f32 1.442695, %v1087_v47 }
 0xc16   : > { %3227 = vpow2.f32 %v1088_v48  ;;  %v1176_v48 = vstv %s2788_s29  ;;  %s2799_s29 = sld [smem:[#allocation2 + $0x7d]] }
 0xc20   : > { %v3228_v49 = vpop.eup %3227 }
 0xc21   : > { %v2773_v50 = vadd.f32 -1.0, %v3228_v49 }
 0xc23   : > { %v1091_v52 = vsel %vm1086_vm5, %v1085_v46, %v2773_v50 }
 0xc24   : > { %v3799_v8 = vmul.f32 %v3776_v34, %v1091_v52  ;;  %v1182_v52 = vstv %s2789_s12  ;;  %s2800_s12 = sld [smem:[#allocation2 + $0x7e]] }
 0xc26   : > { %v1093_v53 = vrot.slane %v3799_v8, 7  ;;  %v3827_v54 = vrot.slane %v3799_v8, 1  ;;  %v1171_v50 = vmul.f32 %v1170_v44, %v3799_v8 }
 0xc28   : > { %1099 = vrot.lane.b32.xlu1 %v1093_v53, %s4726_s23  ;;  %1094 = vrot.lane.b32.xlu0 %v1093_v53, %s4727_s16  ;;  %v1119_v15 = vmul.f32 %v1118_v5, %v1093_v53 }
 0xc2c   : > { %1111 = vrot.lane.b32.xlu1 %v1093_v53, %s4720_s20  ;;  %1105 = vrot.lane.b32.xlu0 %v1093_v53, %s4721_s22 }
 0xc30   : > { %1127 = vrot.lane.b32.xlu1 %v1093_v53, %s4722_s5  ;;  %1121 = vrot.lane.b32.xlu0 %v1093_v53, %s4723_s13 }
 0xc34   : > { %1139 = vrot.lane.b32.xlu1 %v1093_v53, %s4724_s26  ;;  %1133 = vrot.lane.b32.xlu0 %v1093_v53, %s4725_s0 }
 0xc38   : > { %1151 = vrot.lane.b32.xlu1 %v3799_v8, %s4726_s23  ;;  %1145 = vrot.lane.b32.xlu0 %v3799_v8, %s4727_s16 }
 0xc3c   : > { %1163 = vrot.lane.b32.xlu1 %v3799_v8, %s4720_s20  ;;  %1157 = vrot.lane.b32.xlu0 %v3799_v8, %s4721_s22 }
 0xc40   : > { %1179 = vrot.lane.b32.xlu1 %v3799_v8, %s4722_s5  ;;  %1173 = vrot.lane.b32.xlu0 %v3799_v8, %s4723_s13 }
 0xc44   : > { %1191 = vrot.lane.b32.xlu1 %v3799_v8, %s4724_s26  ;;  %1185 = vrot.lane.b32.xlu0 %v3799_v8, %s4725_s0 }
 0xc48   : > { %1204 = vrot.lane.b32.xlu1 %v3827_v54, %s4726_s23  ;;  %1198 = vrot.lane.b32.xlu0 %v3827_v54, %s4727_s16 }
 0xc4c   : > { %1216 = vrot.lane.b32.xlu1 %v3827_v54, %s4720_s20  ;;  %1210 = vrot.lane.b32.xlu0 %v3827_v54, %s4721_s22 }
 0xc50   : > { %1232 = vrot.lane.b32.xlu1 %v3827_v54, %s4722_s5  ;;  %1226 = vrot.lane.b32.xlu0 %v3827_v54, %s4723_s13 }
 0xc54   : > { %1244 = vrot.lane.b32.xlu1 %v3827_v54, %s4724_s26  ;;  %1238 = vrot.lane.b32.xlu0 %v3827_v54, %s4725_s0 }
 0xc58   : > { %1298 = vrot.lane.b32.xlu0 %v3849_v56, %s4726_s23  ;;  %1307 = vrot.lane.b32.xlu1 %v3849_v56, %s4725_s0 }
 0xc5c   : > { %1313 = vrot.lane.b32.xlu0 %v3842_v55, %s4726_s23 }
 0xc60   : > { %1323 = vrot.lane.b32.xlu0 %v3842_v55, %s4725_s0 }
 0xc9a   : > { %v1100_v59 = vpop.permute.xlu1 %1099  ;;  %v1095_v60 = vpop.permute.xlu0 %1094 }
 0xc9b   : > { %v1103_v61 = vmul.f32 %v1102_v57, %v1100_v59  ;;  %v1098_v62 = vmul.f32 %v1097_v58, %v1095_v60  ;;  %v1188_v60 = vstv %s2790_s7  ;;  %s2804_s7 = sld [smem:[#allocation2 + $0x81]] }
 0xc9d   : > { %v1104_v3 = vadd.f32 %v1103_v61, %v1098_v62 }
 0xc9e   : > { %v1112_v1 = vpop.permute.xlu1 %1111  ;;  %v1106_v2 = vpop.permute.xlu0 %1105 }
 0xc9f   : > { %v1109_v4 = vmul.f32 %v1108_v63, %v1106_v2  ;;  %v1115_v7 = vmul.f32 %v1114_v0, %v1112_v1  ;;  %v1194_v63 = vstv %s2791_s24  ;;  %s2805_s24 = sld [smem:[#allocation2 + $0x82]] }
 0xca1   : > { %v1110_v9 = vadd.f32 %v1109_v4, %v1104_v3  ;;  %v1201_v4 = vstv %s2792_s1  ;;  %s2806_s1 = sld [smem:[#allocation2 + $0x83]]  ;;  %v1301_v44 = vstv %s2804_s7 }
 0xca2   : > { %v1128_v11 = vpop.permute.xlu1 %1127  ;;  %v1122_v13 = vpop.permute.xlu0 %1121 }
 0xca3   : > { %v1116_v14 = vadd.f32 %v1115_v7, %v1110_v9  ;;  %v1125_v6 = vmul.f32 %v1124_v12, %v1122_v13  ;;  %v1131_v21 = vmul.f32 %v1130_v16, %v1128_v11  ;;  %v1207_v7 = vstv %s2793_s2  ;;  %s2807_s2 = sld [smem:[#allocation2 + $0x84]] }
 0xca5   : > { %v1120_v17 = vadd.f32 %v1119_v15, %v1116_v14  ;;  %v1213_v14 = vstv %s2794_s28  ;;  %s2808_s28 = sld [smem:[#allocation2 + $0x85]] }
 0xca6   : > { %v1140_v18 = vpop.permute.xlu1 %1139  ;;  %v1134_v20 = vpop.permute.xlu0 %1133 }
 0xca7   : > { %v1126_v22 = vadd.f32 %v1125_v6, %v1120_v17  ;;  %v1137_v25 = vmul.f32 %v1136_v19, %v1134_v20  ;;  %v1143_v30 = vmul.f32 %v1142_v23, %v1140_v18  ;;  %v1219_v17 = vstv %s2795_s21  ;;  %s2809_s21 = sld [smem:[#allocation2 + $0x86]] }
 0xca8   : > { %v1223_v19 = vstv %s2796_s18  ;;  %s2810_s18 = sld [smem:[#allocation2 + $0x87]] }
 0xca9   : > { %v1132_v24 = vadd.f32 %v1131_v21, %v1126_v22 }
 0xcaa   : > { %v1152_v26 = vpop.permute.xlu1 %1151  ;;  %v1146_v29 = vpop.permute.xlu0 %1145 }
 0xcab   : > { %v1138_v31 = vadd.f32 %v1137_v25, %v1132_v24  ;;  %v1149_v35 = vmul.f32 %v1148_v27, %v1146_v29  ;;  %v1155_v39 = vmul.f32 %v1154_v32, %v1152_v26  ;;  %v1229_v24 = vstv %s2797_s11  ;;  %s2811_s11 = sld [smem:[#allocation2 + $0x88]] }
 0xcac   : > { %v1224_v26 = vmul.f32 %v1223_v19, %v3827_v54  ;;  %v1235_v27 = vstv %s2798_s6  ;;  %s2812_s6 = sld [smem:[#allocation2 + $0x89]] }
 0xcad   : > { %v1144_v33 = vadd.f32 %v1143_v30, %v1138_v31  ;;  %v1241_v31 = vstv %s2799_s29 }
 0xcae   : > { %v1164_v36 = vpop.permute.xlu1 %1163  ;;  %v1158_v38 = vpop.permute.xlu0 %1157 }
 0xcaf   : > { %v1150_v28 = vadd.f32 %v1149_v35, %v1144_v33  ;;  %v1161_v42 = vmul.f32 %v1160_v37, %v1158_v38  ;;  %v1167_v46 = vmul.f32 %v1166_v40, %v1164_v36  ;;  %v1247_v36 = vstv %s2800_s12 }
 0xcb1   : > { %v1156_v41 = vadd.f32 %v1155_v39, %v1150_v28 }
 0xcb2   : > { %v1180_v43 = vpop.permute.xlu1 %1179  ;;  %v1174_v45 = vpop.permute.xlu0 %1173 }
 0xcb3   : > { %v1162_v47 = vadd.f32 %v1161_v42, %v1156_v41  ;;  %v1177_v59 = vmul.f32 %v1176_v48, %v1174_v45  ;;  %v1183_v61 = vmul.f32 %v1182_v52, %v1180_v43  ;;  %v1329_v43 = vrot.slane %v3842_v55, 1 }
 0xcb4   : > { %v1304_v45 = vstv %s2805_s24 }
 0xcb5   : > { %v1168_v49 = vadd.f32 %v1167_v46, %v1162_v47  ;;  %v1305_v47 = vmul.f32 %v1304_v45, %v3849_v56 }
 0xcb6   : > { %v1192_v53 = vpop.permute.xlu1 %1191  ;;  %v1186_v57 = vpop.permute.xlu0 %1185 }
 0xcb7   : > { %v1172_v58 = vadd.f32 %v1171_v50, %v1168_v49  ;;  %v1189_v3 = vmul.f32 %v1188_v60, %v1186_v57  ;;  %v1195_v5 = vmul.f32 %v1194_v63, %v1192_v53  ;;  %v1310_v49 = vstv %s2806_s1 }
 0xcb8   : > { %v1316_v57 = vstv %s2807_s2 }
 0xcb9   : > { %v1178_v62 = vadd.f32 %v1177_v59, %v1172_v58 }
 0xcba   : > { %v1205_v0 = vpop.permute.xlu1 %1204  ;;  %v1199_v1 = vpop.permute.xlu0 %1198 }
 0xcbb   : > { %v1184_v2 = vadd.f32 %v1183_v61, %v1178_v62  ;;  %v1202_v12 = vmul.f32 %v1201_v4, %v1199_v1  ;;  %v1208_v15 = vmul.f32 %v1207_v7, %v1205_v0  ;;  %v1320_v61 = vstv %s2808_s28 }
 0xcbc   : > { %v1321_v63 = vmul.f32 %v3842_v55, %v1320_v61  ;;  %v1326_v0 = vstv %s2809_s21  ;;  %v1337_v7 = vstv %s2811_s11 }
 0xcbd   : > { %v1190_v8 = vadd.f32 %v1189_v3, %v1184_v2 }
 0xcbe   : > { %v1211_v9 = vpop.permute.xlu0 %1210  ;;  %v1217_v13 = vpop.permute.xlu1 %1216 }
 0xcbf   : > { %v1196_v11 = vadd.f32 %v1195_v5, %v1190_v8  ;;  %v1214_v18 = vmul.f32 %v1213_v14, %v1211_v9  ;;  %v1220_v21 = vmul.f32 %v1219_v17, %v1217_v13  ;;  %v1333_v8 = vstv %s2810_s18 }
 0xcc0   : > { %v1343_v14 = vstv %s2812_s6 }
 0xcc1   : > { %v1203_v16 = vadd.f32 %v1202_v12, %v1196_v11 }
 0xcc2   : > { %v1227_v20 = vpop.permute.xlu0 %1226  ;;  %v1233_v23 = vpop.permute.xlu1 %1232 }
 0xcc3   : > { %v1209_v6 = vadd.f32 %v1208_v15, %v1203_v16  ;;  %v1230_v30 = vmul.f32 %v1229_v24, %v1227_v20  ;;  %v1236_v33 = vmul.f32 %v1235_v27, %v1233_v23 }
 0xcc5   : > { %v1215_v22 = vadd.f32 %v1214_v18, %v1209_v6  ;;  %v1338_v6 = vmul.f32 %v1337_v7, %v1329_v43 }
 0xcc6   : > { %v1239_v32 = vpop.permute.xlu0 %1238  ;;  %v1245_v37 = vpop.permute.xlu1 %1244 }
 0xcc7   : > { %v1221_v25 = vadd.f32 %v1220_v21, %v1215_v22  ;;  %v1242_v39 = vmul.f32 %v1241_v31, %v1239_v32  ;;  %v1248_v28 = vmul.f32 %v1247_v36, %v1245_v37 }
 0xcc9   : > { %v1225_v29 = vadd.f32 %v1224_v26, %v1221_v25 }
 0xcca   : > { %v1299_v46 = vpop.permute.xlu0 %1298  ;;  %v1308_v50 = vpop.permute.xlu1 %1307 }
 0xccb   : > { %v1231_v35 = vadd.f32 %v1230_v30, %v1225_v29  ;;  %v1302_v48 = vmul.f32 %v1301_v44, %v1299_v46  ;;  %v1311_v53 = vmul.f32 %v1310_v49, %v1308_v50 }
 0xccd   : > { %v1237_v38 = vadd.f32 %v1236_v33, %v1231_v35  ;;  %v1306_v52 = vadd.f32 %v1305_v47, %v1302_v48 }
 0xcce   : > { %v1314_v58 = vpop.permute.xlu0 %1313 }
 0xccf   : > { %v1243_v40 = vadd.f32 %v1242_v39, %v1237_v38  ;;  %v1312_v59 = vadd.f32 %v1311_v53, %v1306_v52  ;;  %v1317_v60 = vmul.f32 %v1316_v57, %v1314_v58 }
 0xcd1   : > { %v3861_v41 = vadd.f32 %v1248_v28, %v1243_v40  ;;  %v1318_v62 = vadd.f32 %v1317_v60, %v1312_v59  ;;  %v1383_v59 = vstv %s2814_s15  ;;  %s2816_s15 = sld [smem:[#allocation2 + $0x8c]] }
 0xcd2   : > { %v1324_v56 = vpop.permute.xlu0 %1323 }
 0xcd3   : > { %v1252_v42 = vmul.f32 %v3776_v34, %v3861_v41  ;;  %v1322_v1 = vadd.f32 %v1321_v63, %v1318_v62  ;;  %v1327_v2 = vmul.f32 %v1326_v0, %v1324_v56 }
 0xcd5   : > { %1253 = vadd.xlane.f32.xlu1 %v1252_v42  ;;  %v1262_v54 = vmul.f32 %v1252_v42, %v3861_v41  ;;  %v1328_v12 = vadd.f32 %v1327_v2, %v1322_v1 }
 0xcd7   : > { %1263 = vadd.xlane.f32.xlu0 %v1262_v54 }
 0xce6   : > { %1330 = vrot.lane.b32.xlu1 %v1329_v43, %s4726_s23 }
 0xced   : > { %1340 = vrot.lane.b32.xlu0 %v1329_v43, %s4725_s0 }
 0xd62   : > { %v1254_v3 = vpop.xlane.xlu1 %1253 }
 0xd63   : > { %v1255_v4 = vrot.slane %v1254_v3, 4 }
 0xd64   : > { %v1264_v5 = vpop.xlane.xlu0 %1263 }
 0xd65   : > { %v1256_v9 = vadd.f32 %v1255_v4, %v1254_v3  ;;  %v1265_v11 = vrot.slane %v1264_v5, 4 }
 0xd66   : > { %v1331_v13 = vpop.permute.xlu1 %1330 }
 0xd67   : > { %v1257_v15 = vrot.slane %v1256_v9, 2  ;;  %v1266_v16 = vadd.f32 %v1265_v11, %v1264_v5  ;;  %v1334_v17 = vmul.f32 %v1333_v8, %v1331_v13  ;;  %v1395_v5 = vstv %s2816_s15 }
 0xd68   : > { %v1341_v55 = vpop.permute.xlu0 %1340 }
 0xd69   : > { %v1267_v18 = vrot.slane %v1266_v16, 2  ;;  %v1335_v19 = vadd.f32 %v1334_v17, %v1328_v12  ;;  %v1344_v20 = vmul.f32 %v1343_v14, %v1341_v55  ;;  %v1258_v21 = vadd.f32 %v1257_v15, %v1256_v9 }
 0xd6b   : > { %v1339_v22 = vadd.f32 %v1338_v6, %v1335_v19  ;;  %v1259_v23 = vrot.slane %v1258_v21, 1  ;;  %v1268_v24 = vadd.f32 %v1267_v18, %v1266_v16 }
 0xd6d   : > { %v1345_v25 = vadd.f32 %v1344_v20, %v1339_v22  ;;  %v1260_v26 = vadd.f32 %v1259_v23, %v1258_v21  ;;  %v1269_v27 = vrot.slane %v1268_v24, 1 }
 0xd6f   : > { %3073 = vpush %v1260_v26  ;;  %v1270_v29 = vadd.f32 %v1269_v27, %v1268_v24  ;;  %v1348_v30 = vmul.f32 %v3776_v34, %v1345_v25 }
 0xd71   : > { %3075 = vpush %v1270_v29  ;;  %1349 = vadd.xlane.f32.xlu1 %v1348_v30  ;;  %v1358_v31 = vmul.f32 %v1348_v30, %v1345_v25 }
 0xd73   : > { %1359 = vadd.xlane.f32.xlu0 %v1358_v31 }
 0xda0   : > { %s3074_s29 = spop %3073 }
 0xda1   : > { %s3872_s12 = smul.f32 0.00390625, %s3074_s29 }
 0xda2   : > { %s3076_s7 = spop %3075 }
 0xda3   : > { %s1274_s24 = smul.f32 %s3872_s12, %s3872_s12 }
 0xda4   : > { %s1273_s1 = smul.f32 0.00390625, %s3076_s7 }
 0xda6   : > { %s1275_s2 = ssub.f32 %s1273_s1, %s1274_s24 }
 0xda8   : > { %s1276_s28 = smax.f32 %s4690_s8, %s1275_s2 }
 0xda9   : > { %s1279_s21 = sadd.f32 1e-05, %s1276_s28 }
 0xdab   : > { %v1280_v32 = vstv %s1279_s21  ;;  %s2813_s21 = sld [smem:[#allocation2 + $0x8a]] }
 0xdac   : > { %3229 = vrsqrt.f32 %v1280_v32 }
 0xdb1   : > { %v1381_v57 = vstv %s2813_s21 }
 0xdb6   : > { %v3230_v33 = vpop.eup %3229 }
 0xdb7   : > { %3077 = vpush %v3230_v33 }
 0xde8   : > { %s3877_s18 = spop %3077 }
 0xdfe   : > { %v1350_v35 = vpop.xlane.xlu1 %1349 }
 0xdff   : > { %v1351_v36 = vrot.slane %v1350_v35, 4 }
 0xe00   : > { %v1360_v37 = vpop.xlane.xlu0 %1359 }
 0xe01   : > { %v1352_v38 = vadd.f32 %v1351_v36, %v1350_v35  ;;  %v1361_v39 = vrot.slane %v1360_v37, 4 }
 0xe03   : > { %v1353_v28 = vrot.slane %v1352_v38, 2  ;;  %v1362_v40 = vadd.f32 %v1361_v39, %v1360_v37 }
 0xe05   : > { %v1363_v42 = vrot.slane %v1362_v40, 2  ;;  %v1354_v54 = vadd.f32 %v1353_v28, %v1352_v38 }
 0xe07   : > { %v1355_v43 = vrot.slane %v1354_v54, 1  ;;  %v1364_v44 = vadd.f32 %v1363_v42, %v1362_v40 }
 0xe09   : > { %v1356_v45 = vadd.f32 %v1355_v43, %v1354_v54  ;;  %v1365_v46 = vrot.slane %v1364_v44, 1 }
 0xe0b   : > { %3079 = vpush %v1356_v45  ;;  %v1366_v47 = vadd.f32 %v1365_v46, %v1364_v44 }
 0xe0d   : > { %3081 = vpush %v1366_v47 }
 0xe3c   : > { %s3080_s11 = spop %3079 }
 0xe3d   : > { %s1368_s6 = smul.f32 0.00390625, %s3080_s11  ;;  %s2818_s11 = sld [smem:[#allocation2 + $0x8e]] }
 0xe3e   : > { %s3082_s29 = spop %3081 }
 0xe3f   : > { %s1370_s7 = smul.f32 %s1368_s6, %s1368_s6  ;;  %v1373_v50 = vstv %s1368_s6  ;;  %s2819_s6 = sld [smem:[#allocation2 + $0x8f]] }
 0xe40   : > { %s1369_s24 = smul.f32 0.00390625, %s3082_s29  ;;  %v1374_v52 = vsub.f32 %v1345_v25, %v1373_v50  ;;  %s2820_s29 = sld [smem:[#allocation2 + $0x90]] }
 0xe42   : > { %s1371_s1 = ssub.f32 %s1369_s24, %s1370_s7  ;;  %s2821_s7 = sld [smem:[#allocation2 + $0x91]] }
 0xe43   : > { %v1406_v7 = vstv %s2818_s11  ;;  %s2822_s24 = sld [smem:[#allocation2 + $0x92]] }
 0xe44   : > { %s1372_s2 = smax.f32 %s4690_s8, %s1371_s1  ;;  %s2823_s1 = sld [smem:[#allocation2 + $0x93]] }
 0xe45   : > { %s1375_s28 = sadd.f32 1e-05, %s1372_s2  ;;  %v1412_v14 = vstv %s2819_s6  ;;  %s2824_s2 = sld [smem:[#allocation2 + $0x94]] }
 0xe46   : > { %v1416_v17 = vstv %s2820_s29 }
 0xe47   : > { %v1376_v48 = vstv %s1375_s28 }
 0xe48   : > { %3231 = vrsqrt.f32 %v1376_v48  ;;  %v1422_v19 = vstv %s2821_s7 }
 0xe49   : > { %v1428_v22 = vstv %s2822_s24  ;;  %s2825_s24 = sld [smem:[#allocation2 + $0x95]] }
 0xe4a   : > { %v1434_v26 = vstv %s2823_s1  ;;  %s2826_s1 = sld [smem:[#allocation2 + $0x96]] }
 0xe4b   : > { %v1440_v31 = vstv %s2824_s2 }
 0xe52   : > { %v3232_v49 = vpop.eup %3231 }
 0xe53   : > { %3083 = vpush %v3232_v49 }
 0xe84   : > { %s3084_s4 = spop %3083 }
 0xe85   : > { %v1379_v53 = vstv %s3084_s4  ;;  %s2817_s4 = sld [smem:[#allocation2 + $0x8d]] }
 0xe86   : > { %v1380_v58 = vmul.f32 %v1379_v53, %v1374_v52 }
 0xe88   : > { %v1382_v60 = vmul.f32 %v1381_v57, %v1380_v58 }
 0xe8a   : > { %v1384_v61 = vadd.f32 %v1383_v59, %v1382_v60 }
 0xe8b   : > { %v1400_v3 = vstv %s2817_s4 }
 0xe8c   : > { %v1386_v62 = vmin.f32 %v1384_v61, 0.0  ;;  %vm1385_vm6 = vcmp.gt.f32.partialorder %v1384_v61, 0.0 }
 0xe8e   : > { %v1387_v63 = vmul.f32 1.442695, %v1386_v62  ;;  %v1478_v62 = vstv %s2825_s24  ;;  %s2834_s24 = sld [smem:[#allocation2 + $0x9d]] }
 0xe90   : > { %3233 = vpow2.f32 %v1387_v63 }
 0xe9a   : > { %v3234_v0 = vpop.eup %3233 }
 0xe9b   : > { %v2815_v56 = vadd.f32 -1.0, %v3234_v0  ;;  %v1480_v0 = vstv %s2826_s1  ;;  %s2835_s1 = sld [smem:[#allocation2 + $0x9e]] }
 0xe9d   : > { %v1390_v1 = vsel %vm1385_vm6, %v1384_v61, %v2815_v56 }
 0xe9e   : > { %v1391_v2 = vmul.f32 %v3776_v34, %v1390_v1 }
 0xea0   : > { %1397 = vrot.lane.b32.xlu0 %v1391_v2, %s4726_s23  ;;  %1392 = vrot.lane.b32.xlu1 %v1391_v2, %s4727_s16  ;;  %v1417_v21 = vmul.f32 %v1416_v17, %v1391_v2 }
 0xea4   : > { %1419 = vrot.lane.b32.xlu0 %v1391_v2, %s4723_s13  ;;  %1403 = vrot.lane.b32.xlu1 %v1391_v2, %s4721_s22 }
 0xea8   : > { %1431 = vrot.lane.b32.xlu0 %v1391_v2, %s4725_s0  ;;  %1409 = vrot.lane.b32.xlu1 %v1391_v2, %s4720_s20 }
 0xeac   : > { %1425 = vrot.lane.b32.xlu1 %v1391_v2, %s4722_s5 }
 0xeb0   : > { %1437 = vrot.lane.b32.xlu1 %v1391_v2, %s4724_s26 }
 0xf12   : > { %v1398_v4 = vpop.permute.xlu0 %1397  ;;  %v1393_v8 = vpop.permute.xlu1 %1392 }
 0xf13   : > { %v1401_v9 = vmul.f32 %v1400_v3, %v1398_v4  ;;  %v1396_v11 = vmul.f32 %v1395_v5, %v1393_v8 }
 0xf15   : > { %v1402_v15 = vadd.f32 %v1401_v9, %v1396_v11 }
 0xf16   : > { %v1404_v12 = vpop.permute.xlu1 %1403  ;;  %v1420_v16 = vpop.permute.xlu0 %1419 }
 0xf17   : > { %v1407_v13 = vmul.f32 %v1406_v7, %v1404_v12  ;;  %v1423_v24 = vmul.f32 %v1422_v19, %v1420_v16  ;;  %v3894_v7 = vld [vmem:[%s4659_s3] sm:$0xff] }
 0xf19   : > { %v1408_v55 = vadd.f32 %v1407_v13, %v1402_v15 }
 0xf1a   : > { %v1410_v6 = vpop.permute.xlu1 %1409  ;;  %v1432_v27 = vpop.permute.xlu0 %1431 }
 0xf1b   : > { %v1413_v18 = vmul.f32 %v1412_v14, %v1410_v6  ;;  %v1435_v33 = vmul.f32 %v1434_v26, %v1432_v27 }
 0xf1d   : > { %v1414_v20 = vadd.f32 %v1413_v18, %v1408_v55 }
 0xf1e   : > { %v1426_v23 = vpop.permute.xlu1 %1425 }
 0xf1f   : > { %v1418_v25 = vadd.f32 %v1417_v21, %v1414_v20  ;;  %v1429_v30 = vmul.f32 %v1428_v22, %v1426_v23 }
 0xf21   : > { %v1424_v29 = vadd.f32 %v1423_v24, %v1418_v25 }
 0xf22   : > { %v1438_v32 = vpop.permute.xlu1 %1437 }
 0xf23   : > { %v1430_v35 = vadd.f32 %v1429_v30, %v1424_v29  ;;  %v1441_v37 = vmul.f32 %v1440_v31, %v1438_v32  ;;  %v1526_v32 = vstv %s2834_s24  ;;  %s3947_s24 = sld [smem:[#allocation2 + $0xa8]] }
 0xf25   : > { %v1436_v36 = vadd.f32 %v1435_v33, %v1430_v35 }
 0xf27   : > { %v1442_v38 = vadd.f32 %v1441_v37, %v1436_v36  ;;  %v1532_v37 = vstv %s2835_s1  ;;  %s3949_s1 = sld [smem:[#allocation2 + $0x31]] }
 0xf29   : > { %v1445_v39 = vmul.f32 %v3776_v34, %v1442_v38 }
 0xf2b   : > { %1446 = vadd.xlane.f32.xlu0 %v1445_v39  ;;  %v1455_v28 = vmul.f32 %v1445_v39, %v1442_v38 }
 0xf2d   : > { %1456 = vadd.xlane.f32.xlu1 %v1455_v28 }
 0xfb8   : > { %v1447_v40 = vpop.xlane.xlu0 %1446 }
 0xfb9   : > { %v1448_v42 = vrot.slane %v1447_v40, 4 }
 0xfba   : > { %v1457_v54 = vpop.xlane.xlu1 %1456 }
 0xfbb   : > { %v1449_v43 = vadd.f32 %v1448_v42, %v1447_v40  ;;  %v1458_v44 = vrot.slane %v1457_v54, 4 }
 0xfbd   : > { %v1450_v45 = vrot.slane %v1449_v43, 2  ;;  %v1459_v46 = vadd.f32 %v1458_v44, %v1457_v54 }
 0xfbf   : > { %v1460_v47 = vrot.slane %v1459_v46, 2  ;;  %v1451_v48 = vadd.f32 %v1450_v45, %v1449_v43 }
 0xfc1   : > { %v1452_v49 = vrot.slane %v1451_v48, 1  ;;  %v1461_v50 = vadd.f32 %v1460_v47, %v1459_v46 }
 0xfc3   : > { %v1453_v52 = vadd.f32 %v1452_v49, %v1451_v48  ;;  %v1462_v53 = vrot.slane %v1461_v50, 1 }
 0xfc5   : > { %3085 = vpush %v1453_v52  ;;  %v1463_v57 = vadd.f32 %v1462_v53, %v1461_v50 }
 0xfc7   : > { %3087 = vpush %v1463_v57 }
 0xff6   : > { %s3086_s28 = spop %3085 }
 0xff7   : > { %s1465_s21 = smul.f32 0.00390625, %s3086_s28  ;;  %s2837_s28 = sld [smem:[#allocation2 + $0xa0]] }
 0xff8   : > { %s3088_s4 = spop %3087 }
 0xff9   : > { %s1467_s15 = smul.f32 %s1465_s21, %s1465_s21  ;;  %v1470_v59 = vstv %s1465_s21  ;;  %s2829_s21 = sld [smem:[#allocation2 + $0x98]] }
 0xffa   : > { %s1466_s11 = smul.f32 0.00390625, %s3088_s4  ;;  %v1471_v60 = vsub.f32 %v1442_v38, %v1470_v59  ;;  %s2838_s4 = sld [smem:[#allocation2 + $0xa1]] }
 0xffc   : > { %s1468_s6 = ssub.f32 %s1466_s11, %s1467_s15  ;;  %s2828_s15 = sld [smem:[#allocation2 + $0x97]] }
 0xffd   : > { %s2830_s11 = sld [smem:[#allocation2 + $0x99]]  ;;  %v1544_v44 = vstv %s2837_s28  ;;  %s3956_s28 = sld [smem:[#allocation2 + $0xaa]] }
 0xffe   : > { %s1469_s29 = smax.f32 %s4690_s8, %s1468_s6  ;;  %s2831_s6 = sld [smem:[#allocation2 + $0x9a]] }
 0xfff   : > { %s1472_s7 = sadd.f32 1e-05, %s1469_s29  ;;  %v1498_v13 = vstv %s2829_s21  ;;  %s2832_s29 = sld [smem:[#allocation2 + $0x9b]] }
0x1000   : > { %s2839_s21 = sld [smem:[#allocation2 + $0xa2]]  ;;  %v1550_v48 = vstv %s2838_s4 }
0x1001   : > { %v1473_v34 = vstv %s1472_s7  ;;  %s2833_s7 = sld [smem:[#allocation2 + $0x9c]]  ;;  %s3958_s4 = sld [smem:[#allocation2 + $0x32]] }
0x1002   : > { %3235 = vrsqrt.f32 %v1473_v34  ;;  %v1493_v14 = vstv %s2828_s15  ;;  %s2840_s15 = sld [smem:[#allocation2 + $0xa3]] }
0x1003   : > { %v1504_v55 = vstv %s2830_s11  ;;  %s2841_s11 = sld [smem:[#allocation2 + $0xa4]] }
0x1004   : > { %v1510_v18 = vstv %s2831_s6  ;;  %s3943_s6 = sld [smem:[#allocation2 + $0xa5]] }
0x1005   : > { %v1514_v23 = vstv %s2832_s29  ;;  %s2843_s29 = sld [smem:[#allocation2 + $0xa6]] }
0x1006   : > { %v1556_v53 = vstv %s2839_s21  ;;  %s3966_s21 = sld [smem:[#allocation2 + $0xac]] }
0x1007   : > { %v1520_v27 = vstv %s2833_s7  ;;  %s3945_s7 = sld [smem:[#allocation2 + $0xa7]] }
0x1008   : > { %v1562_v59 = vstv %s2840_s15  ;;  %s3973_s15 = sld [smem:[#allocation2 + $0xae]] }
0x100c   : > { %v3236_v58 = vpop.eup %3235 }
0x100d   : > { %3089 = vpush %v3236_v58 }
0x103e   : > { %s3090_s2 = spop %3089 }
0x103f   : > { %v1476_v61 = vstv %s3090_s2  ;;  %s2836_s2 = sld [smem:[#allocation2 + $0x9f]] }
0x1040   : > { %v1477_v63 = vmul.f32 %v1476_v61, %v1471_v60 }
0x1042   : > { %v1479_v56 = vmul.f32 %v1478_v62, %v1477_v63  ;;  %v1566_v63 = vstv %s2841_s11  ;;  %s3977_s11 = sld [smem:[#allocation2 + $0xaf]] }
0x1044   : > { %v1481_v1 = vadd.f32 %v1480_v0, %v1479_v56 }
0x1045   : > { %v1538_v40 = vstv %s2836_s2  ;;  %s3952_s2 = sld [smem:[#allocation2 + $0xa9]] }
0x1046   : > { %v1483_v2 = vmin.f32 %v1481_v1, 0.0  ;;  %vm1482_vm7 = vcmp.gt.f32.partialorder %v1481_v1, 0.0 }
0x1048   : > { %v1484_v3 = vmul.f32 1.442695, %v1483_v2  ;;  %v1572_v2 = vstv %s3943_s6  ;;  %s3980_s6 = sld [smem:[#allocation2 + $0xb0]] }
0x104a   : > { %3237 = vpow2.f32 %v1484_v3  ;;  %v625_v3 = vstv %s3709_s30  ;;  %s3963_s30 = sld [smem:[#allocation2 + $0xab]] }
0x1054   : > { %v3238_v4 = vpop.eup %3237 }
0x1055   : > { %v2827_v5 = vadd.f32 -1.0, %v3238_v4 }
0x1057   : > { %v1487_v8 = vsel %vm1482_vm7, %v1481_v1, %v2827_v5 }
0x1058   : > { %v3897_v9 = vmul.f32 %v3894_v7, %v1487_v8  ;;  %v1578_v8 = vstv %s2843_s29  ;;  %s3982_s29 = sld [smem:[#allocation2 + $0x58]] }
0x105a   : > { %v1489_v11 = vrot.slane %v3897_v9, 7  ;;  %v3925_v12 = vrot.slane %v3897_v9, 1  ;;  %v1567_v5 = vmul.f32 %v1566_v63, %v3897_v9 }
0x105c   : > { %1495 = vrot.lane.b32.xlu1 %v1489_v11, %s4726_s23  ;;  %1490 = vrot.lane.b32.xlu0 %v1489_v11, %s4727_s16  ;;  %v1515_v31 = vmul.f32 %v1514_v23, %v1489_v11 }
0x1060   : > { %1507 = vrot.lane.b32.xlu1 %v1489_v11, %s4720_s20  ;;  %1501 = vrot.lane.b32.xlu0 %v1489_v11, %s4721_s22 }
0x1064   : > { %1523 = vrot.lane.b32.xlu1 %v1489_v11, %s4722_s5  ;;  %1517 = vrot.lane.b32.xlu0 %v1489_v11, %s4723_s13 }
0x1068   : > { %1535 = vrot.lane.b32.xlu1 %v1489_v11, %s4724_s26  ;;  %1529 = vrot.lane.b32.xlu0 %v1489_v11, %s4725_s0 }
0x106c   : > { %1547 = vrot.lane.b32.xlu1 %v3897_v9, %s4726_s23  ;;  %1541 = vrot.lane.b32.xlu0 %v3897_v9, %s4727_s16 }
0x1070   : > { %1559 = vrot.lane.b32.xlu1 %v3897_v9, %s4720_s20  ;;  %1553 = vrot.lane.b32.xlu0 %v3897_v9, %s4721_s22 }
0x1074   : > { %1575 = vrot.lane.b32.xlu1 %v3897_v9, %s4722_s5  ;;  %1569 = vrot.lane.b32.xlu0 %v3897_v9, %s4723_s13 }
0x1078   : > { %1587 = vrot.lane.b32.xlu1 %v3897_v9, %s4724_s26  ;;  %1581 = vrot.lane.b32.xlu0 %v3897_v9, %s4725_s0 }
0x107c   : > { %1600 = vrot.lane.b32.xlu1 %v3925_v12, %s4726_s23  ;;  %1594 = vrot.lane.b32.xlu0 %v3925_v12, %s4727_s16 }
0x1080   : > { %1612 = vrot.lane.b32.xlu1 %v3925_v12, %s4720_s20  ;;  %1606 = vrot.lane.b32.xlu0 %v3925_v12, %s4721_s22 }
0x1084   : > { %1628 = vrot.lane.b32.xlu1 %v3925_v12, %s4722_s5  ;;  %1622 = vrot.lane.b32.xlu0 %v3925_v12, %s4723_s13 }
0x1088   : > { %1640 = vrot.lane.b32.xlu1 %v3925_v12, %s4724_s26  ;;  %1634 = vrot.lane.b32.xlu0 %v3925_v12, %s4725_s0 }
0x10ce   : > { %v1496_v15 = vpop.permute.xlu1 %1495  ;;  %v1491_v16 = vpop.permute.xlu0 %1490 }
0x10cf   : > { %v1499_v17 = vmul.f32 %v1498_v13, %v1496_v15  ;;  %v1494_v6 = vmul.f32 %v1493_v14, %v1491_v16  ;;  %v631_v14 = vstv %s3714_s9  ;;  %s3970_s9 = sld [smem:[#allocation2 + $0xad]] }
0x10d1   : > { %v1500_v21 = vadd.f32 %v1499_v17, %v1494_v6  ;;  %v626_v17 = vsub.f32 %v3700_v51, %v625_v3  ;;  %v1584_v6 = vstv %s3945_s7  ;;  %s2854_s7 = sld [smem:[#allocation2 + $0xb1]] }
0x10d2   : > { %v1508_v19 = vpop.permute.xlu1 %1507  ;;  %v1502_v20 = vpop.permute.xlu0 %1501 }
0x10d3   : > { %v1505_v22 = vmul.f32 %v1504_v55, %v1502_v20  ;;  %v1511_v24 = vmul.f32 %v1510_v18, %v1508_v19  ;;  %v632_v18 = vmul.f32 %v631_v14, %v626_v17  ;;  %v1590_v19 = vstv %s3947_s24  ;;  %s2760_s24 = sld [smem:[#allocation2 + $0x59]] }
0x10d5   : > { %v1506_v25 = vadd.f32 %v1505_v22, %v1500_v21  ;;  %v633_v22 = vstv %s3949_s1 }
0x10d6   : > { %v1524_v26 = vpop.permute.xlu1 %1523  ;;  %v1518_v29 = vpop.permute.xlu0 %1517 }
0x10d7   : > { %v1512_v30 = vadd.f32 %v1511_v24, %v1506_v25  ;;  %v1521_v35 = vmul.f32 %v1520_v27, %v1518_v29  ;;  %v1527_v39 = vmul.f32 %v1526_v32, %v1524_v26  ;;  %v1597_v25 = vstv %s3952_s2 }
0x10d8   : > { %v634_v27 = vmul.f32 %v633_v22, %v632_v18  ;;  %v1603_v29 = vstv %s3956_s28 }
0x10d9   : > { %v1516_v33 = vadd.f32 %v1515_v31, %v1512_v30  ;;  %v635_v31 = vstv %s3958_s4 }
0x10da   : > { %v1536_v36 = vpop.permute.xlu1 %1535  ;;  %v1530_v38 = vpop.permute.xlu0 %1529 }
0x10db   : > { %v1522_v28 = vadd.f32 %v1521_v35, %v1516_v33  ;;  %v1533_v54 = vmul.f32 %v1532_v37, %v1530_v38  ;;  %v1539_v46 = vmul.f32 %v1538_v40, %v1536_v36  ;;  %v1609_v36 = vstv %s3963_s30 }
0x10dd   : > { %v1528_v42 = vadd.f32 %v1527_v39, %v1522_v28  ;;  %v636_v39 = vadd.f32 %v635_v31, %v634_v27  ;;  %v1615_v28 = vstv %s3966_s21  ;;  %v3267_v27 = vld [vmem:[%s3620_s25] sm:$0xff] }
0x10de   : > { %v1548_v43 = vpop.permute.xlu1 %1547  ;;  %v1542_v45 = vpop.permute.xlu0 %1541 }
0x10df   : > { %v1534_v47 = vadd.f32 %v1533_v54, %v1528_v42  ;;  %v1545_v50 = vmul.f32 %v1544_v44, %v1542_v45  ;;  %v1551_v34 = vmul.f32 %v1550_v48, %v1548_v43  ;;  %v1619_v54 = vstv %s3970_s9  ;;  %s2855_s9 = sld [smem:[#allocation2 + $0xb2]] }
0x10e0   : > { %v951_v44 = vstv %s3785_s14  ;;  %s2801_s14 = sld [smem:[#allocation2 + $0x7f]]  ;;  %vm637_vm8 = vcmp.gt.f32.partialorder %v636_v39, 0.0 }
0x10e1   : > { %v1540_v49 = vadd.f32 %v1539_v46, %v1534_v47  ;;  %v638_v47 = vmin.f32 %v636_v39, 0.0 }
0x10e2   : > { %v1560_v52 = vpop.permute.xlu1 %1559  ;;  %v1554_v57 = vpop.permute.xlu0 %1553 }
0x10e3   : > { %v1546_v58 = vadd.f32 %v1545_v50, %v1540_v49  ;;  %v1557_v61 = vmul.f32 %v1556_v53, %v1554_v57  ;;  %v1563_v56 = vmul.f32 %v1562_v59, %v1560_v52  ;;  %v1625_v49 = vstv %s3973_s15  ;;  %s2856_s15 = sld [smem:[#allocation2 + $0xb3]] }
0x10e4   : > { %v957_v50 = vstv %s3790_s17  ;;  %v1620_v53 = vmul.f32 %v1619_v54, %v3925_v12  ;;  %v952_v57 = vsub.f32 %v3771_v10, %v951_v44  ;;  %s2802_s17 = sld [smem:[#allocation2 + $0x80]] }
0x10e5   : > { %v1552_v60 = vadd.f32 %v1551_v34, %v1546_v58  ;;  %v1631_v34 = vstv %s3977_s11 }
0x10e6   : > { %v1576_v62 = vpop.permute.xlu1 %1575  ;;  %v1570_v0 = vpop.permute.xlu0 %1569  ;;  %v1285_v22 = vstv %s2801_s14  ;;  %s4071_s14 = sld [smem:[#allocation2 + $0x121]] }
0x10e7   : > { %v1558_v1 = vadd.f32 %v1557_v61, %v1552_v60  ;;  %v1573_v16 = vmul.f32 %v1572_v2, %v1570_v0  ;;  %v1579_v55 = vmul.f32 %v1578_v8, %v1576_v62  ;;  %v639_v60 = vmul.f32 1.442695, %v638_v47 }
0x10e8   : > { %v958_v61 = vmul.f32 %v957_v50, %v952_v57  ;;  %v1637_v62 = vstv %s3980_s6  ;;  %v959_v0 = vstv %s3982_s29  ;;  %v1643_v2 = vstv %s2854_s7  ;;  %s4063_s6 = sld [smem:[#allocation2 + $0xb5]]  ;;  %s4065_s29 = sld [smem:[#allocation2 + $0xd9]] }
0x10e9   : > { %v1564_v4 = vadd.f32 %v1563_v56, %v1558_v1  ;;  %3239 = vpow2.f32 %v639_v60  ;;  %v961_v8 = vstv %s2760_s24  ;;  %s4067_s7 = sld [smem:[#allocation2 + $0xfd]]  ;;  %s4069_s24 = sld [smem:[#allocation2 + $0xb4]] }
0x10ea   : > { %v1588_v11 = vpop.permute.xlu1 %1587  ;;  %v1582_v13 = vpop.permute.xlu0 %1581  ;;  %v960_v12 = vmul.f32 %v959_v0, %v958_v61 }
0x10eb   : > { %v1568_v15 = vadd.f32 %v1567_v5, %v1564_v4  ;;  %v1585_v24 = vmul.f32 %v1584_v6, %v1582_v13  ;;  %v1591_v51 = vmul.f32 %v1590_v19, %v1588_v11 }
0x10ec   : > { %v962_v14 = vadd.f32 %v961_v8, %v960_v12 }
0x10ed   : > { %v1574_v9 = vadd.f32 %v1573_v16, %v1568_v15  ;;  %v1277_v16 = vstv %s3872_s12 }
0x10ee   : > { %v1601_v20 = vpop.permute.xlu1 %1600  ;;  %v1595_v21 = vpop.permute.xlu0 %1594  ;;  %v964_v6 = vmin.f32 %v962_v14, 0.0  ;;  %v1278_v18 = vsub.f32 %v3861_v41, %v1277_v16  ;;  %vm963_vm9 = vcmp.gt.f32.partialorder %v962_v14, 0.0 }
0x10ef   : > { %v1580_v23 = vadd.f32 %v1579_v55, %v1574_v9  ;;  %v1598_v33 = vmul.f32 %v1597_v25, %v1595_v21  ;;  %v1604_v37 = vmul.f32 %v1603_v29, %v1601_v20  ;;  %v1283_v55 = vstv %s3877_s18 }
0x10f0   : > { %v965_v19 = vmul.f32 1.442695, %v964_v6  ;;  %v1284_v20 = vmul.f32 %v1283_v55, %v1278_v18  ;;  %v1287_v25 = vstv %s2802_s17  ;;  %s4073_s17 = sld [smem:[#allocation2 + $0xd8]]  ;;  %v1718_v55 = vstv %s4067_s7  ;;  %s4149_s7 = sld [smem:[#allocation2 + $0xde]] }
0x10f1   : > { %v1586_v26 = vadd.f32 %v1585_v24, %v1580_v23  ;;  %v1722_v18 = vstv %s4071_s14  ;;  %s4165_s14 = sld [smem:[#allocation2 + $0xdf]] }
0x10f2   : > { %v1607_v30 = vpop.permute.xlu0 %1606  ;;  %v1613_v35 = vpop.permute.xlu1 %1612  ;;  %3241 = vpow2.f32 %v965_v19  ;;  %v1286_v23 = vmul.f32 %v1285_v22, %v1284_v20 }
0x10f3   : > { %v1592_v32 = vadd.f32 %v1591_v51, %v1586_v26  ;;  %v1610_v42 = vmul.f32 %v1609_v36, %v1607_v30  ;;  %v1616_v45 = vmul.f32 %v1615_v28, %v1613_v35  ;;  %v3240_v9 = vpop.eup %3239  ;;  %v3268_v36 = vld [vmem:[%s3620_s25 + $0x8] sm:$0xff] }
0x10f4   : > { %v2719_v21 = vadd.f32 -1.0, %v3240_v9  ;;  %v1288_v26 = vadd.f32 %v1287_v25, %v1286_v23  ;;  %v1696_v9 = vstv %s4069_s24  ;;  %s4157_s24 = sld [smem:[#allocation2 + $0x126]] }
0x10f5   : > { %v1599_v38 = vadd.f32 %v1598_v33, %v1592_v32 }
0x10f6   : > { %v1623_v43 = vpop.permute.xlu0 %1622  ;;  %v1629_v48 = vpop.permute.xlu1 %1628  ;;  %v642_v24 = vsel %vm637_vm8, %v636_v39, %v2719_v21  ;;  %v1290_v30 = vmin.f32 %v1288_v26, 0.0  ;;  %vm1289_vm10 = vcmp.gt.f32.partialorder %v1288_v26, 0.0  ;;  %v1699_v19 = vstv %s4073_s17  ;;  %s4171_s17 = sld [smem:[#allocation2 + $0x103]] }
0x10f7   : > { %v1605_v40 = vadd.f32 %v1604_v37, %v1599_v38  ;;  %v1626_v59 = vmul.f32 %v1625_v49, %v1623_v43  ;;  %v1632_v56 = vmul.f32 %v1631_v34, %v1629_v48  ;;  %v643_v51 = vmul.f32 %v3894_v7, %v642_v24 }
0x10f8   : > { %v1291_v41 = vmul.f32 1.442695, %v1290_v30 }
0x10f9   : > { %v1611_v46 = vadd.f32 %v1610_v42, %v1605_v40  ;;  %v4003_v29 = vadd.f32 %v3267_v27, %v643_v51  ;;  %v3269_v42 = vld [vmem:[%s3620_s25 + $0x10] sm:$0xff] }
0x10fa   : > { %v1635_v63 = vpop.permute.xlu0 %1634  ;;  %v1641_v3 = vpop.permute.xlu1 %1640  ;;  %3243 = vpow2.f32 %v1291_v41 }
0x10fb   : > { %v1617_v52 = vadd.f32 %v1616_v45, %v1611_v46  ;;  %v1638_v5 = vmul.f32 %v1637_v62, %v1635_v63  ;;  %v1644_v10 = vmul.f32 %v1643_v2, %v1641_v3  ;;  %v1683_v2 = vstv %s2856_s15  ;;  %s4106_s15 = sld [smem:[#allocation2 + $0x123]] }
0x10fc   : > { %v3242_v31 = vpop.eup %3241 }
0x10fd   : > { %v1621_v58 = vadd.f32 %v1620_v53, %v1617_v52  ;;  %v2761_v32 = vadd.f32 -1.0, %v3242_v31 }
0x10ff   : > { %v1627_v1 = vadd.f32 %v1626_v59, %v1621_v58  ;;  %v968_v33 = vsel %vm963_vm9, %v962_v14, %v2761_v32 }
0x1100   : > { %v969_v35 = vmul.f32 %v3894_v7, %v968_v33 }
0x1101   : > { %v1633_v4 = vadd.f32 %v1632_v56, %v1627_v1  ;;  %v1681_v56 = vstv %s2855_s9  ;;  %s4096_s9 = sld [smem:[#allocation2 + $0xff]] }
0x1102   : > { %v4021_v37 = vmul.f32 %v3268_v36, %v969_v35 }
0x1103   : > { %v1639_v11 = vadd.f32 %v1638_v5, %v1633_v4 }
0x1104   : > { %v3244_v38 = vpop.eup %3243 }
0x1105   : > { %v3993_v13 = vadd.f32 %v1644_v10, %v1639_v11  ;;  %v2803_v39 = vadd.f32 -1.0, %v3244_v38 }
0x1107   : > { %v1648_v15 = vmul.f32 %v3894_v7, %v3993_v13  ;;  %v1294_v28 = vsel %vm1289_vm10, %v1288_v26, %v2803_v39 }
0x1108   : > { %v1295_v40 = vmul.f32 %v3894_v7, %v1294_v28 }
0x1109   : > { %1649 = vadd.xlane.f32.xlu0 %v1648_v15  ;;  %v1658_v17 = vmul.f32 %v1648_v15, %v3993_v13  ;;  %v3270_v15 = vld [vmem:[%s3620_s25 + $0x18] sm:$0xff] }
0x110a   : > { %v4041_v54 = vadd.f32 %v3269_v42, %v1295_v40 }
0x110b   : > { %1659 = vadd.xlane.f32.xlu1 %v1658_v17  ;;  %v1710_v17 = vstv %s4063_s6  ;;  %s4137_s6 = sld [smem:[#allocation2 + $0xdd]] }
0x111c   : > { %1707 = vrot.lane.b32.xlu1 %v4003_v29, %s4726_s23 }
0x111f   : > { %1693 = vrot.lane.b32.xlu0 %v4003_v29, %s4727_s16 }
0x1120   : > { %1743 = vrot.lane.b32.xlu1 %v4003_v29, %s4720_s20 }
0x1123   : > { %1725 = vrot.lane.b32.xlu0 %v4003_v29, %s4721_s22 }
0x1124   : > { %1795 = vrot.lane.b32.xlu1 %v4003_v29, %s4722_s5 }
0x1127   : > { %1777 = vrot.lane.b32.xlu0 %v4003_v29, %s4723_s13 }
0x1128   : > { %1831 = vrot.lane.b32.xlu1 %v4003_v29, %s4724_s26 }
0x112b   : > { %1813 = vrot.lane.b32.xlu0 %v4003_v29, %s4725_s0 }
0x112c   : > { %1867 = vrot.lane.b32.xlu1 %v4021_v37, %s4726_s23 }
0x112f   : > { %1849 = vrot.lane.b32.xlu0 %v4021_v37, %s4727_s16 }
0x1130   : > { %1903 = vrot.lane.b32.xlu1 %v4021_v37, %s4720_s20 }
0x1133   : > { %1885 = vrot.lane.b32.xlu0 %v4021_v37, %s4721_s22 }
0x1134   : > { %1955 = vrot.lane.b32.xlu1 %v4021_v37, %s4722_s5 }
0x1137   : > { %1937 = vrot.lane.b32.xlu0 %v4021_v37, %s4723_s13 }
0x1138   : > { %1991 = vrot.lane.b32.xlu1 %v4021_v37, %s4724_s26 }
0x113b   : > { %1973 = vrot.lane.b32.xlu0 %v4021_v37, %s4725_s0 }
0x113c   : > { %2027 = vrot.lane.b32.xlu1 %v4041_v54, %s4726_s23 }
0x113f   : > { %2009 = vrot.lane.b32.xlu0 %v4041_v54, %s4727_s16 }
0x1140   : > { %2063 = vrot.lane.b32.xlu1 %v4041_v54, %s4720_s20 }
0x1143   : > { %2045 = vrot.lane.b32.xlu0 %v4041_v54, %s4721_s22 }
0x1144   : > { %2115 = vrot.lane.b32.xlu1 %v4041_v54, %s4722_s5 }
0x1147   : > { %2097 = vrot.lane.b32.xlu0 %v4041_v54, %s4723_s13 }
0x1148   : > { %2151 = vrot.lane.b32.xlu1 %v4041_v54, %s4724_s26 }
0x114b   : > { %2133 = vrot.lane.b32.xlu0 %v4041_v54, %s4725_s0 }
0x1196   : > { %v1650_v43 = vpop.xlane.xlu0 %1649 }
0x1197   : > { %v1651_v44 = vrot.slane %v1650_v43, 4 }
0x1198   : > { %v1660_v45 = vpop.xlane.xlu1 %1659 }
0x1199   : > { %v1652_v46 = vadd.f32 %v1651_v44, %v1650_v43  ;;  %v1661_v47 = vrot.slane %v1660_v45, 4  ;;  %v1754_v43 = vstv %s4096_s9  ;;  %s4197_s9 = sld [smem:[#allocation2 + $0x129]] }
0x119a   : > { %v1694_v14 = vpop.permute.xlu0 %1693 }
0x119b   : > { %v1653_v48 = vrot.slane %v1652_v46, 2  ;;  %v1662_v49 = vadd.f32 %v1661_v47, %v1660_v45  ;;  %v1697_v26 = vmul.f32 %v1696_v9, %v1694_v14  ;;  %v1700_v31 = vmul.f32 %v1699_v19, %v1694_v14 }
0x119c   : > { %v1708_v6 = vpop.permute.xlu1 %1707 }
0x119d   : > { %v1654_v50 = vadd.f32 %v1653_v48, %v1652_v46  ;;  %v1663_v52 = vrot.slane %v1662_v49, 2  ;;  %v1711_v21 = vmul.f32 %v1710_v17, %v1708_v6  ;;  %v1719_v24 = vmul.f32 %v1718_v55, %v1708_v6 }
0x119e   : > { %v1726_v51 = vpop.permute.xlu0 %1725  ;;  %v1723_v27 = vmul.f32 %v1722_v18, %v1708_v6 }
0x119f   : > { %v1655_v53 = vrot.slane %v1654_v50, 1  ;;  %v1664_v34 = vadd.f32 %v1663_v52, %v1662_v49  ;;  %v1712_v36 = vadd.f32 %v1711_v21, %v1697_v26  ;;  %v1758_v49 = vstv %s4106_s15  ;;  %s4199_s15 = sld [smem:[#allocation2 + $0xbe]] }
0x11a0   : > { %v1744_v48 = vpop.permute.xlu1 %1743  ;;  %v1802_v21 = vstv %s4149_s7  ;;  %s4231_s7 = sld [smem:[#allocation2 + $0x108]] }
0x11a1   : > { %v1656_v57 = vadd.f32 %v1655_v53, %v1654_v50  ;;  %v1665_v58 = vrot.slane %v1664_v34, 1 }
0x11a3   : > { %3091 = vpush %v1656_v57  ;;  %v1666_v59 = vadd.f32 %v1665_v58, %v1664_v34  ;;  %v1755_v57 = vmul.f32 %v1754_v43, %v1744_v48 }
0x11a5   : > { %3093 = vpush %v1666_v59 }
0x11d4   : > { %s3092_s12 = spop %3091 }
0x11d5   : > { %s1668_s18 = smul.f32 0.00390625, %s3092_s12  ;;  %s4075_s12 = sld [smem:[#allocation2 + $0xfc]] }
0x11d6   : > { %s3094_s2 = spop %3093 }
0x11d7   : > { %s1670_s1 = smul.f32 %s1668_s18, %s1668_s18  ;;  %v1673_v62 = vstv %s1668_s18  ;;  %s4077_s18 = sld [smem:[#allocation2 + $0x120]] }
0x11d8   : > { %s1669_s28 = smul.f32 0.00390625, %s3094_s2  ;;  %v1674_v63 = vsub.f32 %v3993_v13, %v1673_v62  ;;  %s4082_s2 = sld [smem:[#allocation2 + $0xda]] }
0x11da   : > { %s1671_s4 = ssub.f32 %s1669_s28, %s1670_s1  ;;  %s4079_s1 = sld [smem:[#allocation2 + $0xb6]] }
0x11db   : > { %s4084_s28 = sld [smem:[#allocation2 + $0xfe]]  ;;  %v1702_v20 = vstv %s4075_s12  ;;  %s4173_s12 = sld [smem:[#allocation2 + $0x127]] }
0x11dc   : > { %s1672_s30 = smax.f32 %s4690_s8, %s1671_s4  ;;  %s4086_s4 = sld [smem:[#allocation2 + $0x122]]  ;;  %v1703_v41 = vmul.f32 %v1702_v20, %v1694_v14 }
0x11dd   : > { %s1675_s21 = sadd.f32 1e-05, %s1672_s30  ;;  %s4091_s30 = sld [smem:[#allocation2 + $0xb7]]  ;;  %v1705_v22 = vstv %s4077_s18 }
0x11de   : > { %v1732_v30 = vstv %s4082_s2  ;;  %v1706_v35 = vmul.f32 %v1705_v22, %v1694_v14  ;;  %v1720_v40 = vadd.f32 %v1719_v24, %v1703_v41  ;;  %s4175_s18 = sld [smem:[#allocation2 + $0xbc]]  ;;  %v1796_v24 = vpop.permute.xlu1 %1795  ;;  %s4461_s8 = sld [smem:[#allocation2 + $0xf8]] }
0x11df   : > { %v1676_v60 = vstv %s1675_s21  ;;  %s4094_s21 = sld [smem:[#allocation2 + $0xdb]]  ;;  %v1733_v45 = vmul.f32 %v1732_v30, %v1726_v51  ;;  %s4183_s2 = sld [smem:[#allocation2 + $0x104]] }
0x11e0   : > { %3245 = vrsqrt.f32 %v1676_v60  ;;  %v1728_v25 = vstv %s4079_s1  ;;  %v1724_v44 = vadd.f32 %v1723_v27, %v1706_v35  ;;  %v1759_v60 = vmul.f32 %v1758_v49, %v1744_v48  ;;  %s4177_s1 = sld [smem:[#allocation2 + $0xe0]] }
0x11e1   : > { %v1736_v32 = vstv %s4084_s28  ;;  %v1729_v38 = vmul.f32 %v1728_v25, %v1726_v51  ;;  %s4185_s28 = sld [smem:[#allocation2 + $0x128]]  ;;  %v1820_v35 = vstv %s4165_s14  ;;  %s4243_s14 = sld [smem:[#allocation2 + $0x109]] }
0x11e2   : > { %v1740_v33 = vstv %s4086_s4  ;;  %v1737_v46 = vmul.f32 %v1736_v32, %v1726_v51  ;;  %s4187_s4 = sld [smem:[#allocation2 + $0xbd]] }
0x11e3   : > { %v1746_v39 = vstv %s4091_s30  ;;  %v1741_v47 = vmul.f32 %v1740_v33, %v1726_v51  ;;  %v1730_v50 = vadd.f32 %v1729_v38, %v1712_v36  ;;  %s4189_s30 = sld [smem:[#allocation2 + $0xe1]]  ;;  %v1824_v36 = vstv %s4171_s17  ;;  %s4245_s17 = sld [smem:[#allocation2 + $0x12d]] }
0x11e4   : > { %v1747_v52 = vmul.f32 %v1746_v39, %v1744_v48  ;;  %v1738_v58 = vadd.f32 %v1737_v46, %v1720_v40  ;;  %v1828_v38 = vstv %s4173_s12  ;;  %s4247_s12 = sld [smem:[#allocation2 + $0xc2]] }
0x11e5   : > { %v1750_v42 = vstv %s4094_s21  ;;  %v1742_v59 = vadd.f32 %v1741_v47, %v1724_v44  ;;  %s4195_s21 = sld [smem:[#allocation2 + $0x105]] }
0x11e6   : > { %v1751_v53 = vmul.f32 %v1750_v42, %v1744_v48  ;;  %v1834_v48 = vstv %s4175_s18  ;;  %v1838_v49 = vstv %s4177_s1  ;;  %s4249_s18 = sld [smem:[#allocation2 + $0xe6]]  ;;  %s4255_s1 = sld [smem:[#allocation2 + $0x10a]] }
0x11ea   : > { %v3246_v61 = vpop.eup %3245 }
0x11eb   : > { %3095 = vpush %v3246_v61 }
0x121c   : > { %s3096_s11 = spop %3095 }
0x121d   : > { %v1679_v0 = vstv %s3096_s11  ;;  %s4135_s11 = sld [smem:[#allocation2 + $0xb9]] }
0x121e   : > { %v1680_v1 = vmul.f32 %v1679_v0, %v1674_v63 }
0x1220   : > { %v1682_v3 = vmul.f32 %v1681_v56, %v1680_v1  ;;  %v1748_v56 = vadd.f32 %v1747_v52, %v1730_v50  ;;  %v1842_v50 = vstv %s4183_s2  ;;  %v1846_v52 = vstv %s4185_s28  ;;  %s4257_s2 = sld [smem:[#allocation2 + $0x12e]]  ;;  %s4259_s28 = sld [smem:[#allocation2 + $0xc3]] }
0x1222   : > { %v1684_v4 = vadd.f32 %v1683_v2, %v1682_v3  ;;  %v1756_v2 = vadd.f32 %v1755_v57, %v1738_v58  ;;  %v1760_v3 = vadd.f32 %v1759_v60, %v1742_v59 }
0x1224   : > { %v1686_v5 = vmin.f32 %v1684_v4, 0.0  ;;  %vm1685_vm11 = vcmp.gt.f32.partialorder %v1684_v4, 0.0 }
0x1226   : > { %v1687_v12 = vmul.f32 1.442695, %v1686_v5 }
0x1228   : > { %3247 = vpow2.f32 %v1687_v12 }
0x1232   : > { %v3248_v8 = vpop.eup %3247 }
0x1233   : > { %v2857_v10 = vadd.f32 -1.0, %v3248_v8 }
0x1235   : > { %v1690_v11 = vsel %vm1685_vm11, %v1684_v4, %v2857_v10  ;;  %v1780_v10 = vstv %s4135_s11  ;;  %s4213_s11 = sld [smem:[#allocation2 + $0xe3]] }
0x1236   : > { %v1691_v13 = vmul.f32 %v3894_v7, %v1690_v11  ;;  %v1714_v7 = vstv %s4065_s29  ;;  %s4147_s29 = sld [smem:[#allocation2 + $0xba]]  ;;  %v1784_v11 = vstv %s4137_s6  ;;  %s4219_s6 = sld [smem:[#allocation2 + $0x107]] }
0x1237   : > { %v1715_v23 = vmul.f32 %v1714_v7, %v1708_v6 }
0x1238   : > { %v4089_v16 = vmul.f32 %v3270_v15, %v1691_v13  ;;  %v1778_v15 = vpop.permute.xlu0 %1777 }
0x1239   : > { %v1716_v28 = vadd.f32 %v1715_v23, %v1700_v31  ;;  %v1781_v55 = vmul.f32 %v1780_v10, %v1778_v15  ;;  %v1785_v9 = vmul.f32 %v1784_v11, %v1778_v15  ;;  %v1810_v23 = vstv %s4157_s24  ;;  %s4235_s24 = sld [smem:[#allocation2 + $0xc1]] }
0x123a   : > { %2187 = vrot.lane.b32.xlu1 %v4089_v16, %s4726_s23  ;;  %2169 = vrot.lane.b32.xlu0 %v4089_v16, %s4727_s16  ;;  %s4120_s23 = sld [smem:[#allocation2 + $0xb8]]  ;;  %s4128_s16 = sld [smem:[#allocation2 + $0x124]]  ;;  %v1803_v31 = vmul.f32 %v1802_v21, %v1796_v24  ;;  %v1811_v32 = vmul.f32 %v1810_v23, %v1796_v24 }
0x123b   : > { %v1734_v34 = vadd.f32 %v1733_v45, %v1716_v28 }
0x123c   : > { %v1798_v20 = vstv %s4147_s29  ;;  %v1814_v39 = vpop.permute.xlu0 %1813  ;;  %s4225_s29 = sld [smem:[#allocation2 + $0xe4]] }
0x123d   : > { %v1752_v1 = vadd.f32 %v1751_v53, %v1734_v34  ;;  %v1799_v30 = vmul.f32 %v1798_v20, %v1796_v24  ;;  %v1821_v45 = vmul.f32 %v1820_v35, %v1814_v39  ;;  %v1825_v46 = vmul.f32 %v1824_v36, %v1814_v39  ;;  %v1832_v53 = vpop.permute.xlu1 %1831 }
0x123e   : > { %2223 = vrot.lane.b32.xlu1 %v4089_v16, %s4720_s20  ;;  %2205 = vrot.lane.b32.xlu0 %v4089_v16, %s4721_s22  ;;  %s4122_s20 = sld [smem:[#allocation2 + $0xdc]]  ;;  %s4126_s22 = sld [smem:[#allocation2 + $0x100]]  ;;  %v1829_v47 = vmul.f32 %v1828_v38, %v1814_v39  ;;  %v1835_v60 = vmul.f32 %v1834_v48, %v1832_v53 }
0x1240   : > { %v1762_v61 = vstv %s4120_s23  ;;  %v1774_v0 = vstv %s4128_s16  ;;  %s4201_s23 = sld [smem:[#allocation2 + $0xe2]]  ;;  %s4211_s16 = sld [smem:[#allocation2 + $0xbf]] }
0x1241   : > { %v1763_v4 = vmul.f32 %v1762_v61, %v4003_v29  ;;  %v1775_v8 = vmul.f32 %v1774_v0, %v4003_v29  ;;  %v1839_v61 = vmul.f32 %v1838_v49, %v1832_v53  ;;  %v1852_v0 = vstv %s4187_s4  ;;  %s4261_s4 = sld [smem:[#allocation2 + $0xe7]] }
0x1242   : > { %2275 = vrot.lane.b32.xlu1 %v4089_v16, %s4722_s5  ;;  %2257 = vrot.lane.b32.xlu0 %v4089_v16, %s4723_s13  ;;  %s4139_s5 = sld [smem:[#allocation2 + $0x101]]  ;;  %s4141_s13 = sld [smem:[#allocation2 + $0x125]] }
0x1243   : > { %v1764_v17 = vadd.f32 %v1763_v4, %v1748_v56  ;;  %v1776_v7 = vadd.f32 %v1775_v8, %v1760_v3  ;;  %v1856_v56 = vstv %s4189_s30  ;;  %v1850_v3 = vpop.permute.xlu0 %1849  ;;  %s4267_s30 = sld [smem:[#allocation2 + $0x10b]] }
0x1244   : > { %v1766_v62 = vstv %s4122_s20  ;;  %v1770_v63 = vstv %s4126_s22  ;;  %s4207_s20 = sld [smem:[#allocation2 + $0x106]]  ;;  %s4209_s22 = sld [smem:[#allocation2 + $0x12a]]  ;;  %v1853_v10 = vmul.f32 %v1852_v0, %v1850_v3  ;;  %v1857_v11 = vmul.f32 %v1856_v56, %v1850_v3 }
0x1245   : > { %v1767_v5 = vmul.f32 %v1766_v62, %v4003_v29  ;;  %v1771_v12 = vmul.f32 %v1770_v63, %v4003_v29  ;;  %v1782_v25 = vadd.f32 %v1781_v55, %v1764_v17  ;;  %v1843_v62 = vmul.f32 %v1842_v50, %v1832_v53 }
0x1246   : > { %2311 = vrot.lane.b32.xlu1 %v4089_v16, %s4724_s26  ;;  %2293 = vrot.lane.b32.xlu0 %v4089_v16, %s4725_s0  ;;  %s4155_s26 = sld [smem:[#allocation2 + $0x102]]  ;;  %s4163_s0 = sld [smem:[#allocation2 + $0xbb]]  ;;  %v1847_v63 = vmul.f32 %v1846_v52, %v1832_v53  ;;  %v1874_v17 = vstv %s4201_s23  ;;  %v1922_v53 = vstv %s4235_s24 }
0x1247   : > { %v1768_v6 = vadd.f32 %v1767_v5, %v1752_v1  ;;  %v1772_v29 = vadd.f32 %v1771_v12, %v1756_v2  ;;  %v1800_v28 = vadd.f32 %v1799_v30, %v1782_v25  ;;  %v1860_v1 = vstv %s4195_s21  ;;  %s4269_s21 = sld [smem:[#allocation2 + $0x12f]]  ;;  %s4283_s23 = sld [smem:[#allocation2 + $0x10c]] }
0x1248   : > { %v1788_v13 = vstv %s4139_s5  ;;  %v1792_v14 = vstv %s4141_s13  ;;  %v1864_v2 = vstv %s4197_s9  ;;  %s4221_s5 = sld [smem:[#allocation2 + $0x12b]]  ;;  %s4223_s13 = sld [smem:[#allocation2 + $0xc0]]  ;;  %v1892_v25 = vstv %s4213_s11 }
0x1249   : > { %v1789_v18 = vmul.f32 %v1788_v13, %v1778_v15  ;;  %v1793_v19 = vmul.f32 %v1792_v14, %v1778_v15  ;;  %v1786_v51 = vadd.f32 %v1785_v9, %v1768_v6  ;;  %v1861_v13 = vmul.f32 %v1860_v1, %v1850_v3  ;;  %s4275_s9 = sld [smem:[#allocation2 + $0xc4]]  ;;  %s4295_s11 = sld [smem:[#allocation2 + $0x10d]] }
0x124a   : > { %v1865_v14 = vmul.f32 %v1864_v2, %v1850_v3  ;;  %v1870_v15 = vstv %s4199_s15  ;;  %v1878_v6 = vstv %s4207_s20  ;;  %s4277_s15 = sld [smem:[#allocation2 + $0xe8]]  ;;  %v1940_v2 = vstv %s4247_s12  ;;  %s4313_s24 = sld [smem:[#allocation2 + $0xeb]] }
0x124b   : > { %v1790_v26 = vadd.f32 %v1789_v18, %v1772_v29  ;;  %v1794_v27 = vadd.f32 %v1793_v19, %v1776_v7  ;;  %v1804_v40 = vadd.f32 %v1803_v31, %v1786_v51  ;;  %v1882_v29 = vstv %s4209_s22  ;;  %v1868_v7 = vpop.permute.xlu1 %1867  ;;  %s4285_s20 = sld [smem:[#allocation2 + $0x130]]  ;;  %s4287_s22 = sld [smem:[#allocation2 + $0xc5]] }
0x124c   : > { %v1806_v22 = vstv %s4155_s26  ;;  %v1816_v33 = vstv %s4163_s0  ;;  %s4233_s26 = sld [smem:[#allocation2 + $0x12c]]  ;;  %v1871_v20 = vmul.f32 %v1870_v15, %v1868_v7  ;;  %v1875_v21 = vmul.f32 %v1874_v17, %v1868_v7  ;;  %s4237_s0 = sld [smem:[#allocation2 + $0xe5]] }
0x124d   : > { %v1807_v41 = vmul.f32 %v1806_v22, %v1796_v24  ;;  %v1812_v43 = vadd.f32 %v1811_v32, %v1794_v27  ;;  %v1817_v44 = vmul.f32 %v1816_v33, %v1814_v39  ;;  %v1822_v34 = vadd.f32 %v1821_v45, %v1804_v40  ;;  %v1886_v27 = vpop.permute.xlu0 %1885  ;;  %s4325_s12 = sld [smem:[#allocation2 + $0xec]] }
0x124e   : > { %v1879_v22 = vmul.f32 %v1878_v6, %v1868_v7  ;;  %v1883_v23 = vmul.f32 %v1882_v29, %v1868_v7  ;;  %v1888_v24 = vstv %s4211_s16  ;;  %v1896_v51 = vstv %s4219_s6  ;;  %s4289_s16 = sld [smem:[#allocation2 + $0xe9]] }
0x124f   : > { %v1808_v42 = vadd.f32 %v1807_v41, %v1790_v26  ;;  %v1818_v57 = vadd.f32 %v1817_v44, %v1800_v28  ;;  %v1830_v59 = vadd.f32 %v1829_v47, %v1812_v43  ;;  %v1840_v5 = vadd.f32 %v1839_v61, %v1822_v34  ;;  %v1904_v43 = vpop.permute.xlu1 %1903  ;;  %s4297_s6 = sld [smem:[#allocation2 + $0x131]] }
0x1250   : > { %v1900_v26 = vstv %s4221_s5  ;;  %v1889_v33 = vmul.f32 %v1888_v24, %v1886_v27  ;;  %v1893_v35 = vmul.f32 %v1892_v25, %v1886_v27  ;;  %v1897_v36 = vmul.f32 %v1896_v51, %v1886_v27  ;;  %s4299_s5 = sld [smem:[#allocation2 + $0xc6]] }
0x1251   : > { %v1826_v58 = vadd.f32 %v1825_v46, %v1808_v42  ;;  %v1836_v4 = vadd.f32 %v1835_v60, %v1818_v57  ;;  %v1848_v8 = vadd.f32 %v1847_v63, %v1830_v59  ;;  %v1858_v9 = vadd.f32 %v1857_v11, %v1840_v5 }
0x1252   : > { %v1901_v38 = vmul.f32 %v1900_v26, %v1886_v27  ;;  %v1906_v39 = vstv %s4223_s13  ;;  %v1910_v28 = vstv %s4225_s29  ;;  %v1914_v40 = vstv %s4231_s7  ;;  %s4301_s13 = sld [smem:[#allocation2 + $0xea]]  ;;  %s4307_s29 = sld [smem:[#allocation2 + $0x10e]] }
0x1253   : > { %v1844_v12 = vadd.f32 %v1843_v62, %v1826_v58  ;;  %v1854_v55 = vadd.f32 %v1853_v10, %v1836_v4  ;;  %v1866_v19 = vadd.f32 %v1865_v14, %v1848_v8  ;;  %v1876_v31 = vadd.f32 %v1875_v21, %v1858_v9  ;;  %v1956_v9 = vpop.permute.xlu1 %1955  ;;  %s4309_s7 = sld [smem:[#allocation2 + $0x132]] }
0x1254   : > { %v1918_v42 = vstv %s4233_s26  ;;  %v1907_v48 = vmul.f32 %v1906_v39, %v1904_v43  ;;  %v1911_v49 = vmul.f32 %v1910_v28, %v1904_v43  ;;  %v1915_v50 = vmul.f32 %v1914_v40, %v1904_v43  ;;  %s4311_s26 = sld [smem:[#allocation2 + $0xc7]] }
0x1255   : > { %v1862_v18 = vadd.f32 %v1861_v13, %v1844_v12  ;;  %v1872_v30 = vadd.f32 %v1871_v20, %v1854_v55  ;;  %v1884_v32 = vadd.f32 %v1883_v23, %v1866_v19  ;;  %v1894_v45 = vadd.f32 %v1893_v35, %v1876_v31  ;;  %v1938_v12 = vpop.permute.xlu0 %1937 }
0x1256   : > { %v1919_v52 = vmul.f32 %v1918_v42, %v1904_v43  ;;  %v1926_v57 = vstv %s4237_s0  ;;  %v1930_v34 = vstv %s4243_s14  ;;  %v1934_v58 = vstv %s4245_s17  ;;  %s4319_s0 = sld [smem:[#allocation2 + $0x10f]]  ;;  %s4321_s14 = sld [smem:[#allocation2 + $0x133]] }
0x1257   : > { %v1880_v41 = vadd.f32 %v1879_v22, %v1862_v18  ;;  %v1890_v44 = vadd.f32 %v1889_v33, %v1872_v30  ;;  %v1902_v47 = vadd.f32 %v1901_v38, %v1884_v32  ;;  %v1912_v60 = vadd.f32 %v1911_v49, %v1894_v45  ;;  %v1992_v45 = vpop.permute.xlu1 %1991  ;;  %s4323_s17 = sld [smem:[#allocation2 + $0xc8]] }
0x1258   : > { %v1923_v63 = vmul.f32 %v1922_v53, %v4021_v37  ;;  %v1927_v0 = vmul.f32 %v1926_v57, %v4021_v37  ;;  %v1931_v56 = vmul.f32 %v1930_v34, %v4021_v37  ;;  %v1935_v1 = vmul.f32 %v1934_v58, %v4021_v37 }
0x1259   : > { %v1898_v46 = vadd.f32 %v1897_v36, %v1880_v41  ;;  %v1908_v59 = vadd.f32 %v1907_v48, %v1890_v44  ;;  %v1920_v62 = vadd.f32 %v1919_v52, %v1902_v47  ;;  %v1944_v3 = vstv %s4249_s18  ;;  %v1974_v31 = vpop.permute.xlu0 %1973  ;;  %s4331_s18 = sld [smem:[#allocation2 + $0x110]] }
0x125a   : > { %v1948_v4 = vstv %s4255_s1  ;;  %v1952_v5 = vstv %s4257_s2  ;;  %v1928_v10 = vadd.f32 %v1927_v0, %v1912_v60  ;;  %v1941_v13 = vmul.f32 %v1940_v2, %v1938_v12  ;;  %s4333_s1 = sld [smem:[#allocation2 + $0x134]]  ;;  %s4335_s2 = sld [smem:[#allocation2 + $0xc9]] }
0x125b   : > { %v1916_v61 = vadd.f32 %v1915_v50, %v1898_v46  ;;  %v1924_v8 = vadd.f32 %v1923_v63, %v1908_v59  ;;  %v1936_v11 = vadd.f32 %v1935_v1, %v1920_v62  ;;  %v1945_v14 = vmul.f32 %v1944_v3, %v1938_v12 }
0x125c   : > { %v1949_v15 = vmul.f32 %v1948_v4, %v1938_v12  ;;  %v1953_v17 = vmul.f32 %v1952_v5, %v1938_v12  ;;  %v1958_v6 = vstv %s4259_s28  ;;  %v1962_v29 = vstv %s4261_s4  ;;  %s4337_s28 = sld [smem:[#allocation2 + $0xed]]  ;;  %s4343_s4 = sld [smem:[#allocation2 + $0x111]] }
0x125d   : > { %v1932_v37 = vadd.f32 %v1931_v56, %v1916_v61  ;;  %v1966_v7 = vstv %s4267_s30  ;;  %v1970_v55 = vstv %s4269_s21  ;;  %v1942_v18 = vadd.f32 %v1941_v13, %v1924_v8  ;;  %v2010_v61 = vpop.permute.xlu0 %2009  ;;  %s4345_s30 = sld [smem:[#allocation2 + $0x135]]  ;;  %s4347_s21 = sld [smem:[#allocation2 + $0xca]] }
0x125e   : > { %v1946_v19 = vadd.f32 %v1945_v14, %v1928_v10  ;;  %v1954_v21 = vadd.f32 %v1953_v17, %v1936_v11  ;;  %v1959_v22 = vmul.f32 %v1958_v6, %v1956_v9  ;;  %v1963_v23 = vmul.f32 %v1962_v29, %v1956_v9 }
0x125f   : > { %v1950_v20 = vadd.f32 %v1949_v15, %v1932_v37  ;;  %v1967_v24 = vmul.f32 %v1966_v7, %v1956_v9  ;;  %v1971_v25 = vmul.f32 %v1970_v55, %v1956_v9  ;;  %v1976_v51 = vstv %s4275_s9  ;;  %v2028_v37 = vpop.permute.xlu1 %2027  ;;  %s4349_s9 = sld [smem:[#allocation2 + $0xee]] }
0x1260   : > { %v1980_v26 = vstv %s4277_s15  ;;  %v1984_v27 = vstv %s4283_s23  ;;  %v1988_v30 = vstv %s4285_s20  ;;  %v1960_v41 = vadd.f32 %v1959_v22, %v1942_v18  ;;  %s4355_s15 = sld [smem:[#allocation2 + $0x112]]  ;;  %s4357_s23 = sld [smem:[#allocation2 + $0x136]] }
0x1261   : > { %v1964_v32 = vadd.f32 %v1963_v23, %v1946_v19  ;;  %v1968_v33 = vadd.f32 %v1967_v24, %v1950_v20  ;;  %v1972_v35 = vadd.f32 %v1971_v25, %v1954_v21  ;;  %v1977_v36 = vmul.f32 %v1976_v51, %v1974_v31  ;;  %v2046_v20 = vpop.permute.xlu0 %2045  ;;  %s4359_s20 = sld [smem:[#allocation2 + $0xcb]] }
0x1262   : > { %v1981_v38 = vmul.f32 %v1980_v26, %v1974_v31  ;;  %v1985_v39 = vmul.f32 %v1984_v27, %v1974_v31  ;;  %v1989_v28 = vmul.f32 %v1988_v30, %v1974_v31  ;;  %v1994_v40 = vstv %s4287_s22  ;;  %s4361_s22 = sld [smem:[#allocation2 + $0xef]] }
0x1263   : > { %v1998_v42 = vstv %s4289_s16  ;;  %v2002_v43 = vstv %s4295_s11  ;;  %v2006_v44 = vstv %s4297_s6  ;;  %v1978_v46 = vadd.f32 %v1977_v36, %v1960_v41  ;;  %s4367_s16 = sld [smem:[#allocation2 + $0x113]]  ;;  %s4369_s11 = sld [smem:[#allocation2 + $0x137]] }
0x1264   : > { %v1982_v47 = vadd.f32 %v1981_v38, %v1964_v32  ;;  %v1986_v48 = vadd.f32 %v1985_v39, %v1968_v33  ;;  %v1990_v49 = vadd.f32 %v1989_v28, %v1972_v35  ;;  %v1995_v50 = vmul.f32 %v1994_v40, %v1992_v45  ;;  %v2064_v33 = vpop.permute.xlu1 %2063  ;;  %s4371_s6 = sld [smem:[#allocation2 + $0xcc]] }
0x1265   : > { %v1999_v52 = vmul.f32 %v1998_v42, %v1992_v45  ;;  %v2003_v53 = vmul.f32 %v2002_v43, %v1992_v45  ;;  %v2007_v57 = vmul.f32 %v2006_v44, %v1992_v45  ;;  %v2012_v34 = vstv %s4299_s5  ;;  %s4373_s5 = sld [smem:[#allocation2 + $0xf0]] }
0x1266   : > { %v2016_v58 = vstv %s4301_s13  ;;  %v2020_v59 = vstv %s4307_s29  ;;  %v2024_v60 = vstv %s4309_s7  ;;  %v1996_v62 = vadd.f32 %v1995_v50, %v1978_v46  ;;  %s4379_s13 = sld [smem:[#allocation2 + $0x114]]  ;;  %s4381_s29 = sld [smem:[#allocation2 + $0x138]] }
0x1267   : > { %v2000_v63 = vadd.f32 %v1999_v52, %v1982_v47  ;;  %v2004_v0 = vadd.f32 %v2003_v53, %v1986_v48  ;;  %v2008_v56 = vadd.f32 %v2007_v57, %v1990_v49  ;;  %v2013_v1 = vmul.f32 %v2012_v34, %v2010_v61  ;;  %s4387_s7 = sld [smem:[#allocation2 + $0xcd]] }
0x1268   : > { %v2017_v2 = vmul.f32 %v2016_v58, %v2010_v61  ;;  %v2021_v3 = vmul.f32 %v2020_v59, %v2010_v61  ;;  %v2025_v4 = vmul.f32 %v2024_v60, %v2010_v61  ;;  %v2030_v5 = vstv %s4311_s26  ;;  %s4389_s26 = sld [smem:[#allocation2 + $0xf1]] }
0x1269   : > { %v2034_v12 = vstv %s4313_s24  ;;  %v2038_v8 = vstv %s4319_s0  ;;  %v2042_v10 = vstv %s4321_s14  ;;  %v2014_v11 = vadd.f32 %v2013_v1, %v1996_v62  ;;  %s4395_s24 = sld [smem:[#allocation2 + $0x115]]  ;;  %s4397_s0 = sld [smem:[#allocation2 + $0x139]] }
0x126a   : > { %v2018_v13 = vadd.f32 %v2017_v2, %v2000_v63  ;;  %v2022_v14 = vadd.f32 %v2021_v3, %v2004_v0  ;;  %v2026_v15 = vadd.f32 %v2025_v4, %v2008_v56  ;;  %v2031_v17 = vmul.f32 %v2030_v5, %v2028_v37  ;;  %v2098_v63 = vpop.permute.xlu0 %2097  ;;  %s4399_s14 = sld [smem:[#allocation2 + $0xce]] }
0x126b   : > { %v2035_v6 = vmul.f32 %v2034_v12, %v2028_v37  ;;  %v2039_v29 = vmul.f32 %v2038_v8, %v2028_v37  ;;  %v2043_v7 = vmul.f32 %v2042_v10, %v2028_v37  ;;  %v2048_v55 = vstv %s4323_s17  ;;  %s4401_s17 = sld [smem:[#allocation2 + $0xf2]] }
0x126c   : > { %v2052_v9 = vstv %s4325_s12  ;;  %v2056_v18 = vstv %s4331_s18  ;;  %v2060_v19 = vstv %s4333_s1  ;;  %v2032_v21 = vadd.f32 %v2031_v17, %v2014_v11  ;;  %s4403_s12 = sld [smem:[#allocation2 + $0x116]]  ;;  %s4405_s18 = sld [smem:[#allocation2 + $0x13a]]  ;;  %v2116_v11 = vpop.permute.xlu1 %2115 }
0x126d   : > { %v2036_v22 = vadd.f32 %v2035_v6, %v2018_v13  ;;  %v2040_v23 = vadd.f32 %v2039_v29, %v2022_v14  ;;  %v2044_v24 = vadd.f32 %v2043_v7, %v2026_v15  ;;  %v2049_v25 = vmul.f32 %v2048_v55, %v2046_v20  ;;  %s4407_s1 = sld [smem:[#allocation2 + $0xd3]] }
0x126e   : > { %v2053_v51 = vmul.f32 %v2052_v9, %v2046_v20  ;;  %v2057_v26 = vmul.f32 %v2056_v18, %v2046_v20  ;;  %v2061_v27 = vmul.f32 %v2060_v19, %v2046_v20  ;;  %v2066_v30 = vstv %s4335_s2  ;;  %s4409_s2 = sld [smem:[#allocation2 + $0xf7]] }
0x126f   : > { %v2070_v31 = vstv %s4337_s28  ;;  %v2074_v41 = vstv %s4343_s4  ;;  %v2078_v32 = vstv %s4345_s30  ;;  %v2050_v35 = vadd.f32 %v2049_v25, %v2032_v21  ;;  %s4415_s28 = sld [smem:[#allocation2 + $0x11b]]  ;;  %s4417_s4 = sld [smem:[#allocation2 + $0x13f]]  ;;  %v2134_v21 = vpop.permute.xlu0 %2133 }
0x1270   : > { %v2054_v36 = vadd.f32 %v2053_v51, %v2036_v22  ;;  %v2058_v38 = vadd.f32 %v2057_v26, %v2040_v23  ;;  %v2062_v39 = vadd.f32 %v2061_v27, %v2044_v24  ;;  %v2067_v28 = vmul.f32 %v2066_v30, %v2064_v33  ;;  %s4419_s30 = sld [smem:[#allocation2 + $0xcf]] }
0x1271   : > { %v2071_v40 = vmul.f32 %v2070_v31, %v2064_v33  ;;  %v2075_v42 = vmul.f32 %v2074_v41, %v2064_v33  ;;  %v2079_v43 = vmul.f32 %v2078_v32, %v2064_v33  ;;  %v2082_v44 = vstv %s4347_s21  ;;  %s4421_s21 = sld [smem:[#allocation2 + $0xf3]] }
0x1272   : > { %v2086_v45 = vstv %s4349_s9  ;;  %v2090_v46 = vstv %s4355_s15  ;;  %v2094_v47 = vstv %s4357_s23  ;;  %v2068_v48 = vadd.f32 %v2067_v28, %v2050_v35  ;;  %s4423_s9 = sld [smem:[#allocation2 + $0x117]]  ;;  %s4425_s15 = sld [smem:[#allocation2 + $0x13b]]  ;;  %v2152_v35 = vpop.permute.xlu1 %2151 }
0x1273   : > { %v2072_v49 = vadd.f32 %v2071_v40, %v2054_v36  ;;  %v2076_v50 = vadd.f32 %v2075_v42, %v2058_v38  ;;  %v2080_v52 = vadd.f32 %v2079_v43, %v2062_v39  ;;  %v2083_v53 = vmul.f32 %v2082_v44, %v4041_v54  ;;  %s4427_s23 = sld [smem:[#allocation2 + $0xd0]] }
0x1274   : > { %v2087_v57 = vmul.f32 %v2086_v45, %v4041_v54  ;;  %v2091_v34 = vmul.f32 %v2090_v46, %v4041_v54  ;;  %v2095_v58 = vmul.f32 %v2094_v47, %v4041_v54  ;;  %v2100_v59 = vstv %s4359_s20  ;;  %s4429_s20 = sld [smem:[#allocation2 + $0xf4]] }
0x1275   : > { %v2104_v60 = vstv %s4361_s22  ;;  %v2108_v61 = vstv %s4367_s16  ;;  %v2112_v62 = vstv %s4369_s11  ;;  %v2084_v0 = vadd.f32 %v2083_v53, %v2068_v48  ;;  %s4435_s22 = sld [smem:[#allocation2 + $0x118]]  ;;  %s4437_s16 = sld [smem:[#allocation2 + $0x13c]] }
0x1276   : > { %v2088_v56 = vadd.f32 %v2087_v57, %v2072_v49  ;;  %v2092_v54 = vadd.f32 %v2091_v34, %v2076_v50  ;;  %v2096_v1 = vadd.f32 %v2095_v58, %v2080_v52  ;;  %v2101_v2 = vmul.f32 %v2100_v59, %v2098_v63  ;;  %s4439_s11 = sld [smem:[#allocation2 + $0xd1]] }
0x1277   : > { %v2105_v3 = vmul.f32 %v2104_v60, %v2098_v63  ;;  %v2109_v4 = vmul.f32 %v2108_v61, %v2098_v63  ;;  %v2113_v5 = vmul.f32 %v2112_v62, %v2098_v63  ;;  %v2118_v12 = vstv %s4371_s6  ;;  %s4441_s6 = sld [smem:[#allocation2 + $0xf5]] }
0x1278   : > { %v2122_v8 = vstv %s4373_s5  ;;  %v2126_v10 = vstv %s4379_s13  ;;  %v2130_v37 = vstv %s4381_s29  ;;  %v2102_v13 = vadd.f32 %v2101_v2, %v2084_v0  ;;  %s4443_s5 = sld [smem:[#allocation2 + $0x119]]  ;;  %s4445_s13 = sld [smem:[#allocation2 + $0x13d]] }
0x1279   : > { %v2106_v14 = vadd.f32 %v2105_v3, %v2088_v56  ;;  %v2110_v15 = vadd.f32 %v2109_v4, %v2092_v54  ;;  %v2114_v17 = vadd.f32 %v2113_v5, %v2096_v1  ;;  %v2119_v6 = vmul.f32 %v2118_v12, %v2116_v11  ;;  %s4447_s29 = sld [smem:[#allocation2 + $0xd2]] }
0x127a   : > { %v2123_v29 = vmul.f32 %v2122_v8, %v2116_v11  ;;  %v2127_v7 = vmul.f32 %v2126_v10, %v2116_v11  ;;  %v2131_v55 = vmul.f32 %v2130_v37, %v2116_v11  ;;  %v2136_v9 = vstv %s4387_s7  ;;  %s4449_s7 = sld [smem:[#allocation2 + $0xf6]] }
0x127b   : > { %v2140_v18 = vstv %s4389_s26  ;;  %v2144_v19 = vstv %s4395_s24  ;;  %v2148_v20 = vstv %s4397_s0  ;;  %v2120_v22 = vadd.f32 %v2119_v6, %v2102_v13  ;;  %s4455_s26 = sld [smem:[#allocation2 + $0x11a]]  ;;  %s4457_s24 = sld [smem:[#allocation2 + $0x13e]] }
0x127c   : > { %v2124_v23 = vadd.f32 %v2123_v29, %v2106_v14  ;;  %v2128_v24 = vadd.f32 %v2127_v7, %v2110_v15  ;;  %v2132_v25 = vadd.f32 %v2131_v55, %v2114_v17  ;;  %v2137_v51 = vmul.f32 %v2136_v9, %v2134_v21  ;;  %s4459_s0 = sld [smem:[#allocation2 + $0xd4]] }
0x127d   : > { %v2141_v26 = vmul.f32 %v2140_v18, %v2134_v21  ;;  %v2145_v27 = vmul.f32 %v2144_v19, %v2134_v21  ;;  %v2149_v30 = vmul.f32 %v2148_v20, %v2134_v21  ;;  %v2154_v31 = vstv %s4399_s14  ;;  %s4463_s14 = sld [smem:[#allocation2 + $0x11c]] }
0x127e   : > { %v2158_v41 = vstv %s4401_s17  ;;  %v2162_v32 = vstv %s4403_s12  ;;  %v2166_v33 = vstv %s4405_s18  ;;  %v2138_v36 = vadd.f32 %v2137_v51, %v2120_v22  ;;  %s4465_s17 = sld [smem:[#allocation2 + $0x140]]  ;;  %s4471_s12 = sld [smem:[#allocation2 + $0xd5]] }
0x127f   : > { %v2142_v38 = vadd.f32 %v2141_v26, %v2124_v23  ;;  %v2146_v39 = vadd.f32 %v2145_v27, %v2128_v24  ;;  %v2150_v28 = vadd.f32 %v2149_v30, %v2132_v25  ;;  %v2155_v40 = vmul.f32 %v2154_v31, %v2152_v35  ;;  %s4477_s18 = sld [smem:[#allocation2 + $0xf9]] }
0x1280   : > { %v2159_v42 = vmul.f32 %v2158_v41, %v2152_v35  ;;  %v2163_v43 = vmul.f32 %v2162_v32, %v2152_v35  ;;  %v2167_v44 = vmul.f32 %v2166_v33, %v2152_v35  ;;  %v2242_v45 = vstv %s4407_s1  ;;  %s4479_s1 = sld [smem:[#allocation2 + $0x11d]] }
0x1281   : > { %v2246_v46 = vstv %s4409_s2  ;;  %v2250_v47 = vstv %s4415_s28  ;;  %v2254_v48 = vstv %s4417_s4  ;;  %v2156_v49 = vadd.f32 %v2155_v40, %v2138_v36  ;;  %s4524_s2 = sld [smem:[#allocation2 + $0x142]]  ;;  %s4526_s28 = sld [smem:[#allocation2 + $0x11f]] }
0x1282   : > { %v2160_v50 = vadd.f32 %v2159_v42, %v2142_v38  ;;  %v2164_v52 = vadd.f32 %v2163_v43, %v2146_v39  ;;  %v2168_v53 = vadd.f32 %v2167_v44, %v2150_v28  ;;  %v2172_v57 = vstv %s4419_s30  ;;  %s4497_s30 = sld [smem:[#allocation2 + $0xd6]]  ;;  %s3001_s4 = sld [smem:[#allocation2 + $0x143]] }
0x1283   : > { %v2176_v34 = vstv %s4421_s21  ;;  %v2180_v58 = vstv %s4423_s9  ;;  %v2184_v59 = vstv %s4425_s15  ;;  %v2190_v60 = vstv %s4427_s23  ;;  %s4505_s21 = sld [smem:[#allocation2 + $0x141]]  ;;  %s4507_s9 = sld [smem:[#allocation2 + $0x11e]] }
0x1284   : > { %v2194_v61 = vstv %s4429_s20  ;;  %v2198_v62 = vstv %s4435_s22  ;;  %v2202_v63 = vstv %s4437_s16  ;;  %v2208_v0 = vstv %s4439_s11  ;;  %s4509_s15 = sld [smem:[#allocation2 + $0xd7]]  ;;  %s4521_s23 = sld [smem:[#allocation2 + $0xfb]] }
0x1285   : > { %v2212_v56 = vstv %s4441_s6  ;;  %v2216_v54 = vstv %s4443_s5  ;;  %v2220_v1 = vstv %s4445_s13  ;;  %v2226_v2 = vstv %s4447_s29  ;;  %s3005_s20 = sld [smem:[#allocation2 + $0x145]]  ;;  %s3006_s22 = sld [smem:[#allocation2 + $0x149]] }
0x1286   : > { %v2230_v3 = vstv %s4449_s7  ;;  %v2234_v4 = vstv %s4455_s26  ;;  %v2238_v5 = vstv %s4457_s24  ;;  %v2260_v10 = vstv %s4459_s0  ;;  %s4728_s7 = smov 0.0   ;;  %s3002_s0 = sld [smem:[#allocation2 + $0x144]] }
0x1287   : > { %v2264_v37 = vstv %s4461_s8  ;;  %v2268_v11 = vstv %s4463_s14  ;;  %v2272_v13 = vstv %s4465_s17  ;;  %s4499_s8 = sld [smem:[#allocation2 + $0xfa]]  ;;  %v2243_v24 = vmul.f32 %v2242_v45, %v4089_v16  ;;  %s3003_s14 = sld [smem:[#allocation2 + $0x148]] }
0x1288   : > { %v2278_v25 = vstv %s4471_s12  ;;  %v2282_v51 = vstv %s4477_s18  ;;  %v2286_v26 = vstv %s4479_s1 }
0x12ac   : > { %v2170_v12 = vpop.permute.xlu0 %2169  ;;  %v2188_v8 = vpop.permute.xlu1 %2187 }
0x12ad   : > { %v2173_v14 = vmul.f32 %v2172_v57, %v2170_v12  ;;  %v2177_v15 = vmul.f32 %v2176_v34, %v2170_v12  ;;  %v2181_v17 = vmul.f32 %v2180_v58, %v2170_v12  ;;  %v2185_v6 = vmul.f32 %v2184_v59, %v2170_v12 }
0x12ae   : > { %v2191_v29 = vmul.f32 %v2190_v60, %v2188_v8  ;;  %v2195_v7 = vmul.f32 %v2194_v61, %v2188_v8  ;;  %v2199_v55 = vmul.f32 %v2198_v62, %v2188_v8  ;;  %v2203_v9 = vmul.f32 %v2202_v63, %v2188_v8 }
0x12af   : > { %v2174_v18 = vadd.f32 %v2173_v14, %v2156_v49  ;;  %v2178_v19 = vadd.f32 %v2177_v15, %v2160_v50  ;;  %v2182_v20 = vadd.f32 %v2181_v17, %v2164_v52  ;;  %v2186_v21 = vadd.f32 %v2185_v6, %v2168_v53 }
0x12b0   : > { %v2206_v22 = vpop.permute.xlu0 %2205  ;;  %v2224_v23 = vpop.permute.xlu1 %2223  ;;  %v2247_v50 = vmul.f32 %v2246_v46, %v4089_v16  ;;  %v2251_v52 = vmul.f32 %v2250_v47, %v4089_v16  ;;  %v2255_v53 = vmul.f32 %v2254_v48, %v4089_v16  ;;  %v2296_v34 = vstv %s4497_s30 }
0x12b1   : > { %v2192_v27 = vadd.f32 %v2191_v29, %v2174_v18  ;;  %v2196_v30 = vadd.f32 %v2195_v7, %v2178_v19  ;;  %v2200_v31 = vadd.f32 %v2199_v55, %v2182_v20  ;;  %v2204_v41 = vadd.f32 %v2203_v9, %v2186_v21 }
0x12b2   : > { %v2209_v32 = vmul.f32 %v2208_v0, %v2206_v22  ;;  %v2213_v33 = vmul.f32 %v2212_v56, %v2206_v22  ;;  %v2217_v35 = vmul.f32 %v2216_v54, %v2206_v22  ;;  %v2221_v36 = vmul.f32 %v2220_v1, %v2206_v22 }
0x12b3   : > { %v2227_v38 = vmul.f32 %v2226_v2, %v2224_v23  ;;  %v2231_v39 = vmul.f32 %v2230_v3, %v2224_v23  ;;  %v2235_v28 = vmul.f32 %v2234_v4, %v2224_v23  ;;  %v2239_v40 = vmul.f32 %v2238_v5, %v2224_v23 }
0x12b4   : > { %v2210_v42 = vadd.f32 %v2209_v32, %v2192_v27  ;;  %v2214_v43 = vadd.f32 %v2213_v33, %v2196_v30  ;;  %v2218_v44 = vadd.f32 %v2217_v35, %v2200_v31  ;;  %v2222_v45 = vadd.f32 %v2221_v36, %v2204_v41  ;;  %v2258_v49 = vpop.permute.xlu0 %2257  ;;  %v2276_v57 = vpop.permute.xlu1 %2275  ;;  %v4541_v41 = vld [vmem:[%s4659_s3] sm:$0xff] }
0x12b5   : > { %v2261_v62 = vmul.f32 %v2260_v10, %v2258_v49  ;;  %v2265_v63 = vmul.f32 %v2264_v37, %v2258_v49  ;;  %v2269_v0 = vmul.f32 %v2268_v11, %v2258_v49  ;;  %v2300_v56 = vstv %s4499_s8 }
0x12b6   : > { %v2228_v58 = vadd.f32 %v2227_v38, %v2210_v42  ;;  %v2232_v59 = vadd.f32 %v2231_v39, %v2214_v43  ;;  %v2236_v60 = vadd.f32 %v2235_v28, %v2218_v44  ;;  %v2240_v61 = vadd.f32 %v2239_v40, %v2222_v45 }
0x12b7   : > { %v2273_v1 = vmul.f32 %v2272_v13, %v2258_v49  ;;  %v2290_v2 = vstv %s4505_s21  ;;  %v2279_v3 = vmul.f32 %v2278_v25, %v2276_v57  ;;  %v2283_v4 = vmul.f32 %v2282_v51, %v2276_v57 }
0x12b8   : > { %v2244_v46 = vadd.f32 %v2243_v24, %v2228_v58  ;;  %v2248_v16 = vadd.f32 %v2247_v50, %v2232_v59  ;;  %v2252_v47 = vadd.f32 %v2251_v52, %v2236_v60  ;;  %v2256_v48 = vadd.f32 %v2255_v53, %v2240_v61  ;;  %v2294_v54 = vpop.permute.xlu0 %2293  ;;  %v2312_v17 = vpop.permute.xlu1 %2311 }
0x12b9   : > { %v2287_v10 = vmul.f32 %v2286_v26, %v2276_v57  ;;  %v2304_v37 = vstv %s4507_s9  ;;  %v2297_v11 = vmul.f32 %v2296_v34, %v2294_v54  ;;  %v2301_v14 = vmul.f32 %v2300_v56, %v2294_v54 }
0x12ba   : > { %v2262_v5 = vadd.f32 %v2261_v62, %v2244_v46  ;;  %v2266_v12 = vadd.f32 %v2265_v63, %v2248_v16  ;;  %v2270_v8 = vadd.f32 %v2269_v0, %v2252_v47  ;;  %v2314_v15 = vstv %s4509_s15 }
0x12bb   : > { %v2274_v6 = vadd.f32 %v2273_v1, %v2256_v48  ;;  %v2291_v55 = vmul.f32 %v2290_v2, %v2276_v57  ;;  %v2318_v9 = vstv %s4521_s23  ;;  %v2305_v20 = vmul.f32 %v2304_v37, %v2294_v54  ;;  %s4567_s23 = sshll.u32 %s3473_s19, 2 }
0x12bc   : > { %v2280_v29 = vadd.f32 %v2279_v3, %v2262_v5  ;;  %v2284_v7 = vadd.f32 %v2283_v4, %v2266_v12  ;;  %v2288_v13 = vadd.f32 %v2287_v10, %v2270_v8  ;;  %v2315_v21 = vmul.f32 %v2314_v15, %v2312_v17 }
0x12bd   : > { %v2308_v22 = vstv %s4524_s2  ;;  %v2322_v23 = vstv %s4526_s28  ;;  %v2292_v24 = vadd.f32 %v2291_v55, %v2274_v6  ;;  %v2319_v26 = vmul.f32 %v2318_v9, %v2312_v17  ;;  %s2515_s2 = sld [smem:[#allocation7 + %s4567_s23]]  ;;  %s4729_s28 = sshll.u32 %s3614_s10, 5 }
0x12be   : > { %v2298_v18 = vadd.f32 %v2297_v11, %v2280_v29  ;;  %v2302_v19 = vadd.f32 %v2301_v14, %v2284_v7  ;;  %v2306_v25 = vadd.f32 %v2305_v20, %v2288_v13  ;;  %v2309_v27 = vmul.f32 %v2308_v22, %v2294_v54 }
0x12bf   : > { %v2323_v31 = vmul.f32 %v2322_v23, %v2312_v17  ;;  %v2326_v33 = vstv %s3001_s4  ;;  %v2364_v55 = vstv %s3002_s0  ;;  %s4574_s4 = scalar_lea.vmem [#allocation9], %s4729_s28 }
0x12c0   : > { %v4534_v51 = vadd.f32 %v2315_v21, %v2298_v18  ;;  %v4536_v30 = vadd.f32 %v2319_v26, %v2302_v19  ;;  %v2310_v35 = vadd.f32 %v2309_v27, %v2292_v24  ;;  %v2327_v39 = vmul.f32 %v2326_v33, %v2312_v17 }
0x12c1   : > { %v4545_v36 = vadd.f32 %v2323_v31, %v2306_v25  ;;  %v2366_v19 = vstv %s3003_s14  ;;  %s2520_s14 = sadd.s32 1, %s4567_s23 }
0x12c2   : > { %v2331_v32 = vmul.f32 %v4541_v41, %v4534_v51  ;;  %v2377_v28 = vmul.f32 %v4541_v41, %v4536_v30  ;;  %v4550_v40 = vadd.f32 %v2327_v39, %v2310_v35 }
0x12c3   : > { %v2423_v42 = vmul.f32 %v4541_v41, %v4545_v36 }
0x12c4   : > { %2332 = vadd.xlane.f32.xlu0 %v2331_v32  ;;  %v2341_v38 = vmul.f32 %v2331_v32, %v4534_v51  ;;  %v2387_v43 = vmul.f32 %v2377_v28, %v4536_v30  ;;  %v2469_v44 = vmul.f32 %v4541_v41, %v4550_v40 }
0x12c5   : > { %v2433_v45 = vmul.f32 %v2423_v42, %v4545_v36 }
0x12c6   : > { %2342 = vadd.xlane.f32.xlu1 %v2341_v38  ;;  %v2479_v49 = vmul.f32 %v2469_v44, %v4550_v40 }
0x12c8   : > { %2378 = vadd.xlane.f32.xlu0 %v2377_v28 }
0x12ca   : > { %2424 = vadd.xlane.f32.xlu1 %v2423_v42 }
0x12cc   : > { %2388 = vadd.xlane.f32.xlu0 %v2387_v43 }
0x12ce   : > { %2470 = vadd.xlane.f32.xlu1 %v2469_v44 }
0x12d0   : > { %2434 = vadd.xlane.f32.xlu0 %v2433_v45 }
0x12d4   : > { %2480 = vadd.xlane.f32.xlu0 %v2479_v49 }
0x1351   : > { %v2333_v50 = vpop.xlane.xlu0 %2332 }
0x1352   : > { %v2334_v52 = vrot.slane %v2333_v50, 4 }
0x1353   : > { %v2343_v53 = vpop.xlane.xlu1 %2342 }
0x1354   : > { %v2335_v57 = vadd.f32 %v2334_v52, %v2333_v50  ;;  %v2344_v34 = vrot.slane %v2343_v53, 4  ;;  %v2516_v50 = vstv %s2515_s2  ;;  %v3272_v52 = vld [vmem:[%s3620_s25] sm:$0xff] }
0x1355   : > { %v2379_v16 = vpop.xlane.xlu0 %2378 }
0x1356   : > { %v2336_v58 = vrot.slane %v2335_v57, 2  ;;  %v2345_v59 = vadd.f32 %v2344_v34, %v2343_v53  ;;  %v2380_v48 = vrot.slane %v2379_v16, 4 }
0x1357   : > { %v2425_v6 = vpop.xlane.xlu1 %2424 }
0x1358   : > { %v2346_v60 = vrot.slane %v2345_v59, 2  ;;  %v2337_v61 = vadd.f32 %v2336_v58, %v2335_v57  ;;  %v2381_v1 = vadd.f32 %v2380_v48, %v2379_v16  ;;  %v2426_v18 = vrot.slane %v2425_v6, 4 }
0x1359   : > { %v2389_v47 = vpop.xlane.xlu0 %2388 }
0x135a   : > { %v2338_v62 = vrot.slane %v2337_v61, 1  ;;  %v2347_v63 = vadd.f32 %v2346_v60, %v2345_v59  ;;  %v2390_v54 = vrot.slane %v2389_v47, 4  ;;  %v2382_v3 = vrot.slane %v2381_v1, 2 }
0x135b   : > { %v2427_v23 = vadd.f32 %v2426_v18, %v2425_v6  ;;  %v2471_v58 = vpop.xlane.xlu1 %2470 }
0x135c   : > { %v2339_v0 = vadd.f32 %v2338_v62, %v2337_v61  ;;  %v2348_v56 = vrot.slane %v2347_v63, 1  ;;  %v2391_v2 = vadd.f32 %v2390_v54, %v2389_v47  ;;  %v2383_v12 = vadd.f32 %v2382_v3, %v2381_v1 }
0x135d   : > { %v2435_v7 = vpop.xlane.xlu0 %2434  ;;  %v2428_v26 = vrot.slane %v2427_v23, 2  ;;  %v2410_v62 = vstv %s3005_s20 }
0x135e   : > { %3097 = vpush %v2339_v0  ;;  %v2349_v46 = vadd.f32 %v2348_v56, %v2347_v63  ;;  %v2392_v4 = vrot.slane %v2391_v2, 2  ;;  %v2384_v10 = vrot.slane %v2383_v12, 1  ;;  %v2436_v20 = vrot.slane %v2435_v7, 4 }
0x135f   : > { %v2429_v32 = vadd.f32 %v2428_v26, %v2427_v23  ;;  %v2472_v0 = vrot.slane %v2471_v58, 4  ;;  %v2412_v56 = vstv %s3006_s22  ;;  %s2527_s22 = sadd.s32 2, %s4567_s23 }
0x1360   : > { %3099 = vpush %v2349_v46  ;;  %v2393_v8 = vadd.f32 %v2392_v4, %v2391_v2  ;;  %v2385_v14 = vadd.f32 %v2384_v10, %v2383_v12  ;;  %v2437_v24 = vadd.f32 %v2436_v20, %v2435_v7 }
0x1361   : > { %v2430_v35 = vrot.slane %v2429_v32, 1  ;;  %v2481_v60 = vpop.xlane.xlu0 %2480 }
0x1362   : > { %v2394_v37 = vrot.slane %v2393_v8, 1  ;;  %v2438_v31 = vrot.slane %v2437_v24, 2  ;;  %v2482_v46 = vrot.slane %v2481_v60, 4 }
0x1363   : > { %v2431_v43 = vadd.f32 %v2430_v35, %v2429_v32 }
0x1364   : > { %v2395_v15 = vadd.f32 %v2394_v37, %v2393_v8  ;;  %v2439_v33 = vadd.f32 %v2438_v31, %v2437_v24  ;;  %v2483_v48 = vadd.f32 %v2482_v46, %v2481_v60 }
0x1366   : > { %v2440_v38 = vrot.slane %v2439_v33, 1  ;;  %v2484_v4 = vrot.slane %v2483_v48, 2 }
0x1368   : > { %v2441_v44 = vadd.f32 %v2440_v38, %v2439_v33  ;;  %v2485_v12 = vadd.f32 %v2484_v4, %v2483_v48 }
0x136a   : > { %v2486_v10 = vrot.slane %v2485_v12, 1 }
0x138f   : > { %s3098_s16 = spop %3097 }
0x1390   : > { %s2351_s11 = smul.f32 0.00390625, %s3098_s16 }
0x1391   : > { %s3100_s5 = spop %3099 }
0x1392   : > { %s2353_s6 = smul.f32 %s2351_s11, %s2351_s11  ;;  %v2356_v17 = vstv %s2351_s11 }
0x1393   : > { %s2352_s13 = smul.f32 0.00390625, %s3100_s5  ;;  %v2357_v29 = vsub.f32 %v4534_v51, %v2356_v17  ;;  %v2487_v17 = vadd.f32 %v2486_v10, %v2485_v12 }
0x1395   : > { %s2354_s29 = ssub.f32 %s2352_s13, %s2353_s6 }
0x1397   : > { %s2355_s26 = smax.f32 %s4728_s7, %s2354_s29 }
0x1398   : > { %s2358_s24 = sadd.f32 1e-05, %s2355_s26 }
0x139a   : > { %v2359_v5 = vstv %s2358_s24 }
0x139b   : > { %3249 = vrsqrt.f32 %v2359_v5 }
0x13a5   : > { %v3250_v11 = vpop.eup %3249 }
0x13a6   : > { %3101 = vpush %v3250_v11 }
0x13a7   : > { %3103 = vpush %v2385_v14 }
0x13a8   : > { %3105 = vpush %v2395_v15 }
0x13d7   : > { %s3102_s17 = spop %3101 }
0x13d8   : > { %v2362_v13 = vstv %s3102_s17  ;;  %s3104_s12 = spop %3103  ;;  %s2521_s17 = sld [smem:[#allocation7 + %s2520_s14]] }
0x13d9   : > { %v2363_v9 = vmul.f32 %v2362_v13, %v2357_v29  ;;  %s4561_s18 = smul.f32 0.00390625, %s3104_s12  ;;  %s3106_s1 = spop %3105  ;;  %v3273_v13 = vld [vmem:[%s3620_s25 + $0x8] sm:$0xff] }
0x13da   : > { %s2398_s30 = smul.f32 0.00390625, %s3106_s1  ;;  %s3008_s12 = sld [smem:[#allocation2 + $0x146]] }
0x13db   : > { %v2365_v21 = vmul.f32 %v2364_v55, %v2363_v9  ;;  %s2399_s8 = smul.f32 %s4561_s18, %s4561_s18  ;;  %v2402_v34 = vstv %s4561_s18  ;;  %s3009_s18 = sld [smem:[#allocation2 + $0x14a]] }
0x13dc   : > { %v2403_v59 = vsub.f32 %v4536_v30, %v2402_v34  ;;  %v2473_v30 = vadd.f32 %v2472_v0, %v2471_v58  ;;  %s4730_s14 = sld [smem:[#allocation24_spill]] }
0x13dd   : > { %v2367_v22 = vadd.f32 %v2366_v19, %v2365_v21  ;;  %s2400_s21 = ssub.f32 %s2398_s30, %s2399_s8 }
0x13de   : > { %v2474_v2 = vrot.slane %v2473_v30, 2  ;;  %v2522_v7 = vstv %s2521_s17 }
0x13df   : > { %v2369_v25 = vmin.f32 %v2367_v22, 0.0  ;;  %s2401_s9 = smax.f32 %s4728_s7, %s2400_s21  ;;  %vm2368_vm12 = vcmp.gt.f32.partialorder %v2367_v22, 0.0 }
0x13e0   : > { %s2404_s15 = sadd.f32 1e-05, %s2401_s9  ;;  %v2475_v5 = vadd.f32 %v2474_v2, %v2473_v30  ;;  %v2456_v21 = vstv %s3008_s12 }
0x13e1   : > { %v2370_v51 = vmul.f32 1.442695, %v2369_v25  ;;  %v2458_v23 = vstv %s3009_s18 }
0x13e2   : > { %v2405_v27 = vstv %s2404_s15  ;;  %v2476_v8 = vrot.slane %v2475_v5, 1 }
0x13e3   : > { %3251 = vpow2.f32 %v2370_v51 }
0x13e4   : > { %3253 = vrsqrt.f32 %v2405_v27  ;;  %v2477_v15 = vadd.f32 %v2476_v8, %v2475_v5 }
0x13ed   : > { %v3252_v39 = vpop.eup %3251 }
0x13ee   : > { %v3254_v28 = vpop.eup %3253  ;;  %v3004_v42 = vadd.f32 -1.0, %v3252_v39  ;;  %v3274_v39 = vld [vmem:[%s3620_s25 + $0x10] sm:$0xff] }
0x13ef   : > { %3107 = vpush %v3254_v28 }
0x13f0   : > { %v2373_v45 = vsel %vm2368_vm12, %v2367_v22, %v3004_v42  ;;  %3109 = vpush %v2431_v43 }
0x13f1   : > { %v2374_v49 = vmul.f32 %v4541_v41, %v2373_v45  ;;  %3111 = vpush %v2441_v44 }
0x13f3   : > { %v2513_v53 = vadd.f32 %v3272_v52, %v2374_v49 }
0x13f5   : > { %v2517_v57 = vadd.f32 %v2516_v50, %v2513_v53 }
0x13f7   : > { %2518 = vst [vmem:[%s4574_s4] sm:$0xff] %v2517_v57 }
0x1420   : > { %s3108_s16 = spop %3107 }
0x1421   : > { %v2408_v61 = vstv %s3108_s16  ;;  %s3110_s11 = spop %3109  ;;  %s2528_s16 = sld [smem:[#allocation7 + %s2527_s22]] }
0x1422   : > { %v2409_v63 = vmul.f32 %v2408_v61, %v2403_v59  ;;  %s4579_s6 = smul.f32 0.00390625, %s3110_s11  ;;  %s3112_s5 = spop %3111 }
0x1423   : > { %s2444_s13 = smul.f32 0.00390625, %s3112_s5  ;;  %s3012_s11 = sld [smem:[#allocation2 + $0x14b]] }
0x1424   : > { %v2411_v16 = vmul.f32 %v2410_v62, %v2409_v63  ;;  %s2445_s29 = smul.f32 %s4579_s6, %s4579_s6  ;;  %v2448_v18 = vstv %s4579_s6  ;;  %s2534_s5 = sadd.s32 3, %s4567_s23  ;;  %v3275_v63 = vld [vmem:[%s3620_s25 + $0x18] sm:$0xff] }
0x1425   : > { %v2449_v19 = vsub.f32 %v4545_v36, %v2448_v18  ;;  %s2541_s23 = scalar_lea.sflag [#allocation4], %s3614_s10 }
0x1426   : > { %v2413_v47 = vadd.f32 %v2412_v56, %v2411_v16  ;;  %s2446_s26 = ssub.f32 %s2444_s13, %s2445_s29  ;;  %s2535_s13 = sld [smem:[#allocation7 + %s2534_s5]] }
0x1427   : > { %v2529_v38 = vstv %s2528_s16  ;;  %s3024_s29 = sshll.u32 %s3473_s19, 9  ;;  %s3424_s19 = smov [#allocation9]  }
0x1428   : > { %v2415_v54 = vmin.f32 %v2413_v47, 0.0  ;;  %s2447_s24 = smax.f32 %s4728_s7, %s2446_s26  ;;  %vm2414_vm13 = vcmp.gt.f32.partialorder %v2413_v47, 0.0  ;;  %s2554_s26 = sshll.u32 %s4574_s4, 4  ;;  %s4611_s26 = int_to_ptr.vmem [resolvable:$true] %s2554_s26 }
0x1429   : > { %s2450_s0 = sadd.f32 1e-05, %s2447_s24  ;;  %v2504_v52 = vstv %s3012_s11  ;;  %s4609_s17 = scalar_lea.hbm %s4730_s14, %s3024_s29 }
0x142a   : > { %v2416_v1 = vmul.f32 1.442695, %v2415_v54  ;;  %s3334_s12 = scalar_lea.vmem %s4611_s26, 512  ;;  %s3338_s25 = sshll.u32 %s3424_s19, 4  ;;  %s3339_s25 = int_to_ptr.vmem [resolvable:$false] %s3338_s25 }
0x142b   : > { %v2451_v3 = vstv %s2450_s0  ;;  %p3335_p0 = scmp.ne.s32.totalorder %s4611_s26, %s3334_s12  ;;  %s3340_s18 = scalar_lea.vmem %s3339_s25, 1024 }
0x142c   : > { %3255 = vpow2.f32 %v2416_v1  ;;  %v2536_v62 = vstv %s2535_s13  ;;  %p3341_p6 = scmp.lt.s32.totalorder %s4611_s26, %s3339_s25  ;;  %p3342_p12 = scmp.lt.s32.totalorder %s3340_s18, %s3334_s12 }
0x142d   : > { %3257 = vrsqrt.f32 %v2451_v3  ;;  %p3336_p10 = pnand %p3335_p0, %p4731_p8 }
0x142e   : > { %p3343_p1 = por %p3342_p12, %p3341_p6 }
0x142f   : > { %p3337_p4 = pneg %p3336_p10 }
0x1431   : > { %p3344_p7 = pnand %p3343_p1, %p3337_p4 }
0x1436   : > { %v3256_v37 = vpop.eup %3255 }
0x1437   : > { %v3258_v11 = vpop.eup %3257  ;;  %v3007_v14 = vadd.f32 -1.0, %v3256_v37 }
0x1438   : > { %3113 = vpush %v3258_v11 }
0x1439   : > { %v2419_v6 = vsel %vm2414_vm13, %v2413_v47, %v3007_v14  ;;  %3115 = vpush %v2477_v15 }
0x143a   : > { %v2420_v29 = vmul.f32 %v4541_v41, %v2419_v6  ;;  %3117 = vpush %v2487_v17 }
0x143c   : > { %v2519_v55 = vadd.f32 %v3273_v13, %v2420_v29 }
0x143e   : > { %v2523_v9 = vadd.f32 %v2522_v7, %v2519_v55 }
0x1440   : > { %3015 = vst [vmem:[%s4574_s4 + $0x8] sm:$0xff] %v2523_v9 }
0x1469   : > { %s3114_s1 = spop %3113 }
0x146a   : > { %v2454_v20 = vstv %s3114_s1  ;;  %s3116_s30 = spop %3115 }
0x146b   : > { %v2455_v22 = vmul.f32 %v2454_v20, %v2449_v19  ;;  %s4590_s8 = smul.f32 0.00390625, %s3116_s30  ;;  %s3118_s21 = spop %3117 }
0x146c   : > { %s2490_s9 = smul.f32 0.00390625, %s3118_s21 }
0x146d   : > { %v2457_v24 = vmul.f32 %v2456_v21, %v2455_v22  ;;  %s2491_s15 = smul.f32 %s4590_s8, %s4590_s8  ;;  %v2494_v43 = vstv %s4590_s8 }
0x146e   : > { %v2495_v44 = vsub.f32 %v4550_v40, %v2494_v43 }
0x146f   : > { %v2459_v25 = vadd.f32 %v2458_v23, %v2457_v24  ;;  %s2492_s2 = ssub.f32 %s2490_s9, %s2491_s15 }
0x1471   : > { %v2461_v51 = vmin.f32 %v2459_v25, 0.0  ;;  %s2493_s28 = smax.f32 %s4728_s7, %s2492_s2  ;;  %vm2460_vm14 = vcmp.gt.f32.partialorder %v2459_v25, 0.0  ;;  %s3011_s7 = sld [smem:[#allocation2 + $0x147]] }
0x1472   : > { %s2496_s20 = sadd.f32 1e-05, %s2493_s28 }
0x1473   : > { %v2462_v36 = vmul.f32 1.442695, %v2461_v51 }
0x1474   : > { %v2497_v26 = vstv %s2496_s20 }
0x1475   : > { %3259 = vpow2.f32 %v2462_v36 }
0x1476   : > { %3261 = vrsqrt.f32 %v2497_v26 }
0x1477   : > { %v2502_v49 = vstv %s3011_s7 }
0x147f   : > { %v3260_v27 = vpop.eup %3259 }
0x1480   : > { %v3262_v31 = vpop.eup %3261  ;;  %v3010_v32 = vadd.f32 -1.0, %v3260_v27 }
0x1481   : > { %3119 = vpush %v3262_v31 }
0x1482   : > { %v2465_v33 = vsel %vm2460_vm14, %v2459_v25, %v3010_v32 }
0x1483   : > { %v2466_v35 = vmul.f32 %v4541_v41, %v2465_v33 }
0x1485   : > { %v2526_v28 = vadd.f32 %v3274_v39, %v2466_v35 }
0x1487   : > { %v2530_v42 = vadd.f32 %v2529_v38, %v2526_v28 }
0x1489   : > { %3016 = vst [vmem:[%s4574_s4 + $0x10] sm:$0xff] %v2530_v42 }
0x14b2   : > { %s3120_s6 = spop %3119 }
0x14b3   : > { %v2500_v45 = vstv %s3120_s6 }
0x14b4   : > { %v2501_v50 = vmul.f32 %v2500_v45, %v2495_v44 }
0x14b6   : > { %v2503_v53 = vmul.f32 %v2502_v49, %v2501_v50 }
0x14b8   : > { %v2505_v57 = vadd.f32 %v2504_v52, %v2503_v53 }
0x14ba   : > { %v2507_v34 = vmin.f32 %v2505_v57, 0.0  ;;  %vm2506_vm15 = vcmp.gt.f32.partialorder %v2505_v57, 0.0 }
0x14bc   : > { %v2508_v58 = vmul.f32 1.442695, %v2507_v34 }
0x14be   : > { %3263 = vpow2.f32 %v2508_v58 }
0x14c8   : > { %v3264_v59 = vpop.eup %3263 }
0x14c9   : > { %v3013_v60 = vadd.f32 -1.0, %v3264_v59 }
0x14cb   : > { %v2511_v40 = vsel %vm2506_vm15, %v2505_v57, %v3013_v60 }
0x14cc   : > { %v2512_v61 = vmul.f32 %v4541_v41, %v2511_v40 }
0x14ce   : > { %v2533_v0 = vadd.f32 %v3275_v63, %v2512_v61 }
0x14d0   : > { %v2537_v56 = vadd.f32 %v2536_v62, %v2533_v0 }
0x14d2   : > { %3017 = vst [vmem:[%s4574_s4 + $0x18] sm:$0xff] %v2537_v56 }
0x14d3   : > { %3347 = shalt.err (!%p3344_p7)
}
0x14d4   : > { %s3348_s4 = scalar_lea.hbm %s4609_s17, 512  ;;  %s3352_s8 = scalar_lea.hbm %s4730_s14, 1024 }
0x14d5   : > { %p3349_p11 = scmp.ne.s32.totalorder %s4609_s17, %s3348_s4  ;;  %p3353_p2 = scmp.lt.u32.totalorder %s4609_s17, %s4730_s14 }
0x14d6   : > { %p3354_p5 = scmp.lt.u32.totalorder %s3352_s8, %s3348_s4  ;;  %p3356_p0 = scmp.lt.u32.totalorder %s3348_s4, %s4609_s17 }
0x14d7   : > { %p3350_p13 = pnand %p3349_p11, %p4731_p8 }
0x14d8   : > { %p3355_p3 = por %p3354_p5, %p3353_p2 }
0x14d9   : > { %p3351_p9 = pneg %p3350_p13 }
0x14da   : > { %p3357_p10 = por %p3356_p0, %p3355_p3 }
0x14dc   : > { %p3358_p4 = pnand %p3357_p10, %p3351_p9 }
0x14de   : > { %3361 = shalt.err (!%p3358_p4)
}
0x14df   : > { %s3425_s15 = smov 128   ;;  %s3426_s2 = smov 8  }
0x14e0   : > { %3131 = dma.vmem_to_hbm [thread:$0]  (%p4731_p8), %s4611_s26, 512, %s4609_s17, %s2541_s23, %s3425_s15, %s3425_s15, %s3426_s2  }
0x14e1 PF: > { %s4732_s28 = sld [smem:[#allocation14_spill]]  ;;  %s4733_s20 = sld [smem:[#allocation20_spill]] }
0x14e2   : > { %s4734_s22 = sld [smem:[#allocation17_spill]] }
0x14e7   : > { %s2569_s16 = sand.u32 1, %s4732_s28   ;;  %p4735_p6 = scmp.ne.s32.totalorder %s4733_s20, 0 }
0x14e8   : > { %p4736_p12 = scmp.ge.s32.totalorder %s4734_s22, 2  ;;  %s2570_s7 = scalar_lea.sflag [#allocation4], %s2569_s16 }
0x14ea   : > { %p3145_p1 = pnand %p4736_p12, %p4735_p6 }
0x14ec   : > { %3391 = dma.done.wait (!%p3145_p1), %s2570_s7, 512  }
0x14ed   : > { %3393 = vsyncadd (!%p3145_p1), %s2570_s7, 4294966784  ;;  %s4737_s18 = sld [smem:[#allocation18_spill]]  ;;  %s4738_s15 = sld [smem:[#allocation15_spill]] }
0x14ee   : > { %s4739_s16 = sld [smem:[#allocation16_spill]]  ;;  %s4740_s17 = sld [smem:[#allocation19_spill]] }
0x14f3   : > { %p19_p7 = scmp.ge.s32.totalorder %s4737_s18, 4  }
0x14f5   :  { %21 = sbr.rel (!%p19_p7) target bundleno = 12 (0xc), region = 97 }
0x14fc   :  { %2575 = vsyncpa [#allocation3], 1 }
0x14fd   :  { %2577 = vsyncpa [#allocation3 + $0x1], 1 }
0x14fe   :  { %2578 = vsyncpa [#allocation4], 1 }
0x14ff   :  { %2580 = vsyncpa [#allocation4 + $0x1], 1 }
0x1500   :  { %2581 = vsyncpa [#allocation5], 1 }
0x1501   :  { %2583 = vsyncpa [#allocation5 + $0x1], 1 }
0x1502   :  { %2584 = vsyncpa [#allocation6], 1 }
0x1503   :  { %2586 = vsyncpa [#allocation6 + $0x1], 1 }

</bundles_post_ra>
